<compile_context>
chip_gen: v7x
topology: tpu7x:2x2x1
jax: 0.10.0
libtpu: 0.0.40
codegen_flags: <defaults>
</compile_context>

<pallas_src>
import functools

import jax
import jax.numpy as jnp
from jax.experimental import pallas as pl
from jax.experimental.pallas import tpu as pltpu
import numpy as np


def _window_attention_kernel(x_ref, wqkv_ref, bqkv_ref, wproj_ref, bproj_ref,
                             bm_ref, o_ref, *, num_heads, scale):
    Wb, N, C = x_ref.shape          # Wb windows of N tokens, C channels
    H = num_heads
    D = C // H
    T = Wb * N
    nW = bm_ref.shape[0] // H       # distinct masks (windows per image)
    k_img = Wb // nW                # images packed into this block
    cdt = x_ref.dtype               # compute dtype for MXU operands (e.g. bf16)

    # ---- fused qkv projection over all Wb windows at once: (T, C) @ (C, 3C)
    x2 = x_ref[...].reshape(T, C)
    qkv = jnp.dot(x2, wqkv_ref[...], preferred_element_type=jnp.float32)
    qkv = qkv + bqkv_ref[...]                                   # (T, 3C) f32

    def heads_to_batch(t):
        # (T, C) -> (Wb*H, N, D): head-major batch via tile-friendly ops only.
        t = t.reshape(Wb, N, C)            # leading split
        t = jnp.swapaxes(t, -1, -2)        # (Wb, C, N)   minor-dim transpose
        t = t.reshape(Wb * H, D, N)        # sublane-aligned regroup (C = H*D)
        return jnp.swapaxes(t, -1, -2)     # (Wb*H, N, D)

    q = heads_to_batch(qkv[:, :C] * scale)
    k_ = heads_to_batch(qkv[:, C:2 * C])
    v_ = heads_to_batch(qkv[:, 2 * C:])

    # ---- per-(window, head) attention, batched in a single einsum
    s = jnp.einsum('bnd,bmd->bnm', q.astype(cdt), k_.astype(cdt),
                   preferred_element_type=jnp.float32)          # (Wb*H, N, N)

    bm = bm_ref[...]                                            # (nW*H, N, N)
    if k_img > 1:
        s = (s.reshape(k_img, nW * H, N, N) + bm[None]).reshape(Wb * H, N, N)
    else:
        s = s + bm

    # ---- softmax in f32; normalization via EUP approx reciprocal
    s = s - jnp.max(s, axis=-1, keepdims=True)
    p = jnp.exp(s)
    p = p * pl.reciprocal(jnp.sum(p, axis=-1, keepdims=True), approx=True)

    o = jnp.einsum('bnm,bmd->bnd', p.astype(cdt), v_,
                   preferred_element_type=jnp.float32)          # (Wb*H, N, D)

    # ---- back to token-major (T, C) and output projection
    o = jnp.swapaxes(o, -1, -2)            # (Wb*H, D, N)
    o = o.reshape(Wb, C, N)
    o = jnp.swapaxes(o, -1, -2)            # (Wb, N, C)
    attn_out = o.reshape(T, C)

    y = jnp.dot(attn_out.astype(cdt), wproj_ref[...],
                preferred_element_type=jnp.float32) + bproj_ref[...]

    # TODO(synk): attn_drop / proj_drop are identity in eval mode (p=0.0); not implemented.
    o_ref[...] = y.reshape(Wb, N, C).astype(o_ref.dtype)


def window_attention(x, wqkv, bqkv, wproj, bproj, rel_bias, mask=None, *,
                     num_heads, scale, compute_dtype=jnp.bfloat16):
    """x: (B_, N, C); rel_bias: (H, N, N); mask: (nW, N, N) additive or None."""
    B_, N, C = x.shape
    orig_dtype = x.dtype
    H = num_heads
    assert C % H == 0
    if mask is None:
        mask = jnp.zeros((1, N, N), jnp.float32)
    nW = mask.shape[0]
    assert B_ % nW == 0
    B = B_ // nW                                   # number of images

    # ---- choose how many images' windows go into one grid step -------------
    tokens_per_image = nW * N
    k = max(1, 256 // tokens_per_image) if tokens_per_image < 256 else 1
    k = min(k, B)
    if B >= 2:                                     # keep >= 2 grid steps (v7x: 2 TCs)
        k = min(k, max(1, B // 2))
    while B % k:
        k -= 1
    Wb = k * nW                                    # windows per grid step
    grid = (B // k,)

    # ---- trace-time glue: combine rel-pos bias & mask, cast MXU operands ---
    bias_mask = (rel_bias[None, :, :, :].astype(jnp.float32)
                 + mask[:, None, :, :].astype(jnp.float32))     # (nW, H, N, N)
    bias_mask = bias_mask.reshape(nW * H, N, N)

    x_c = x.astype(compute_dtype)
    wqkv_c = wqkv.astype(compute_dtype)
    wproj_c = wproj.astype(compute_dtype)
    bqkv_c = bqkv.reshape(1, 3 * C).astype(jnp.float32)
    bproj_c = bproj.reshape(1, C).astype(jnp.float32)

    kernel = functools.partial(_window_attention_kernel,
                               num_heads=num_heads, scale=scale)

    itm = jnp.dtype(compute_dtype).itemsize
    cost = pl.CostEstimate(
        flops=2 * B_ * N * C * 3 * C               # qkv projection
              + 4 * B_ * N * N * C                 # q@k^T and p@v over all heads
              + 2 * B_ * N * C * C,                # output projection
        transcendentals=B_ * H * N * N,            # exp in softmax
        bytes_accessed=B_ * N * C * (itm + jnp.dtype(orig_dtype).itemsize)
                       + (3 * C * C + C * C) * itm
                       + nW * H * N * N * 4 + 4 * C * 4,
    )

    return pl.pallas_call(
        kernel,
        out_shape=jax.ShapeDtypeStruct((B_, N, C), orig_dtype),
        grid_spec=pltpu.PrefetchScalarGridSpec(
            num_scalar_prefetch=0,
            grid=grid,
            in_specs=[
                pl.BlockSpec((Wb, N, C), lambda g: (g, 0, 0)),        # x (Wb windows)
                pl.BlockSpec((C, 3 * C), lambda g: (0, 0)),           # qkv weight
                pl.BlockSpec((1, 3 * C), lambda g: (0, 0)),           # qkv bias
                pl.BlockSpec((C, C), lambda g: (0, 0)),               # proj weight
                pl.BlockSpec((1, C), lambda g: (0, 0)),               # proj bias
                pl.BlockSpec((nW * H, N, N), lambda g: (0, 0, 0)),    # bias + mask
            ],
            out_specs=pl.BlockSpec((Wb, N, C), lambda g: (g, 0, 0)),
        ),
        compiler_params=pltpu.CompilerParams(
            dimension_semantics=("parallel",),
            vmem_limit_bytes=32 * 1024 * 1024,     # tiny working set; explicit for v7x (64 MiB phys)
        ),
        cost_estimate=cost,
    )(x_c, wqkv_c, bqkv_c, wproj_c, bproj_c, bias_mask)


def _relative_position_index(window_size):
    Wh, Ww = window_size
    coords_h = np.arange(Wh)
    coords_w = np.arange(Ww)
    coords = np.stack(np.meshgrid(coords_h, coords_w, indexing="ij"))  # (2, Wh, Ww)
    coords_flatten = coords.reshape(2, -1)                             # (2, N)
    relative_coords = coords_flatten[:, :, None] - coords_flatten[:, None, :]
    relative_coords = relative_coords.transpose(1, 2, 0).astype(np.int64)
    relative_coords[:, :, 0] += Wh - 1
    relative_coords[:, :, 1] += Ww - 1
    relative_coords[:, :, 0] *= 2 * Ww - 1
    return relative_coords.sum(-1)                                     # (N, N)


def _reference(x, wqkv, bqkv, wproj, bproj, rel_bias, mask, num_heads, scale):
    B_, N, C = x.shape
    H, D = num_heads, C // num_heads
    qkv = (x @ wqkv + bqkv).reshape(B_, N, 3, H, D).transpose(2, 0, 3, 1, 4)
    q, k, v = qkv[0] * scale, qkv[1], qkv[2]
    attn = jnp.einsum("bhnd,bhmd->bhnm", q, k) + rel_bias[None]
    nW = mask.shape[0]
    attn = (attn.reshape(B_ // nW, nW, H, N, N) + mask[None, :, None]).reshape(B_, H, N, N)
    attn = jax.nn.softmax(attn, axis=-1)
    out = jnp.einsum("bhnm,bhmd->bhnd", attn, v).transpose(0, 2, 1, 3).reshape(B_, N, C)
    return out @ wproj + bproj


if __name__ == "__main__":
    # Small Swin-like config (shapes consistent with the nn.Module forward)
    dim = 32
    num_heads = 4
    window_size = (4, 4)
    Wh, Ww = window_size
    N = Wh * Ww                    # 16 tokens per window
    B = 2                          # images
    nW = 16                        # windows per image -> 256 rows per grid step
    B_ = B * nW                    # 32 windows total
    head_dim = dim // num_heads
    scale = head_dim ** (-0.5)

    key = jax.random.PRNGKey(0)
    kx, kt, kw1, kb1, kw2, kb2, km = jax.random.split(key, 7)

    x = jax.random.normal(kx, (B_, N, dim), jnp.float32)
    rel_table = 0.02 * jax.random.normal(
        kt, ((2 * Wh - 1) * (2 * Ww - 1), num_heads), jnp.float32)
    wqkv = 0.05 * jax.random.normal(kw1, (dim, 3 * dim), jnp.float32)
    bqkv = 0.05 * jax.random.normal(kb1, (1, 3 * dim), jnp.float32)
    wproj = 0.05 * jax.random.normal(kw2, (dim, dim), jnp.float32)
    bproj = 0.05 * jax.random.normal(kb2, (1, dim), jnp.float32)

    # Relative position bias gather (trace-time glue in plain JAX) -> (H, N, N)
    rel_index = jnp.asarray(_relative_position_index(window_size))           # (N, N)
    rel_bias = rel_table[rel_index.reshape(-1)].reshape(N, N, num_heads)
    rel_bias = jnp.transpose(rel_bias, (2, 0, 1))                             # (H, N, N)

    # Shifted-window style additive mask (0 / -100), shape (nW, N, N)
    mask = jnp.where(jax.random.uniform(km, (nW, N, N)) < 0.25, -100.0, 0.0)
    mask = mask.astype(jnp.float32)

    out = window_attention(x, wqkv, bqkv, wproj, bproj, rel_bias, mask,
                           num_heads=num_heads, scale=scale)
    out = jax.block_until_ready(out)

    ref = _reference(x, wqkv, bqkv, wproj, bproj, rel_bias, mask, num_heads, scale)
    assert out.shape == (B_, N, dim)
    # Tolerance accounts for bf16 MXU operands + approx-reciprocal softmax vs.
    # an all-f32 reference (observed error is ~1e-3; margin is ~20x).
    ok = jnp.allclose(out, ref, atol=2e-2, rtol=2e-2)
    assert bool(ok), "mismatch vs pure-JAX reference"

    print("KERNEL_OK")
</pallas_src>

<mosaic_0001>
module attributes {stable_mosaic.version = 11 : i64} {
  func.func @_window_attention_kernel(%arg0: i32, %arg1: memref<16x16x32xbf16, #tpu.memory_space<vmem>>, %arg2: memref<32x96xbf16, #tpu.memory_space<vmem>>, %arg3: memref<1x96xf32, #tpu.memory_space<vmem>>, %arg4: memref<32x32xbf16, #tpu.memory_space<vmem>>, %arg5: memref<1x32xf32, #tpu.memory_space<vmem>>, %arg6: memref<64x16x16xf32, #tpu.memory_space<vmem>>, %arg7: memref<16x16x32xf32, #tpu.memory_space<vmem>>) attributes {dimension_semantics = [#tpu.dimension_semantics<parallel>], iteration_bounds = array<i64: 2>, scalar_prefetch = 0 : i64, scratch_operands = 0 : i64, tpu.core_type = #tpu.core_type<tc>, window_params = [{transform_indices = @transform_0, window_bounds = array<i64: 16, 16, 32>}, {pipeline_mode = #tpu.pipeline_mode<synchronous>, transform_indices = @transform_1, window_bounds = array<i64: 32, 96>}, {pipeline_mode = #tpu.pipeline_mode<synchronous>, transform_indices = @transform_2, window_bounds = array<i64: 1, 96>}, {pipeline_mode = #tpu.pipeline_mode<synchronous>, transform_indices = @transform_3, window_bounds = array<i64: 32, 32>}, {pipeline_mode = #tpu.pipeline_mode<synchronous>, transform_indices = @transform_4, window_bounds = array<i64: 1, 32>}, {pipeline_mode = #tpu.pipeline_mode<synchronous>, transform_indices = @transform_5, window_bounds = array<i64: 64, 16, 16>}, {transform_indices = @transform_6, window_bounds = array<i64: 16, 16, 32>}]} {
    %c0 = arith.constant 0 : index
    %c0_0 = arith.constant 0 : index
    %c0_1 = arith.constant 0 : index
    %0 = vector.load %arg1[%c0, %c0_0, %c0_1] : memref<16x16x32xbf16, #tpu.memory_space<vmem>>, vector<16x16x32xbf16>
    %1 = vector.shape_cast %0 : vector<16x16x32xbf16> to vector<256x32xbf16>
    %c0_2 = arith.constant 0 : index
    %c0_3 = arith.constant 0 : index
    %2 = vector.load %arg2[%c0_2, %c0_3] : memref<32x96xbf16, #tpu.memory_space<vmem>>, vector<32x96xbf16>
    %cst = arith.constant dense<0.000000e+00> : vector<256x96xf32>
    %3 = tpu.matmul %1, %2, %cst {dimension_numbers = #tpu.dot_dimension_numbers<[1], [0], [0], [1], [0, 0, 1, 1], [], []>} : vector<256x32xbf16>, vector<32x96xbf16>, vector<256x96xf32> -> vector<256x96xf32>
    %c0_4 = arith.constant 0 : index
    %c0_5 = arith.constant 0 : index
    %4 = vector.load %arg3[%c0_4, %c0_5] : memref<1x96xf32, #tpu.memory_space<vmem>>, vector<1x96xf32>
    %5 = vector.broadcast %4 : vector<1x96xf32> to vector<256x96xf32>
    %6 = arith.addf %3, %5 : vector<256x96xf32>
    %7 = vector.extract_strided_slice %6 {offsets = [0, 0], sizes = [256, 32], strides = [1, 1]} : vector<256x96xf32> to vector<256x32xf32>
    %cst_6 = arith.constant 0.353553385 : f32
    %8 = vector.broadcast %cst_6 : f32 to vector<256x32xf32>
    %9 = arith.mulf %7, %8 : vector<256x32xf32>
    %10 = vector.shape_cast %9 : vector<256x32xf32> to vector<16x16x32xf32>
    %11 = tpu.transpose %10, [0, 2, 1] : vector<16x16x32xf32> -> vector<16x32x16xf32>
    %12 = vector.shape_cast %11 : vector<16x32x16xf32> to vector<64x8x16xf32>
    %13 = tpu.transpose %12, [0, 2, 1] : vector<64x8x16xf32> -> vector<64x16x8xf32>
    %14 = vector.extract_strided_slice %6 {offsets = [0, 32], sizes = [256, 32], strides = [1, 1]} : vector<256x96xf32> to vector<256x32xf32>
    %15 = vector.shape_cast %14 : vector<256x32xf32> to vector<16x16x32xf32>
    %16 = tpu.transpose %15, [0, 2, 1] : vector<16x16x32xf32> -> vector<16x32x16xf32>
    %17 = vector.shape_cast %16 : vector<16x32x16xf32> to vector<64x8x16xf32>
    %18 = tpu.transpose %17, [0, 2, 1] : vector<64x8x16xf32> -> vector<64x16x8xf32>
    %19 = vector.extract_strided_slice %6 {offsets = [0, 64], sizes = [256, 32], strides = [1, 1]} : vector<256x96xf32> to vector<256x32xf32>
    %20 = vector.shape_cast %19 : vector<256x32xf32> to vector<16x16x32xf32>
    %21 = tpu.transpose %20, [0, 2, 1] : vector<16x16x32xf32> -> vector<16x32x16xf32>
    %22 = vector.shape_cast %21 : vector<16x32x16xf32> to vector<64x8x16xf32>
    %23 = tpu.transpose %22, [0, 2, 1] : vector<64x8x16xf32> -> vector<64x16x8xf32>
    %24 = arith.truncf %13 : vector<64x16x8xf32> to vector<64x16x8xbf16>
    %25 = arith.truncf %18 : vector<64x16x8xf32> to vector<64x16x8xbf16>
    "tpu.trace_start"() <{level = 10 : i32, message = "bnd,bmd->bnm"}> : () -> ()
    %cst_7 = arith.constant dense<0.000000e+00> : vector<64x16x16xf32>
    %26 = tpu.matmul %24, %25, %cst_7 {dimension_numbers = #tpu.dot_dimension_numbers<[2], [2], [1], [1], [0, 0, 0, 1, 1, 1], [0], [0]>} : vector<64x16x8xbf16>, vector<64x16x8xbf16>, vector<64x16x16xf32> -> vector<64x16x16xf32>
    "tpu.trace_stop"() : () -> ()
    %c0_8 = arith.constant 0 : index
    %c0_9 = arith.constant 0 : index
    %c0_10 = arith.constant 0 : index
    %27 = vector.load %arg6[%c0_8, %c0_9, %c0_10] : memref<64x16x16xf32, #tpu.memory_space<vmem>>, vector<64x16x16xf32>
    %28 = arith.addf %26, %27 : vector<64x16x16xf32>
    %cst_11 = arith.constant dense<0xFF800000> : vector<64x16xf32>
    %29 = vector.multi_reduction <maximumf>, %28, %cst_11 [2] : vector<64x16x16xf32> to vector<64x16xf32>
    %30 = vector.shape_cast %29 : vector<64x16xf32> to vector<64x16x1xf32>
    %31 = vector.broadcast %30 : vector<64x16x1xf32> to vector<64x16x16xf32>
    %32 = arith.subf %28, %31 : vector<64x16x16xf32>
    %33 = math.exp %32 : vector<64x16x16xf32>
    %cst_12 = arith.constant dense<0.000000e+00> : vector<64x16xf32>
    %34 = vector.multi_reduction <add>, %33, %cst_12 [2] : vector<64x16x16xf32> to vector<64x16xf32>
    %35 = vector.shape_cast %34 : vector<64x16xf32> to vector<64x16x1xf32>
    %36 = tpu.reciprocal %35 {approx = true} : vector<64x16x1xf32> -> vector<64x16x1xf32>
    %37 = vector.broadcast %36 : vector<64x16x1xf32> to vector<64x16x16xf32>
    %38 = arith.mulf %33, %37 : vector<64x16x16xf32>
    %39 = arith.truncf %38 : vector<64x16x16xf32> to vector<64x16x16xbf16>
    "tpu.trace_start"() <{level = 10 : i32, message = "bnm,bmd->bnd"}> : () -> ()
    %cst_13 = arith.constant dense<0.000000e+00> : vector<64x16x8xf32>
    %40 = tpu.matmul %39, %23, %cst_13 {dimension_numbers = #tpu.dot_dimension_numbers<[2], [1], [1], [2], [0, 0, 0, 1, 1, 2], [0], [0]>} : vector<64x16x16xbf16>, vector<64x16x8xf32>, vector<64x16x8xf32> -> vector<64x16x8xf32>
    "tpu.trace_stop"() : () -> ()
    %41 = tpu.transpose %40, [0, 2, 1] : vector<64x16x8xf32> -> vector<64x8x16xf32>
    %42 = vector.shape_cast %41 : vector<64x8x16xf32> to vector<16x32x16xf32>
    %43 = tpu.transpose %42, [0, 2, 1] : vector<16x32x16xf32> -> vector<16x16x32xf32>
    %44 = vector.shape_cast %43 : vector<16x16x32xf32> to vector<256x32xf32>
    %45 = arith.truncf %44 : vector<256x32xf32> to vector<256x32xbf16>
    %c0_14 = arith.constant 0 : index
    %c0_15 = arith.constant 0 : index
    %46 = vector.load %arg4[%c0_14, %c0_15] : memref<32x32xbf16, #tpu.memory_space<vmem>>, vector<32x32xbf16>
    %cst_16 = arith.constant dense<0.000000e+00> : vector<256x32xf32>
    %47 = tpu.matmul %45, %46, %cst_16 {dimension_numbers = #tpu.dot_dimension_numbers<[1], [0], [0], [1], [0, 0, 1, 1], [], []>} : vector<256x32xbf16>, vector<32x32xbf16>, vector<256x32xf32> -> vector<256x32xf32>
    %c0_17 = arith.constant 0 : index
    %c0_18 = arith.constant 0 : index
    %48 = vector.load %arg5[%c0_17, %c0_18] : memref<1x32xf32, #tpu.memory_space<vmem>>, vector<1x32xf32>
    %49 = vector.broadcast %48 : vector<1x32xf32> to vector<256x32xf32>
    %50 = arith.addf %47, %49 : vector<256x32xf32>
    %51 = vector.shape_cast %50 : vector<256x32xf32> to vector<16x16x32xf32>
    %c0_19 = arith.constant 0 : index
    %c0_20 = arith.constant 0 : index
    %c0_21 = arith.constant 0 : index
    %52 = vector.load %arg7[%c0_19, %c0_20, %c0_21] : memref<16x16x32xf32, #tpu.memory_space<vmem>>, vector<16x16x32xf32>
    tpu.vector_store %arg7[%c0_19, %c0_20, %c0_21], %51 {strides = array<i32>} : memref<16x16x32xf32, #tpu.memory_space<vmem>>, vector<16x16x32xf32>,
    return
  }
  func.func @transform_0(%arg0: i32) -> (i32, i32, i32) {
    %c0_i32 = arith.constant 0 : i32
    %c0_i32_0 = arith.constant 0 : i32
    %c0_i32_1 = arith.constant 0 : i32
    return %arg0, %c0_i32, %c0_i32_0 : i32, i32, i32
  }
  func.func @transform_1(%arg0: i32) -> (i32, i32) {
    %c0_i32 = arith.constant 0 : i32
    %c0_i32_0 = arith.constant 0 : i32
    %c0_i32_1 = arith.constant 0 : i32
    return %c0_i32, %c0_i32_0 : i32, i32
  }
  func.func @transform_2(%arg0: i32) -> (i32, i32) {
    %c0_i32 = arith.constant 0 : i32
    %c0_i32_0 = arith.constant 0 : i32
    %c0_i32_1 = arith.constant 0 : i32
    return %c0_i32, %c0_i32_0 : i32, i32
  }
  func.func @transform_3(%arg0: i32) -> (i32, i32) {
    %c0_i32 = arith.constant 0 : i32
    %c0_i32_0 = arith.constant 0 : i32
    %c0_i32_1 = arith.constant 0 : i32
    return %c0_i32, %c0_i32_0 : i32, i32
  }
  func.func @transform_4(%arg0: i32) -> (i32, i32) {
    %c0_i32 = arith.constant 0 : i32
    %c0_i32_0 = arith.constant 0 : i32
    %c0_i32_1 = arith.constant 0 : i32
    return %c0_i32, %c0_i32_0 : i32, i32
  }
  func.func @transform_5(%arg0: i32) -> (i32, i32, i32) {
    %c0_i32 = arith.constant 0 : i32
    %c0_i32_0 = arith.constant 0 : i32
    %c0_i32_1 = arith.constant 0 : i32
    %c0_i32_2 = arith.constant 0 : i32
    return %c0_i32, %c0_i32_0, %c0_i32_1 : i32, i32, i32
  }
  func.func @transform_6(%arg0: i32) -> (i32, i32, i32) {
    %c0_i32 = arith.constant 0 : i32
    %c0_i32_0 = arith.constant 0 : i32
    %c0_i32_1 = arith.constant 0 : i32
    return %arg0, %c0_i32, %c0_i32_0 : i32, i32, i32
  }
}

</mosaic_0001>

<bundles_post_ra>
// kernel: tpu_custom_call.1
= control target key start
LH: loop header
LB: loop body
LE: loop exit
PB: predicated region body
PF: predicated region fallthrough
CT: control target
= control target key end

     0   :  { %11 = vsyncpa [#allocation3], 0  ;;  %s27555_s0 = inlined_call_operand.vmem [shape: bf16[32,16,32], index: 0, kind: input, shape index: {}]   ;;  %s27556_s1 = inlined_call_operand.vmem [shape: bf16[32,96], index: 1, kind: input, shape index: {}]   ;;  %s27557_s2 = inlined_call_operand.vmem [shape: f32[1,96], index: 2, kind: input, shape index: {}]   ;;  %s27558_s3 = inlined_call_operand.vmem [shape: bf16[32,32], index: 3, kind: input, shape index: {}]   ;;  %s27559_s4 = inlined_call_operand.vmem [shape: f32[1,32], index: 4, kind: input, shape index: {}]   ;;  %s27560_s5 = inlined_call_operand.vmem [shape: f32[64,16,16], index: 5, kind: input, shape index: {}]   ;;  %s27561_s6 = inlined_call_operand.hbm [shape: f32[32,16,32], index: 6, kind: output, shape index: {}]  }
   0x1   :  { %13 = vsyncpa [#allocation3 + $0x1], 0  ;;  %s22947_s21 = smov 0   ;;  %s22949_s22 = smov 0  }
   0x2   :  { %s22951_s23 = smov 0   ;;  %s22953_s24 = smov 0  }
   0x3 LB: > { %s22968_s25 = sadd.s32 4294967295, %s22903_s24   ;;  %s19201_s26 = sadd.s32 4294967294, %s22903_s24   ;;  %s22903_s24 = sphi %s22953_s24, %s28425_s24   ;;  %s22899_s23 = sphi %s22951_s23, %s28424_s23   ;;  %s22895_s22 = sphi %s22949_s22, %s28423_s22   ;;  %s22891_s21 = sphi %s22947_s21, %s28422_s21  }
   0x4   : > { %s22972_s27 = sadd.s32 1, %s22903_s24   ;;  %s157_s28 = sadd.s32 1, %s22899_s23 }
   0x5   : > { %s154_s29 = ssub.s32 %s22903_s24, %s22972_s27  ;;  %p167_p0 = scmp.ne.s32.totalorder %s22899_s23, %s22895_s22 }
   0x6   : > { %p155_p1 = scmp.eq.s32.totalorder %s154_s29, 0  ;;  %p168_p2 = scmp.eq.s32.totalorder %s22968_s25, 1 }
   0x7   : > { %p173_p3 = scmp.ne.s32.totalorder %s22895_s22, %s22891_s21  ;;  %p174_p4 = scmp.eq.s32.totalorder %s19201_s26, 1 }
   0x8   : > { %s22983_s30 = scalar_select %p155_p1, %s22899_s23, %s157_s28  }
   0x9   : > { %p22985_p5 = por %p168_p2, %p167_p0  ;;  %p22989_p6 = por %p174_p4, %p173_p3 }
   0xa   : > { %p19204_p7 = scmp.ge.s32.totalorder %s22903_s24, 1  ;;  %p217_p8 = scmp.lt.s32.totalorder %s22903_s24, 3 }
   0xc   : > { %p218_p9 = pnand %p19204_p7, %p217_p8 }
   0xe   : > { %221 = sbr.rel (%p218_p9) target bundleno = 2675 (0xa73), region = 44 }
  0x15   : > { %v22309_v0 = vld [vmem:[%s27556_s1] sm:$0xff]   ;;  %s19206_s11 = sshll.u32 %s22968_s25, 4  ;;  %v22310_v1 = vld [vmem:[%s27556_s1 + $0x8] sm:$0xff]   ;;  %vm392_vm0 = vcmask 261120   ;;  %s22905_s20 = smov 64   ;;  %vm22908_vm1 = vmmov 0  }
  0x16   : > { %p249_p10 = scmp.lt.s32.totalorder %s19206_s11, 31  ;;  %19756 = vmatprep.subr.bf16.mxu0 %v22309_v0  ;;  %20596 = vmatprep.subr.bf16.mxu1 %v22309_v0  ;;  %v23042_v18 = vld [vmem:[%s27557_s2] ss:$0 sm:$0xff]  ;;  %s22906_s26 = smov 96   ;;  %vm6746_vm2 = vcmask 64512   ;;  %vm9755_vm3 = vcmask 130048  }
  0x17   : > { %19757 = vmatpush3.bf16.msra.mxu0 %v22309_v0  ;;  %20598 = vmatpush3.bf16.msra.mxu1 %v22309_v0  ;;  %s245_s12 = sand.u32 1, %s22895_s22   ;;  %s22909_s29 = smov [#allocation2]  }
  0x18   : > { %s28427_s11 = smov (!%p249_p10, %s19206_s11), 31  ;;  %19758 = vmatprep.subr.bf16.mxu0 %v22310_v1  ;;  %20597 = vmatprep.subr.bf16.mxu1 %v22310_v1  ;;  %s19205_s13 = sshll.u32 %s245_s12, 8 }
  0x19   : > { %s19461_s14 = sshll.u32 %s28427_s11, 3  ;;  %s27401_s16 = scalar_lea.vmem [#allocation2], %s19205_s13 }
  0x1a   : > { %s23005_s17 = scalar_lea.vmem %s27555_s0, %s19461_s14  ;;  %s19139_s18 = sshll.u32 %s27401_s16, 4  ;;  %s27503_s18 = int_to_ptr.vmem [resolvable:$true] %s19139_s18 }
  0x1b   : > { %19759 = vmatpush3.bf16.msra.mxu0 %v22310_v1  ;;  %20599 = vmatpush3.bf16.msra.mxu1 %v22310_v1  ;;  %v22311_v2 = vld [vmem:[%s23005_s17] sm:$0xff]   ;;  %v22313_v4 = vld [vmem:[%s23005_s17 + $0x8] sm:$0xff]   ;;  %v22315_v6 = vld [vmem:[%s23005_s17 + $0x10] sm:$0xff]   ;;  %s22841_s28 = scalar_lea.vmem %s27503_s18, 4096  ;;  %s22845_s9 = sshll.u32 %s22909_s29, 4  ;;  %s22846_s9 = int_to_ptr.vmem [resolvable:$false] %s22845_s9 }
  0x1c   : > { %v22312_v3 = vld [vmem:[%s23005_s17 + $0x40] sm:$0xff]   ;;  %19760 = vmatprep.mubr.msk.bf16.mxu0 %vm392_vm0, %v22311_v2  ;;  %v22314_v5 = vld [vmem:[%s23005_s17 + $0x48] sm:$0xff]   ;;  %v22317_v7 = vld [vmem:[%s23005_s17 + $0x50] sm:$0xff]   ;;  %p22842_p11 = scmp.ne.s32.totalorder %s27503_s18, %s22841_s28  ;;  %s22847_s10 = scalar_lea.vmem %s22846_s9, 8192 }
  0x1d   : > { %19776 = vmatprep.mubr.msk.bf16.mxu1 %vm392_vm0, %v22312_v3  ;;  %v22316_v8 = vld [vmem:[%s23005_s17 + $0x18] sm:$0xff]   ;;  %v22319_v10 = vld [vmem:[%s23005_s17 + $0x20] sm:$0xff]   ;;  %v22320_v12 = vld [vmem:[%s23005_s17 + $0x28] sm:$0xff]   ;;  %p22848_p0 = scmp.lt.s32.totalorder %s27503_s18, %s22846_s9  ;;  %p22849_p1 = scmp.lt.s32.totalorder %s22847_s10, %s22841_s28 }
  0x1e   : > { %19761 = vmatmul.mubr.msk.bf16.vlgmr.msra.gmra.mrb[0].mxu0 %vm392_vm0, %v22313_v4  ;;  %19777 = vmatmul.mubr.msk.bf16.vlgmr.msra.gmra.mrb[0].mxu1 %vm392_vm0, %v22314_v5  ;;  %v22318_v9 = vld [vmem:[%s23005_s17 + $0x58] sm:$0xff]   ;;  %v22321_v11 = vld [vmem:[%s23005_s17 + $0x60] sm:$0xff]   ;;  %v22322_v13 = vld [vmem:[%s23005_s17 + $0x68] sm:$0xff]   ;;  %p22843_p12 = pnand %p22842_p11, %p22985_p5 }
  0x1f   : > { %19764 = vmatprep.mubr.msk.bf16.mxu0 %vm392_vm0, %v22315_v6  ;;  %19780 = vmatprep.mubr.msk.bf16.mxu1 %vm392_vm0, %v22317_v7  ;;  %v22323_v14 = vld [vmem:[%s23005_s17 + $0x30] sm:$0xff]   ;;  %v22324_v16 = vld [vmem:[%s23005_s17 + $0x38] sm:$0xff]   ;;  %p22850_p2 = por %p22849_p1, %p22848_p0 }
  0x20   : > { %v22325_v15 = vld [vmem:[%s23005_s17 + $0x70] sm:$0xff]   ;;  %v22326_v17 = vld [vmem:[%s23005_s17 + $0x78] sm:$0xff]   ;;  %s19463_s17 = sshll.u32 %s22968_s25, 12  ;;  %s27514_s25 = scalar_lea.sflag [#allocation3], %s245_s12 }
  0x21   : > { %p22844_p13 = pneg %p22843_p12 }
  0x23   : > { %p22851_p3 = pnand %p22850_p2, %p22844_p13 }
  0x26   : > { %19765 = vmatmul.mubr.msk.bf16.gmra.mrb[4].mxu0 %vm392_vm0, %v22316_v8  ;;  %19781 = vmatmul.mubr.msk.bf16.gmra.mrb[4].mxu1 %vm392_vm0, %v22318_v9 }
  0x27   : > { %19768 = vmatprep.mubr.msk.bf16.mxu0 %vm392_vm0, %v22319_v10  ;;  %19784 = vmatprep.mubr.msk.bf16.mxu1 %vm392_vm0, %v22321_v11 }
  0x2e   : > { %19769 = vmatmul.mubr.msk.bf16.gmra.mrb[8].mxu0 %vm392_vm0, %v22320_v12  ;;  %19785 = vmatmul.mubr.msk.bf16.gmra.mrb[8].mxu1 %vm392_vm0, %v22322_v13 }
  0x2f   : > { %19772 = vmatprep.mubr.msk.bf16.mxu0 %vm392_vm0, %v22323_v14  ;;  %19788 = vmatprep.mubr.msk.bf16.mxu1 %vm392_vm0, %v22325_v15 }
  0x36   : > { %19773 = vmatmul.mubr.msk.bf16.gmra.mrb[12].mxu0 %vm392_vm0, %v22324_v16  ;;  %19789 = vmatmul.mubr.msk.bf16.gmra.mrb[12].mxu1 %vm392_vm0, %v22326_v17 }
  0xf1   : > { %v19762_v19 = vpop.f32.mrb[0].mxu0  ;;  %v19778_v21 = vpop.f32.mrb[0].mxu1 }
  0xf2   : > { %v484_v20 = vadd.f32 %v19762_v19, %v23042_v18  ;;  %v475_v22 = vpop.f32.mrb[1].mxu0  ;;  %v548_v23 = vadd.f32 %v19778_v21, %v23042_v18  ;;  %v539_v26 = vpop.f32.mrb[1].mxu1 }
  0xf3   : > { %v476_v24 = vadd.f32 %v23042_v18, %v475_v22  ;;  %v19763_v25 = vpop.f32.mrb[2].mxu0  ;;  %v23050_v29 = vadd.f32 %v23042_v18, %v539_v26  ;;  %v19779_v30 = vpop.f32.mrb[2].mxu1 }
  0xf4   : > { %v487_v27 = vadd.f32 %v19763_v25, %v23042_v18  ;;  %5886 = vrot.lane.b32.xlu1 %v484_v20, %s22905_s20  ;;  %v478_v28 = vpop.f32.mrb[3].mxu0  ;;  %v23052_v31 = vmul.f32 0.35355338, %v484_v20  ;;  %5918 = vrot.lane.b32.xlu0 %v548_v23, %s22905_s20  ;;  %v551_v33 = vadd.f32 %v19779_v30, %v23042_v18  ;;  %v542_v34 = vpop.f32.mrb[3].mxu1  ;;  %v23059_v36 = vmul.f32 0.35355338, %v548_v23 }
  0xf5   : > { %v479_v32 = vadd.f32 %v23042_v18, %v478_v28  ;;  %v23057_v35 = vmul.f32 0.35355338, %v476_v24  ;;  %v23062_v38 = vadd.f32 %v23042_v18, %v542_v34  ;;  %v23067_v40 = vmul.f32 0.35355338, %v23050_v29 }
  0xf6   : > { %v20645_v37 = vpack.i.bf16 %v487_v27, %v484_v20  ;;  %v23064_v39 = vmul.f32 0.35355338, %v487_v27  ;;  %v20650_v41 = vpack.i.bf16 %v551_v33, %v548_v23  ;;  %v23081_v48 = vmul.f32 0.35355338, %v551_v33 }
  0xf7   : > { %v20655_v42 = vpack.i.bf16 %v479_v32, %v476_v24  ;;  %v20665_v43 = vpack.i.bf16 %v23052_v31, %v23057_v35  ;;  %v23071_v44 = vmul.f32 0.35355338, %v479_v32  ;;  %v20660_v45 = vpack.i.bf16 %v23062_v38, %v23050_v29 }
  0xf8   : > { %5882 = vrot.lane.b32.xlu1 %v476_v24, %s22905_s20  ;;  %v20689_v46 = vpack.i.bf16 %v23059_v36, %v23067_v40  ;;  %v23079_v47 = vmul.f32 0.35355338, %v23062_v38  ;;  %5914 = vrot.lane.b32.xlu0 %v23050_v29, %s22905_s20 }
  0xf9   : > { %v19766_v49 = vpop.f32.mrb[4].mxu0  ;;  %v20667_v50 = vpack.i.bf16 %v23064_v39, %v23071_v44  ;;  %v19782_v52 = vpop.f32.mrb[4].mxu1 }
  0xfa   : > { %v491_v51 = vpop.f32.mrb[5].mxu0  ;;  %v20691_v53 = vpack.i.bf16 %v23081_v48, %v23079_v47  ;;  %v23093_v56 = vadd.f32 %v19782_v52, %v23042_v18  ;;  %v23095_v57 = vpop.f32.mrb[5].mxu1 }
  0xfb   : > { %v23090_v54 = vadd.f32 %v23042_v18, %v491_v51  ;;  %v19767_v55 = vpop.f32.mrb[6].mxu0  ;;  %v19783_v60 = vpop.f32.mrb[6].mxu1 }
  0xfc   : > { %20646 = vrot.lane.b32.xlu1 %v20645_v37, %s22906_s26  ;;  %v503_v58 = vadd.f32 %v19767_v55, %v23042_v18  ;;  %v494_v59 = vpop.f32.mrb[7].mxu0  ;;  %20651 = vrot.lane.b32.xlu0 %v20650_v41, %s22906_s26  ;;  %v23104_v62 = vadd.f32 %v19783_v60, %v23042_v18  ;;  %v558_v63 = vpop.f32.mrb[7].mxu1  ;;  %v500_v41 = vadd.f32 %v19766_v49, %v23042_v18 }
  0xfd   : > { %v23101_v61 = vadd.f32 %v23042_v18, %v494_v59  ;;  %v23107_v0 = vadd.f32 %v23042_v18, %v558_v63 }
  0xfe   : > { %v23109_v1 = vmul.f32 0.35355338, %v503_v58  ;;  %v23117_v4 = vmul.f32 0.35355338, %v23104_v62  ;;  %v20718_v6 = vpack.i.bf16 %v23104_v62, %v23093_v56  ;;  %v20713_v55 = vpack.i.bf16 %v503_v58, %v500_v41 }
  0xff   : > { %v20723_v2 = vpack.i.bf16 %v23101_v61, %v23090_v54  ;;  %v23114_v3 = vmul.f32 0.35355338, %v23101_v61  ;;  %v23121_v5 = vmul.f32 0.35355338, %v23107_v0  ;;  %v608_v31 = vmul.f32 0.35355338, %v500_v41 }
 0x100   : > { %5888 = vrot.lane.b32.xlu1 %v487_v27, %s22905_s20  ;;  %20656 = vrot.lane.b32.xlu0 %v20655_v42, %s22906_s26 }
 0x101   : > { %v20735_v7 = vpack.i.bf16 %v23109_v1, %v23114_v3  ;;  %v19770_v8 = vpop.f32.mrb[8].mxu0  ;;  %v20759_v9 = vpack.i.bf16 %v23117_v4, %v23121_v5  ;;  %v19786_v11 = vpop.f32.mrb[8].mxu1 }
 0x102   : > { %v23131_v10 = vadd.f32 %v19770_v8, %v23042_v18  ;;  %v507_v12 = vpop.f32.mrb[9].mxu0  ;;  %v23134_v13 = vadd.f32 %v19786_v11, %v23042_v18  ;;  %v571_v15 = vpop.f32.mrb[9].mxu1 }
 0x103   : > { %v23137_v14 = vadd.f32 %v23042_v18, %v507_v12  ;;  %v19771_v16 = vpop.f32.mrb[10].mxu0  ;;  %v23141_v17 = vadd.f32 %v23042_v18, %v571_v15  ;;  %v19787_v20 = vpop.f32.mrb[10].mxu1  ;;  %v556_v15 = vadd.f32 %v23042_v18, %v23095_v57 }
 0x104   : > { %5920 = vrot.lane.b32.xlu1 %v551_v33, %s22905_s20  ;;  %v23144_v19 = vadd.f32 %v19771_v16, %v23042_v18  ;;  %5884 = vrot.lane.b32.xlu0 %v479_v32, %s22905_s20  ;;  %v23148_v21 = vadd.f32 %v19787_v20, %v23042_v18  ;;  %v510_v23 = vpop.f32.mrb[11].mxu0  ;;  %v574_v28 = vpop.f32.mrb[11].mxu1  ;;  %v23173_v33 = vmul.f32 0.35355338, %v23131_v10  ;;  %v23188_v51 = vmul.f32 0.35355338, %v23134_v13 }
 0x105   : > { %v23156_v25 = vadd.f32 %v23042_v18, %v510_v23  ;;  %v23165_v29 = vadd.f32 %v23042_v18, %v574_v28  ;;  %v23170_v32 = vmul.f32 0.35355338, %v23137_v14  ;;  %v622_v39 = vmul.f32 0.35355338, %v556_v15 }
 0x106   : > { %v20781_v22 = vpack.i.bf16 %v23144_v19, %v23131_v10  ;;  %v20786_v24 = vpack.i.bf16 %v23148_v21, %v23134_v13  ;;  %v23159_v26 = vmul.f32 0.35355338, %v23144_v19 }
 0x107   : > { %v23162_v27 = vmul.f32 0.35355338, %v23156_v25  ;;  %v20791_v30 = vpack.i.bf16 %v23156_v25, %v23137_v14  ;;  %v20801_v34 = vpack.i.bf16 %v23173_v33, %v23170_v32  ;;  %v20796_v42 = vpack.i.bf16 %v23165_v29, %v23141_v17 }
 0x108   : > { %20661 = vrot.lane.b32.xlu1 %v20660_v45, %s22906_s26  ;;  %v23185_v45 = vmul.f32 0.35355338, %v23141_v17  ;;  %v23191_v52 = vmul.f32 0.35355338, %v23165_v29 }
 0x109   : > { %v20803_v37 = vpack.i.bf16 %v23159_v26, %v23162_v27  ;;  %v19774_v60 = vpop.f32.mrb[12].mxu0  ;;  %v19790_v23 = vpop.f32.mrb[12].mxu1 }
 0x10a   : > { %v20825_v49 = vpack.i.bf16 %v23188_v51, %v23185_v45  ;;  %v23205_v63 = vadd.f32 %v19774_v60, %v23042_v18  ;;  %v523_v8 = vpop.f32.mrb[13].mxu0  ;;  %v23222_v28 = vadd.f32 %v19790_v23, %v23042_v18  ;;  %v20728_v60 = vpack.i.bf16 %v23107_v0, %v556_v15 }
 0x10b   : > { %v23210_v11 = vadd.f32 %v23042_v18, %v523_v8  ;;  %v19775_v12 = vpop.f32.mrb[14].mxu0 }
 0x10c   : > { %5916 = vrot.lane.b32.xlu1 %v23062_v38, %s22905_s20  ;;  %v23196_v38 = vmul.f32 0.35355338, %v23148_v21  ;;  %v23215_v16 = vadd.f32 %v19775_v12, %v23042_v18  ;;  %v526_v20 = vpop.f32.mrb[15].mxu0 }
 0x10e   : > { %v20827_v59 = vpack.i.bf16 %v23196_v38, %v23191_v52  ;;  %v617_v51 = vmul.f32 0.35355338, %v23215_v16 }
 0x110   : > { %5890 = vrot.lane.b32.xlu1 %v23090_v54, %s22905_s20 }
 0x114   : > { %20714 = vrot.lane.b32.xlu1 %v20713_v55, %s22906_s26  ;;  %v587_v55 = vpop.f32.mrb[13].mxu1 }
 0x115   : > { %v23226_v8 = vadd.f32 %v23042_v18, %v587_v55  ;;  %v19791_v57 = vpop.f32.mrb[14].mxu1 }
 0x116   : > { %v23232_v12 = vadd.f32 %v19791_v57, %v23042_v18 }
 0x117   : > { %v630_v57 = vmul.f32 0.35355338, %v23226_v8 }
 0x118   : > { %5896 = vrot.lane.b32.xlu1 %v503_v58, %s22905_s20  ;;  %v23218_v58 = vadd.f32 %v23042_v18, %v526_v20  ;;  %27796 = vst [vmem:[#allocation5_spill] sm:$0xff] %v23232_v12  ;;  %v590_v20 = vpop.f32.mrb[15].mxu1 }
 0x11a   : > { %v615_v52 = vmul.f32 0.35355338, %v23218_v58 }
 0x11c   : > { %5928 = vrot.lane.b32.xlu1 %v23104_v62, %s22905_s20  ;;  %v20871_v23 = vpack.i.bf16 %v617_v51, %v615_v52 }
 0x120   : > { %20724 = vrot.lane.b32.xlu1 %v20723_v2, %s22906_s26  ;;  %v23236_v2 = vadd.f32 %v23042_v18, %v590_v20  ;;  %v606_v18 = vmul.f32 0.35355338, %v23090_v54  ;;  %v632_v20 = vmul.f32 0.35355338, %v23222_v28 }
 0x122   : > { %20666 = vxpose.xlu0.b32.start [1/2] (short) (narrow) %v20665_v43, 32  ;;  %v20733_v35 = vpack.i.bf16 %v608_v31, %v606_v18  ;;  %v624_v43 = vmul.f32 0.35355338, %v23093_v56  ;;  %v631_v31 = vmul.f32 0.35355338, %v23236_v2 }
 0x124   : > { %20729 = vrot.lane.b32.xlu1 %v20728_v60, %s22906_s26  ;;  %v20757_v44 = vpack.i.bf16 %v624_v43, %v622_v39 }
 0x126   : > { %20668 = vxpose.xlu0.b32.end [2/2] (short) (narrow) %v20667_v50, 32 }
 0x128   : > { %5892 = vrot.lane.b32.xlu1 %v23101_v61, %s22905_s20 }
 0x12c   : > { %5924 = vrot.lane.b32.xlu1 %v23107_v0, %s22905_s20 }
 0x12f   : > { %20690 = vxpose.xlu0.b32.start [1/2] (short) (narrow) %v20689_v46, 32 }
 0x133   : > { %20692 = vxpose.xlu0.b32.end [2/2] (short) (narrow) %v20691_v53, 32 }
 0x155   : > { %20734 = vxpose.xlu1.b32.start [1/2] (short) (narrow) %v20733_v35, 32  ;;  %v633_v35 = vmul.f32 0.35355338, %v23232_v12 }
 0x159   : > { %20736 = vxpose.xlu1.b32.end [2/2] (short) (narrow) %v20735_v7, 32 }
 0x162   : > { %20758 = vxpose.xlu1.b32.start [1/2] (short) (narrow) %v20757_v44, 32  ;;  %v20895_v44 = vpack.i.bf16 %v633_v35, %v631_v31 }
 0x164   : > { %5894 = vrot.lane.b32.xlu0 %v500_v41, %s22905_s20  ;;  %v614_v41 = vmul.f32 0.35355338, %v23210_v11 }
 0x166   : > { %v23257_v36 = vpop.permute.xlu1 %5886  ;;  %20760 = vxpose.xlu1.b32.end [2/2] (short) (narrow) %v20759_v9, 32  ;;  %v23267_v46 = vpop.permute.xlu0 %5918 }
 0x167   : > { %27797 = vst [vmem:[#allocation6_spill] sm:$0xff] %v23267_v46 }
 0x168   : > { %5926 = vrot.lane.b32.xlu0 %v23093_v56, %s22905_s20 }
 0x16a   : > { %v23264_v40 = vpop.permute.xlu1 %5882  ;;  %v23277_v50 = vpop.permute.xlu0 %5914 }
 0x16c   : > { %5922 = vrot.lane.b32.xlu0 %v556_v15, %s22905_s20 }
 0x16e   : > { %v23269_v47 = vpop.permute.xlu1 %20646  ;;  %v20652_v54 = vpop.permute.xlu0 %20651 }
 0x16f   : > { %v20654_v0 = vunpack.i.h.bf16 %v20652_v54  ;;  %v20653_v1 = vunpack.i.l.bf16 %v20652_v54 }
 0x170   : > { %20719 = vrot.lane.b32.xlu0 %v20718_v6, %s22906_s26 }
 0x172   : > { %v23275_v48 = vpop.permute.xlu1 %5888  ;;  %v23313_v5 = vpop.permute.xlu0 %20656 }
 0x174   : > { %5902 = vrot.lane.b32.xlu0 %v23131_v10, %s22905_s20  ;;  %v20859_v10 = vpack.i.bf16 %v23218_v58, %v23210_v11 }
 0x176   : > { %v23281_v53 = vpop.permute.xlu1 %5920  ;;  %v23317_v6 = vpop.permute.xlu0 %5884 }
 0x177   : > { %27798 = vst [vmem:[#allocation7_spill] sm:$0xff] %v23281_v53 }
 0x178   : > { %5934 = vrot.lane.b32.xlu0 %v23134_v13, %s22905_s20 }
 0x17a   : > { %v20662_v61 = vpop.permute.xlu1 %20661 }
 0x17b   : > { %v20664_v3 = vunpack.i.h.bf16 %v20662_v61  ;;  %v20663_v4 = vunpack.i.l.bf16 %v20662_v61 }
 0x17c   : > { %5898 = vrot.lane.b32.xlu0 %v23137_v14, %s22905_s20 }
 0x17d   : > { %v23285_v56 = vpack.i.bf16 %v20654_v0, %v20664_v3  ;;  %v23287_v62 = vpack.i.bf16 %v20653_v1, %v20663_v4  ;;  %v20849_v1 = vpack.i.bf16 %v23215_v16, %v23205_v63 }
 0x17e   : > { %v23321_v7 = vpop.permute.xlu1 %5916 }
 0x180   : > { %5930 = vrot.lane.b32.xlu0 %v23141_v17, %s22905_s20  ;;  %v20864_v17 = vpack.i.bf16 %v23236_v2, %v23226_v8 }
 0x182   : > { %v23329_v13 = vpop.permute.xlu1 %5890 }
 0x184   : > { %20782 = vrot.lane.b32.xlu0 %v20781_v22, %s22906_s26 }
 0x188   : > { %20787 = vrot.lane.b32.xlu0 %v20786_v24, %s22906_s26 }
 0x18c   : > { %5904 = vrot.lane.b32.xlu1 %v23144_v19, %s22905_s20 }
 0x190   : > { %5936 = vrot.lane.b32.xlu1 %v23148_v21, %s22905_s20  ;;  %v23345_v21 = vpop.permute.xlu1 %20714 }
 0x194   : > { %20792 = vrot.lane.b32.xlu1 %v20791_v30, %s22906_s26  ;;  %v23351_v24 = vpop.permute.xlu1 %5896 }
 0x198   : > { %20797 = vrot.lane.b32.xlu1 %v20796_v42, %s22906_s26  ;;  %v23363_v27 = vpop.permute.xlu1 %5928  ;;  %v616_v42 = vmul.f32 0.35355338, %v23205_v63 }
 0x199   : > { %27799 = vst [vmem:[#allocation8_spill] sm:$0xff] %v23363_v27 }
 0x19c   : > { %5900 = vrot.lane.b32.xlu1 %v23156_v25, %s22905_s20  ;;  %v23367_v30 = vpop.permute.xlu1 %20724 }
 0x1a0   : > { %5932 = vrot.lane.b32.xlu1 %v23165_v29, %s22905_s20  ;;  %v23371_v33 = vpop.permute.xlu1 %20729 }
 0x1a2   : > { %v23323_v9 = vpop.trf.xlu0 }
 0x1a4   : > { %5912 = vrot.lane.b32.xlu1 %v23215_v16, %s22905_s20 }
 0x1a6   : > { %20802 = vxpose.xlu0.b32.start [1/2] (short) (narrow) %v20801_v34, 32  ;;  %v23334_v14 = vpop.trf.xlu0  ;;  %v23373_v34 = vpop.permute.xlu1 %5892 }
 0x1a8   : > { %20860 = vrot.lane.b32.xlu1 %v20859_v10, %s22906_s26  ;;  %v20854_v10 = vpack.i.bf16 %v23232_v12, %v23222_v28 }
 0x1aa   : > { %20804 = vxpose.xlu0.b32.end [2/2] (short) (narrow) %v20803_v37, 32  ;;  %v23342_v19 = vpop.trf.xlu0  ;;  %v23375_v37 = vpop.permute.xlu1 %5924 }
 0x1ac   : > { %20865 = vrot.lane.b32.xlu1 %v20864_v17, %s22906_s26 }
 0x1ae   : > { %v23347_v22 = vpop.trf.xlu0 }
 0x1b0   : > { %5908 = vrot.lane.b32.xlu1 %v23218_v58, %s22905_s20  ;;  %v20893_v58 = vpack.i.bf16 %v632_v20, %v630_v57 }
 0x1b2   : > { %v23353_v25 = vpop.trf.xlu0 }
 0x1b3   : > { %20826 = vxpose.xlu0.b32.start [1/2] (short) (narrow) %v20825_v49, 32  ;;  %v20869_v49 = vpack.i.bf16 %v616_v42, %v614_v41 }
 0x1b6   : > { %v23358_v26 = vpop.trf.xlu0 }
 0x1b7   : > { %20828 = vxpose.xlu0.b32.end [2/2] (short) (narrow) %v20827_v59, 32 }
 0x1ba   : > { %v23365_v29 = vpop.trf.xlu0 }
 0x1be   : > { %v23369_v32 = vpop.trf.xlu0 }
 0x1d5   : > { %v23379_v45 = vpop.trf.xlu1 }
 0x1d6   : > { %v23383_v38 = vpop.permute.xlu0 %5894 }
 0x1d9   : > { %20870 = vxpose.xlu1.b32.start [1/2] (short) (narrow) %v20869_v49, 32  ;;  %v23385_v59 = vpop.trf.xlu1 }
 0x1da   : > { %v23387_v15 = vpop.permute.xlu0 %5926 }
 0x1db   : > { %27800 = vst [vmem:[#allocation9_spill] sm:$0xff] %v23387_v15 }
 0x1dd   : > { %20872 = vxpose.xlu1.b32.end [2/2] (short) (narrow) %v20871_v23, 32  ;;  %v23389_v55 = vpop.trf.xlu1 }
 0x1de   : > { %v23391_v60 = vpop.permute.xlu0 %5922 }
 0x1e1   : > { %v23395_v18 = vpop.trf.xlu1 }
 0x1e2   : > { %v23401_v43 = vpop.permute.xlu0 %20719 }
 0x1e5   : > { %v23399_v39 = vpop.trf.xlu1 }
 0x1e6   : > { %20894 = vxpose.xlu1.b32.start [1/2] (short) (narrow) %v20893_v58, 32  ;;  %v23407_v61 = vpop.permute.xlu0 %5902  ;;  %v20678_v58 = vunpack.i.h.bf16 %v23334_v14 }
 0x1e8   : > { %5910 = vrot.lane.b32.xlu0 %v23205_v63, %s22905_s20 }
 0x1e9   : > { %v23405_v54 = vpop.trf.xlu1 }
 0x1ea   : > { %20896 = vxpose.xlu1.b32.end [2/2] (short) (narrow) %v20895_v44, 32  ;;  %v23415_v3 = vpop.permute.xlu0 %5934  ;;  %v20673_v44 = vunpack.i.h.bf16 %v23323_v9 }
 0x1eb   : > { %27801 = vst [vmem:[#allocation10_spill] sm:$0xff] %v23415_v3  ;;  %v20741_v3 = vunpack.i.h.bf16 %v23379_v45 }
 0x1ec   : > { %5906 = vrot.lane.b32.xlu0 %v23210_v11, %s22905_s20  ;;  %v20917_v12 = vpack.i.bf16 %v20678_v58, %v20673_v44 }
 0x1ed   : > { %v23411_v0 = vpop.trf.xlu1 }
 0x1ee   : > { %v23423_v17 = vpop.permute.xlu0 %5898  ;;  %v20772_v46 = vunpack.i.l.bf16 %v23411_v0 }
 0x1f0   : > { %20850 = vrot.lane.b32.xlu0 %v20849_v1, %s22906_s26  ;;  %v20702_v1 = vunpack.i.h.bf16 %v23358_v26 }
 0x1f1   : > { %v23418_v4 = vpop.trf.xlu1 }
 0x1f2   : > { %v23425_v41 = vpop.permute.xlu0 %5930 }
 0x1f4   : > { %20855 = vrot.lane.b32.xlu0 %v20854_v10, %s22906_s26  ;;  %v20697_v10 = vunpack.i.h.bf16 %v23353_v25  ;;  %s27501_s26 = scalar_lea.hbm %s27561_s6, %s19463_s17 }
 0x1f6   : > { %v23429_v42 = vpop.permute.xlu0 %20782 }
 0x1fa   : > { %v20788_v51 = vpop.permute.xlu0 %20787 }
 0x1fb   : > { %v20790_v49 = vunpack.i.h.bf16 %v20788_v51  ;;  %v20789_v23 = vunpack.i.l.bf16 %v20788_v51  ;;  %v20929_v51 = vpack.i.bf16 %v20702_v1, %v20697_v10 }
 0x1fe   : > { %v23427_v11 = vpop.permute.xlu1 %5904 }
 0x202   : > { %v23431_v63 = vpop.permute.xlu1 %5936 }
 0x203   : > { %27802 = vst [vmem:[#allocation11_spill] sm:$0xff] %v23431_v63  ;;  %v20670_v63 = vunpack.i.l.bf16 %v23323_v9 }
 0x206   : > { %v23433_v16 = vpop.permute.xlu1 %20792 }
 0x20a   : > { %v20798_v52 = vpop.permute.xlu1 %20797 }
 0x20b   : > { %v20800_v57 = vunpack.i.h.bf16 %v20798_v52  ;;  %v20799_v20 = vunpack.i.l.bf16 %v20798_v52  ;;  %v20675_v52 = vunpack.i.l.bf16 %v23334_v14  ;;  %v20765_v14 = vunpack.i.h.bf16 %v23399_v39 }
 0x20d   : > { %v23436_v31 = vpack.i.bf16 %v20790_v49, %v20800_v57  ;;  %v23438_v35 = vpack.i.bf16 %v20789_v23, %v20799_v20  ;;  %v20941_v49 = vpack.i.bf16 %v20675_v52, %v20670_v63  ;;  %v20699_v23 = vunpack.i.l.bf16 %v23358_v26 }
 0x20e   : > { %v20694_v57 = vunpack.i.l.bf16 %v23353_v25  ;;  %v20743_v63 = vunpack.i.l.bf16 %v23385_v59  ;;  %v20738_v26 = vunpack.i.l.bf16 %v23379_v45  ;;  %v20767_v52 = vunpack.i.l.bf16 %v23405_v54 }
 0x210   : > { %5940 = vrot.lane.b32.xlu1 %v23236_v2, %s22905_s20  ;;  %v20953_v20 = vpack.i.bf16 %v20699_v23, %v20694_v57  ;;  %v20746_v2 = vunpack.i.h.bf16 %v23385_v59  ;;  %v20989_v1 = vpack.i.bf16 %v20743_v63, %v20738_v26  ;;  %v20680_v57 = vunpack.i.l.bf16 %v23342_v19  ;;  %v23459_v59 = vpop.permute.xlu1 %5900 }
 0x212   : > { %20918 = vxpose.xlu0.b32.start.end [1/1] (short) (narrow) %v20917_v12, 16  ;;  %v20965_v58 = vpack.i.bf16 %v20746_v2, %v20741_v3  ;;  %v20770_v12 = vunpack.i.h.bf16 %v23405_v54  ;;  %v20685_v3 = vunpack.i.l.bf16 %v23347_v22 }
 0x214   : > { %v20977_v44 = vpack.i.bf16 %v20770_v12, %v20765_v14  ;;  %v21205_v45 = vpack.i.bf16 %v20685_v3, %v20680_v57  ;;  %v20688_v14 = vunpack.i.h.bf16 %v23347_v22  ;;  %v20748_v3 = vunpack.i.l.bf16 %v23389_v55 }
 0x215   : > { %v20751_v57 = vunpack.i.h.bf16 %v23389_v55 }
 0x217   : > { %20930 = vxpose.xlu0.b32.start.end [1/1] (short) (narrow) %v20929_v51, 16  ;;  %v20762_v51 = vunpack.i.l.bf16 %v23399_v39  ;;  %v20683_v39 = vunpack.i.h.bf16 %v23342_v19 }
 0x219   : > { %v21001_v2 = vpack.i.bf16 %v20767_v52, %v20762_v51  ;;  %v21217_v63 = vpack.i.bf16 %v20688_v14, %v20683_v39  ;;  %v20753_v52 = vunpack.i.l.bf16 %v23395_v18 }
 0x21b   : > { %v21229_v19 = vpack.i.bf16 %v20753_v52, %v20748_v3 }
 0x21c   : > { %20942 = vxpose.xlu0.b32.start.end [1/1] (short) (narrow) %v20941_v49, 16 }
 0x221   : > { %20954 = vxpose.xlu0.b32.start.end [1/1] (short) (narrow) %v20953_v20, 16 }
 0x226   : > { %20966 = vxpose.xlu0.b32.start.end [1/1] (short) (narrow) %v20965_v58, 16  ;;  %v20805_v9 = vpop.trf.xlu0 }
 0x227   : > { %v20809_v49 = vunpack.i.h.bf16 %v20805_v9  ;;  %v20806_v27 = vunpack.i.l.bf16 %v20805_v9 }
 0x22a   : > { %v20810_v25 = vpop.trf.xlu0 }
 0x22b   : > { %20978 = vxpose.xlu0.b32.start.end [1/1] (short) (narrow) %v20977_v44, 16  ;;  %v20814_v23 = vunpack.i.h.bf16 %v20810_v25  ;;  %v20811_v51 = vunpack.i.l.bf16 %v20810_v25 }
 0x22d   : > { %v21013_v12 = vpack.i.bf16 %v20814_v23, %v20809_v49  ;;  %v21037_v22 = vpack.i.bf16 %v20811_v51, %v20806_v27 }
 0x22e   : > { %v20815_v10 = vpop.trf.xlu0 }
 0x22f   : > { %v20816_v39 = vunpack.i.l.bf16 %v20815_v10  ;;  %v20819_v55 = vunpack.i.h.bf16 %v20815_v10 }
 0x230   : > { %20990 = vxpose.xlu0.b32.start.end [1/1] (short) (narrow) %v20989_v1, 16  ;;  %v23463_v1 = vpop.permute.xlu1 %5932 }
 0x232   : > { %v20820_v20 = vpop.trf.xlu0 }
 0x233   : > { %v20821_v25 = vunpack.i.l.bf16 %v20820_v20  ;;  %v20824_v51 = vunpack.i.h.bf16 %v20820_v20 }
 0x234   : > { %v23471_v14 = vpop.permute.xlu1 %5912 }
 0x235   : > { %21002 = vxpose.xlu0.b32.start.end [1/1] (short) (narrow) %v21001_v2, 16  ;;  %v21253_v27 = vpack.i.bf16 %v20821_v25, %v20816_v39 }
 0x236   : > { %v20829_v58 = vpop.trf.xlu0 }
 0x237   : > { %v20833_v54 = vunpack.i.h.bf16 %v20829_v58  ;;  %v20830_v2 = vunpack.i.l.bf16 %v20829_v58  ;;  %v21265_v58 = vpack.i.bf16 %v20824_v51, %v20819_v55  ;;  %v20704_v51 = vunpack.i.l.bf16 %v23365_v29 }
 0x238   : > { %v20709_v55 = vunpack.i.l.bf16 %v23369_v32 }
 0x239   : > { %21206 = vxpose.xlu1.b32.start.end [1/1] (short) (narrow) %v21205_v45, 16 }
 0x23a   : > { %v20834_v44 = vpop.trf.xlu0  ;;  %21014 = vxpose.xlu0.b32.start.end [1/1] (short) (narrow) %v21013_v12, 16  ;;  %v20756_v12 = vunpack.i.h.bf16 %v23395_v18  ;;  %v21301_v15 = vpack.i.bf16 %v20709_v55, %v20704_v51 }
 0x23b   : > { %v20838_v26 = vunpack.i.h.bf16 %v20834_v44  ;;  %v20835_v45 = vunpack.i.l.bf16 %v20834_v44 }
 0x23d   : > { %v21025_v49 = vpack.i.bf16 %v20838_v26, %v20833_v54  ;;  %v21241_v54 = vpack.i.bf16 %v20756_v12, %v20751_v57  ;;  %v23475_v26 = vpop.permute.xlu1 %20860 }
 0x23e   : > { %21218 = vxpose.xlu1.b32.start.end [1/1] (short) (narrow) %v21217_v63, 16  ;;  %v23467_v23 = vpop.trf.xlu0  ;;  %v21049_v63 = vpack.i.bf16 %v20835_v45, %v20830_v2 }
 0x23f   : > { %21026 = vxpose.xlu0.b32.start.end [1/1] (short) (narrow) %v21025_v49, 16 }
 0x241   : > { %v23477_v18 = vpop.permute.xlu1 %20865 }
 0x242   : > { %v23473_v9 = vpop.trf.xlu0 }
 0x243   : > { %21230 = vxpose.xlu1.b32.start.end [1/1] (short) (narrow) %v21229_v19, 16 }
 0x244   : > { %21038 = vxpose.xlu0.b32.start.end [1/1] (short) (narrow) %v21037_v22, 16 }
 0x245   : > { %v23479_v44 = vpop.permute.xlu1 %5908 }
 0x248   : > { %21242 = vxpose.xlu1.b32.start.end [1/1] (short) (narrow) %v21241_v54, 16 }
 0x249   : > { %21050 = vxpose.xlu0.b32.start.end [1/1] (short) (narrow) %v21049_v63, 16 }
 0x24d   : > { %21254 = vxpose.xlu1.b32.start.end [1/1] (short) (narrow) %v21253_v27, 16 }
 0x252   : > { %21266 = vxpose.xlu1.b32.start.end [1/1] (short) (narrow) %v21265_v58, 16 }
 0x259   : > { %v20873_v52 = vpop.trf.xlu1 }
 0x25a   : > { %v20877_v49 = vunpack.i.h.bf16 %v20873_v52 }
 0x25d   : > { %v20878_v3 = vpop.trf.xlu1 }
 0x25e   : > { %v20882_v19 = vunpack.i.h.bf16 %v20878_v3 }
 0x260   : > { %v21061_v22 = vpack.i.bf16 %v20882_v19, %v20877_v49  ;;  %v20879_v19 = vunpack.i.l.bf16 %v20878_v3  ;;  %v20777_v3 = vunpack.i.l.bf16 %v23418_v4 }
 0x261   : > { %v20883_v57 = vpop.trf.xlu1 }
 0x262   : > { %21062 = vxpose.xlu0.b32.start.end [1/1] (short) (narrow) %v21061_v22, 16  ;;  %v20884_v45 = vunpack.i.l.bf16 %v20883_v57  ;;  %v20887_v39 = vunpack.i.h.bf16 %v20883_v57 }
 0x265   : > { %v20888_v2 = vpop.trf.xlu1 }
 0x266   : > { %v20889_v12 = vunpack.i.l.bf16 %v20888_v2  ;;  %v20892_v25 = vunpack.i.h.bf16 %v20888_v2  ;;  %v20707_v2 = vunpack.i.h.bf16 %v23365_v29  ;;  %v20780_v29 = vunpack.i.h.bf16 %v23418_v4 }
 0x267   : > { %v20726_v4 = vunpack.i.l.bf16 %v23367_v30 }
 0x268   : > { %v21277_v20 = vpack.i.bf16 %v20889_v12, %v20884_v45  ;;  %v21289_v27 = vpack.i.bf16 %v20892_v25, %v20887_v39  ;;  %v20712_v45 = vunpack.i.h.bf16 %v23369_v32  ;;  %v20874_v12 = vunpack.i.l.bf16 %v20873_v52  ;;  %v23488_v52 = vpop.permute.xlu0 %5910 }
 0x269   : > { %v20897_v10 = vpop.trf.xlu1  ;;  %v20775_v32 = vunpack.i.h.bf16 %v23411_v0  ;;  %v20843_v0 = vunpack.i.h.bf16 %v23467_v23 }
 0x26a   : > { %21278 = vxpose.xlu1.b32.start.end [1/1] (short) (narrow) %v21277_v20, 16  ;;  %v20901_v54 = vunpack.i.h.bf16 %v20897_v10  ;;  %v20898_v57 = vunpack.i.l.bf16 %v20897_v10  ;;  %v21085_v25 = vpack.i.bf16 %v20879_v19, %v20874_v12  ;;  %v21313_v53 = vpack.i.bf16 %v20712_v45, %v20707_v2 }
 0x26b   : > { %v20840_v10 = vunpack.i.l.bf16 %v23467_v23  ;;  %v20727_v45 = vunpack.i.h.bf16 %v23367_v30  ;;  %v20658_v30 = vunpack.i.l.bf16 %v23313_v5 }
 0x26c   : > { %v23494_v51 = vpop.permute.xlu0 %5906 }
 0x26d   : > { %v20902_v63 = vpop.trf.xlu1 }
 0x26e   : > { %v20906_v58 = vunpack.i.h.bf16 %v20902_v63  ;;  %v20903_v20 = vunpack.i.l.bf16 %v20902_v63  ;;  %v21337_v63 = vpack.i.bf16 %v20780_v29, %v20775_v32  ;;  %v20659_v29 = vunpack.i.h.bf16 %v23313_v5 }
 0x26f   : > { %21290 = vxpose.xlu1.b32.start.end [1/1] (short) (narrow) %v21289_v27, 16  ;;  %v20731_v5 = vunpack.i.l.bf16 %v23371_v33 }
 0x270   : > { %v21073_v49 = vpack.i.bf16 %v20906_v58, %v20901_v54  ;;  %v21097_v27 = vpack.i.bf16 %v20903_v20, %v20898_v57  ;;  %v21325_v54 = vpack.i.bf16 %v20777_v3, %v20772_v46  ;;  %v20848_v46 = vunpack.i.h.bf16 %v23473_v9  ;;  %v23500_v55 = vpop.permute.xlu0 %20850 }
 0x271   : > { %v20907_v22 = vpop.trf.xlu1  ;;  %v20794_v3 = vunpack.i.l.bf16 %v23433_v16 }
 0x272   : > { %21074 = vxpose.xlu0.b32.start.end [1/1] (short) (narrow) %v21073_v49, 16  ;;  %v21361_v58 = vpack.i.bf16 %v20848_v46, %v20843_v0  ;;  %v20716_v49 = vunpack.i.l.bf16 %v23345_v21  ;;  %v20911_v23 = vunpack.i.h.bf16 %v20907_v22 }
 0x274   : > { %21302 = vxpose.xlu1.b32.start.end [1/1] (short) (narrow) %v21301_v15, 16  ;;  %v20845_v15 = vunpack.i.l.bf16 %v23473_v9  ;;  %v21133_v12 = vpack.i.bf16 %v20716_v49, %v20726_v4  ;;  %v20717_v9 = vunpack.i.h.bf16 %v23345_v21  ;;  %v23505_v2 = vpop.permute.xlu0 %20855  ;;  %v20648_v21 = vunpack.i.l.bf16 %v23269_v47 }
 0x275   : > { %v20912_v39 = vpop.trf.xlu1 }
 0x276   : > { %v20913_v19 = vunpack.i.l.bf16 %v20912_v39  ;;  %v20916_v57 = vunpack.i.h.bf16 %v20912_v39  ;;  %v21135_v20 = vpack.i.bf16 %v20717_v9, %v20727_v45  ;;  %v20852_v9 = vunpack.i.l.bf16 %v23500_v55 }
 0x277   : > { %21086 = vxpose.xlu0.b32.start.end [1/1] (short) (narrow) %v21085_v25, 16 }
 0x279   : > { %21314 = vxpose.xlu1.b32.start.end [1/1] (short) (narrow) %v21313_v53, 16  ;;  %v21349_v53 = vpack.i.bf16 %v20845_v15, %v20840_v10  ;;  %v21397_v15 = vpack.i.bf16 %v20648_v21, %v20658_v30  ;;  %v20785_v10 = vunpack.i.h.bf16 %v23429_v42  ;;  %v20857_v30 = vunpack.i.l.bf16 %v23505_v2 }
 0x27c   : > { %21098 = vxpose.xlu0.b32.start.end [1/1] (short) (narrow) %v21097_v27, 16  ;;  %v21385_v27 = vpack.i.bf16 %v20916_v57, %v20911_v23  ;;  %v20853_v23 = vunpack.i.h.bf16 %v23500_v55  ;;  %v20867_v55 = vunpack.i.l.bf16 %v23477_v18 }
 0x27e   : > { %21326 = vxpose.xlu1.b32.start.end [1/1] (short) (narrow) %v21325_v54, 16  ;;  %v20784_v54 = vunpack.i.l.bf16 %v23429_v42  ;;  %v20722_v42 = vunpack.i.h.bf16 %v23401_v43 }
 0x280   : > { %v21157_v39 = vpack.i.bf16 %v20784_v54, %v20794_v3 }
 0x281   : > { %21110 = vxpose.xlu0.b32.start [1/2] (short) (narrow) %v23287_v62, 32  ;;  %v20908_v62 = vunpack.i.l.bf16 %v20907_v22  ;;  %v20795_v22 = vunpack.i.h.bf16 %v23433_v16  ;;  %v20721_v16 = vunpack.i.l.bf16 %v23401_v43  ;;  %v20862_v43 = vunpack.i.l.bf16 %v23475_v26 }
 0x282   : > { %v23542_v57 = vpop.permute.xlu1 %5940 }
 0x283   : > { %21338 = vxpose.xlu1.b32.start.end [1/1] (short) (narrow) %v21337_v63, 16  ;;  %v21159_v46 = vpack.i.bf16 %v20785_v10, %v20795_v22  ;;  %v21421_v49 = vpack.i.bf16 %v20721_v16, %v20731_v5  ;;  %v20858_v22 = vunpack.i.h.bf16 %v23505_v2 }
 0x285   : > { %21112 = vxpose.xlu0.b32.end [2/2] (short) (narrow) %v23285_v56, 32  ;;  %v21373_v56 = vpack.i.bf16 %v20913_v19, %v20908_v62 }
 0x288   : > { %21350 = vxpose.xlu1.b32.start.end [1/1] (short) (narrow) %v21349_v53, 16  ;;  %v20649_v53 = vunpack.i.h.bf16 %v23269_v47  ;;  %v20732_v47 = vunpack.i.h.bf16 %v23371_v33  ;;  %v20863_v33 = vunpack.i.h.bf16 %v23475_v26 }
 0x28a   : > { %v21399_v0 = vpack.i.bf16 %v20649_v53, %v20659_v29  ;;  %v21423_v19 = vpack.i.bf16 %v20722_v42, %v20732_v47  ;;  %v20868_v29 = vunpack.i.h.bf16 %v23477_v18 }
 0x28c   : > { %v21471_v53 = vpack.i.bf16 %v20858_v22, %v20868_v29 }
 0x28d   : > { %21362 = vxpose.xlu1.b32.start.end [1/1] (short) (narrow) %v21361_v58, 16 }
 0x28e   : > { %21134 = vxpose.xlu0.b32.start [1/2] (short) (narrow) %v21133_v12, 32 }
 0x292   : > { %21374 = vxpose.xlu1.b32.start.end [1/1] (short) (narrow) %v21373_v56, 16  ;;  %21136 = vxpose.xlu0.b32.end [2/2] (short) (narrow) %v21135_v20, 32  ;;  %v23507_v25 = vpop.trf.xlu0 }
 0x296   : > { %v23512_v32 = vpop.trf.xlu0 }
 0x297   : > { %21386 = vxpose.xlu1.b32.start.end [1/1] (short) (narrow) %v21385_v27, 16 }
 0x29a   : > { %v23518_v63 = vpop.trf.xlu0 }
 0x29b   : > { %27803 = vst [vmem:[#allocation12_spill] sm:$0xff] %v23518_v63  ;;  %21158 = vxpose.xlu0.b32.start [1/2] (short) (narrow) %v21157_v39, 32  ;;  %v21469_v39 = vpack.i.bf16 %v20857_v30, %v20867_v55 }
 0x29c   : > { %21398 = vxpose.xlu1.b32.start [1/2] (short) (narrow) %v21397_v15, 32 }
 0x29e   : > { %v23521_v4 = vpop.trf.xlu0 }
 0x29f   : > { %27804 = vst [vmem:[#allocation13_spill] sm:$0xff] %v23521_v4  ;;  %21160 = vxpose.xlu0.b32.end [2/2] (short) (narrow) %v21159_v46, 32 }
 0x2a0   : > { %21400 = vxpose.xlu1.b32.end [2/2] (short) (narrow) %v21399_v0, 32 }
 0x2a2   : > { %v23524_v58 = vpop.trf.xlu0 }
 0x2a6   : > { %v23528_v62 = vpop.trf.xlu0 }
 0x2a8   : > { %21182 = vxpose.xlu0.b32.start [1/2] (short) (narrow) %v23438_v35, 32  ;;  %v21445_v35 = vpack.i.bf16 %v20852_v9, %v20862_v43 }
 0x2a9   : > { %21422 = vxpose.xlu1.b32.start [1/2] (short) (narrow) %v21421_v49, 32 }
 0x2aa   : > { %v23532_v45 = vpop.trf.xlu0 }
 0x2ab   : > { %27805 = vst [vmem:[#allocation14_spill] sm:$0xff] %v23532_v45 }
 0x2ac   : > { %21184 = vxpose.xlu0.b32.end [2/2] (short) (narrow) %v23436_v31, 32  ;;  %v21447_v31 = vpack.i.bf16 %v20853_v23, %v20863_v33 }
 0x2ad   : > { %21424 = vxpose.xlu1.b32.end [2/2] (short) (narrow) %v21423_v19, 32 }
 0x2ae   : > { %v23535_v12 = vpop.trf.xlu0 }
 0x2af   : > { %27806 = vst [vmem:[#allocation15_spill] sm:$0xff] %v23535_v12 }
 0x2b2   : > { %v23539_v56 = vpop.trf.xlu0 }
 0x2b3   : > { %27807 = vst [vmem:[#allocation16_spill] sm:$0xff] %v23539_v56 }
 0x2b6   : > { %21446 = vxpose.xlu1.b32.start [1/2] (short) (narrow) %v21445_v35, 32  ;;  %v23545_v20 = vpop.trf.xlu0 }
 0x2b7   : > { %27808 = vst [vmem:[#allocation17_spill] sm:$0xff] %v23545_v20 }
 0x2b9   : > { %v23547_v27 = vpop.trf.xlu1 }
 0x2ba   : > { %21448 = vxpose.xlu1.b32.end [2/2] (short) (narrow) %v21447_v31, 32  ;;  %v23549_v3 = vpop.trf.xlu0 }
 0x2bb   : > { %27809 = vst [vmem:[#allocation18_spill] sm:$0xff] %v23549_v3 }
 0x2bd   : > { %v23552_v54 = vpop.trf.xlu1 }
 0x2be   : > { %v23555_v21 = vpop.trf.xlu0 }
 0x2bf   : > { %27810 = vst [vmem:[#allocation19_spill] sm:$0xff] %v23555_v21 }
 0x2c1   : > { %v23558_v26 = vpop.trf.xlu1 }
 0x2c2   : > { %27811 = vst [vmem:[#allocation20_spill] sm:$0xff] %v23558_v26  ;;  %v23561_v15 = vpop.trf.xlu0 }
 0x2c3   : > { %21470 = vxpose.xlu1.b32.start [1/2] (short) (narrow) %v21469_v39, 32 }
 0x2c5   : > { %v23563_v10 = vpop.trf.xlu1 }
 0x2c6   : > { %27812 = vst [vmem:[#allocation21_spill] sm:$0xff] %v23563_v10  ;;  %v23565_v46 = vpop.trf.xlu0 }
 0x2c7   : > { %21472 = vxpose.xlu1.b32.end [2/2] (short) (narrow) %v21471_v53, 32 }
 0x2c9   : > { %v23567_v0 = vpop.trf.xlu1 }
 0x2ca   : > { %27813 = vst [vmem:[#allocation22_spill] sm:$0xff] %v23567_v0  ;;  %v23569_v16 = vpop.trf.xlu0 }
 0x2cb   : > { %27814 = vst [vmem:[#allocation23_spill] sm:$0xff] %v23569_v16 }
 0x2cd   : > { %v23571_v5 = vpop.trf.xlu1 }
 0x2ce   : > { %27815 = vst [vmem:[#allocation24_spill] sm:$0xff] %v23571_v5  ;;  %v23573_v2 = vpop.trf.xlu0 }
 0x2cf   : > { %27816 = vst [vmem:[#allocation25_spill] sm:$0xff] %v23573_v2 }
 0x2d1   : > { %v23575_v42 = vpop.trf.xlu1 }
 0x2d2   : > { %27817 = vst [vmem:[#allocation26_spill] sm:$0xff] %v23575_v42  ;;  %v23577_v18 = vpop.trf.xlu0 }
 0x2d3   : > { %27818 = vst [vmem:[#allocation27_spill] sm:$0xff] %v23577_v18 }
 0x2d5   : > { %v23579_v49 = vpop.trf.xlu1 }
 0x2d6   : > { %27819 = vst [vmem:[#allocation28_spill] sm:$0xff] %v23579_v49  ;;  %v23581_v47 = vpop.trf.xlu0 }
 0x2d7   : > { %27820 = vst [vmem:[#allocation29_spill] sm:$0xff] %v23581_v47 }
 0x2d9   : > { %v23583_v19 = vpop.trf.xlu1 }
 0x2da   : > { %27821 = vst [vmem:[#allocation30_spill] sm:$0xff] %v23583_v19  ;;  %v23585_v9 = vpop.trf.xlu0 }
 0x2db   : > { %27822 = vst [vmem:[#allocation31_spill] sm:$0xff] %v23585_v9 }
 0x2dd   : > { %v23587_v43 = vpop.trf.xlu1  ;;  %5938 = vrot.lane.b32.xlu0 %v23226_v8, %s22905_s20 }
 0x2de   : > { %27823 = vst [vmem:[#allocation32_spill] sm:$0xff] %v23587_v43  ;;  %v23591_v23 = vpop.trf.xlu0 }
 0x2df   : > { %27824 = vst [vmem:[#allocation33_spill] sm:$0xff] %v23591_v23 }
 0x2e1   : > { %v23593_v35 = vpop.trf.xlu1  ;;  %5942 = vrot.lane.b32.xlu0 %v23222_v28, %s22905_s20 }
 0x2e2   : > { %27825 = vst [vmem:[#allocation34_spill] sm:$0xff] %v23593_v35  ;;  %v23597_v33 = vpop.trf.xlu0 }
 0x2e3   : > { %27826 = vst [vmem:[#allocation35_spill] sm:$0xff] %v23597_v33 }
 0x2e5   : > { %v23599_v31 = vpop.trf.xlu1 }
 0x2e6   : > { %27827 = vst [vmem:[#allocation36_spill] sm:$0xff] %v23599_v31  ;;  %v23601_v30 = vpop.trf.xlu0 }
 0x2e7   : > { %27828 = vst [vmem:[#allocation37_spill] sm:$0xff] %v23601_v30 }
 0x2ea   : > { %v23603_v55 = vpop.trf.xlu1  ;;  %v23605_v22 = vpop.trf.xlu0 }
 0x2eb   : > { %27829 = vst [vmem:[#allocation38_spill] sm:$0xff] %v23603_v55  ;;  %27830 = vst [vmem:[#allocation39_spill] sm:$0xff] %v23605_v22 }
 0x2ee   : > { %v23607_v39 = vpop.trf.xlu1  ;;  %v23609_v8 = vpop.trf.xlu0 }
 0x2ef   : > { %27831 = vst [vmem:[#allocation40_spill] sm:$0xff] %v23607_v39  ;;  %27832 = vst [vmem:[#allocation41_spill] sm:$0xff] %v23609_v8 }
 0x2f2   : > { %v23611_v29 = vpop.trf.xlu1  ;;  %v23613_v53 = vpop.trf.xlu0 }
 0x2f3   : > { %27833 = vst [vmem:[#allocation42_spill] sm:$0xff] %v23611_v29  ;;  %27834 = vst [vmem:[#allocation43_spill] sm:$0xff] %v23613_v53 }
 0x2f6   : > { %v23615_v23 = vpop.trf.xlu1  ;;  %v23617_v28 = vpop.trf.xlu0 }
 0x2f7   : > { %27835 = vst [vmem:[#allocation44_spill] sm:$0xff] %v23615_v23  ;;  %27836 = vst [vmem:[#allocation45_spill] sm:$0xff] %v23617_v28 }
 0x2fa   : > { %v23619_v9 = vpop.trf.xlu1  ;;  %v23621_v21 = vpop.trf.xlu0 }
 0x2fb   : > { %27837 = vst [vmem:[#allocation46_spill] sm:$0xff] %v23619_v9  ;;  %27838 = vst [vmem:[#allocation47_spill] sm:$0xff] %v23621_v21 }
 0x2fe   : > { %v23623_v3 = vpop.trf.xlu1  ;;  %v23625_v2 = vpop.trf.xlu0 }
 0x2ff   : > { %27839 = vst [vmem:[#allocation48_spill] sm:$0xff] %v23623_v3  ;;  %27840 = vst [vmem:[#allocation49_spill] sm:$0xff] %v23625_v2 }
 0x302   : > { %v23627_v22 = vpop.trf.xlu1  ;;  %v23629_v16 = vpop.trf.xlu0 }
 0x303   : > { %27841 = vst [vmem:[#allocation50_spill] sm:$0xff] %v23627_v22  ;;  %27842 = vst [vmem:[#allocation51_spill] sm:$0xff] %v23629_v16 }
 0x306   : > { %v23631_v8 = vpop.trf.xlu1  ;;  %v23633_v4 = vpop.trf.xlu0 }
 0x307   : > { %27843 = vst [vmem:[#allocation52_spill] sm:$0xff] %v23631_v8  ;;  %27844 = vst [vmem:[#allocation53_spill] sm:$0xff] %v23633_v4 }
 0x30a   : > { %v23635_v63 = vpop.trf.xlu1  ;;  %v23637_v12 = vpop.trf.xlu0 }
 0x30b   : > { %27845 = vst [vmem:[#allocation54_spill] sm:$0xff] %v23635_v63  ;;  %27846 = vst [vmem:[#allocation55_spill] sm:$0xff] %v23637_v12 }
 0x30e   : > { %v23639_v45 = vpop.trf.xlu1  ;;  %v23641_v9 = vpop.trf.xlu0 }
 0x30f   : > { %27847 = vst [vmem:[#allocation56_spill] sm:$0xff] %v23639_v45  ;;  %27848 = vst [vmem:[#allocation57_spill] sm:$0xff] %v23641_v9 }
 0x312   : > { %v23643_v21 = vpop.trf.xlu1  ;;  %v21113_v3 = vpop.trf.xlu0 }
 0x313   : > { %27849 = vst [vmem:[#allocation58_spill] sm:$0xff] %v23643_v21  ;;  %v21117_v22 = vunpack.i.h.bf16 %v21113_v3  ;;  %v21114_v8 = vunpack.i.l.bf16 %v21113_v3 }
 0x316   : > { %v23645_v2 = vpop.trf.xlu1  ;;  %v21118_v29 = vpop.trf.xlu0 }
 0x317   : > { %27850 = vst [vmem:[#allocation59_spill] sm:$0xff] %v23645_v2  ;;  %v21122_v23 = vunpack.i.h.bf16 %v21118_v29  ;;  %v21119_v28 = vunpack.i.l.bf16 %v21118_v29 }
 0x319   : > { %v21493_v55 = vpack.i.bf16 %v21122_v23, %v21117_v22  ;;  %v21505_v12 = vpack.i.bf16 %v21119_v28, %v21114_v8 }
 0x31a   : > { %v23647_v53 = vpop.trf.xlu1  ;;  %v23649_v63 = vpop.trf.xlu0 }
 0x31b   : > { %27851 = vst [vmem:[#allocation60_spill] sm:$0xff] %v23647_v53  ;;  %21494 = vxpose.xlu1.b32.start.end [1/1] (short) (narrow) %v21493_v55, 16 }
 0x31e   : > { %v23651_v45 = vpop.trf.xlu1  ;;  %v23653_v9 = vpop.trf.xlu0 }
 0x31f   : > { %27852 = vst [vmem:[#allocation61_spill] sm:$0xff] %v23651_v45 }
 0x320   : > { %21506 = vxpose.xlu1.b32.start.end [1/1] (short) (narrow) %v21505_v12, 16 }
 0x322   : > { %v23655_v21 = vpop.trf.xlu1  ;;  %v23657_v2 = vpop.trf.xlu0 }
 0x323   : > { %27853 = vst [vmem:[#allocation62_spill] sm:$0xff] %v23655_v21  ;;  %v21141_v39 = vunpack.i.h.bf16 %v23657_v2 }
 0x326   : > { %v23660_v29 = vpop.trf.xlu1  ;;  %v23662_v3 = vpop.trf.xlu0 }
 0x327   : > { %27854 = vst [vmem:[#allocation63_spill] sm:$0xff] %v23660_v29  ;;  %v21146_v23 = vunpack.i.h.bf16 %v23662_v3 }
 0x329   : > { %v21517_v55 = vpack.i.bf16 %v21146_v23, %v21141_v39 }
 0x32a   : > { %v23665_v22 = vpop.trf.xlu1  ;;  %v21147_v8 = vpop.trf.xlu0 }
 0x32b   : > { %27855 = vst [vmem:[#allocation64_spill] sm:$0xff] %v23665_v22  ;;  %21518 = vxpose.xlu1.b32.start.end [1/1] (short) (narrow) %v21517_v55, 16  ;;  %v21151_v20 = vunpack.i.h.bf16 %v21147_v8 }
 0x32e   : > { %v23667_v28 = vpop.trf.xlu1  ;;  %v21152_v12 = vpop.trf.xlu0 }
 0x32f   : > { %27856 = vst [vmem:[#allocation65_spill] sm:$0xff] %v23667_v28 }
 0x332   : > { %v21387_v53 = vpop.trf.xlu1  ;;  %v23669_v21 = vpop.trf.xlu0 }
 0x333   : > { %v21391_v45 = vunpack.i.h.bf16 %v21387_v53  ;;  %v21388_v4 = vunpack.i.l.bf16 %v21387_v53 }
 0x336   : > { %v21392_v16 = vpop.trf.xlu1  ;;  %v23671_v31 = vpop.trf.xlu0 }
 0x337   : > { %v21396_v35 = vunpack.i.h.bf16 %v21392_v16  ;;  %v21393_v29 = vunpack.i.l.bf16 %v21392_v16 }
 0x339   : > { %v23673_v47 = vpack.c.bf16 %v21393_v29, %v21388_v4  ;;  %v23675_v18 = vpack.c.bf16 %v21396_v35, %v21391_v45  ;;  %v21153_v35 = vunpack.i.l.bf16 %v21152_v12 }
 0x33a   : > { %v21401_v39 = vpop.trf.xlu1  ;;  %v21171_v23 = vpop.trf.xlu0 }
 0x33b   : > { %27857 = vst [vmem:[#allocation66_spill] sm:$0xff] %v23673_v47  ;;  %27858 = vst [vmem:[#allocation67_spill] sm:$0xff] %v23675_v18  ;;  %v21402_v22 = vunpack.i.l.bf16 %v21401_v39  ;;  %v21405_v53 = vunpack.i.h.bf16 %v21401_v39  ;;  %v21148_v18 = vunpack.i.l.bf16 %v21147_v8  ;;  %v21172_v8 = vunpack.i.l.bf16 %v21171_v23 }
 0x33e   : > { %v21406_v55 = vpop.trf.xlu1  ;;  %v21176_v19 = vpop.trf.xlu0 }
 0x33f   : > { %v21407_v28 = vunpack.i.l.bf16 %v21406_v55  ;;  %v21410_v30 = vunpack.i.h.bf16 %v21406_v55  ;;  %v21709_v55 = vpack.i.bf16 %v21153_v35, %v21148_v18  ;;  %v21138_v35 = vunpack.i.l.bf16 %v23657_v2 }
 0x340   : > { %v21129_v2 = vunpack.i.l.bf16 %v23653_v9 }
 0x341   : > { %v21673_v43 = vpack.i.bf16 %v21407_v28, %v21402_v22  ;;  %v21685_v49 = vpack.i.bf16 %v21410_v30, %v21405_v53  ;;  %v21156_v22 = vunpack.i.h.bf16 %v21152_v12 }
 0x342   : > { %v21411_v33 = vpop.trf.xlu1  ;;  %v23677_v42 = vpop.trf.xlu0 }
 0x343   : > { %21674 = vxpose.xlu0.b32.start.end [1/1] (short) (narrow) %v21673_v43, 16  ;;  %v21415_v45 = vunpack.i.h.bf16 %v21411_v33  ;;  %v27617_v43 = vmov 0.0   ;;  %v21412_v18 = vunpack.i.l.bf16 %v21411_v33 }
 0x344   : > { %19792 = vmatprep.subr.bf16.mxu1 %v27617_v43  ;;  %19840 = vmatprep.subr.bf16.mxu0 %v27617_v43 }
 0x345   : > { %19794 = vmatprep.mubr.msk.bf16.mxu1 %vm22908_vm1, %v27617_v43  ;;  %19842 = vmatprep.mubr.msk.bf16.mxu0 %vm22908_vm1, %v27617_v43 }
 0x346   : > { %v21416_v16 = vpop.trf.xlu1  ;;  %v23679_v4 = vpop.trf.xlu0 }
 0x347   : > { %v21420_v10 = vunpack.i.h.bf16 %v21416_v16  ;;  %v21417_v56 = vunpack.i.l.bf16 %v21416_v16  ;;  %v21143_v16 = vunpack.i.l.bf16 %v23662_v3 }
 0x348   : > { %21686 = vxpose.xlu0.b32.start.end [1/1] (short) (narrow) %v21685_v49, 16 }
 0x349   : > { %v21697_v26 = vpack.i.bf16 %v21420_v10, %v21415_v45  ;;  %v21177_v10 = vunpack.i.l.bf16 %v21176_v19  ;;  %v21541_v12 = vpack.i.bf16 %v21417_v56, %v21412_v18  ;;  %v21165_v56 = vunpack.i.h.bf16 %v23669_v21 }
 0x34a   : > { %v21425_v29 = vpop.trf.xlu1  ;;  %v23681_v47 = vpop.trf.xlu0  ;;  %v21170_v18 = vunpack.i.h.bf16 %v23671_v31 }
 0x34b   : > { %v21429_v49 = vunpack.i.h.bf16 %v21425_v29  ;;  %v21426_v43 = vunpack.i.l.bf16 %v21425_v29 }
 0x34d   : > { %21698 = vxpose.xlu0.b32.start.end [1/1] (short) (narrow) %v21697_v26, 16  ;;  %v21721_v26 = vpack.i.bf16 %v21156_v22, %v21151_v20 }
 0x34e   : > { %v21430_v28 = vpop.trf.xlu1  ;;  %v23685_v39 = vpop.trf.xlu0 }
 0x34f   : > { %v21434_v30 = vunpack.i.h.bf16 %v21430_v28  ;;  %v21431_v20 = vunpack.i.l.bf16 %v21430_v28  ;;  %v21162_v28 = vunpack.i.l.bf16 %v23669_v21 }
 0x351   : > { %v21529_v53 = vpack.i.bf16 %v21434_v30, %v21429_v49  ;;  %v21180_v30 = vunpack.i.h.bf16 %v21176_v19  ;;  %v21175_v49 = vunpack.i.h.bf16 %v21171_v23  ;;  %v21565_v3 = vpack.i.bf16 %v21431_v20, %v21426_v43 }
 0x352   : > { %21710 = vxpose.xlu0.b32.start.end [1/1] (short) (narrow) %v21709_v55, 16  ;;  %v21435_v0 = vpop.trf.xlu1  ;;  %v21733_v55 = vpack.i.bf16 %v21177_v10, %v21172_v8  ;;  %v21577_v23 = vpack.i.bf16 %v21170_v18, %v21165_v56  ;;  %v21167_v10 = vunpack.i.l.bf16 %v23671_v31  ;;  %v21132_v8 = vunpack.i.h.bf16 %v23653_v9 }
 0x353   : > { %21530 = vxpose.xlu1.b32.start.end [1/1] (short) (narrow) %v21529_v53, 16  ;;  %v21553_v53 = vpack.i.bf16 %v21143_v16, %v21138_v35  ;;  %v21745_v22 = vpack.i.bf16 %v21180_v30, %v21175_v49  ;;  %v21436_v43 = vunpack.i.l.bf16 %v21435_v0  ;;  %v21186_v30 = vunpack.i.l.bf16 %v23677_v42 }
 0x354   : > { %v21191_v49 = vunpack.i.l.bf16 %v23679_v4  ;;  %v21439_v31 = vunpack.i.h.bf16 %v21435_v0  ;;  %v21199_v0 = vunpack.i.h.bf16 %v23681_v47 }
 0x356   : > { %v21440_v45 = vpop.trf.xlu1  ;;  %v21601_v9 = vpack.i.bf16 %v21191_v49, %v21186_v30 }
 0x357   : > { %21722 = vxpose.xlu0.b32.start.end [1/1] (short) (narrow) %v21721_v26, 16  ;;  %v21124_v26 = vunpack.i.l.bf16 %v23649_v63  ;;  %v21441_v16 = vunpack.i.l.bf16 %v21440_v45 }
 0x358   : > { %21542 = vxpose.xlu1.b32.start.end [1/1] (short) (narrow) %v21541_v12, 16  ;;  %v21127_v12 = vunpack.i.h.bf16 %v23649_v63 }
 0x359   : > { %v21757_v29 = vpack.i.bf16 %v21129_v2, %v21124_v26  ;;  %v21781_v21 = vpack.i.bf16 %v21441_v16, %v21436_v43  ;;  %v21189_v16 = vunpack.i.h.bf16 %v23677_v42 }
 0x35a   : > { %v21449_v5 = vpop.trf.xlu1 }
 0x35b   : > { %v21453_v63 = vunpack.i.h.bf16 %v21449_v5 }
 0x35c   : > { %21734 = vxpose.xlu0.b32.start.end [1/1] (short) (narrow) %v21733_v55, 16  ;;  %v21589_v55 = vpack.i.bf16 %v21167_v10, %v21162_v28 }
 0x35d   : > { %21554 = vxpose.xlu1.b32.start.end [1/1] (short) (narrow) %v21553_v53, 16  ;;  %v21769_v53 = vpack.i.bf16 %v21132_v8, %v21127_v12  ;;  %v21204_v12 = vunpack.i.h.bf16 %v23685_v39 }
 0x35e   : > { %v21454_v33 = vpop.trf.xlu1 }
 0x35f   : > { %v21458_v56 = vunpack.i.h.bf16 %v21454_v33  ;;  %v21455_v10 = vunpack.i.l.bf16 %v21454_v33  ;;  %v21817_v30 = vpack.i.bf16 %v21204_v12, %v21199_v0 }
 0x361   : > { %21746 = vxpose.xlu0.b32.start.end [1/1] (short) (narrow) %v21745_v22, 16  ;;  %v21444_v22 = vunpack.i.h.bf16 %v21440_v45  ;;  %v21613_v26 = vpack.i.bf16 %v21458_v56, %v21453_v63 }
 0x362   : > { %21566 = vxpose.xlu1.b32.start.end [1/1] (short) (narrow) %v21565_v3, 16  ;;  %v23697_v19 = vpop.trf.xlu1  ;;  %v21201_v3 = vunpack.i.l.bf16 %v23685_v39 }
 0x363   : > { %v21793_v2 = vpack.i.bf16 %v21444_v22, %v21439_v31  ;;  %v21463_v49 = vunpack.i.h.bf16 %v23697_v19  ;;  %v21460_v31 = vunpack.i.l.bf16 %v23697_v19 }
 0x366   : > { %21758 = vxpose.xlu0.b32.start.end [1/1] (short) (narrow) %v21757_v29, 16  ;;  %v21464_v35 = vpop.trf.xlu1  ;;  %v21450_v29 = vunpack.i.l.bf16 %v21449_v5 }
 0x367   : > { %21578 = vxpose.xlu1.b32.start.end [1/1] (short) (narrow) %v21577_v23, 16  ;;  %v21196_v23 = vunpack.i.l.bf16 %v23681_v47  ;;  %v21468_v33 = vunpack.i.h.bf16 %v21464_v35  ;;  %v21465_v39 = vunpack.i.l.bf16 %v21464_v35 }
 0x368   : > { %v21625_v43 = vpack.i.bf16 %v21455_v10, %v21450_v29 }
 0x369   : > { %v21805_v8 = vpack.i.bf16 %v21201_v3, %v21196_v23  ;;  %v21829_v47 = vpack.i.bf16 %v21468_v33, %v21463_v49 }
 0x36a   : > { %v21473_v20 = vpop.trf.xlu1 }
 0x36b   : > { %21770 = vxpose.xlu0.b32.start.end [1/1] (short) (narrow) %v21769_v53, 16  ;;  %v21477_v42 = vunpack.i.h.bf16 %v21473_v20 }
 0x36c   : > { %21590 = vxpose.xlu1.b32.start.end [1/1] (short) (narrow) %v21589_v55, 16  ;;  %v21194_v55 = vunpack.i.h.bf16 %v23679_v4  ;;  %v21841_v4 = vpack.i.bf16 %v21465_v39, %v21460_v31 }
 0x36e   : > { %v21478_v18 = vpop.trf.xlu1  ;;  %v21637_v5 = vpack.i.bf16 %v21194_v55, %v21189_v16 }
 0x36f   : > { %v21479_v53 = vunpack.i.l.bf16 %v21478_v18 }
 0x370   : > { %21782 = vxpose.xlu0.b32.start.end [1/1] (short) (narrow) %v21781_v21, 16  ;;  %v21474_v21 = vunpack.i.l.bf16 %v21473_v20 }
 0x371   : > { %21602 = vxpose.xlu1.b32.start.end [1/1] (short) (narrow) %v21601_v9, 16  ;;  %v21482_v9 = vunpack.i.h.bf16 %v21478_v18 }
 0x372   : > { %v21483_v28 = vpop.trf.xlu1  ;;  %v21649_v22 = vpack.i.bf16 %v21479_v53, %v21474_v21 }
 0x373   : > { %v21484_v56 = vunpack.i.l.bf16 %v21483_v28 }
 0x375   : > { %21794 = vxpose.xlu0.b32.start.end [1/1] (short) (narrow) %v21793_v2, 16  ;;  %v21661_v2 = vpack.i.bf16 %v21482_v9, %v21477_v42 }
 0x376   : > { %21614 = vxpose.xlu1.b32.start.end [1/1] (short) (narrow) %v21613_v26, 16  ;;  %v21488_v45 = vpop.trf.xlu1  ;;  %v21487_v26 = vunpack.i.h.bf16 %v21483_v28 }
 0x377   : > { %v21489_v63 = vunpack.i.l.bf16 %v21488_v45  ;;  %v21492_v23 = vunpack.i.h.bf16 %v21488_v45 }
 0x379   : > { %v21853_v3 = vpack.i.bf16 %v21489_v63, %v21484_v56  ;;  %v21865_v10 = vpack.i.bf16 %v21492_v23, %v21487_v26  ;;  %v20947_v56 = vunpack.i.h.bf16 %v23524_v58 }
 0x37a   : > { %21806 = vxpose.xlu0.b32.start.end [1/1] (short) (narrow) %v21805_v8, 16 }
 0x37b   : > { %21626 = vxpose.xlu1.b32.start.end [1/1] (short) (narrow) %v21625_v43, 16 }
 0x37f   : > { %21818 = vxpose.xlu0.b32.start.end [1/1] (short) (narrow) %v21817_v30, 16 }
 0x380   : > { %21638 = vxpose.xlu1.b32.start.end [1/1] (short) (narrow) %v21637_v5, 16 }
 0x384   : > { %21830 = vxpose.xlu0.b32.start.end [1/1] (short) (narrow) %v21829_v47, 16 }
 0x385   : > { %21650 = vxpose.xlu1.b32.start.end [1/1] (short) (narrow) %v21649_v22, 16  ;;  %v27859_v22 = vmov 0.0  }
 0x389   : > { %21842 = vxpose.xlu0.b32.start.end [1/1] (short) (narrow) %v21841_v4, 16 }
 0x38a   : > { %21662 = vxpose.xlu1.b32.start.end [1/1] (short) (narrow) %v21661_v2, 16 }
 0x38e   : > { %21854 = vxpose.xlu0.b32.start.end [1/1] (short) (narrow) %v21853_v3, 16 }
 0x38f   : > { %6010 = vxpose.xlu1.b32.start [1/2] (short) (narrow) %v23257_v36, 32 }
 0x393   : > { %21866 = vxpose.xlu0.b32.start.end [1/1] (short) (narrow) %v21865_v10, 16  ;;  %6011 = vxpose.xlu1.b32.end [2/2] (short) (narrow) %v23275_v48, 32 }
 0x398   : > { %5978 = vxpose.xlu0.b32.start [1/2] (short) (narrow) %v23264_v40, 32 }
 0x39b   : > { %v21495_v19 = vpop.trf.xlu1 }
 0x39c   : > { %5979 = vxpose.xlu0.b32.end [2/2] (short) (narrow) %v23317_v6, 32  ;;  %6106 = vxpose.xlu1.b32.start [1/2] (short) (narrow) %v23423_v17, 32  ;;  %v21496_v35 = vunpack.i.l.bf16 %v21495_v19  ;;  %v21499_v20 = vunpack.i.h.bf16 %v21495_v19 }
 0x39f   : > { %v21500_v18 = vpop.trf.xlu1 }
 0x3a0   : > { %6107 = vxpose.xlu1.b32.end [2/2] (short) (narrow) %v23459_v59, 32  ;;  %v21504_v28 = vunpack.i.h.bf16 %v21500_v18  ;;  %v21501_v29 = vunpack.i.l.bf16 %v21500_v18 }
 0x3a2   : > { %v23719_v8 = vpack.c.bf16 %v21501_v29, %v21496_v35  ;;  %v23721_v36 = vpack.c.bf16 %v21504_v28, %v21499_v20  ;;  %v27860_v29 = vld [vmem:[#allocation6_spill] sm:$0xff] }
 0x3a3   : > { %v21507_v0 = vpop.trf.xlu1 }
 0x3a4   : > { %v21511_v40 = vunpack.i.h.bf16 %v21507_v0  ;;  %v21508_v48 = vunpack.i.l.bf16 %v21507_v0 }
 0x3a5   : > { %6042 = vxpose.xlu0.b32.start [1/2] (short) (narrow) %v23329_v13, 32 }
 0x3a7   : > { %v21512_v6 = vpop.trf.xlu1 }
 0x3a8   : > { %v21516_v17 = vunpack.i.h.bf16 %v21512_v6  ;;  %v21513_v45 = vunpack.i.l.bf16 %v21512_v6 }
 0x3a9   : > { %6043 = vxpose.xlu0.b32.end [2/2] (short) (narrow) %v23373_v34, 32  ;;  %6170 = vxpose.xlu1.b32.start [1/2] (short) (narrow) %v23494_v51, 32  ;;  %v5939_v51 = vpop.permute.xlu0 %5938 }
 0x3aa   : > { %v23726_v59 = vpack.c.bf16 %v21513_v45, %v21508_v48  ;;  %v23728_v12 = vpack.c.bf16 %v21516_v17, %v21511_v40 }
 0x3ab   : > { %v21519_v43 = vpop.trf.xlu1 }
 0x3ac   : > { %v21520_v16 = vunpack.i.l.bf16 %v21519_v43  ;;  %v21523_v55 = vunpack.i.h.bf16 %v21519_v43  ;;  %v21208_v43 = vunpack.i.l.bf16 %v23547_v27 }
 0x3ad   : > { %6171 = vxpose.xlu1.b32.end [2/2] (short) (narrow) %v23479_v44, 32  ;;  %v23739_v5 = vpop.permute.xlu0 %5942 }
 0x3af   : > { %v21524_v30 = vpop.trf.xlu1 }
 0x3b0   : > { %v21528_v13 = vunpack.i.h.bf16 %v21524_v30  ;;  %v21525_v49 = vunpack.i.l.bf16 %v21524_v30 }
 0x3b2   : > { %6074 = vxpose.xlu0.b32.start [1/2] (short) (narrow) %v23383_v38, 32  ;;  %v23732_v33 = vpack.c.bf16 %v21525_v49, %v21520_v16  ;;  %v23734_v34 = vpack.c.bf16 %v21528_v13, %v21523_v55  ;;  %v27861_v55 = vld [vmem:[#allocation7_spill] sm:$0xff] }
 0x3b6   : > { %6075 = vxpose.xlu0.b32.end [2/2] (short) (narrow) %v23351_v24, 32  ;;  %6234 = vxpose.xlu1.b32.start [1/2] (short) (narrow) %v23277_v50, 32 }
 0x3ba   : > { %6235 = vxpose.xlu1.b32.end [2/2] (short) (narrow) %v23321_v7, 32 }
 0x3c3   : > { %v21675_v44 = vpop.trf.xlu0  ;;  %6138 = vxpose.xlu0.b32.start [1/2] (short) (narrow) %v23407_v61, 32  ;;  %6298 = vxpose.xlu1.b32.start [1/2] (short) (narrow) %v23391_v60, 32  ;;  %v20944_v61 = vunpack.i.l.bf16 %v23524_v58  ;;  %v20949_v60 = vunpack.i.l.bf16 %v23528_v62 }
 0x3c4   : > { %v21676_v53 = vunpack.i.l.bf16 %v21675_v44  ;;  %v21679_v31 = vunpack.i.h.bf16 %v21675_v44 }
 0x3c7   : > { %v21680_v38 = vpop.trf.xlu0  ;;  %6139 = vxpose.xlu0.b32.end [2/2] (short) (narrow) %v23427_v11, 32  ;;  %6299 = vxpose.xlu1.b32.end [2/2] (short) (narrow) %v23375_v37, 32  ;;  %v6490_v37 = vpack.c.bf16 %v20949_v60, %v20944_v61 }
 0x3c8   : > { %v21681_v21 = vunpack.i.l.bf16 %v21680_v38  ;;  %v21684_v47 = vunpack.i.h.bf16 %v21680_v38 }
 0x3ca   : > { %v6554_v24 = vpack.c.bf16 %v21681_v21, %v21676_v53  ;;  %v6555_v11 = vpack.c.bf16 %v21684_v47, %v21679_v31 }
 0x3cb   : > { %v23745_v50 = vpop.trf.xlu0 }
 0x3cc   : > { %v6751_v7 = vsel %vm6746_vm2, %v6554_v24, 0  ;;  %v6798_v4 = vsel %vm6746_vm2, %v6555_v11, 0  ;;  %v21688_v21 = vunpack.i.l.bf16 %v23745_v50 }
 0x3cd   : > { %19793 = vmatpush3.bf16.xpose.msra.mxu1 %v6751_v7 }
 0x3ce   : > { %19798 = vmatprep.subr.bf16.mxu1 %v27859_v22 }
 0x3cf   : > { %v23750_v39 = vpop.trf.xlu0 }
 0x3d0   : > { %6362 = vxpose.xlu1.b32.start [1/2] (short) (narrow) %v23425_v41, 32  ;;  %v20952_v41 = vunpack.i.h.bf16 %v23528_v62  ;;  %v21693_v24 = vunpack.i.l.bf16 %v23750_v39 }
 0x3d2   : > { %v6491_v23 = vpack.c.bf16 %v20952_v41, %v20947_v56  ;;  %v20992_v56 = vunpack.i.l.bf16 %v23561_v15  ;;  %v20997_v41 = vunpack.i.l.bf16 %v23565_v46 }
 0x3d3   : > { %v23754_v9 = vpop.trf.xlu0  ;;  %6202 = vxpose.xlu0.b32.start [1/2] (short) (narrow) %v23488_v52, 32  ;;  %v21531_v42 = vpop.trf.xlu1 }
 0x3d4   : > { %6363 = vxpose.xlu1.b32.end [2/2] (short) (narrow) %v23463_v1, 32  ;;  %19795 = vmatmul.mubr.msk.bf16.vlgmr.msra.gmra.mrb[16].mxu1 %vm6746_vm2, %v6490_v37  ;;  %v21535_v2 = vunpack.i.h.bf16 %v21531_v42  ;;  %v21532_v3 = vunpack.i.l.bf16 %v21531_v42 }
 0x3d5   : > { %19799 = vmatpush3.bf16.xpose.msra.mxu1 %v6798_v4  ;;  %19800 = vmatprep.mubr.msk.bf16.mxu1 %vm22908_vm1, %v27859_v22  ;;  %v21216_v4 = vunpack.i.h.bf16 %v23552_v54 }
 0x3d6   : > { %19804 = vmatprep.subr.bf16.mxu1 %v27859_v22 }
 0x3d7   : > { %v23764_v63 = vpop.trf.xlu0  ;;  %6203 = vxpose.xlu0.b32.end [2/2] (short) (narrow) %v23471_v14, 32  ;;  %v21536_v52 = vpop.trf.xlu1 }
 0x3d8   : > { %v21540_v1 = vunpack.i.h.bf16 %v21536_v52  ;;  %v21537_v26 = vunpack.i.l.bf16 %v21536_v52 }
 0x3da   : > { %v23770_v35 = vpack.c.bf16 %v21537_v26, %v21532_v3  ;;  %v23772_v58 = vpack.c.bf16 %v21540_v1, %v21535_v2  ;;  %v21211_v3 = vunpack.i.h.bf16 %v23547_v27 }
 0x3db   : > { %v23768_v10 = vpop.trf.xlu0  ;;  %v21543_v19 = vpop.trf.xlu1 }
 0x3dc   : > { %19801 = vmatmul.mubr.msk.bf16.vlgmr.msra.gmra.mrb[20].mxu1 %vm6746_vm2, %v6491_v23  ;;  %v21544_v18 = vunpack.i.l.bf16 %v21543_v19  ;;  %v21547_v17 = vunpack.i.h.bf16 %v21543_v19  ;;  %v21712_v61 = vunpack.i.l.bf16 %v23768_v10  ;;  %v6493_v19 = vpack.c.bf16 %v21216_v4, %v21211_v3 }
 0x3dd   : > { %6426 = vxpose.xlu1.b32.start [1/2] (short) (narrow) %v5939_v51, 32  ;;  %19806 = vmatprep.mubr.msk.bf16.mxu1 %vm22908_vm1, %v27859_v22  ;;  %v21700_v4 = vunpack.i.l.bf16 %v23754_v9 }
 0x3df   : > { %v23777_v14 = vpop.trf.xlu0  ;;  %v21548_v62 = vpop.trf.xlu1 }
 0x3e0   : > { %v21549_v20 = vunpack.i.l.bf16 %v21548_v62  ;;  %v21552_v48 = vunpack.i.h.bf16 %v21548_v62  ;;  %v21717_v60 = vunpack.i.l.bf16 %v23777_v14  ;;  %v6498_v62 = vpack.c.bf16 %v20997_v41, %v20992_v56 }
 0x3e1   : > { %6427 = vxpose.xlu1.b32.end [2/2] (short) (narrow) %v23542_v57, 32  ;;  %v21213_v57 = vunpack.i.l.bf16 %v23552_v54  ;;  %v6558_v54 = vpack.c.bf16 %v21693_v24, %v21688_v21 }
 0x3e2   : > { %v6556_v40 = vpack.c.bf16 %v21549_v20, %v21544_v18  ;;  %v6557_v49 = vpack.c.bf16 %v21552_v48, %v21547_v17  ;;  %v6564_v26 = vpack.c.bf16 %v21717_v60, %v21712_v61  ;;  %v21691_v20 = vunpack.i.h.bf16 %v23745_v50 }
 0x3e3   : > { %v23780_v28 = vpop.trf.xlu0  ;;  %6266 = vxpose.xlu0.b32.start [1/2] (short) (narrow) %v27860_v29, 32  ;;  %v23783_v0 = vpop.trf.xlu1  ;;  %v6492_v38 = vpack.c.bf16 %v21213_v57, %v21208_v43  ;;  %v21696_v18 = vunpack.i.h.bf16 %v23750_v39  ;;  %v6939_v27 = vsel %vm6746_vm2, %v6558_v54, 0  ;;  %v20920_v39 = vunpack.i.l.bf16 %v23507_v25 }
 0x3e4   : > { %v6845_v6 = vsel %vm6746_vm2, %v6556_v40, 0  ;;  %v21727_v45 = vunpack.i.h.bf16 %v23780_v28  ;;  %v21556_v44 = vunpack.i.l.bf16 %v23783_v0  ;;  %v6892_v11 = vsel %vm6746_vm2, %v6557_v49, 0  ;;  %v27862_v40 = vld [vmem:[#allocation9_spill] sm:$0xff] }
 0x3e5   : > { %19805 = vmatpush3.bf16.xpose.msra.mxu1 %v6845_v6  ;;  %v7221_v6 = vsel %vm6746_vm2, %v6564_v26, 0  ;;  %v20925_v17 = vunpack.i.l.bf16 %v23512_v32  ;;  %v6559_v49 = vpack.c.bf16 %v21696_v18, %v21691_v20  ;;  %v21724_v41 = vunpack.i.l.bf16 %v23780_v28  ;;  %v27866_v26 = vld [vmem:[#allocation16_spill] sm:$0xff] }
 0x3e6   : > { %19810 = vmatprep.subr.bf16.mxu1 %v27859_v22  ;;  %v20923_v54 = vunpack.i.h.bf16 %v23507_v25 }
 0x3e7   : > { %v23789_v16 = vpop.trf.xlu0  ;;  %6267 = vxpose.xlu0.b32.end [2/2] (short) (narrow) %v27861_v55, 32  ;;  %v23792_v30 = vpop.trf.xlu1  ;;  %v27864_v55 = vld [vmem:[#allocation8_spill] sm:$0xff]  ;;  %v6494_v24 = vpack.c.bf16 %v20925_v17, %v20920_v39  ;;  %v21708_v17 = vunpack.i.h.bf16 %v23764_v63 }
 0x3e8   : > { %v21732_v13 = vunpack.i.h.bf16 %v23789_v16  ;;  %v21561_v51 = vunpack.i.l.bf16 %v23792_v30  ;;  %v21729_v56 = vunpack.i.l.bf16 %v23789_v16 }
 0x3ea   : > { %v23798_v53 = vpack.c.bf16 %v21732_v13, %v21727_v45  ;;  %v6562_v7 = vpack.c.bf16 %v21561_v51, %v21556_v44  ;;  %v27863_v45 = vld [vmem:[#allocation24_spill] sm:$0xff]  ;;  %v27865_v44 = vld [vmem:[#allocation22_spill] sm:$0xff] }
 0x3eb   : > { %v23802_v47 = vpop.trf.xlu0  ;;  %v23804_v31 = vpop.trf.xlu1  ;;  %v21237_v43 = vunpack.i.l.bf16 %v27863_v45 }
 0x3ec   : > { %19807 = vmatmul.mubr.msk.bf16.vlgmr.msra.gmra.mrb[24].mxu1 %vm6746_vm2, %v6492_v38  ;;  %v7127_v37 = vsel %vm6746_vm2, %v6562_v7, 0  ;;  %v21739_v42 = vunpack.i.h.bf16 %v23802_v47  ;;  %v21232_v38 = vunpack.i.l.bf16 %v27865_v44 }
 0x3ed   : > { %19811 = vmatpush3.bf16.xpose.msra.mxu1 %v6892_v11  ;;  %19841 = vmatpush3.bf16.xpose.msra.mxu0 %v7127_v37  ;;  %v6986_v11 = vsel %vm6746_vm2, %v6559_v49, 0  ;;  %v7315_v37 = vsel %vm6746_vm2, %v23732_v33, 0  ;;  %v20928_v33 = vunpack.i.h.bf16 %v23512_v32  ;;  %v6568_v32 = vpack.c.bf16 %v21729_v56, %v21724_v41  ;;  %v27871_v56 = vld [vmem:[#allocation28_spill] sm:$0xff]  ;;  %v27872_v41 = vld [vmem:[#allocation11_spill] sm:$0xff] }
 0x3ee   : > { %19812 = vmatprep.mubr.msk.bf16.mxu1 %vm22908_vm1, %v27859_v22  ;;  %19816 = vmatprep.subr.bf16.mxu1 %v27859_v22  ;;  %v6500_v7 = vpack.c.bf16 %v21237_v43, %v21232_v38 }
 0x3ef   : > { %v23815_v52 = vpop.trf.xlu0  ;;  %v23817_v2 = vpop.trf.xlu1  ;;  %19852 = vmatprep.subr.bf16.mxu0 %v27859_v22 }
 0x3f0   : > { %v21744_v1 = vunpack.i.h.bf16 %v23815_v52 }
 0x3f2   : > { %v23825_v23 = vpack.c.bf16 %v21744_v1, %v21739_v42  ;;  %v21705_v42 = vunpack.i.l.bf16 %v23764_v63 }
 0x3f3   : > { %v23829_v29 = vpop.trf.xlu0  ;;  %6330 = vxpose.xlu0.b32.start [1/2] (short) (narrow) %v27862_v40, 32  ;;  %v23832_v48 = vpop.trf.xlu1 }
 0x3f4   : > { %19813 = vmatmul.mubr.msk.bf16.vlgmr.msra.gmra.mrb[28].mxu1 %vm6746_vm2, %v6493_v19  ;;  %19843 = vmatmul.mubr.msk.bf16.vlgmr.msra.gmra.mrb[16].mxu0 %vm6746_vm2, %v6498_v62  ;;  %v21751_v50 = vunpack.i.h.bf16 %v23829_v29  ;;  %v20968_v19 = vunpack.i.l.bf16 %v27866_v26  ;;  %v27867_v62 = vld [vmem:[#allocation17_spill] sm:$0xff]  ;;  %v6560_v25 = vpack.c.bf16 %v21705_v42, %v21700_v4 }
 0x3f5   : > { %19817 = vmatpush3.bf16.xpose.msra.mxu1 %v6939_v27  ;;  %19853 = vmatpush3.bf16.xpose.msra.mxu0 %v7221_v6  ;;  %v20973_v20 = vunpack.i.l.bf16 %v27867_v62  ;;  %v27870_v42 = vld [vmem:[#allocation21_spill] sm:$0xff] }
 0x3f6   : > { %19818 = vmatprep.mubr.msk.bf16.mxu1 %vm22908_vm1, %v27859_v22  ;;  %19854 = vmatprep.mubr.msk.bf16.mxu0 %vm22908_vm1, %v27859_v22  ;;  %v7033_v38 = vsel %vm6746_vm2, %v6560_v25, 0  ;;  %v21225_v4 = vunpack.i.l.bf16 %v27870_v42 }
 0x3f7   : > { %v23842_v57 = vpop.trf.xlu0  ;;  %6331 = vxpose.xlu0.b32.end [2/2] (short) (narrow) %v27864_v55, 32  ;;  %v23845_v13 = vpop.trf.xlu1  ;;  %19822 = vmatprep.subr.bf16.mxu1 %v27859_v22  ;;  %v6502_v39 = vpack.c.bf16 %v20973_v20, %v20968_v19  ;;  %v27868_v55 = vld [vmem:[#allocation10_spill] sm:$0xff] }
 0x3f8   : > { %v21756_v51 = vunpack.i.h.bf16 %v23842_v57  ;;  %19864 = vmatprep.subr.bf16.mxu0 %v27859_v22 }
 0x3fa   : > { %v23855_v21 = vpack.c.bf16 %v21756_v51, %v21751_v50  ;;  %v6495_v50 = vpack.c.bf16 %v20928_v33, %v20923_v54  ;;  %v21703_v51 = vunpack.i.h.bf16 %v23754_v9  ;;  %v21249_v9 = vunpack.i.l.bf16 %v27871_v56 }
 0x3fb   : > { %v21759_v61 = vpop.trf.xlu0  ;;  %v23857_v60 = vpop.trf.xlu1 }
 0x3fc   : > { %19819 = vmatmul.mubr.msk.bf16.vlgmr.msra.gmra.mrb[32].mxu1 %vm6746_vm2, %v6494_v24  ;;  %19855 = vmatmul.mubr.msk.bf16.vlgmr.msra.gmra.mrb[20].mxu0 %vm6746_vm2, %v6500_v7  ;;  %v21763_v3 = vunpack.i.h.bf16 %v21759_v61  ;;  %v21760_v1 = vunpack.i.l.bf16 %v21759_v61  ;;  %v7409_v24 = vsel %vm6746_vm2, %v6568_v32, 0  ;;  %v27869_v61 = vld [vmem:[#allocation20_spill] sm:$0xff]  ;;  %v6561_v33 = vpack.c.bf16 %v21708_v17, %v21703_v51 }
 0x3fd   : > { %19823 = vmatpush3.bf16.xpose.msra.mxu1 %v6986_v11  ;;  %19865 = vmatpush3.bf16.xpose.msra.mxu0 %v7315_v37  ;;  %v21220_v11 = vunpack.i.l.bf16 %v27869_v61  ;;  %v21592_v19 = vunpack.i.l.bf16 %v23857_v60 }
 0x3fe   : > { %19824 = vmatprep.mubr.msk.bf16.mxu1 %vm22908_vm1, %v27859_v22  ;;  %19866 = vmatprep.mubr.msk.bf16.mxu0 %vm22908_vm1, %v27859_v22  ;;  %v7080_v51 = vsel %vm6746_vm2, %v6561_v33, 0 }
 0x3ff   : > { %v21764_v18 = vpop.trf.xlu0  ;;  %v23872_v16 = vpop.trf.xlu1  ;;  %19828 = vmatprep.subr.bf16.mxu1 %v27859_v22  ;;  %19876 = vmatprep.subr.bf16.mxu0 %v27859_v22 }
 0x400   : > { %v21768_v28 = vunpack.i.h.bf16 %v21764_v18  ;;  %v21765_v40 = vunpack.i.l.bf16 %v21764_v18  ;;  %v21597_v7 = vunpack.i.l.bf16 %v23872_v16 }
 0x402   : > { %v23880_v27 = vpack.c.bf16 %v21765_v40, %v21760_v1  ;;  %v23882_v6 = vpack.c.bf16 %v21768_v28, %v21763_v3  ;;  %v27873_v1 = vld [vmem:[#allocation5_spill] sm:$0xff]  ;;  %v27874_v28 = vld [vmem:[#allocation26_spill] sm:$0xff]  ;;  %v6570_v25 = vpack.c.bf16 %v21597_v7, %v21592_v19 }
 0x403   : > { %v21771_v43 = vpop.trf.xlu0  ;;  %6394 = vxpose.xlu0.b32.start [1/2] (short) (narrow) %v27868_v55, 32  ;;  %v23886_v49 = vpop.trf.xlu1  ;;  %v21244_v40 = vunpack.i.l.bf16 %v27874_v28 }
 0x404   : > { %19825 = vmatmul.mubr.msk.bf16.vlgmr.msra.gmra.mrb[36].mxu1 %vm6746_vm2, %v6495_v50  ;;  %19867 = vmatmul.mubr.msk.bf16.vlgmr.msra.gmra.mrb[24].mxu0 %vm6746_vm2, %v6502_v39  ;;  %v21772_v63 = vunpack.i.l.bf16 %v21771_v43  ;;  %v21775_v37 = vunpack.i.h.bf16 %v21771_v43  ;;  %v6496_v39 = vpack.c.bf16 %v21225_v4, %v21220_v11  ;;  %v7503_v7 = vsel %vm6746_vm2, %v6570_v25, 0 }
 0x405   : > { %19829 = vmatpush3.bf16.xpose.msra.mxu1 %v7033_v38  ;;  %19877 = vmatpush3.bf16.xpose.msra.mxu0 %v7409_v24  ;;  %v6504_v17 = vpack.c.bf16 %v21249_v9, %v21244_v40  ;;  %v21736_v38 = vunpack.i.l.bf16 %v23802_v47  ;;  %v21564_v24 = vunpack.i.h.bf16 %v23792_v30  ;;  %v21223_v11 = vunpack.i.h.bf16 %v27869_v61  ;;  %v27875_v9 = vld [vmem:[#allocation35_spill] sm:$0xff] }
 0x406   : > { %19830 = vmatprep.mubr.msk.bf16.mxu1 %vm22908_vm1, %v27859_v22  ;;  %19878 = vmatprep.mubr.msk.bf16.mxu0 %vm22908_vm1, %v27859_v22  ;;  %v21228_v4 = vunpack.i.h.bf16 %v27870_v42  ;;  %v21040_v47 = vunpack.i.l.bf16 %v27875_v9  ;;  %v21559_v61 = vunpack.i.h.bf16 %v23783_v0 }
 0x407   : > { %6395 = vxpose.xlu0.b32.end [2/2] (short) (narrow) %v27872_v41, 32  ;;  %v21776_v3 = vpop.trf.xlu0  ;;  %5944 = vrot.lane.b32.xlu1 %v27873_v1, %s22905_s20  ;;  %v23900_v54 = vpop.trf.xlu1  ;;  %v21741_v41 = vunpack.i.l.bf16 %v23815_v52 }
 0x408   : > { %v21780_v20 = vunpack.i.h.bf16 %v21776_v3  ;;  %v21777_v18 = vunpack.i.l.bf16 %v21776_v3  ;;  %19834 = vmatprep.subr.bf16.mxu1 %v27859_v22  ;;  %19888 = vmatprep.subr.bf16.mxu0 %v27859_v22  ;;  %v27876_v3 = vld [vmem:[#allocation37_spill] sm:$0xff]  ;;  %v6563_v42 = vpack.c.bf16 %v21564_v24, %v21559_v61  ;;  %v6497_v25 = vpack.c.bf16 %v21228_v4, %v21223_v11 }
 0x409   : > { %v21045_v30 = vunpack.i.l.bf16 %v27876_v3 }
 0x40a   : > { %v23910_v32 = vpack.c.bf16 %v21777_v18, %v21772_v63  ;;  %v23912_v50 = vpack.c.bf16 %v21780_v20, %v21775_v37  ;;  %v6572_v20 = vpack.c.bf16 %v21741_v41, %v21736_v38  ;;  %v7174_v38 = vsel %vm6746_vm2, %v6563_v42, 0 }
 0x40b   : > { %v21783_v43 = vpop.trf.xlu0  ;;  %v23914_v55 = vpop.trf.xlu1  ;;  %v21585_v41 = vunpack.i.l.bf16 %v23845_v13 }
 0x40c   : > { %19831 = vmatmul.mubr.msk.bf16.vlgmr.msra.gmra.mrb[40].mxu1 %vm6746_vm2, %v6496_v39  ;;  %19879 = vmatmul.mubr.msk.bf16.vlgmr.msra.gmra.mrb[28].mxu0 %vm6746_vm2, %v6504_v17  ;;  %v21787_v63 = vunpack.i.h.bf16 %v21783_v43  ;;  %v21784_v37 = vunpack.i.l.bf16 %v21783_v43  ;;  %v6506_v39 = vpack.c.bf16 %v21045_v30, %v21040_v47  ;;  %v21715_v17 = vunpack.i.h.bf16 %v23768_v10 }
 0x40d   : > { %19835 = vmatpush3.bf16.xpose.msra.mxu1 %v7080_v51  ;;  %19889 = vmatpush3.bf16.xpose.msra.mxu0 %v7503_v7  ;;  %v21720_v51 = vunpack.i.h.bf16 %v23777_v14  ;;  %v7597_v24 = vsel %vm6746_vm2, %v6572_v20, 0  ;;  %v20995_v10 = vunpack.i.h.bf16 %v23561_v15  ;;  %v27877_v7 = vld [vmem:[#allocation32_spill] sm:$0xff]  ;;  %v27878_v15 = vld [vmem:[#allocation30_spill] sm:$0xff] }
 0x40e   : > { %19836 = vmatprep.mubr.msk.bf16.mxu1 %vm22908_vm1, %v27859_v22  ;;  %19890 = vmatprep.mubr.msk.bf16.mxu0 %vm22908_vm1, %v27859_v22  ;;  %v21261_v11 = vunpack.i.l.bf16 %v27877_v7 }
 0x40f   : > { %v21788_v1 = vpop.trf.xlu0  ;;  %v23927_v52 = vpop.trf.xlu1  ;;  %19846 = vmatprep.subr.bf16.mxu1 %v27859_v22  ;;  %19900 = vmatprep.subr.bf16.mxu0 %v27859_v22  ;;  %v6565_v4 = vpack.c.bf16 %v21720_v51, %v21715_v17  ;;  %v27879_v17 = vld [vmem:[#allocation27_spill] sm:$0xff] }
 0x410   : > { %v21792_v33 = vunpack.i.h.bf16 %v21788_v1  ;;  %v21789_v19 = vunpack.i.l.bf16 %v21788_v1  ;;  %v21016_v51 = vunpack.i.l.bf16 %v27879_v17 }
 0x411   : > { %v7268_v42 = vsel %vm6746_vm2, %v6565_v4, 0 }
 0x412   : > { %v23936_v18 = vpack.c.bf16 %v21789_v19, %v21784_v37  ;;  %v23938_v40 = vpack.c.bf16 %v21792_v33, %v21787_v63  ;;  %v21580_v37 = vunpack.i.l.bf16 %v23832_v48  ;;  %v21753_v19 = vunpack.i.l.bf16 %v23842_v57 }
 0x413   : > { %v23941_v43 = vpop.trf.xlu0  ;;  %6458 = vxpose.xlu0.b32.start [1/2] (short) (narrow) %v23739_v5, 32  ;;  %v23944_v0 = vpop.trf.xlu1  ;;  %v21000_v5 = vunpack.i.h.bf16 %v23565_v46  ;;  %v21256_v46 = vunpack.i.l.bf16 %v27878_v15 }
 0x414   : > { %19837 = vmatmul.mubr.msk.bf16.vlgmr.msra.gmra.mrb[44].mxu1 %vm6746_vm2, %v6497_v25  ;;  %19891 = vmatmul.mubr.msk.bf16.vlgmr.msra.gmra.mrb[32].mxu0 %vm6746_vm2, %v6506_v39  ;;  %v6574_v47 = vpack.c.bf16 %v21585_v41, %v21580_v37  ;;  %v21748_v25 = vunpack.i.l.bf16 %v23829_v29  ;;  %v21240_v39 = vunpack.i.h.bf16 %v27863_v45  ;;  %v21235_v29 = vunpack.i.h.bf16 %v27865_v44 }
 0x415   : > { %19847 = vmatpush3.bf16.xpose.msra.mxu1 %v7174_v38  ;;  %19901 = vmatpush3.bf16.xpose.msra.mxu0 %v7597_v24  ;;  %v6499_v30 = vpack.c.bf16 %v21000_v5, %v20995_v10  ;;  %v6508_v1 = vpack.c.bf16 %v21261_v11, %v21256_v46  ;;  %v27880_v38 = vld [vmem:[#allocation29_spill] sm:$0xff]  ;;  %v7362_v46 = vsel %vm6746_vm2, %v23734_v34, 0  ;;  %v20971_v44 = vunpack.i.h.bf16 %v27866_v26  ;;  %v27882_v26 = vld [vmem:[#allocation34_spill] sm:$0xff] }
 0x416   : > { %19848 = vmatprep.mubr.msk.bf16.mxu1 %vm22908_vm1, %v27859_v22  ;;  %19902 = vmatprep.mubr.msk.bf16.mxu0 %vm22908_vm1, %v27859_v22  ;;  %v7691_v20 = vsel %vm6746_vm2, %v6574_v47, 0  ;;  %v21021_v24 = vunpack.i.l.bf16 %v27880_v38  ;;  %v6576_v45 = vpack.c.bf16 %v21753_v19, %v21748_v25  ;;  %v6501_v10 = vpack.c.bf16 %v21240_v39, %v21235_v29 }
 0x417   : > { %v23955_v63 = vpop.trf.xlu0  ;;  %v23957_v14 = vpop.trf.xlu1  ;;  %19858 = vmatprep.subr.bf16.mxu1 %v27859_v22  ;;  %19912 = vmatprep.subr.bf16.mxu0 %v27859_v22  ;;  %v21628_v34 = vunpack.i.l.bf16 %v23944_v0 }
 0x418   : > { %v6510_v5 = vpack.c.bf16 %v21021_v24, %v21016_v51  ;;  %v7785_v4 = vsel %vm6746_vm2, %v6576_v45, 0  ;;  %v21633_v47 = vunpack.i.l.bf16 %v23957_v14  ;;  %v7456_v45 = vsel %vm6746_vm2, %v23798_v53, 0 }
 0x419   : > { %v21595_v53 = vunpack.i.h.bf16 %v23857_v60 }
 0x41a   : > { %v6578_v25 = vpack.c.bf16 %v21633_v47, %v21628_v34 }
 0x41b   : > { %v23967_v61 = vpop.trf.xlu0  ;;  %v23969_v33 = vpop.trf.xlu1 }
 0x41c   : > { %19849 = vmatmul.mubr.msk.bf16.vlgmr.msra.gmra.mrb[48].mxu1 %vm6746_vm2, %v6499_v30  ;;  %19903 = vmatmul.mubr.msk.bf16.vlgmr.msra.gmra.mrb[36].mxu0 %vm6746_vm2, %v6508_v1  ;;  %v20976_v30 = vunpack.i.h.bf16 %v27867_v62  ;;  %v27881_v1 = vld [vmem:[#allocation36_spill] sm:$0xff]  ;;  %v21268_v62 = vunpack.i.l.bf16 %v27882_v26 }
 0x41d   : > { %19859 = vmatpush3.bf16.xpose.msra.mxu1 %v7268_v42  ;;  %19913 = vmatpush3.bf16.xpose.msra.mxu0 %v7691_v20  ;;  %v21273_v19 = vunpack.i.l.bf16 %v27881_v1 }
 0x41e   : > { %19860 = vmatprep.mubr.msk.bf16.mxu1 %vm22908_vm1, %v27859_v22  ;;  %19914 = vmatprep.mubr.msk.bf16.mxu0 %vm22908_vm1, %v27859_v22  ;;  %v6503_v39 = vpack.c.bf16 %v20976_v30, %v20971_v44  ;;  %v27885_v44 = vld [vmem:[#allocation53_spill] sm:$0xff] }
 0x41f   : > { %v23980_v41 = vpop.trf.xlu0  ;;  %v23982_v57 = vpop.trf.xlu1  ;;  %19870 = vmatprep.subr.bf16.mxu1 %v27859_v22  ;;  %19924 = vmatprep.subr.bf16.mxu0 %v27859_v22  ;;  %v6512_v51 = vpack.c.bf16 %v21273_v19, %v21268_v62  ;;  %v21093_v30 = vunpack.i.l.bf16 %v27885_v44 }
 0x423   : > { %v23991_v11 = vpop.trf.xlu0  ;;  %v23993_v37 = vpop.trf.xlu1 }
 0x424   : > { %19861 = vmatmul.mubr.msk.bf16.vlgmr.msra.gmra.mrb[52].mxu1 %vm6746_vm2, %v6501_v10  ;;  %19915 = vmatmul.mubr.msk.bf16.vlgmr.msra.gmra.mrb[40].mxu0 %vm6746_vm2, %v6510_v5  ;;  %v7879_v10 = vsel %vm6746_vm2, %v6578_v25, 0  ;;  %v21600_v5 = vunpack.i.h.bf16 %v23872_v16  ;;  %v21247_v16 = vunpack.i.h.bf16 %v27874_v28  ;;  %v21043_v28 = vunpack.i.h.bf16 %v27875_v9 }
 0x425   : > { %19871 = vmatpush3.bf16.xpose.msra.mxu1 %v7362_v46  ;;  %19925 = vmatpush3.bf16.xpose.msra.mxu0 %v7785_v4  ;;  %v21252_v46 = vunpack.i.h.bf16 %v27871_v56  ;;  %v27884_v4 = vld [vmem:[#allocation51_spill] sm:$0xff] }
 0x426   : > { %19872 = vmatprep.mubr.msk.bf16.mxu1 %vm22908_vm1, %v27859_v22  ;;  %19926 = vmatprep.mubr.msk.bf16.mxu0 %vm22908_vm1, %v27859_v22  ;;  %v21088_v47 = vunpack.i.l.bf16 %v27884_v4  ;;  %v6571_v56 = vpack.c.bf16 %v21600_v5, %v21595_v53 }
 0x427   : > { %v24004_v42 = vpop.trf.xlu0  ;;  %v24006_v20 = vpop.trf.xlu1  ;;  %19882 = vmatprep.subr.bf16.mxu1 %v27859_v22  ;;  %19936 = vmatprep.subr.bf16.mxu0 %v27859_v22  ;;  %v6505_v62 = vpack.c.bf16 %v21252_v46, %v21247_v16 }
 0x428   : > { %v6514_v25 = vpack.c.bf16 %v21093_v30, %v21088_v47 }
 0x42b   : > { %v24016_v24 = vpop.trf.xlu0  ;;  %v24018_v29 = vpop.trf.xlu1 }
 0x42c   : > { %27883 = vst [vmem:[#allocation6_spill] sm:$0xff] %v24018_v29  ;;  %19873 = vmatmul.mubr.msk.bf16.vlgmr.msra.gmra.mrb[56].mxu1 %vm6746_vm2, %v6503_v39  ;;  %19927 = vmatmul.mubr.msk.bf16.vlgmr.msra.gmra.mrb[44].mxu0 %vm6746_vm2, %v6512_v51 }
 0x42d   : > { %19883 = vmatpush3.bf16.xpose.msra.mxu1 %v7456_v45  ;;  %19937 = vmatpush3.bf16.xpose.msra.mxu0 %v7879_v10  ;;  %v7550_v45 = vsel %vm6746_vm2, %v6571_v56, 0  ;;  %v21048_v10 = vunpack.i.h.bf16 %v27876_v3  ;;  %v21621_v56 = vunpack.i.l.bf16 %v23927_v52 }
 0x42e   : > { %19884 = vmatprep.mubr.msk.bf16.mxu1 %vm22908_vm1, %v27859_v22  ;;  %19938 = vmatprep.mubr.msk.bf16.mxu0 %vm22908_vm1, %v27859_v22 }
 0x42f   : > { %v24029_v19 = vpop.trf.xlu0  ;;  %v24031_v34 = vpop.trf.xlu1  ;;  %19894 = vmatprep.subr.bf16.mxu1 %v27859_v22  ;;  %19948 = vmatprep.subr.bf16.mxu0 %v27859_v22  ;;  %v6507_v53 = vpack.c.bf16 %v21048_v10, %v21043_v28  ;;  %v21264_v10 = vunpack.i.h.bf16 %v27877_v7 }
 0x433   : > { %v24041_v39 = vpop.trf.xlu0  ;;  %v24043_v51 = vpop.trf.xlu1 }
 0x434   : > { %27886 = vst [vmem:[#allocation7_spill] sm:$0xff] %v24043_v51  ;;  %19885 = vmatmul.mubr.msk.bf16.vlgmr.msra.gmra.mrb[60].mxu1 %vm6746_vm2, %v6505_v62  ;;  %19939 = vmatmul.mubr.msk.bf16.vlgmr.msra.gmra.mrb[48].mxu0 %vm6746_vm2, %v6514_v25  ;;  %v21844_v60 = vunpack.i.l.bf16 %v24041_v39  ;;  %v7644_v62 = vsel %vm6746_vm2, %v23825_v23, 0  ;;  %v21588_v25 = vunpack.i.h.bf16 %v23845_v13  ;;  %v21583_v23 = vunpack.i.h.bf16 %v23832_v48 }
 0x435   : > { %19895 = vmatpush3.bf16.xpose.msra.mxu1 %v7550_v45  ;;  %19896 = vmatprep.mubr.msk.bf16.mxu1 %vm22908_vm1, %v27859_v22  ;;  %v21616_v45 = vunpack.i.l.bf16 %v23914_v55  ;;  %v21837_v48 = vunpack.i.l.bf16 %v24029_v19 }
 0x436   : > { %19906 = vmatprep.subr.bf16.mxu1 %v27859_v22  ;;  %19950 = vmatprep.mubr.msk.bf16.mxu0 %vm22908_vm1, %v27859_v22 }
 0x437   : > { %v24053_v5 = vpop.trf.xlu0  ;;  %v24055_v46 = vpop.trf.xlu1 }
 0x438   : > { %27887 = vst [vmem:[#allocation9_spill] sm:$0xff] %v24055_v46  ;;  %v21849_v47 = vunpack.i.l.bf16 %v24053_v5 }
 0x43a   : > { %v6580_v30 = vpack.c.bf16 %v21849_v47, %v21844_v60  ;;  %v27889_v60 = vld [vmem:[#allocation40_spill] sm:$0xff] }
 0x43b   : > { %v24061_v16 = vpop.trf.xlu1  ;;  %v24064_v9 = vpop.trf.xlu0  ;;  %v21285_v28 = vunpack.i.l.bf16 %v27889_v60 }
 0x43c   : > { %27888 = vst [vmem:[#allocation24_spill] sm:$0xff] %v24061_v16  ;;  %v7973_v3 = vsel %vm6746_vm2, %v6580_v30, 0  ;;  %19897 = vmatmul.mubr.msk.bf16.vlgmr.msra.gmra.mrb[64].mxu1 %vm6746_vm2, %v6507_v53  ;;  %v6582_v30 = vpack.c.bf16 %v21621_v56, %v21616_v45  ;;  %v27891_v53 = vld [vmem:[#allocation38_spill] sm:$0xff]  ;;  %v6575_v16 = vpack.c.bf16 %v21588_v25, %v21583_v23  ;;  %v21832_v56 = vunpack.i.l.bf16 %v24016_v24 }
 0x43d   : > { %19949 = vmatpush3.bf16.xpose.msra.mxu0 %v7973_v3  ;;  %19907 = vmatpush3.bf16.xpose.msra.mxu1 %v7644_v62  ;;  %v21280_v3 = vunpack.i.l.bf16 %v27891_v53  ;;  %v21259_v62 = vunpack.i.h.bf16 %v27878_v15  ;;  %v27893_v15 = vld [vmem:[#allocation43_spill] sm:$0xff]  ;;  %v21019_v23 = vunpack.i.h.bf16 %v27879_v17 }
 0x43e   : > { %19908 = vmatprep.mubr.msk.bf16.mxu1 %vm22908_vm1, %v27859_v22  ;;  %19918 = vmatprep.subr.bf16.mxu1 %v27859_v22  ;;  %v8067_v7 = vsel %vm6746_vm2, %v6582_v30, 0  ;;  %v7738_v45 = vsel %vm6746_vm2, %v6575_v16, 0  ;;  %v21064_v25 = vunpack.i.l.bf16 %v27893_v15  ;;  %v6584_v16 = vpack.c.bf16 %v21837_v48, %v21832_v56 }
 0x43f   : > { %v24076_v47 = vpop.trf.xlu1  ;;  %19960 = vmatprep.subr.bf16.mxu0 %v27859_v22  ;;  %v24081_v13 = vpop.trf.xlu0  ;;  %v6516_v46 = vpack.c.bf16 %v21285_v28, %v21280_v3  ;;  %v6509_v51 = vpack.c.bf16 %v21264_v10, %v21259_v62  ;;  %v27894_v28 = vld [vmem:[#allocation45_spill] sm:$0xff]  ;;  %v21276_v48 = vunpack.i.h.bf16 %v27881_v1  ;;  %v8255_v1 = vsel %vm6746_vm2, %v23726_v59, 0 }
 0x440   : > { %27890 = vst [vmem:[#allocation8_spill] sm:$0xff] %v24076_v47  ;;  %v21069_v10 = vunpack.i.l.bf16 %v27894_v28  ;;  %v8161_v17 = vsel %vm6746_vm2, %v6584_v16, 0  ;;  %v21096_v59 = vunpack.i.h.bf16 %v27885_v44 }
 0x442   : > { %v6518_v3 = vpack.c.bf16 %v21069_v10, %v21064_v25  ;;  %v27899_v25 = vld [vmem:[#allocation42_spill] sm:$0xff] }
 0x443   : > { %v24085_v29 = vpop.trf.xlu1  ;;  %v24088_v47 = vpop.trf.xlu0  ;;  %v21292_v10 = vunpack.i.l.bf16 %v27899_v25 }
 0x444   : > { %27892 = vst [vmem:[#allocation22_spill] sm:$0xff] %v24085_v29  ;;  %19951 = vmatmul.mubr.msk.bf16.vlgmr.msra.gmra.mrb[52].mxu0 %vm6746_vm2, %v6516_v46  ;;  %19909 = vmatmul.mubr.msk.bf16.vlgmr.msra.gmra.mrb[68].mxu1 %vm6746_vm2, %v6509_v51  ;;  %v21024_v46 = vunpack.i.h.bf16 %v27880_v38  ;;  %v7832_v38 = vsel %vm6746_vm2, %v23855_v21, 0  ;;  %v21631_v21 = vunpack.i.h.bf16 %v23944_v0 }
 0x445   : > { %19961 = vmatpush3.bf16.xpose.msra.mxu0 %v8067_v7  ;;  %19919 = vmatpush3.bf16.xpose.msra.mxu1 %v7738_v45  ;;  %v21636_v45 = vunpack.i.h.bf16 %v23957_v14  ;;  %v21271_v14 = vunpack.i.h.bf16 %v27882_v26  ;;  %v27901_v26 = vld [vmem:[#allocation14_spill] sm:$0xff] }
 0x446   : > { %19920 = vmatprep.mubr.msk.bf16.mxu1 %vm22908_vm1, %v27859_v22  ;;  %19962 = vmatprep.mubr.msk.bf16.mxu0 %vm22908_vm1, %v27859_v22  ;;  %v6511_v62 = vpack.c.bf16 %v21024_v46, %v21019_v23 }
 0x447   : > { %v24101_v30 = vpop.trf.xlu1  ;;  %19930 = vmatprep.subr.bf16.mxu1 %v27859_v22  ;;  %v24106_v51 = vpop.trf.xlu0  ;;  %19972 = vmatprep.subr.bf16.mxu0 %v27859_v22  ;;  %v6579_v23 = vpack.c.bf16 %v21636_v45, %v21631_v21  ;;  %v6513_v16 = vpack.c.bf16 %v21276_v48, %v21271_v14  ;;  %v21091_v48 = vunpack.i.h.bf16 %v27884_v4  ;;  %v8349_v4 = vsel %vm6746_vm2, %v23880_v27, 0 }
 0x448   : > { %27895 = vst [vmem:[#allocation16_spill] sm:$0xff] %v24101_v30  ;;  %v27897_v30 = vld [vmem:[#allocation44_spill] sm:$0xff]  ;;  %v21619_v27 = vunpack.i.h.bf16 %v23914_v55 }
 0x449   : > { %v21297_v29 = vunpack.i.l.bf16 %v27897_v30  ;;  %v7926_v0 = vsel %vm6746_vm2, %v6579_v23, 0  ;;  %v21624_v23 = vunpack.i.h.bf16 %v23927_v52  ;;  %v21283_v52 = vunpack.i.h.bf16 %v27891_v53  ;;  %v27909_v53 = vld [vmem:[#allocation12_spill] sm:$0xff] }
 0x44b   : > { %v24109_v7 = vpop.trf.xlu1  ;;  %v6520_v46 = vpack.c.bf16 %v21297_v29, %v21292_v10  ;;  %v27902_v29 = vld [vmem:[#allocation15_spill] sm:$0xff]  ;;  %v6515_v10 = vpack.c.bf16 %v21096_v59, %v21091_v48 }
 0x44c   : > { %27896 = vst [vmem:[#allocation17_spill] sm:$0xff] %v24109_v7  ;;  %19963 = vmatmul.mubr.msk.bf16.vlgmr.msra.gmra.mrb[56].mxu0 %vm6746_vm2, %v6518_v3  ;;  %19921 = vmatmul.mubr.msk.bf16.vlgmr.msra.gmra.mrb[72].mxu1 %vm6746_vm2, %v6511_v62  ;;  %v21852_v62 = vunpack.i.h.bf16 %v24053_v5  ;;  %v20961_v45 = vunpack.i.l.bf16 %v27902_v29 }
 0x44d   : > { %19973 = vmatpush3.bf16.xpose.msra.mxu0 %v8161_v17  ;;  %19931 = vmatpush3.bf16.xpose.msra.mxu1 %v7832_v38  ;;  %v21847_v17 = vunpack.i.h.bf16 %v24041_v39  ;;  %v20956_v38 = vunpack.i.l.bf16 %v27901_v26 }
 0x44e   : > { %19932 = vmatprep.mubr.msk.bf16.mxu1 %vm22908_vm1, %v27859_v22  ;;  %19974 = vmatprep.mubr.msk.bf16.mxu0 %vm22908_vm1, %v27859_v22 }
 0x44f   : > { %v24121_v56 = vpop.trf.xlu1  ;;  %19942 = vmatprep.subr.bf16.mxu1 %v27859_v22  ;;  %19984 = vmatprep.subr.bf16.mxu0 %v27859_v22  ;;  %v6581_v39 = vpack.c.bf16 %v21852_v62, %v21847_v17  ;;  %v6522_v5 = vpack.c.bf16 %v20961_v45, %v20956_v38  ;;  %v27907_v62 = vld [vmem:[#allocation46_spill] sm:$0xff]  ;;  %v6583_v38 = vpack.c.bf16 %v21624_v23, %v21619_v27  ;;  %v21067_v23 = vunpack.i.h.bf16 %v27893_v15 }
 0x450   : > { %27898 = vst [vmem:[#allocation10_spill] sm:$0xff] %v24121_v56  ;;  %v21304_v17 = vunpack.i.l.bf16 %v27907_v62  ;;  %v8537_v15 = vsel %vm6746_vm2, %v23910_v32, 0  ;;  %v6662_v56 = vld [vmem:[%s27560_s5 + $0x160] sm:$0xff] }
 0x451   : > { %v8020_v44 = vsel %vm6746_vm2, %v6581_v39, 0  ;;  %v8114_v55 = vsel %vm6746_vm2, %v6583_v38, 0  ;;  %v21840_v39 = vunpack.i.h.bf16 %v24029_v19  ;;  %v27913_v38 = vld [vmem:[#allocation52_spill] sm:$0xff] }
 0x453   : > { %v24130_v3 = vpop.trf.xlu1 }
 0x454   : > { %27900 = vst [vmem:[#allocation20_spill] sm:$0xff] %v24130_v3  ;;  %19975 = vmatmul.mubr.msk.bf16.vlgmr.msra.gmra.mrb[60].mxu0 %vm6746_vm2, %v6520_v46  ;;  %19933 = vmatmul.mubr.msk.bf16.vlgmr.msra.gmra.mrb[76].mxu1 %vm6746_vm2, %v6513_v16  ;;  %v27905_v46 = vld [vmem:[#allocation48_spill] sm:$0xff] }
 0x455   : > { %19985 = vmatpush3.bf16.xpose.msra.mxu0 %v8255_v1  ;;  %19943 = vmatpush3.bf16.xpose.msra.mxu1 %v7926_v0  ;;  %v21309_v16 = vunpack.i.l.bf16 %v27905_v46  ;;  %v21288_v1 = vunpack.i.h.bf16 %v27889_v60  ;;  %v8443_v60 = vsel %vm6746_vm2, %v23719_v8, 0  ;;  %v21072_v8 = vunpack.i.h.bf16 %v27894_v28 }
 0x456   : > { %19944 = vmatprep.mubr.msk.bf16.mxu1 %vm22908_vm1, %v27859_v22  ;;  %19986 = vmatprep.mubr.msk.bf16.mxu0 %vm22908_vm1, %v27859_v22  ;;  %v21573_v28 = vunpack.i.l.bf16 %v23817_v2 }
 0x457   : > { %v24145_v21 = vpop.trf.xlu1  ;;  %19954 = vmatprep.subr.bf16.mxu1 %v27859_v22  ;;  %19996 = vmatprep.subr.bf16.mxu0 %v27859_v22  ;;  %v6524_v45 = vpack.c.bf16 %v21309_v16, %v21304_v17  ;;  %v6517_v48 = vpack.c.bf16 %v21288_v1, %v21283_v52  ;;  %v6519_v1 = vpack.c.bf16 %v21072_v8, %v21067_v23  ;;  %v24201_v52 = vpop.trf.xlu0 }
 0x458   : > { %27903 = vst [vmem:[#allocation21_spill] sm:$0xff] %v24145_v21 }
 0x45b   : > { %v24151_v14 = vpop.trf.xlu1 }
 0x45c   : > { %27904 = vst [vmem:[#allocation28_spill] sm:$0xff] %v24151_v14  ;;  %19987 = vmatmul.mubr.msk.bf16.vlgmr.msra.gmra.mrb[64].mxu0 %vm6746_vm2, %v6522_v5  ;;  %19945 = vmatmul.mubr.msk.bf16.vlgmr.msra.gmra.mrb[80].mxu1 %vm6746_vm2, %v6515_v10  ;;  %v21835_v5 = vunpack.i.h.bf16 %v24016_v24  ;;  %v20932_v10 = vunpack.i.l.bf16 %v27909_v53 }
 0x45d   : > { %19997 = vmatpush3.bf16.xpose.msra.mxu0 %v8349_v4  ;;  %19955 = vmatpush3.bf16.xpose.msra.mxu1 %v8020_v44  ;;  %v27910_v4 = vld [vmem:[#allocation13_spill] sm:$0xff] }
 0x45e   : > { %19956 = vmatprep.mubr.msk.bf16.mxu1 %vm22908_vm1, %v27859_v22  ;;  %19998 = vmatprep.mubr.msk.bf16.mxu0 %vm22908_vm1, %v27859_v22  ;;  %v20937_v44 = vunpack.i.l.bf16 %v27910_v4  ;;  %v6585_v24 = vpack.c.bf16 %v21840_v39, %v21835_v5 }
 0x45f   : > { %v24163_v0 = vpop.trf.xlu1  ;;  %19966 = vmatprep.subr.bf16.mxu1 %v27859_v22  ;;  %20008 = vmatprep.subr.bf16.mxu0 %v27859_v22 }
 0x460   : > { %27906 = vst [vmem:[#allocation11_spill] sm:$0xff] %v24163_v0  ;;  %v6526_v19 = vpack.c.bf16 %v20937_v44, %v20932_v10  ;;  %v8208_v17 = vsel %vm6746_vm2, %v6585_v24, 0  ;;  %v21295_v10 = vunpack.i.h.bf16 %v27899_v25  ;;  %v24218_v24 = vpop.trf.xlu0 }
 0x463   : > { %v24172_v59 = vpop.trf.xlu1 }
 0x464   : > { %27908 = vst [vmem:[#allocation5_spill] sm:$0xff] %v24172_v59  ;;  %19999 = vmatmul.mubr.msk.bf16.vlgmr.msra.gmra.mrb[68].mxu0 %vm6746_vm2, %v6524_v45  ;;  %19957 = vmatmul.mubr.msk.bf16.vlgmr.msra.gmra.mrb[84].mxu1 %vm6746_vm2, %v6517_v48  ;;  %v21321_v45 = vunpack.i.l.bf16 %v27913_v38  ;;  %v21568_v48 = vunpack.i.l.bf16 %v23804_v31 }
 0x465   : > { %20009 = vmatpush3.bf16.xpose.msra.mxu0 %v8443_v60  ;;  %19967 = vmatpush3.bf16.xpose.msra.mxu1 %v8114_v55  ;;  %v21300_v60 = vunpack.i.h.bf16 %v27897_v30  ;;  %v27915_v55 = vld [vmem:[#allocation50_spill] sm:$0xff] }
 0x466   : > { %19968 = vmatprep.mubr.msk.bf16.mxu1 %vm22908_vm1, %v27859_v22  ;;  %20010 = vmatprep.mubr.msk.bf16.mxu0 %vm22908_vm1, %v27859_v22  ;;  %v21316_v39 = vunpack.i.l.bf16 %v27915_v55  ;;  %v6594_v5 = vpack.c.bf16 %v21573_v28, %v21568_v48  ;;  %v27918_v28 = vld [vmem:[#allocation25_spill] sm:$0xff] }
 0x467   : > { %v24187_v16 = vpop.trf.xlu1  ;;  %19978 = vmatprep.subr.bf16.mxu1 %v27859_v22  ;;  %20020 = vmatprep.subr.bf16.mxu0 %v27859_v22  ;;  %v6521_v23 = vpack.c.bf16 %v21300_v60, %v21295_v10  ;;  %v21009_v25 = vunpack.i.l.bf16 %v27918_v28  ;;  %v27922_v10 = vld [vmem:[#allocation56_spill] sm:$0xff] }
 0x468   : > { %27911 = vst [vmem:[#allocation26_spill] sm:$0xff] %v24187_v16  ;;  %v6528_v44 = vpack.c.bf16 %v21321_v45, %v21316_v39  ;;  %v8631_v30 = vsel %vm6746_vm2, %v6594_v5, 0  ;;  %v20964_v45 = vunpack.i.h.bf16 %v27902_v29  ;;  %v8396_v29 = vsel %vm6746_vm2, %v23882_v6, 0 }
 0x46b   : > { %v24193_v27 = vpop.trf.xlu1 }
 0x46c   : > { %27912 = vst [vmem:[#allocation35_spill] sm:$0xff] %v24193_v27  ;;  %20011 = vmatmul.mubr.msk.bf16.vlgmr.msra.gmra.mrb[72].mxu0 %vm6746_vm2, %v6526_v19  ;;  %19969 = vmatmul.mubr.msk.bf16.vlgmr.msra.gmra.mrb[88].mxu1 %vm6746_vm2, %v6519_v1  ;;  %v8302_v19 = vsel %vm6746_vm2, %v23728_v12, 0  ;;  %v27917_v1 = vld [vmem:[#allocation23_spill] sm:$0xff]  ;;  %v24237_v12 = vpop.trf.xlu0 }
 0x46d   : > { %20021 = vmatpush3.bf16.xpose.msra.mxu0 %v8537_v15  ;;  %19979 = vmatpush3.bf16.xpose.msra.mxu1 %v8208_v17  ;;  %v21004_v15 = vunpack.i.l.bf16 %v27917_v1  ;;  %v20959_v17 = vunpack.i.h.bf16 %v27901_v26  ;;  %27920 = vst [vmem:[#allocation27_spill] sm:$0xff] %v24237_v12  ;;  %v8725_v26 = vsel %vm6746_vm2, %v23936_v18, 0 }
 0x46e   : > { %19980 = vmatprep.mubr.msk.bf16.mxu1 %vm22908_vm1, %v27859_v22  ;;  %20022 = vmatprep.mubr.msk.bf16.mxu0 %vm22908_vm1, %v27859_v22 }
 0x46f   : > { %v24208_v32 = vpop.trf.xlu1  ;;  %19990 = vmatprep.subr.bf16.mxu1 %v27859_v22  ;;  %20032 = vmatprep.subr.bf16.mxu0 %v27859_v22  ;;  %v6530_v60 = vpack.c.bf16 %v21009_v25, %v21004_v15  ;;  %v6523_v39 = vpack.c.bf16 %v20964_v45, %v20959_v17  ;;  %v21307_v15 = vunpack.i.h.bf16 %v27907_v62 }
 0x470   : > { %27914 = vst [vmem:[#allocation37_spill] sm:$0xff] %v24208_v32  ;;  %v24256_v18 = vpop.trf.xlu0 }
 0x471   : > { %27924 = vst [vmem:[#allocation34_spill] sm:$0xff] %v24256_v18  ;;  %v6653_v18 = vld [vmem:[%s27560_s5 + $0x118] sm:$0xff] }
 0x473   : > { %v24216_v8 = vpop.trf.xlu1 }
 0x474   : > { %27916 = vst [vmem:[#allocation32_spill] sm:$0xff] %v24216_v8  ;;  %20023 = vmatmul.mubr.msk.bf16.vlgmr.msra.gmra.mrb[76].mxu0 %vm6746_vm2, %v6528_v44  ;;  %19981 = vmatmul.mubr.msk.bf16.vlgmr.msra.gmra.mrb[92].mxu1 %vm6746_vm2, %v6521_v23  ;;  %v21333_v44 = vunpack.i.l.bf16 %v27922_v10  ;;  %v21312_v23 = vunpack.i.h.bf16 %v27905_v46  ;;  %v8819_v46 = vsel %vm6746_vm2, %v23770_v35, 0  ;;  %v24271_v62 = vpop.trf.xlu0  ;;  %v20935_v35 = vunpack.i.h.bf16 %v27909_v53 }
 0x475   : > { %20033 = vmatpush3.bf16.xpose.msra.mxu0 %v8631_v30  ;;  %19991 = vmatpush3.bf16.xpose.msra.mxu1 %v8302_v19  ;;  %v27925_v19 = vld [vmem:[#allocation54_spill] sm:$0xff]  ;;  %27927 = vst [vmem:[#allocation53_spill] sm:$0xff] %v24271_v62 }
 0x476   : > { %19992 = vmatprep.mubr.msk.bf16.mxu1 %vm22908_vm1, %v27859_v22  ;;  %20034 = vmatprep.mubr.msk.bf16.mxu0 %vm22908_vm1, %v27859_v22  ;;  %v21328_v6 = vunpack.i.l.bf16 %v27925_v19  ;;  %v6525_v17 = vpack.c.bf16 %v21312_v23, %v21307_v15  ;;  %v27929_v23 = vld [vmem:[#allocation19_spill] sm:$0xff]  ;;  %v20940_v15 = vunpack.i.h.bf16 %v27910_v4  ;;  %v21609_v4 = vunpack.i.l.bf16 %v23900_v54  ;;  %v6675_v62 = vld [vmem:[%s27560_s5 + $0x1c8] sm:$0xff] }
 0x477   : > { %v24231_v48 = vpop.trf.xlu1  ;;  %20002 = vmatprep.subr.bf16.mxu1 %v27859_v22  ;;  %20044 = vmatprep.subr.bf16.mxu0 %v27859_v22 }
 0x478   : > { %27919 = vst [vmem:[#allocation30_spill] sm:$0xff] %v24231_v48  ;;  %v6532_v25 = vpack.c.bf16 %v21333_v44, %v21328_v6  ;;  %v20985_v6 = vunpack.i.l.bf16 %v27929_v23  ;;  %v21808_v48 = vunpack.i.l.bf16 %v23967_v61 }
 0x47b   : > { %v24239_v5 = vpop.trf.xlu1 }
 0x47c   : > { %27921 = vst [vmem:[#allocation29_spill] sm:$0xff] %v24239_v5  ;;  %20035 = vmatmul.mubr.msk.bf16.vlgmr.msra.gmra.mrb[80].mxu0 %vm6746_vm2, %v6530_v60  ;;  %19993 = vmatmul.mubr.msk.bf16.vlgmr.msra.gmra.mrb[96].mxu1 %vm6746_vm2, %v6523_v39  ;;  %v21801_v60 = vunpack.i.l.bf16 %v23955_v63  ;;  %v21796_v39 = vunpack.i.l.bf16 %v23941_v43 }
 0x47d   : > { %20045 = vmatpush3.bf16.xpose.msra.mxu0 %v8725_v26  ;;  %20003 = vmatpush3.bf16.xpose.msra.mxu1 %v8396_v29  ;;  %v8490_v26 = vsel %vm6746_vm2, %v23721_v36, 0  ;;  %v27928_v29 = vld [vmem:[#allocation18_spill] sm:$0xff] }
 0x47e   : > { %20004 = vmatprep.mubr.msk.bf16.mxu1 %vm22908_vm1, %v27859_v22  ;;  %20046 = vmatprep.mubr.msk.bf16.mxu0 %vm22908_vm1, %v27859_v22  ;;  %v20980_v44 = vunpack.i.l.bf16 %v27928_v29  ;;  %v6600_v36 = vpack.c.bf16 %v21801_v60, %v21796_v39  ;;  %v21576_v60 = vunpack.i.h.bf16 %v23817_v2  ;;  %v27933_v39 = vld [vmem:[#allocation59_spill] sm:$0xff]  ;;  %v27935_v2 = vld [vmem:[#allocation58_spill] sm:$0xff] }
 0x47f   : > { %v24251_v30 = vpop.trf.xlu1  ;;  %20014 = vmatprep.subr.bf16.mxu1 %v27859_v22  ;;  %20056 = vmatprep.subr.bf16.mxu0 %v27859_v22 }
 0x480   : > { %27923 = vst [vmem:[#allocation36_spill] sm:$0xff] %v24251_v30  ;;  %v8913_v53 = vsel %vm6746_vm2, %v6600_v36, 0  ;;  %v21340_v36 = vunpack.i.l.bf16 %v27935_v2 }
 0x483   : > { %v24261_v45 = vpop.trf.xlu1 }
 0x484   : > { %27926 = vst [vmem:[#allocation51_spill] sm:$0xff] %v24261_v45  ;;  %20047 = vmatmul.mubr.msk.bf16.vlgmr.msra.gmra.mrb[84].mxu0 %vm6746_vm2, %v6532_v25  ;;  %20005 = vmatmul.mubr.msk.bf16.vlgmr.msra.gmra.mrb[100].mxu1 %vm6746_vm2, %v6525_v17  ;;  %v6534_v17 = vpack.c.bf16 %v20985_v6, %v20980_v44  ;;  %v24287_v45 = vpop.trf.xlu0  ;;  %v21345_v44 = vunpack.i.l.bf16 %v27933_v39  ;;  %v21604_v6 = vunpack.i.l.bf16 %v23886_v49 }
 0x485   : > { %20057 = vmatpush3.bf16.xpose.msra.mxu0 %v8819_v46  ;;  %20015 = vmatpush3.bf16.xpose.msra.mxu1 %v8490_v26  ;;  %v6527_v46 = vpack.c.bf16 %v20940_v15, %v20935_v35  ;;  %27932 = vst [vmem:[#allocation43_spill] sm:$0xff] %v24287_v45  ;;  %v21324_v35 = vunpack.i.h.bf16 %v27913_v38 }
 0x486   : > { %20016 = vmatprep.mubr.msk.bf16.mxu1 %vm22908_vm1, %v27859_v22  ;;  %20058 = vmatprep.mubr.msk.bf16.mxu0 %vm22908_vm1, %v27859_v22  ;;  %v6536_v38 = vpack.c.bf16 %v21345_v44, %v21340_v36 }
 0x487   : > { %v24279_v25 = vpop.trf.xlu1  ;;  %20026 = vmatprep.subr.bf16.mxu1 %v27859_v22  ;;  %20068 = vmatprep.subr.bf16.mxu0 %v27859_v22 }
 0x488   : > { %27930 = vst [vmem:[#allocation40_spill] sm:$0xff] %v24279_v25  ;;  %v8584_v25 = vsel %vm6746_vm2, %v23912_v50, 0  ;;  %v21571_v50 = vunpack.i.h.bf16 %v23804_v31  ;;  %v21813_v31 = vunpack.i.l.bf16 %v23980_v41 }
 0x48b   : > { %v24285_v26 = vpop.trf.xlu1 }
 0x48c   : > { %27931 = vst [vmem:[#allocation38_spill] sm:$0xff] %v24285_v26  ;;  %20059 = vmatmul.mubr.msk.bf16.vlgmr.msra.gmra.mrb[88].mxu0 %vm6746_vm2, %v6534_v17  ;;  %20017 = vmatmul.mubr.msk.bf16.vlgmr.msra.gmra.mrb[104].mxu1 %vm6746_vm2, %v6527_v46  ;;  %v21319_v17 = vunpack.i.h.bf16 %v27915_v55  ;;  %v6595_v46 = vpack.c.bf16 %v21576_v60, %v21571_v50  ;;  %v27938_v55 = vld [vmem:[#allocation39_spill] sm:$0xff]  ;;  %v21012_v50 = vunpack.i.h.bf16 %v27918_v28  ;;  %v21645_v28 = vunpack.i.l.bf16 %v23982_v57 }
 0x48d   : > { %20069 = vmatpush3.bf16.xpose.msra.mxu0 %v8913_v53  ;;  %20027 = vmatpush3.bf16.xpose.msra.mxu1 %v8584_v25  ;;  %v6602_v25 = vpack.c.bf16 %v21609_v4, %v21604_v6  ;;  %v24310_v53 = vpop.trf.xlu0  ;;  %v21052_v60 = vunpack.i.l.bf16 %v27938_v55  ;;  %v27939_v6 = vld [vmem:[#allocation41_spill] sm:$0xff] }
 0x48e   : > { %20028 = vmatprep.mubr.msk.bf16.mxu1 %vm22908_vm1, %v27859_v22  ;;  %20070 = vmatprep.mubr.msk.bf16.mxu0 %vm22908_vm1, %v27859_v22  ;;  %27936 = vst [vmem:[#allocation44_spill] sm:$0xff] %v24310_v53  ;;  %v6529_v26 = vpack.c.bf16 %v21324_v35, %v21319_v17  ;;  %v8678_v4 = vsel %vm6746_vm2, %v6595_v46, 0  ;;  %v21057_v44 = vunpack.i.l.bf16 %v27939_v6  ;;  %v21007_v35 = vunpack.i.h.bf16 %v27917_v1 }
 0x48f   : > { %v24301_v15 = vpop.trf.xlu1  ;;  %20038 = vmatprep.subr.bf16.mxu1 %v27859_v22  ;;  %20080 = vmatprep.subr.bf16.mxu0 %v27859_v22  ;;  %v9007_v30 = vsel %vm6746_vm2, %v6602_v25, 0 }
 0x490   : > { %27934 = vst [vmem:[#allocation45_spill] sm:$0xff] %v24301_v15  ;;  %v6538_v25 = vpack.c.bf16 %v21057_v44, %v21052_v60  ;;  %v6531_v17 = vpack.c.bf16 %v21012_v50, %v21007_v35  ;;  %v21336_v60 = vunpack.i.h.bf16 %v27922_v10 }
 0x493   : > { %v24312_v15 = vpop.trf.xlu1 }
 0x494   : > { %27937 = vst [vmem:[#allocation42_spill] sm:$0xff] %v24312_v15  ;;  %20071 = vmatmul.mubr.msk.bf16.vlgmr.msra.gmra.mrb[92].mxu0 %vm6746_vm2, %v6536_v38  ;;  %20029 = vmatmul.mubr.msk.bf16.vlgmr.msra.gmra.mrb[108].mxu1 %vm6746_vm2, %v6529_v26  ;;  %v6604_v26 = vpack.c.bf16 %v21813_v31, %v21808_v48  ;;  %v8772_v38 = vsel %vm6746_vm2, %v23938_v40, 0  ;;  %v21640_v31 = vunpack.i.l.bf16 %v23969_v33  ;;  %v27946_v40 = vld [vmem:[#allocation60_spill] sm:$0xff] }
 0x495   : > { %20081 = vmatpush3.bf16.xpose.msra.mxu0 %v9007_v30  ;;  %20039 = vmatpush3.bf16.xpose.msra.mxu1 %v8678_v4  ;;  %v24331_v30 = vpop.trf.xlu0  ;;  %v21352_v35 = vunpack.i.l.bf16 %v27946_v40 }
 0x496   : > { %20040 = vmatprep.mubr.msk.bf16.mxu1 %vm22908_vm1, %v27859_v22  ;;  %20082 = vmatprep.mubr.msk.bf16.mxu0 %vm22908_vm1, %v27859_v22  ;;  %27941 = vst [vmem:[#allocation15_spill] sm:$0xff] %v24331_v30  ;;  %v9101_v1 = vsel %vm6746_vm2, %v6604_v26, 0  ;;  %v6606_v50 = vpack.c.bf16 %v21645_v28, %v21640_v31  ;;  %v21331_v26 = vunpack.i.h.bf16 %v27925_v19  ;;  %v8866_v28 = vsel %vm6746_vm2, %v23772_v58, 0  ;;  %v27948_v31 = vld [vmem:[#allocation31_spill] sm:$0xff]  ;;  %v6671_v30 = vld [vmem:[%s27560_s5 + $0x1a8] sm:$0xff] }
 0x497   : > { %v24326_v36 = vpop.trf.xlu1  ;;  %20050 = vmatprep.subr.bf16.mxu1 %v27859_v22  ;;  %20092 = vmatprep.subr.bf16.mxu0 %v27859_v22  ;;  %v21804_v19 = vunpack.i.h.bf16 %v23955_v63  ;;  %v20988_v58 = vunpack.i.h.bf16 %v27929_v23 }
 0x498   : > { %27940 = vst [vmem:[#allocation14_spill] sm:$0xff] %v24326_v36  ;;  %v27944_v36 = vld [vmem:[#allocation61_spill] sm:$0xff]  ;;  %v9195_v10 = vsel %vm6746_vm2, %v6606_v50, 0 }
 0x499   : > { %v24342_v4 = vpop.trf.xlu0  ;;  %v21357_v48 = vunpack.i.l.bf16 %v27944_v36  ;;  %v6618_v50 = vld [vmem:[%s27560_s5] sm:$0xff] }
 0x49a   : > { %27943 = vst [vmem:[#allocation46_spill] sm:$0xff] %v24342_v4  ;;  %v6649_v4 = vld [vmem:[%s27560_s5 + $0xf8] sm:$0xff] }
 0x49b   : > { %v24334_v46 = vpop.trf.xlu1 }
 0x49c   : > { %27942 = vst [vmem:[#allocation48_spill] sm:$0xff] %v24334_v46  ;;  %20083 = vmatmul.mubr.msk.bf16.vlgmr.msra.gmra.mrb[96].mxu0 %vm6746_vm2, %v6538_v25  ;;  %20041 = vmatmul.mubr.msk.bf16.vlgmr.msra.gmra.mrb[112].mxu1 %vm6746_vm2, %v6531_v17  ;;  %v6540_v25 = vpack.c.bf16 %v21357_v48, %v21352_v35  ;;  %v6533_v17 = vpack.c.bf16 %v21336_v60, %v21331_v26  ;;  %v21820_v46 = vunpack.i.l.bf16 %v23991_v11  ;;  %v21799_v48 = vunpack.i.h.bf16 %v23941_v43  ;;  %v27949_v35 = vld [vmem:[#allocation33_spill] sm:$0xff] }
 0x49d   : > { %20093 = vmatpush3.bf16.xpose.msra.mxu0 %v9101_v1  ;;  %20051 = vmatpush3.bf16.xpose.msra.mxu1 %v8772_v38  ;;  %v24357_v38 = vpop.trf.xlu0  ;;  %v21028_v60 = vunpack.i.l.bf16 %v27948_v31  ;;  %v21033_v26 = vunpack.i.l.bf16 %v27949_v35 }
 0x49e   : > { %20052 = vmatprep.mubr.msk.bf16.mxu1 %vm22908_vm1, %v27859_v22  ;;  %20094 = vmatprep.mubr.msk.bf16.mxu0 %vm22908_vm1, %v27859_v22  ;;  %27947 = vst [vmem:[#allocation13_spill] sm:$0xff] %v24357_v38 }
 0x49f   : > { %v24349_v44 = vpop.trf.xlu1  ;;  %20062 = vmatprep.subr.bf16.mxu1 %v27859_v22  ;;  %20104 = vmatprep.subr.bf16.mxu0 %v27859_v22  ;;  %v6542_v15 = vpack.c.bf16 %v21033_v26, %v21028_v60  ;;  %v27953_v26 = vld [vmem:[#allocation62_spill] sm:$0xff] }
 0x4a0   : > { %27945 = vst [vmem:[#allocation12_spill] sm:$0xff] %v24349_v44  ;;  %v21825_v44 = vunpack.i.l.bf16 %v24004_v42 }
 0x4a2   : > { %v6608_v63 = vpack.c.bf16 %v21825_v44, %v21820_v46  ;;  %v21657_v46 = vunpack.i.l.bf16 %v24006_v20 }
 0x4a3   : > { %v5945_v1 = vpop.permute.xlu1 %5944 }
 0x4a4   : > { %6459 = vxpose.xlu0.b32.end [2/2] (short) (narrow) %v5945_v1, 32  ;;  %20095 = vmatmul.mubr.msk.bf16.vlgmr.msra.gmra.mrb[100].mxu0 %vm6746_vm2, %v6540_v25  ;;  %v20983_v25 = vunpack.i.h.bf16 %v27928_v29  ;;  %v9289_v8 = vsel %vm6746_vm2, %v6608_v63, 0 }
 0x4a5   : > { %20053 = vmatmul.mubr.msk.bf16.vlgmr.msra.gmra.mrb[116].mxu1 %vm6746_vm2, %v6533_v17  ;;  %20105 = vmatpush3.bf16.xpose.msra.mxu0 %v9195_v10  ;;  %v6601_v10 = vpack.c.bf16 %v21804_v19, %v21799_v48  ;;  %v21612_v19 = vunpack.i.h.bf16 %v23900_v54  ;;  %v27951_v48 = vld [vmem:[#allocation63_spill] sm:$0xff]  ;;  %v21607_v54 = vunpack.i.h.bf16 %v23886_v49  ;;  %v21856_v49 = vunpack.i.l.bf16 %v24064_v9 }
 0x4a6   : > { %20063 = vmatpush3.bf16.xpose.msra.mxu1 %v8866_v28  ;;  %20064 = vmatprep.mubr.msk.bf16.mxu1 %vm22908_vm1, %v27859_v22  ;;  %v24383_v28 = vpop.trf.xlu0  ;;  %v6535_v23 = vpack.c.bf16 %v20988_v58, %v20983_v25  ;;  %v21369_v60 = vunpack.i.l.bf16 %v27951_v48 }
 0x4a7   : > { %20106 = vmatprep.mubr.msk.bf16.mxu0 %vm22908_vm1, %v27859_v22  ;;  %20074 = vmatprep.subr.bf16.mxu1 %v27859_v22  ;;  %v6787_v43 = vpop.f32.mrb[16].mxu1  ;;  %27950 = vst [vmem:[#allocation52_spill] sm:$0xff] %v24383_v28  ;;  %v8960_v44 = vsel %vm6746_vm2, %v6601_v10, 0 }
 0x4a8   : > { %20116 = vmatprep.subr.bf16.mxu0 %v27859_v22  ;;  %v24381_v17 = vadd.f32 %v6787_v43, %v6618_v50  ;;  %v19796_v1 = vpop.f32.mrb[17].mxu1  ;;  %v21364_v50 = vunpack.i.l.bf16 %v27953_v26  ;;  %v21343_v43 = vunpack.i.h.bf16 %v27935_v2 }
 0x4a9   : > { %v24385_v29 = vpop.f32.mrb[18].mxu1  ;;  %v6603_v1 = vpack.c.bf16 %v21612_v19, %v21607_v54  ;;  %v21816_v19 = vunpack.i.h.bf16 %v23980_v41 }
 0x4aa   : > { %v19797_v5 = vpop.f32.mrb[19].mxu1  ;;  %v9756_v32 = vsel %vm9755_vm3, %v24381_v17, -inf  ;;  %v6544_v10 = vpack.c.bf16 %v21369_v60, %v21364_v50  ;;  %v21811_v60 = vunpack.i.h.bf16 %v23967_v61  ;;  %v21060_v50 = vunpack.i.h.bf16 %v27939_v6 }
 0x4ab   : > { %9757 = vmax.xlane.f32.xlu1 %v9756_v32  ;;  %v6620_v32 = vld [vmem:[%s27560_s5 + $0x10] sm:$0xff]  ;;  %v21652_v5 = vunpack.i.l.bf16 %v23993_v37 }
 0x4ac   : > { %20107 = vmatmul.mubr.msk.bf16.vlgmr.msra.gmra.mrb[104].mxu0 %vm6746_vm2, %v6542_v15  ;;  %v21348_v15 = vunpack.i.h.bf16 %v27933_v39  ;;  %v6605_v61 = vpack.c.bf16 %v21816_v19, %v21811_v60  ;;  %v27960_v19 = vld [vmem:[#allocation64_spill] sm:$0xff] }
 0x4ad   : > { %20065 = vmatmul.mubr.msk.bf16.vlgmr.msra.gmra.mrb[120].mxu1 %vm6746_vm2, %v6535_v23  ;;  %20117 = vmatpush3.bf16.xpose.msra.mxu0 %v9289_v8  ;;  %v24407_v8 = vpop.trf.xlu0  ;;  %v6610_v58 = vpack.c.bf16 %v21657_v46, %v21652_v5  ;;  %v9054_v46 = vsel %vm6746_vm2, %v6603_v1, 0  ;;  %v27958_v1 = vld [vmem:[#allocation65_spill] sm:$0xff]  ;;  %v21376_v60 = vunpack.i.l.bf16 %v27960_v19 }
 0x4ae   : > { %20075 = vmatpush3.bf16.xpose.msra.mxu1 %v8960_v44  ;;  %20076 = vmatprep.mubr.msk.bf16.mxu1 %vm22908_vm1, %v27859_v22  ;;  %27952 = vst [vmem:[#allocation50_spill] sm:$0xff] %v24407_v8  ;;  %v21861_v44 = vunpack.i.l.bf16 %v24081_v13  ;;  %v6537_v16 = vpack.c.bf16 %v21348_v15, %v21343_v43  ;;  %v27956_v15 = vld [vmem:[#allocation57_spill] sm:$0xff]  ;;  %v9148_v6 = vsel %vm6746_vm2, %v6605_v61, 0 }
 0x4af   : > { %20118 = vmatprep.mubr.msk.bf16.mxu0 %vm22908_vm1, %v27859_v22  ;;  %20086 = vmatprep.subr.bf16.mxu1 %v27859_v22  ;;  %v6834_v25 = vpop.f32.mrb[20].mxu1  ;;  %v9383_v2 = vsel %vm6746_vm2, %v6610_v58, 0  ;;  %v21105_v54 = vunpack.i.l.bf16 %v27956_v15  ;;  %v6666_v8 = vld [vmem:[%s27560_s5 + $0x180] sm:$0xff] }
 0x4b0   : > { %20128 = vmatprep.subr.bf16.mxu0 %v27859_v22  ;;  %v24412_v63 = vadd.f32 %v6834_v25, %v6620_v32  ;;  %v19802_v39 = vpop.f32.mrb[21].mxu1 }
 0x4b1   : > { %v24414_v23 = vpop.f32.mrb[22].mxu1  ;;  %v24426_v32 = vpop.trf.xlu0  ;;  %v21648_v39 = vunpack.i.h.bf16 %v23982_v57 }
 0x4b2   : > { %v19803_v0 = vpop.f32.mrb[23].mxu1  ;;  %v9762_v27 = vsel %vm9755_vm3, %v24412_v63, -inf  ;;  %27954 = vst [vmem:[#allocation23_spill] sm:$0xff] %v24426_v32 }
 0x4b3   : > { %9763 = vmax.xlane.f32.xlu1 %v9762_v27  ;;  %v27955_v0 = vld [vmem:[#allocation55_spill] sm:$0xff]  ;;  %v6612_v27 = vpack.c.bf16 %v21861_v44, %v21856_v49  ;;  %v27959_v44 = vld [vmem:[#allocation6_spill] sm:$0xff] }
 0x4b4   : > { %20119 = vmatmul.mubr.msk.bf16.vlgmr.msra.gmra.mrb[108].mxu0 %vm6746_vm2, %v6544_v10  ;;  %v21100_v5 = vunpack.i.l.bf16 %v27955_v0  ;;  %v21381_v10 = vunpack.i.l.bf16 %v27958_v1  ;;  %v21664_v49 = vunpack.i.l.bf16 %v27959_v44 }
 0x4b5   : > { %20077 = vmatmul.mubr.msk.bf16.vlgmr.msra.gmra.mrb[124].mxu1 %vm6746_vm2, %v6537_v16  ;;  %20129 = vmatpush3.bf16.xpose.msra.mxu0 %v9383_v2  ;;  %v21055_v16 = vunpack.i.h.bf16 %v27938_v55  ;;  %v9477_v25 = vsel %vm6746_vm2, %v6612_v27, 0  ;;  %v24439_v43 = vpop.trf.xlu0  ;;  %v21669_v55 = vunpack.i.l.bf16 %v24031_v34  ;;  %v21360_v2 = vunpack.i.h.bf16 %v27944_v36 }
 0x4b6   : > { %20087 = vmatpush3.bf16.xpose.msra.mxu1 %v9054_v46  ;;  %20088 = vmatprep.mubr.msk.bf16.mxu1 %vm22908_vm1, %v27859_v22  ;;  %v6546_v41 = vpack.c.bf16 %v21105_v54, %v21100_v5  ;;  %27957 = vst [vmem:[#allocation25_spill] sm:$0xff] %v24439_v43  ;;  %v21643_v46 = vunpack.i.h.bf16 %v23969_v33  ;;  %v21355_v54 = vunpack.i.h.bf16 %v27946_v40  ;;  %v6548_v36 = vpack.c.bf16 %v21381_v10, %v21376_v60  ;;  %v27962_v10 = vld [vmem:[#allocation47_spill] sm:$0xff] }
 0x4b7   : > { %20130 = vmatprep.mubr.msk.bf16.mxu0 %vm22908_vm1, %v27859_v22  ;;  %20098 = vmatprep.subr.bf16.mxu1 %v27859_v22  ;;  %v6539_v58 = vpack.c.bf16 %v21060_v50, %v21055_v16  ;;  %v6614_v5 = vpack.c.bf16 %v21669_v55, %v21664_v49  ;;  %v21828_v55 = vunpack.i.h.bf16 %v24004_v42  ;;  %v21076_v49 = vunpack.i.l.bf16 %v27962_v10  ;;  %v6621_v42 = vld [vmem:[%s27560_s5 + $0x18] sm:$0xff] }
 0x4b8   : > { %20140 = vmatprep.subr.bf16.mxu0 %v27859_v22  ;;  %v6607_v16 = vpack.c.bf16 %v21648_v39, %v21643_v46  ;;  %v6541_v33 = vpack.c.bf16 %v21360_v2, %v21355_v54  ;;  %v21823_v39 = vunpack.i.h.bf16 %v23991_v11  ;;  %v27963_v46 = vld [vmem:[#allocation49_spill] sm:$0xff]  ;;  %v21031_v54 = vunpack.i.h.bf16 %v27948_v31 }
 0x4b9   : > { %v24458_v50 = vpop.trf.xlu0  ;;  %v21081_v60 = vunpack.i.l.bf16 %v27963_v46  ;;  %v6634_v2 = vld [vmem:[%s27560_s5 + $0x80] sm:$0xff]  ;;  %v24496_v59 = vadd.f32 %v24414_v23, %v6621_v42  ;;  %v21660_v23 = vunpack.i.h.bf16 %v24006_v20 }
 0x4ba   : > { %27961 = vst [vmem:[#allocation56_spill] sm:$0xff] %v24458_v50  ;;  %v9242_v40 = vsel %vm6746_vm2, %v6607_v16, 0  ;;  %v6638_v20 = vld [vmem:[%s27560_s5 + $0xa0] sm:$0xff] }
 0x4bc   : > { %20131 = vmatmul.mubr.msk.bf16.vlgmr.msra.gmra.mrb[112].mxu0 %vm6746_vm2, %v6546_v41  ;;  %v21873_v41 = vunpack.i.l.bf16 %v24106_v51 }
 0x4bd   : > { %20089 = vmatmul.mubr.msk.bf16.vlgmr.msra.gmra.mrb[128].mxu1 %vm6746_vm2, %v6539_v58  ;;  %20141 = vmatpush3.bf16.xpose.msra.mxu0 %v9477_v25  ;;  %v21868_v25 = vunpack.i.l.bf16 %v24088_v47  ;;  %v24482_v11 = vpop.trf.xlu0 }
 0x4be   : > { %20099 = vmatpush3.bf16.xpose.msra.mxu1 %v9148_v6  ;;  %20100 = vmatprep.mubr.msk.bf16.mxu1 %vm22908_vm1, %v27859_v22  ;;  %v9571_v6 = vsel %vm6746_vm2, %v6614_v5, 0  ;;  %27964 = vst [vmem:[#allocation54_spill] sm:$0xff] %v24482_v11 }
 0x4bf   : > { %20142 = vmatprep.mubr.msk.bf16.mxu0 %vm22908_vm1, %v27859_v22  ;;  %20110 = vmatprep.subr.bf16.mxu1 %v27859_v22  ;;  %v6881_v57 = vpop.f32.mrb[24].mxu1  ;;  %v6616_v5 = vpack.c.bf16 %v21873_v41, %v21868_v25  ;;  %v6609_v25 = vpack.c.bf16 %v21828_v55, %v21823_v39 }
 0x4c0   : > { %20152 = vmatprep.subr.bf16.mxu0 %v27859_v22  ;;  %v19808_v27 = vpop.f32.mrb[25].mxu1 }
 0x4c1   : > { %v24460_v61 = vpop.f32.mrb[26].mxu1  ;;  %v21036_v27 = vunpack.i.h.bf16 %v27949_v35  ;;  %v9336_v55 = vsel %vm6746_vm2, %v6609_v25, 0 }
 0x4c2   : > { %v19809_v58 = vpop.f32.mrb[27].mxu1 }
 0x4c3   : > { %v6543_v21 = vpack.c.bf16 %v21036_v27, %v21031_v54 }
 0x4c4   : > { %20143 = vmatmul.mubr.msk.bf16.vlgmr.msra.gmra.mrb[116].mxu0 %vm6746_vm2, %v6548_v36 }
 0x4c5   : > { %20101 = vmatmul.mubr.msk.bf16.vlgmr.msra.gmra.mrb[132].mxu1 %vm6746_vm2, %v6541_v33  ;;  %20153 = vmatpush3.bf16.xpose.msra.mxu0 %v9571_v6  ;;  %v6550_v33 = vpack.c.bf16 %v21081_v60, %v21076_v49  ;;  %v24518_v49 = vpop.trf.xlu0 }
 0x4c6   : > { %20111 = vmatpush3.bf16.xpose.msra.mxu1 %v9242_v40  ;;  %20112 = vmatprep.mubr.msk.bf16.mxu1 %vm22908_vm1, %v27859_v22  ;;  %v9665_v40 = vsel %vm6746_vm2, %v6616_v5, 0  ;;  %27965 = vst [vmem:[#allocation18_spill] sm:$0xff] %v24518_v49  ;;  %v6619_v5 = vld [vmem:[%s27560_s5 + $0x8] sm:$0xff] }
 0x4c7   : > { %20154 = vmatprep.mubr.msk.bf16.mxu0 %vm22908_vm1, %v27859_v22  ;;  %20122 = vmatprep.subr.bf16.mxu1 %v27859_v22  ;;  %v24487_v16 = vpop.f32.mrb[28].mxu1  ;;  %v7163_v36 = vpop.f32.mrb[16].mxu0 }
 0x4c8   : > { %20164 = vmatprep.subr.bf16.mxu0 %v27859_v22  ;;  %v24490_v41 = vadd.f32 %v7163_v36, %v6634_v2  ;;  %v19814_v31 = vpop.f32.mrb[29].mxu1  ;;  %v19844_v35 = vpop.f32.mrb[17].mxu0  ;;  %v6622_v2 = vld [vmem:[%s27560_s5 + $0x20] sm:$0xff] }
 0x4c9   : > { %v24492_v58 = vpop.f32.mrb[30].mxu1  ;;  %v7166_v6 = vpop.f32.mrb[18].mxu0  ;;  %v24510_v39 = vadd.f32 %v6881_v57, %v6622_v2  ;;  %v21367_v57 = vunpack.i.h.bf16 %v27953_v26  ;;  %v24537_v26 = vadd.f32 %v24385_v29, %v6619_v5  ;;  %v27966_v2 = vld [vmem:[#allocation66_spill] sm:$0xff]  ;;  %v21859_v29 = vunpack.i.h.bf16 %v24064_v9 }
 0x4ca   : > { %v19815_v11 = vpop.f32.mrb[31].mxu1  ;;  %v19845_v43 = vpop.f32.mrb[19].mxu0  ;;  %v9804_v14 = vsel %vm9755_vm3, %v24490_v41, -inf }
 0x4cb   : > { %9805 = vmax.xlane.f32.xlu1 %v9804_v14  ;;  %v21372_v43 = vunpack.i.h.bf16 %v27951_v48  ;;  %v9765_v14 = vsel %vm9755_vm3, %v24496_v59, -inf  ;;  %v24563_v9 = vpop.trf.xlu0 }
 0x4cc   : > { %20155 = vmatmul.mubr.msk.bf16.vlgmr.msra.gmra.mrb[120].mxu0 %vm6746_vm2, %v6550_v33  ;;  %v9768_v33 = vsel %vm9755_vm3, %v24510_v39, -inf  ;;  %27967 = vst [vmem:[#allocation19_spill] sm:$0xff] %v24563_v9  ;;  %v6658_v9 = vld [vmem:[%s27560_s5 + $0x140] sm:$0xff] }
 0x4cd   : > { %20113 = vmatmul.mubr.msk.bf16.vlgmr.msra.gmra.mrb[136].mxu1 %vm6746_vm2, %v6543_v21  ;;  %20165 = vmatpush3.bf16.xpose.msra.mxu0 %v9665_v40  ;;  %v21655_v21 = vunpack.i.h.bf16 %v23993_v37  ;;  %v6545_v36 = vpack.c.bf16 %v21372_v43, %v21367_v57  ;;  %v6623_v40 = vld [vmem:[%s27560_s5 + $0x28] sm:$0xff]  ;;  %v21864_v43 = vunpack.i.h.bf16 %v24081_v13  ;;  %v6624_v13 = vld [vmem:[%s27560_s5 + $0x30] sm:$0xff] }
 0x4ce   : > { %20123 = vmatpush3.bf16.xpose.msra.mxu1 %v9336_v55  ;;  %20124 = vmatprep.mubr.msk.bf16.mxu1 %vm22908_vm1, %v27859_v22  ;;  %v6635_v55 = vld [vmem:[%s27560_s5 + $0x88] sm:$0xff] }
 0x4cf   : > { %20166 = vmatprep.mubr.msk.bf16.mxu0 %vm22908_vm1, %v27859_v22  ;;  %20134 = vmatprep.subr.bf16.mxu1 %v27859_v22  ;;  %v7257_v60 = vpop.f32.mrb[20].mxu0  ;;  %v24523_v48 = vpop.f32.mrb[32].mxu1  ;;  %v6611_v27 = vpack.c.bf16 %v21660_v23, %v21655_v21  ;;  %v21108_v21 = vunpack.i.h.bf16 %v27956_v15  ;;  %v6639_v57 = vld [vmem:[%s27560_s5 + $0xa8] sm:$0xff] }
 0x4d0   : > { %9766 = vmax.xlane.f32.xlu1 %v9765_v14  ;;  %20176 = vmatprep.subr.mxu0 %v27859_v22  ;;  %v19820_v54 = vpop.f32.mrb[33].mxu1  ;;  %v19856_v37 = vpop.f32.mrb[21].mxu0  ;;  %v24532_v31 = vadd.f32 %v7257_v60, %v6638_v20  ;;  %v21103_v14 = vunpack.i.h.bf16 %v27955_v0  ;;  %v24558_v20 = vadd.f32 %v24460_v61, %v6623_v40  ;;  %v9759_v61 = vsel %vm9755_vm3, %v24537_v26, -inf }
 0x4d1   : > { %v24530_v11 = vpop.f32.mrb[34].mxu1  ;;  %v7260_v42 = vpop.f32.mrb[22].mxu0  ;;  %v9430_v23 = vsel %vm6746_vm2, %v6611_v27, 0  ;;  %v6613_v37 = vpack.c.bf16 %v21864_v43, %v21859_v29  ;;  %v21384_v29 = vunpack.i.h.bf16 %v27958_v1 }
 0x4d2   : > { %v19821_v35 = vpop.f32.mrb[35].mxu1  ;;  %v19857_v25 = vpop.f32.mrb[23].mxu0  ;;  %v9816_v60 = vsel %vm9755_vm3, %v24532_v31, -inf  ;;  %v9771_v40 = vsel %vm9755_vm3, %v24558_v20, -inf }
 0x4d3   : > { %v24583_v35 = vadd.f32 %v24487_v16, %v6624_v13  ;;  %v6625_v16 = vld [vmem:[%s27560_s5 + $0x38] sm:$0xff]  ;;  %v9524_v43 = vsel %vm6746_vm2, %v6613_v37, 0  ;;  %v24609_v13 = vpop.trf.xlu0 }
 0x4d4   : > { %9769 = vmax.xlane.f32.xlu1 %v9768_v33  ;;  %20167 = vmatmul.mubr.msk.bf16.vlgmr.msra.gmra.mrb[124].mxu0 %vm6746_vm2, %v27966_v2  ;;  %v24587_v2 = vadd.f32 %v7260_v42, %v6639_v57  ;;  %v21672_v42 = vunpack.i.h.bf16 %v24031_v34  ;;  %27968 = vst [vmem:[#allocation59_spill] sm:$0xff] %v24609_v13  ;;  %v6626_v34 = vld [vmem:[%s27560_s5 + $0x40] sm:$0xff] }
 0x4d5   : > { %20125 = vmatmul.mubr.msk.bf16.vlgmr.msra.gmra.mrb[140].mxu1 %vm6746_vm2, %v6545_v36  ;;  %20177 = vmatpush3.xpose.msk.msra.mxu0 %vm9755_vm3, %v24201_v52  ;;  %v24570_v52 = vadd.f32 %v7166_v6, %v6635_v55  ;;  %v6547_v36 = vpack.c.bf16 %v21108_v21, %v21103_v14  ;;  %v6642_v55 = vld [vmem:[%s27560_s5 + $0xc0] sm:$0xff]  ;;  %v9774_v21 = vsel %vm9755_vm3, %v24583_v35, -inf }
 0x4d6   : > { %20135 = vmatpush3.bf16.xpose.msra.mxu1 %v9430_v23  ;;  %20136 = vmatprep.mubr.msk.bf16.mxu1 %vm22908_vm1, %v27859_v22 }
 0x4d7   : > { %20146 = vmatprep.subr.bf16.mxu1 %v27859_v22  ;;  %20178 = vmatprep.mubr.msk.bf16.mxu0 %vm22908_vm1, %v27859_v22  ;;  %v7351_v0 = vpop.f32.mrb[24].mxu0  ;;  %v24572_v15 = vpop.f32.mrb[36].mxu1  ;;  %v9807_v23 = vsel %vm9755_vm3, %v24570_v52, -inf }
 0x4d8   : > { %9817 = vmax.xlane.f32.xlu1 %v9816_v60  ;;  %20188 = vmatprep.subr.mxu0 %v27859_v22  ;;  %v19826_v5 = vpop.f32.mrb[37].mxu1  ;;  %v19868_v54 = vpop.f32.mrb[25].mxu0  ;;  %v24603_v14 = vadd.f32 %v7351_v0, %v6642_v55  ;;  %v21667_v60 = vunpack.i.h.bf16 %v27959_v44  ;;  %v9819_v0 = vsel %vm9755_vm3, %v24587_v2, -inf  ;;  %v6643_v44 = vld [vmem:[%s27560_s5 + $0xc8] sm:$0xff] }
 0x4d9   : > { %9760 = vmax.xlane.f32.xlu0 %v9759_v61  ;;  %v7354_v27 = vpop.f32.mrb[26].mxu0  ;;  %v24580_v6 = vpop.f32.mrb[38].mxu1  ;;  %v24612_v61 = vadd.f32 %v24492_v58, %v6625_v16  ;;  %v21379_v5 = vunpack.i.h.bf16 %v27960_v19 }
 0x4da   : > { %v19827_v25 = vpop.f32.mrb[39].mxu1  ;;  %v19869_v33 = vpop.f32.mrb[27].mxu0  ;;  %v6615_v37 = vpack.c.bf16 %v21672_v42, %v21667_v60  ;;  %v9828_v19 = vsel %vm9755_vm3, %v24603_v14, -inf  ;;  %v24632_v16 = vadd.f32 %v7354_v27, %v6643_v44  ;;  %v21876_v27 = vunpack.i.h.bf16 %v24106_v51 }
 0x4db   : > { %v6549_v33 = vpack.c.bf16 %v21384_v29, %v21379_v5  ;;  %v9777_v42 = vsel %vm9755_vm3, %v24612_v61, -inf  ;;  %v21079_v60 = vunpack.i.h.bf16 %v27962_v10  ;;  %v24655_v44 = vpop.trf.xlu0 }
 0x4dc   : > { %9772 = vmax.xlane.f32.xlu1 %v9771_v40  ;;  %v24628_v40 = vadd.f32 %v24523_v48, %v6626_v34  ;;  %v6627_v48 = vld [vmem:[%s27560_s5 + $0x48] sm:$0xff]  ;;  %v9618_v29 = vsel %vm6746_vm2, %v6615_v37, 0  ;;  %v21084_v34 = vunpack.i.h.bf16 %v27963_v46  ;;  %27969 = vst [vmem:[#allocation58_spill] sm:$0xff] %v24655_v44  ;;  %v9831_v46 = vsel %vm9755_vm3, %v24632_v16, -inf }
 0x4dd   : > { %20137 = vmatmul.mubr.msk.bf16.vlgmr.msra.gmra.mrb[144].mxu1 %vm6746_vm2, %v6547_v36  ;;  %9808 = vmax.xlane.f32.xlu0 %v9807_v23  ;;  %v24658_v51 = vadd.f32 %v24530_v11, %v6627_v48 }
 0x4de   : > { %20147 = vmatpush3.bf16.xpose.msra.mxu1 %v9524_v43  ;;  %20148 = vmatprep.mubr.msk.bf16.mxu1 %vm22908_vm1, %v27859_v22  ;;  %v6646_v43 = vld [vmem:[%s27560_s5 + $0xe0] sm:$0xff]  ;;  %v9780_v5 = vsel %vm9755_vm3, %v24628_v40, -inf }
 0x4df   : > { %20158 = vmatprep.subr.bf16.mxu1 %v27859_v22  ;;  %v7445_v57 = vpop.f32.mrb[28].mxu0  ;;  %v24617_v1 = vpop.f32.mrb[40].mxu1 }
 0x4e0   : > { %9775 = vmax.xlane.f32.xlu1 %v9774_v21  ;;  %v19832_v54 = vpop.f32.mrb[41].mxu1  ;;  %v19880_v58 = vpop.f32.mrb[29].mxu0  ;;  %v21871_v21 = vunpack.i.h.bf16 %v24088_v47  ;;  %v6628_v47 = vld [vmem:[%s27560_s5 + $0x50] sm:$0xff] }
 0x4e1   : > { %9820 = vmax.xlane.f32.xlu0 %v9819_v0  ;;  %v7448_v36 = vpop.f32.mrb[30].mxu0  ;;  %v24625_v25 = vpop.f32.mrb[42].mxu1  ;;  %v24650_v0 = vadd.f32 %v7445_v57, %v6646_v43  ;;  %v6647_v57 = vld [vmem:[%s27560_s5 + $0xe8] sm:$0xff] }
 0x4e2   : > { %v19833_v55 = vpop.f32.mrb[43].mxu1  ;;  %v19881_v23 = vpop.f32.mrb[31].mxu0  ;;  %v6617_v11 = vpack.c.bf16 %v21876_v27, %v21871_v21  ;;  %v9783_v27 = vsel %vm9755_vm3, %v24658_v51, -inf }
 0x4e3   : > { %v6551_v23 = vpack.c.bf16 %v21084_v34, %v21079_v60  ;;  %v9840_v48 = vsel %vm9755_vm3, %v24650_v0, -inf  ;;  %v24696_v34 = vpop.trf.xlu0 }
 0x4e4   : > { %9829 = vmax.xlane.f32.xlu1 %v9828_v19  ;;  %v24673_v19 = vadd.f32 %v24572_v15, %v6628_v47  ;;  %v6629_v15 = vld [vmem:[%s27560_s5 + $0x58] sm:$0xff]  ;;  %v9712_v21 = vsel %vm6746_vm2, %v6617_v11, 0  ;;  %27970 = vst [vmem:[#allocation39_spill] sm:$0xff] %v24696_v34 }
 0x4e5   : > { %20149 = vmatmul.mubr.msk.bf16.vlgmr.msra.gmra.mrb[148].mxu1 %vm6746_vm2, %v6549_v33  ;;  %9778 = vmax.xlane.f32.xlu0 %v9777_v42  ;;  %v24699_v47 = vadd.f32 %v24580_v6, %v6629_v15 }
 0x4e6   : > { %20159 = vmatpush3.bf16.xpose.msra.mxu1 %v9618_v29  ;;  %20160 = vmatprep.mubr.msk.bf16.mxu1 %vm22908_vm1, %v27859_v22  ;;  %v24677_v29 = vadd.f32 %v7448_v36, %v6647_v57  ;;  %v9786_v60 = vsel %vm9755_vm3, %v24673_v19, -inf }
 0x4e7   : > { %20170 = vmatprep.subr.bf16.mxu1 %v27859_v22  ;;  %v7539_v54 = vpop.f32.mrb[32].mxu0  ;;  %v24663_v10 = vpop.f32.mrb[44].mxu1 }
 0x4e8   : > { %9781 = vmax.xlane.f32.xlu1 %v9780_v5  ;;  %v19838_v58 = vpop.f32.mrb[45].mxu1  ;;  %v19892_v37 = vpop.f32.mrb[33].mxu0  ;;  %v6650_v5 = vld [vmem:[%s27560_s5 + $0x100] sm:$0xff] }
 0x4e9   : > { %9832 = vmax.xlane.f32.xlu0 %v9831_v46  ;;  %v7542_v33 = vpop.f32.mrb[34].mxu0  ;;  %v24670_v55 = vpop.f32.mrb[46].mxu1  ;;  %v24691_v36 = vadd.f32 %v7539_v54, %v6650_v5  ;;  %v6630_v46 = vld [vmem:[%s27560_s5 + $0x60] sm:$0xff]  ;;  %v9843_v54 = vsel %vm9755_vm3, %v24677_v29, -inf  ;;  %v6651_v37 = vld [vmem:[%s27560_s5 + $0x108] sm:$0xff] }
 0x4ea   : > { %v19839_v43 = vpop.f32.mrb[47].mxu1  ;;  %v19893_v42 = vpop.f32.mrb[35].mxu0  ;;  %v24716_v15 = vadd.f32 %v7542_v33, %v6651_v37 }
 0x4eb   : > { %v24712_v42 = vadd.f32 %v24617_v1, %v6630_v46  ;;  %v6631_v1 = vld [vmem:[%s27560_s5 + $0x68] sm:$0xff]  ;;  %v27971_v46 = vld [vmem:[#allocation67_spill] sm:$0xff]  ;;  %v24736_v37 = vpop.trf.xlu0 }
 0x4ec   : > { %9841 = vmax.xlane.f32.xlu1 %v9840_v48  ;;  %27972 = vst [vmem:[#allocation41_spill] sm:$0xff] %v24736_v37 }
 0x4ed   : > { %20161 = vmatmul.mubr.msk.bf16.vlgmr.msra.gmra.mrb[152].mxu1 %vm6746_vm2, %v6551_v23  ;;  %9784 = vmax.xlane.f32.xlu0 %v9783_v27  ;;  %v9852_v27 = vsel %vm9755_vm3, %v24691_v36, -inf }
 0x4ee   : > { %20171 = vmatpush3.bf16.xpose.msra.mxu1 %v9712_v21  ;;  %20172 = vmatprep.mubr.msk.bf16.mxu1 %vm22908_vm1, %v27859_v22  ;;  %v6654_v21 = vld [vmem:[%s27560_s5 + $0x120] sm:$0xff] }
 0x4ef   : > { %20182 = vmatprep.subr.mxu1 %v27859_v22  ;;  %v7633_v57 = vpop.f32.mrb[36].mxu0  ;;  %v7210_v58 = vpop.f32.mrb[48].mxu1 }
 0x4f0   : > { %9787 = vmax.xlane.f32.xlu1 %v9786_v60  ;;  %v19850_v11 = vpop.f32.mrb[49].mxu1  ;;  %v19904_v23 = vpop.f32.mrb[37].mxu0  ;;  %v9789_v60 = vsel %vm9755_vm3, %v24699_v47, -inf  ;;  %v24732_v33 = vadd.f32 %v7633_v57, %v6654_v21  ;;  %v9855_v57 = vsel %vm9755_vm3, %v24716_v15, -inf }
 0x4f1   : > { %9844 = vmax.xlane.f32.xlu0 %v9843_v54  ;;  %v7636_v43 = vpop.f32.mrb[38].mxu0  ;;  %v24709_v6 = vpop.f32.mrb[50].mxu1  ;;  %v9792_v54 = vsel %vm9755_vm3, %v24712_v42, -inf  ;;  %v24740_v11 = vadd.f32 %v24625_v25, %v6631_v1  ;;  %v6632_v23 = vld [vmem:[%s27560_s5 + $0x70] sm:$0xff] }
 0x4f2   : > { %v19851_v48 = vpop.f32.mrb[51].mxu1  ;;  %v19905_v5 = vpop.f32.mrb[39].mxu0  ;;  %v24753_v1 = vadd.f32 %v24663_v10, %v6632_v23  ;;  %v6633_v10 = vld [vmem:[%s27560_s5 + $0x78] sm:$0xff] }
 0x4f3   : > { %v6655_v5 = vld [vmem:[%s27560_s5 + $0x128] sm:$0xff] }
 0x4f4   : > { %9853 = vmax.xlane.f32.xlu1 %v9852_v27  ;;  %v24757_v44 = vadd.f32 %v7636_v43, %v6655_v5  ;;  %v24771_v43 = vpop.trf.xlu0  ;;  %v24774_v5 = vadd.f32 %v24670_v55, %v6633_v10 }
 0x4f5   : > { %20173 = vmatmul.mubr.msk.bf16.vlgmr.msra.gmra.mrb[156].mxu1 %vm6746_vm2, %v27971_v46  ;;  %9790 = vmax.xlane.f32.xlu0 %v9789_v60  ;;  %27973 = vst [vmem:[#allocation61_spill] sm:$0xff] %v24771_v43 }
 0x4f6   : > { %20183 = vmatpush3.xpose.msk.msra.mxu1 %vm9755_vm3, %v24218_v24  ;;  %20184 = vmatprep.mubr.msk.bf16.mxu1 %vm22908_vm1, %v27859_v22 }
 0x4f7   : > { %20194 = vmatprep.subr.mxu1 %v27859_v22  ;;  %v7727_v24 = vpop.f32.mrb[40].mxu0  ;;  %v7304_v48 = vpop.f32.mrb[52].mxu1 }
 0x4f8   : > { %9793 = vmax.xlane.f32.xlu1 %v9792_v54  ;;  %v19862_v27 = vpop.f32.mrb[53].mxu1  ;;  %v19916_v21 = vpop.f32.mrb[41].mxu0  ;;  %v9864_v54 = vsel %vm9755_vm3, %v24732_v33, -inf  ;;  %v24767_v23 = vadd.f32 %v7727_v24, %v6658_v9  ;;  %v6659_v9 = vld [vmem:[%s27560_s5 + $0x148] sm:$0xff] }
 0x4f9   : > { %9856 = vmax.xlane.f32.xlu0 %v9855_v57  ;;  %v7730_v60 = vpop.f32.mrb[42].mxu0  ;;  %v24750_v25 = vpop.f32.mrb[54].mxu1  ;;  %v9795_v57 = vsel %vm9755_vm3, %v24740_v11, -inf  ;;  %v6636_v27 = vld [vmem:[%s27560_s5 + $0x90] sm:$0xff] }
 0x4fa   : > { %v19863_v46 = vpop.f32.mrb[55].mxu1  ;;  %v19917_v37 = vpop.f32.mrb[43].mxu0  ;;  %v24784_v10 = vadd.f32 %v7210_v58, %v6636_v27  ;;  %v24788_v49 = vadd.f32 %v7730_v60, %v6659_v9  ;;  %v6637_v58 = vld [vmem:[%s27560_s5 + $0x98] sm:$0xff] }
 0x4fb   : > { %v9798_v37 = vsel %vm9755_vm3, %v24753_v1, -inf  ;;  %v24802_v60 = vpop.trf.xlu0  ;;  %v24805_v27 = vadd.f32 %v24709_v6, %v6637_v58 }
 0x4fc   : > { %9865 = vmax.xlane.f32.xlu1 %v9864_v54  ;;  %v9867_v54 = vsel %vm9755_vm3, %v24757_v44, -inf  ;;  %27974 = vst [vmem:[#allocation60_spill] sm:$0xff] %v24802_v60 }
 0x4fd   : > { %9796 = vmax.xlane.f32.xlu0 %v9795_v57 }
 0x4ff   : > { %v7821_v21 = vpop.f32.mrb[44].mxu0  ;;  %v7398_v46 = vpop.f32.mrb[56].mxu1 }
 0x500   : > { %9799 = vmax.xlane.f32.xlu1 %v9798_v37  ;;  %v19874_v24 = vpop.f32.mrb[57].mxu1  ;;  %v19928_v57 = vpop.f32.mrb[45].mxu0  ;;  %v9876_v37 = vsel %vm9755_vm3, %v24767_v23, -inf }
 0x501   : > { %9868 = vmax.xlane.f32.xlu0 %v9867_v54  ;;  %v7824_v43 = vpop.f32.mrb[46].mxu0  ;;  %v7401_v55 = vpop.f32.mrb[58].mxu1  ;;  %v9801_v24 = vsel %vm9755_vm3, %v24774_v5, -inf  ;;  %v6640_v54 = vld [vmem:[%s27560_s5 + $0xb0] sm:$0xff] }
 0x502   : > { %v19875_v34 = vpop.f32.mrb[59].mxu1  ;;  %v19929_v13 = vpop.f32.mrb[47].mxu0  ;;  %v24815_v58 = vadd.f32 %v7304_v48, %v6640_v54  ;;  %v6641_v48 = vld [vmem:[%s27560_s5 + $0xb8] sm:$0xff]  ;;  %v6644_v54 = vld [vmem:[%s27560_s5 + $0xd0] sm:$0xff] }
 0x503   : > { %v24798_v34 = vadd.f32 %v7821_v21, %v6662_v56  ;;  %v9810_v13 = vsel %vm9755_vm3, %v24784_v10, -inf  ;;  %v6663_v56 = vld [vmem:[%s27560_s5 + $0x168] sm:$0xff] }
 0x504   : > { %9877 = vmax.xlane.f32.xlu1 %v9876_v37  ;;  %v9879_v37 = vsel %vm9755_vm3, %v24788_v49, -inf  ;;  %v24819_v32 = vadd.f32 %v7824_v43, %v6663_v56  ;;  %v24834_v43 = vadd.f32 %v24750_v25, %v6641_v48  ;;  %v24848_v25 = vadd.f32 %v7398_v46, %v6644_v54  ;;  %v6670_v46 = vld [vmem:[%s27560_s5 + $0x1a0] sm:$0xff] }
 0x505   : > { %9802 = vmax.xlane.f32.xlu0 %v9801_v24 }
 0x506   : > { %27975 = vst [vmem:[#allocation31_spill] sm:$0xff] %v24819_v32  ;;  %27977 = vst [vmem:[#allocation63_spill] sm:$0xff] %v24834_v43  ;;  %v9891_v56 = vsel %vm9755_vm3, %v24819_v32, -inf  ;;  %v9825_v7 = vsel %vm9755_vm3, %v24834_v43, -inf }
 0x507   : > { %v7915_v9 = vpop.f32.mrb[48].mxu0  ;;  %v7492_v57 = vpop.f32.mrb[60].mxu1  ;;  %27979 = vst [vmem:[#allocation55_spill] sm:$0xff] %v24848_v25 }
 0x508   : > { %9811 = vmax.xlane.f32.xlu1 %v9810_v13  ;;  %v19886_v21 = vpop.f32.mrb[61].mxu1  ;;  %v19940_v24 = vpop.f32.mrb[49].mxu0  ;;  %v9888_v13 = vsel %vm9755_vm3, %v24798_v34, -inf }
 0x509   : > { %9880 = vmax.xlane.f32.xlu0 %v9879_v37  ;;  %v7918_v60 = vpop.f32.mrb[50].mxu0  ;;  %v7495_v6 = vpop.f32.mrb[62].mxu1  ;;  %v9813_v21 = vsel %vm9755_vm3, %v24805_v27, -inf }
 0x50a   : > { %v19887_v3 = vpop.f32.mrb[63].mxu1  ;;  %v19941_v50 = vpop.f32.mrb[51].mxu0 }
 0x50b   : > { %v24829_v3 = vadd.f32 %v7915_v9, %v6666_v8  ;;  %v9822_v50 = vsel %vm9755_vm3, %v24815_v58, -inf  ;;  %v6667_v8 = vld [vmem:[%s27560_s5 + $0x188] sm:$0xff]  ;;  %v24844_v24 = vpop.trf.xlu0 }
 0x50c   : > { %9889 = vmax.xlane.f32.xlu1 %v9888_v13  ;;  %27978 = vst [vmem:[#allocation62_spill] sm:$0xff] %v24844_v24 }
 0x50d   : > { %9814 = vmax.xlane.f32.xlu0 %v9813_v21  ;;  %27976 = vst [vmem:[#allocation33_spill] sm:$0xff] %v24829_v3  ;;  %v9900_v48 = vsel %vm9755_vm3, %v24829_v3, -inf }
 0x50f   : > { %v7586_v37 = vpop.f32.mrb[64].mxu1 }
 0x510   : > { %9823 = vmax.xlane.f32.xlu1 %v9822_v50  ;;  %v19898_v9 = vpop.f32.mrb[65].mxu1  ;;  %v24852_v50 = vadd.f32 %v7918_v60, %v6667_v8  ;;  %v6648_v8 = vld [vmem:[%s27560_s5 + $0xf0] sm:$0xff] }
 0x511   : > { %9892 = vmax.xlane.f32.xlu0 %v9891_v56  ;;  %v24846_v13 = vpop.f32.mrb[66].mxu1  ;;  %v6645_v56 = vld [vmem:[%s27560_s5 + $0xd8] sm:$0xff]  ;;  %v9834_v9 = vsel %vm9755_vm3, %v24848_v25, -inf }
 0x512   : > { %v19899_v21 = vpop.f32.mrb[67].mxu1  ;;  %27980 = vst [vmem:[#allocation57_spill] sm:$0xff] %v24852_v50  ;;  %v24866_v60 = vadd.f32 %v7401_v55, %v6645_v56  ;;  %v9903_v38 = vsel %vm9755_vm3, %v24852_v50, -inf }
 0x513   : > { %v24864_v21 = vpop.trf.xlu0 }
 0x514   : > { %9901 = vmax.xlane.f32.xlu1 %v9900_v48  ;;  %27981 = vst [vmem:[#allocation65_spill] sm:$0xff] %v24864_v21  ;;  %27982 = vst [vmem:[#allocation6_spill] sm:$0xff] %v24866_v60 }
 0x515   : > { %9826 = vmax.xlane.f32.xlu0 %v9825_v7 }
 0x517   : > { %v8009_v54 = vpop.f32.mrb[52].mxu0  ;;  %v7680_v7 = vpop.f32.mrb[68].mxu1 }
 0x518   : > { %v24871_v48 = vadd.f32 %v8009_v54, %v6670_v46  ;;  %9835 = vmax.xlane.f32.xlu1 %v9834_v9  ;;  %v19952_v24 = vpop.f32.mrb[53].mxu0  ;;  %v19910_v28 = vpop.f32.mrb[69].mxu1  ;;  %v24882_v54 = vadd.f32 %v7492_v57, %v6648_v8 }
 0x519   : > { %v8012_v21 = vpop.f32.mrb[54].mxu0  ;;  %9904 = vmax.xlane.f32.xlu0 %v9903_v38  ;;  %v24878_v55 = vpop.f32.mrb[70].mxu1  ;;  %v9837_v28 = vsel %vm9755_vm3, %v24866_v60, -inf  ;;  %v6674_v38 = vld [vmem:[%s27560_s5 + $0x1c0] sm:$0xff] }
 0x51a   : > { %27983 = vst [vmem:[#allocation64_spill] sm:$0xff] %v24871_v48  ;;  %v19953_v56 = vpop.f32.mrb[55].mxu0  ;;  %v9912_v46 = vsel %vm9755_vm3, %v24871_v48, -inf  ;;  %27984 = vst [vmem:[#allocation47_spill] sm:$0xff] %v24882_v54  ;;  %v19911_v9 = vpop.f32.mrb[71].mxu1  ;;  %v24884_v24 = vadd.f32 %v8012_v21, %v6671_v30  ;;  %v9846_v57 = vsel %vm9755_vm3, %v24882_v54, -inf  ;;  %v24898_v30 = vadd.f32 %v7495_v6, %v6649_v4 }
 0x51b   : > { %v24896_v8 = vpop.trf.xlu0  ;;  %v6652_v21 = vld [vmem:[%s27560_s5 + $0x110] sm:$0xff] }
 0x51c   : > { %27985 = vst [vmem:[#allocation49_spill] sm:$0xff] %v24884_v24  ;;  %9913 = vmax.xlane.f32.xlu1 %v9912_v46  ;;  %27986 = vst [vmem:[#allocation66_spill] sm:$0xff] %v24896_v8  ;;  %v9915_v45 = vsel %vm9755_vm3, %v24884_v24, -inf }
 0x51d   : > { %9838 = vmax.xlane.f32.xlu0 %v9837_v28  ;;  %27987 = vst [vmem:[#allocation67_spill] sm:$0xff] %v24898_v30 }
 0x51f   : > { %v8103_v56 = vpop.f32.mrb[56].mxu0  ;;  %v7774_v9 = vpop.f32.mrb[72].mxu1 }
 0x520   : > { %v24903_v46 = vadd.f32 %v8103_v56, %v6674_v38  ;;  %9847 = vmax.xlane.f32.xlu1 %v9846_v57  ;;  %v19964_v28 = vpop.f32.mrb[57].mxu0  ;;  %v19922_v53 = vpop.f32.mrb[73].mxu1  ;;  %v24914_v56 = vadd.f32 %v7586_v37, %v6652_v21 }
 0x521   : > { %v8106_v8 = vpop.f32.mrb[58].mxu0  ;;  %9916 = vmax.xlane.f32.xlu0 %v9915_v45  ;;  %v24910_v4 = vpop.f32.mrb[74].mxu1  ;;  %v9849_v53 = vsel %vm9755_vm3, %v24898_v30, -inf  ;;  %v6678_v45 = vld [vmem:[%s27560_s5 + $0x1e0] sm:$0xff] }
 0x522   : > { %27988 = vst [vmem:[#allocation68_spill] sm:$0xff] %v24903_v46  ;;  %v19965_v6 = vpop.f32.mrb[59].mxu0  ;;  %v9924_v38 = vsel %vm9755_vm3, %v24903_v46, -inf  ;;  %27989 = vst [vmem:[#allocation69_spill] sm:$0xff] %v24914_v56  ;;  %v19923_v57 = vpop.f32.mrb[75].mxu1  ;;  %v24916_v28 = vadd.f32 %v8106_v8, %v6675_v62  ;;  %v9858_v37 = vsel %vm9755_vm3, %v24914_v56, -inf  ;;  %v24931_v62 = vadd.f32 %v24846_v13, %v6653_v18 }
 0x523   : > { %v24928_v21 = vpop.trf.xlu0  ;;  %v6656_v8 = vld [vmem:[%s27560_s5 + $0x130] sm:$0xff] }
 0x524   : > { %27990 = vst [vmem:[#allocation70_spill] sm:$0xff] %v24916_v28  ;;  %9925 = vmax.xlane.f32.xlu1 %v9924_v38  ;;  %27991 = vst [vmem:[#allocation71_spill] sm:$0xff] %v24928_v21  ;;  %v9927_v22 = vsel %vm9755_vm3, %v24916_v28, -inf  ;;  %v6679_v21 = vld [vmem:[%s27560_s5 + $0x1e8] sm:$0xff]  ;;  %v6657_v28 = vld [vmem:[%s27560_s5 + $0x138] sm:$0xff] }
 0x525   : > { %9850 = vmax.xlane.f32.xlu0 %v9849_v53  ;;  %27992 = vst [vmem:[#allocation72_spill] sm:$0xff] %v24931_v62 }
 0x527   : > { %v8197_v6 = vpop.f32.mrb[60].mxu0  ;;  %v7868_v57 = vpop.f32.mrb[76].mxu1 }
 0x528   : > { %v24936_v38 = vadd.f32 %v8197_v6, %v6678_v45  ;;  %9859 = vmax.xlane.f32.xlu1 %v9858_v37  ;;  %v19976_v53 = vpop.f32.mrb[61].mxu0  ;;  %v19934_v12 = vpop.f32.mrb[77].mxu1  ;;  %v24947_v6 = vadd.f32 %v7680_v7, %v6656_v8  ;;  %v6660_v8 = vld [vmem:[%s27560_s5 + $0x150] sm:$0xff] }
 0x529   : > { %v8200_v30 = vpop.f32.mrb[62].mxu0  ;;  %9928 = vmax.xlane.f32.xlu0 %v9927_v22  ;;  %v24943_v18 = vpop.f32.mrb[78].mxu1  ;;  %v9861_v12 = vsel %vm9755_vm3, %v24931_v62, -inf  ;;  %v6682_v22 = vld [vmem:[%s27560_s5 + $0x200] sm:$0xff] }
 0x52a   : > { %27993 = vst [vmem:[#allocation73_spill] sm:$0xff] %v24936_v38  ;;  %v19977_v13 = vpop.f32.mrb[63].mxu0  ;;  %v9936_v45 = vsel %vm9755_vm3, %v24936_v38, -inf  ;;  %27994 = vst [vmem:[#allocation74_spill] sm:$0xff] %v24947_v6  ;;  %v19935_v37 = vpop.f32.mrb[79].mxu1  ;;  %v24949_v53 = vadd.f32 %v8200_v30, %v6679_v21  ;;  %v9870_v30 = vsel %vm9755_vm3, %v24947_v6, -inf  ;;  %v24964_v21 = vadd.f32 %v24878_v55, %v6657_v28 }
 0x52b   : > { %v24959_v13 = vpop.trf.xlu0  ;;  %v6683_v6 = vld [vmem:[%s27560_s5 + $0x208] sm:$0xff] }
 0x52c   : > { %27995 = vst [vmem:[#allocation75_spill] sm:$0xff] %v24949_v53  ;;  %9937 = vmax.xlane.f32.xlu1 %v9936_v45  ;;  %27996 = vst [vmem:[#allocation76_spill] sm:$0xff] %v24959_v13  ;;  %v9939_v62 = vsel %vm9755_vm3, %v24949_v53, -inf }
 0x52d   : > { %9862 = vmax.xlane.f32.xlu0 %v9861_v12  ;;  %27997 = vst [vmem:[#allocation77_spill] sm:$0xff] %v24964_v21 }
 0x52f   : > { %v8291_v7 = vpop.f32.mrb[64].mxu0  ;;  %v7962_v37 = vpop.f32.mrb[80].mxu1 }
 0x530   : > { %v24969_v45 = vadd.f32 %v8291_v7, %v6682_v22  ;;  %9871 = vmax.xlane.f32.xlu1 %v9870_v30  ;;  %v19988_v12 = vpop.f32.mrb[65].mxu0  ;;  %v19946_v13 = vpop.f32.mrb[81].mxu1  ;;  %v24980_v7 = vadd.f32 %v7774_v9, %v6660_v8 }
 0x531   : > { %v8294_v38 = vpop.f32.mrb[66].mxu0  ;;  %9940 = vmax.xlane.f32.xlu0 %v9939_v62  ;;  %v24976_v55 = vpop.f32.mrb[82].mxu1  ;;  %v9873_v13 = vsel %vm9755_vm3, %v24964_v21, -inf  ;;  %v6661_v62 = vld [vmem:[%s27560_s5 + $0x158] sm:$0xff] }
 0x532   : > { %27998 = vst [vmem:[#allocation78_spill] sm:$0xff] %v24969_v45  ;;  %v19989_v28 = vpop.f32.mrb[67].mxu0  ;;  %v9948_v22 = vsel %vm9755_vm3, %v24969_v45, -inf  ;;  %27999 = vst [vmem:[#allocation79_spill] sm:$0xff] %v24980_v7  ;;  %v19947_v30 = vpop.f32.mrb[83].mxu1  ;;  %v24984_v56 = vadd.f32 %v8294_v38, %v6683_v6  ;;  %v9882_v8 = vsel %vm9755_vm3, %v24980_v7, -inf  ;;  %v24997_v38 = vadd.f32 %v24910_v4, %v6661_v62 }
 0x533   : > { %v24982_v12 = vpop.trf.xlu0  ;;  %v6686_v28 = vld [vmem:[%s27560_s5 + $0x220] sm:$0xff]  ;;  %v6664_v6 = vld [vmem:[%s27560_s5 + $0x170] sm:$0xff]  ;;  %v6687_v7 = vld [vmem:[%s27560_s5 + $0x228] sm:$0xff] }
 0x534   : > { %28000 = vst [vmem:[#allocation80_spill] sm:$0xff] %v24982_v12  ;;  %28001 = vst [vmem:[#allocation81_spill] sm:$0xff] %v24984_v56  ;;  %9949 = vmax.xlane.f32.xlu1 %v9948_v22  ;;  %v9951_v12 = vsel %vm9755_vm3, %v24984_v56, -inf }
 0x535   : > { %9874 = vmax.xlane.f32.xlu0 %v9873_v13  ;;  %28002 = vst [vmem:[#allocation82_spill] sm:$0xff] %v24997_v38 }
 0x537   : > { %v8385_v9 = vpop.f32.mrb[68].mxu0  ;;  %v8056_v30 = vpop.f32.mrb[84].mxu1 }
 0x538   : > { %v25002_v22 = vadd.f32 %v8385_v9, %v6686_v28  ;;  %9883 = vmax.xlane.f32.xlu1 %v9882_v8  ;;  %v20000_v13 = vpop.f32.mrb[69].mxu0  ;;  %v19958_v21 = vpop.f32.mrb[85].mxu1  ;;  %v25015_v9 = vadd.f32 %v7868_v57, %v6664_v6  ;;  %v6668_v6 = vld [vmem:[%s27560_s5 + $0x190] sm:$0xff] }
 0x539   : > { %9952 = vmax.xlane.f32.xlu0 %v9951_v12  ;;  %v25009_v4 = vpop.trf.xlu0  ;;  %v8388_v62 = vpop.f32.mrb[70].mxu0  ;;  %v9885_v21 = vsel %vm9755_vm3, %v24997_v38, -inf  ;;  %v6665_v12 = vld [vmem:[%s27560_s5 + $0x178] sm:$0xff]  ;;  %v6691_v38 = vld [vmem:[%s27560_s5 + $0x248] sm:$0xff] }
 0x53a   : > { %28003 = vst [vmem:[#allocation83_spill] sm:$0xff] %v25002_v22  ;;  %28004 = vst [vmem:[#allocation84_spill] sm:$0xff] %v25009_v4  ;;  %v25011_v53 = vpop.f32.mrb[86].mxu1  ;;  %v9960_v28 = vsel %vm9755_vm3, %v25002_v22, -inf  ;;  %v20001_v13 = vpop.f32.mrb[71].mxu0  ;;  %v25017_v45 = vadd.f32 %v8388_v62, %v6687_v7  ;;  %v6690_v4 = vld [vmem:[%s27560_s5 + $0x240] sm:$0xff]  ;;  %v25030_v7 = vadd.f32 %v24943_v18, %v6665_v12 }
 0x53b   : > { %28005 = vst [vmem:[#allocation85_spill] sm:$0xff] %v25015_v9  ;;  %v19959_v8 = vpop.f32.mrb[87].mxu1  ;;  %v9894_v57 = vsel %vm9755_vm3, %v25015_v9, -inf }
 0x53c   : > { %28006 = vst [vmem:[#allocation86_spill] sm:$0xff] %v25017_v45  ;;  %9961 = vmax.xlane.f32.xlu1 %v9960_v28  ;;  %28007 = vst [vmem:[#allocation87_spill] sm:$0xff] %v25030_v7  ;;  %v9963_v13 = vsel %vm9755_vm3, %v25017_v45, -inf }
 0x53d   : > { %9886 = vmax.xlane.f32.xlu0 %v9885_v21  ;;  %v25044_v18 = vpop.trf.xlu0 }
 0x53e   : > { %28009 = vst [vmem:[#allocation89_spill] sm:$0xff] %v25044_v18  ;;  %v6694_v18 = vld [vmem:[%s27560_s5 + $0x260] sm:$0xff] }
 0x53f   : > { %v8479_v56 = vpop.f32.mrb[72].mxu0  ;;  %v25037_v28 = vpop.f32.mrb[88].mxu1 }
 0x540   : > { %v25035_v62 = vadd.f32 %v8479_v56, %v6690_v4  ;;  %9895 = vmax.xlane.f32.xlu1 %v9894_v57  ;;  %v20012_v8 = vpop.f32.mrb[73].mxu0  ;;  %v19970_v21 = vpop.f32.mrb[89].mxu1  ;;  %v25050_v4 = vadd.f32 %v7962_v37, %v6668_v6 }
 0x541   : > { %9964 = vmax.xlane.f32.xlu0 %v9963_v13  ;;  %v8482_v12 = vpop.f32.mrb[74].mxu0  ;;  %v25046_v9 = vpop.f32.mrb[90].mxu1  ;;  %v9897_v21 = vsel %vm9755_vm3, %v25030_v7, -inf  ;;  %v6669_v13 = vld [vmem:[%s27560_s5 + $0x198] sm:$0xff] }
 0x542   : > { %28008 = vst [vmem:[#allocation88_spill] sm:$0xff] %v25035_v62  ;;  %v9972_v56 = vsel %vm9755_vm3, %v25035_v62, -inf  ;;  %28010 = vst [vmem:[#allocation90_spill] sm:$0xff] %v25050_v4  ;;  %v19971_v57 = vpop.f32.mrb[91].mxu1  ;;  %v20013_v8 = vpop.f32.mrb[75].mxu0  ;;  %v25052_v22 = vadd.f32 %v8482_v12, %v6691_v38  ;;  %v9906_v37 = vsel %vm9755_vm3, %v25050_v4, -inf  ;;  %v25067_v38 = vadd.f32 %v24976_v55, %v6669_v13 }
 0x543   : > { %v25064_v6 = vpop.trf.xlu0  ;;  %v6672_v12 = vld [vmem:[%s27560_s5 + $0x1b0] sm:$0xff] }
 0x544   : > { %28011 = vst [vmem:[#allocation91_spill] sm:$0xff] %v25052_v22  ;;  %9973 = vmax.xlane.f32.xlu1 %v9972_v56  ;;  %28012 = vst [vmem:[#allocation92_spill] sm:$0xff] %v25064_v6  ;;  %v6695_v6 = vld [vmem:[%s27560_s5 + $0x268] sm:$0xff] }
 0x545   : > { %9898 = vmax.xlane.f32.xlu0 %v9897_v21  ;;  %28013 = vst [vmem:[#allocation93_spill] sm:$0xff] %v25067_v38  ;;  %v9975_v21 = vsel %vm9755_vm3, %v25052_v22, -inf  ;;  %v6673_v22 = vld [vmem:[%s27560_s5 + $0x1b8] sm:$0xff] }
 0x547   : > { %v8573_v62 = vpop.f32.mrb[76].mxu0  ;;  %v25074_v57 = vpop.f32.mrb[92].mxu1 }
 0x548   : > { %v25072_v56 = vadd.f32 %v8573_v62, %v6694_v18  ;;  %9907 = vmax.xlane.f32.xlu1 %v9906_v37  ;;  %v20024_v8 = vpop.f32.mrb[77].mxu0  ;;  %v19982_v7 = vpop.f32.mrb[93].mxu1  ;;  %v25085_v18 = vadd.f32 %v8056_v30, %v6672_v12 }
 0x549   : > { %v8576_v55 = vpop.f32.mrb[78].mxu0  ;;  %9976 = vmax.xlane.f32.xlu0 %v9975_v21  ;;  %v25081_v13 = vpop.f32.mrb[94].mxu1  ;;  %v9909_v7 = vsel %vm9755_vm3, %v25067_v38, -inf }
 0x54a   : > { %28014 = vst [vmem:[#allocation94_spill] sm:$0xff] %v25072_v56  ;;  %v20025_v45 = vpop.f32.mrb[79].mxu0  ;;  %v9984_v62 = vsel %vm9755_vm3, %v25072_v56, -inf  ;;  %28015 = vst [vmem:[#allocation95_spill] sm:$0xff] %v25085_v18  ;;  %v19983_v37 = vpop.f32.mrb[95].mxu1  ;;  %v25087_v8 = vadd.f32 %v8576_v55, %v6695_v6  ;;  %v9918_v6 = vsel %vm9755_vm3, %v25085_v18, -inf  ;;  %v25102_v55 = vadd.f32 %v25011_v53, %v6673_v22 }
 0x54b   : > { %v6698_v45 = vld [vmem:[%s27560_s5 + $0x280] sm:$0xff]  ;;  %v25097_v21 = vpop.trf.xlu0  ;;  %v9758_v30 = vpop.xlane.xlu1 %9757  ;;  %v6699_v18 = vld [vmem:[%s27560_s5 + $0x288] sm:$0xff] }
 0x54c   : > { %28016 = vst [vmem:[#allocation96_spill] sm:$0xff] %v25087_v8  ;;  %9985 = vmax.xlane.f32.xlu1 %v9984_v62  ;;  %28017 = vst [vmem:[#allocation97_spill] sm:$0xff] %v25097_v21  ;;  %v6676_v62 = vld [vmem:[%s27560_s5 + $0x1d0] sm:$0xff]  ;;  %v9987_v21 = vsel %vm9755_vm3, %v25087_v8, -inf  ;;  %v10140_v22 = vsub.f32 %v24381_v17, %v9758_v30  ;;  %v6677_v17 = vld [vmem:[%s27560_s5 + $0x1d8] sm:$0xff] }
 0x54d   : > { %9910 = vmax.xlane.f32.xlu0 %v9909_v7  ;;  %28018 = vst [vmem:[#allocation98_spill] sm:$0xff] %v25102_v55 }
 0x54e   : > { %v10268_v30 = vmul.f32 1.442695, %v10140_v22 }
 0x54f   : > { %v8667_v12 = vpop.f32.mrb[80].mxu0  ;;  %v25109_v7 = vpop.f32.mrb[96].mxu1 }
 0x550   : > { %v25107_v37 = vadd.f32 %v8667_v12, %v6698_v45  ;;  %9919 = vmax.xlane.f32.xlu1 %v9918_v6  ;;  %v20036_v56 = vpop.f32.mrb[81].mxu0  ;;  %v19994_v38 = vpop.f32.mrb[97].mxu1  ;;  %22329 = vpow2.f32 %v10268_v30  ;;  %v6681_v30 = vld [vmem:[%s27560_s5 + $0x1f8] sm:$0xff] }
 0x551   : > { %v8670_v53 = vpop.f32.mrb[82].mxu0  ;;  %9988 = vmax.xlane.f32.xlu0 %v9987_v21  ;;  %v25117_v4 = vpop.f32.mrb[98].mxu1  ;;  %v25122_v56 = vadd.f32 %v25037_v28, %v6676_v62  ;;  %v9921_v38 = vsel %vm9755_vm3, %v25102_v55, -inf  ;;  %v6702_v21 = vld [vmem:[%s27560_s5 + $0x2a0] sm:$0xff] }
 0x552   : > { %28019 = vst [vmem:[#allocation99_spill] sm:$0xff] %v25107_v37  ;;  %v20037_v45 = vpop.f32.mrb[83].mxu0  ;;  %v9996_v12 = vsel %vm9755_vm3, %v25107_v37, -inf  ;;  %v19995_v6 = vpop.f32.mrb[99].mxu1  ;;  %v25124_v8 = vadd.f32 %v8670_v53, %v6699_v18  ;;  %v25139_v53 = vadd.f32 %v25046_v9, %v6677_v17  ;;  %v6703_v9 = vld [vmem:[%s27560_s5 + $0x2a8] sm:$0xff] }
 0x553   : > { %28020 = vst [vmem:[#allocation100_spill] sm:$0xff] %v25122_v56  ;;  %v9764_v24 = vpop.xlane.xlu1 %9763  ;;  %v9930_v18 = vsel %vm9755_vm3, %v25122_v56, -inf  ;;  %v25136_v62 = vpop.trf.xlu0  ;;  %v6680_v45 = vld [vmem:[%s27560_s5 + $0x1f0] sm:$0xff] }
 0x554   : > { %28021 = vst [vmem:[#allocation101_spill] sm:$0xff] %v25124_v8  ;;  %9997 = vmax.xlane.f32.xlu1 %v9996_v12  ;;  %28022 = vst [vmem:[#allocation102_spill] sm:$0xff] %v25136_v62  ;;  %v9999_v22 = vsel %vm9755_vm3, %v25124_v8, -inf }
 0x555   : > { %9922 = vmax.xlane.f32.xlu0 %v9921_v38  ;;  %28023 = vst [vmem:[#allocation103_spill] sm:$0xff] %v25139_v53 }
 0x557   : > { %v8761_v28 = vpop.f32.mrb[84].mxu0  ;;  %v25146_v6 = vpop.f32.mrb[100].mxu1 }
 0x558   : > { %v25144_v12 = vadd.f32 %v8761_v28, %v6702_v21  ;;  %9931 = vmax.xlane.f32.xlu1 %v9930_v18  ;;  %v20048_v38 = vpop.f32.mrb[85].mxu0  ;;  %v9806_v37 = vpop.xlane.xlu1 %9805  ;;  %v25158_v28 = vadd.f32 %v25074_v57, %v6680_v45  ;;  %v6706_v57 = vld [vmem:[%s27560_s5 + $0x2c0] sm:$0xff]  ;;  %v10142_v45 = vsub.f32 %v24412_v63, %v9764_v24  ;;  %v6707_v24 = vld [vmem:[%s27560_s5 + $0x2c8] sm:$0xff] }
 0x559   : > { %v20006_v55 = vpop.f32.mrb[101].mxu1  ;;  %10000 = vmax.xlane.f32.xlu0 %v9999_v22  ;;  %v8764_v17 = vpop.f32.mrb[86].mxu0 }
 0x55a   : > { %28024 = vst [vmem:[#allocation104_spill] sm:$0xff] %v25144_v12  ;;  %v25153_v62 = vpop.f32.mrb[102].mxu1  ;;  %v10008_v21 = vsel %vm9755_vm3, %v25144_v12, -inf  ;;  %28025 = vst [vmem:[#allocation105_spill] sm:$0xff] %v25158_v28  ;;  %v20049_v38 = vpop.f32.mrb[87].mxu0  ;;  %v25160_v8 = vadd.f32 %v8764_v17, %v6703_v9  ;;  %v9933_v55 = vsel %vm9755_vm3, %v25139_v53, -inf }
 0x55b   : > { %v20007_v18 = vpop.f32.mrb[103].mxu1  ;;  %v9942_v9 = vsel %vm9755_vm3, %v25158_v28, -inf  ;;  %v25175_v17 = vpop.trf.xlu0 }
 0x55c   : > { %28026 = vst [vmem:[#allocation106_spill] sm:$0xff] %v25160_v8  ;;  %10009 = vmax.xlane.f32.xlu1 %v10008_v21  ;;  %28027 = vst [vmem:[#allocation107_spill] sm:$0xff] %v25175_v17  ;;  %v25178_v21 = vadd.f32 %v25081_v13, %v6681_v30  ;;  %v10011_v53 = vsel %vm9755_vm3, %v25160_v8, -inf  ;;  %v10272_v17 = vmul.f32 1.442695, %v10142_v45  ;;  %v10156_v13 = vsub.f32 %v24490_v41, %v9806_v37  ;;  %v25194_v28 = vpop.eup %22329 }
 0x55d   : > { %v25167_v22 = vpop.xlane.xlu1 %9766  ;;  %9934 = vmax.xlane.f32.xlu0 %v9933_v55  ;;  %28030 = vst [vmem:[#allocation110_spill] sm:$0xff] %v25194_v28  ;;  %v10524_v46 = vsel %vm9755_vm3, %v25194_v28, 0.0 }
 0x55e   : > { %28028 = vst [vmem:[#allocation108_spill] sm:$0xff] %v25178_v21  ;;  %v9945_v41 = vsel %vm9755_vm3, %v25178_v21, -inf  ;;  %22331 = vpow2.f32 %v10272_v17 }
 0x55f   : > { %v8855_v18 = vpop.f32.mrb[88].mxu0  ;;  %v25182_v12 = vpop.f32.mrb[104].mxu1 }
 0x560   : > { %v25180_v38 = vadd.f32 %v8855_v18, %v6706_v57  ;;  %9943 = vmax.xlane.f32.xlu1 %v9942_v9  ;;  %v20060_v55 = vpop.f32.mrb[89].mxu0  ;;  %v20018_v63 = vpop.f32.mrb[105].mxu1 }
 0x561   : > { %v9770_v56 = vpop.xlane.xlu1 %9769  ;;  %10012 = vmax.xlane.f32.xlu0 %v10011_v53  ;;  %v8858_v30 = vpop.f32.mrb[90].mxu0  ;;  %v6684_v63 = vld [vmem:[%s27560_s5 + $0x210] sm:$0xff]  ;;  %v10300_v53 = vmul.f32 1.442695, %v10156_v13 }
 0x562   : > { %28029 = vst [vmem:[#allocation109_spill] sm:$0xff] %v25180_v38  ;;  %v25190_v57 = vpop.f32.mrb[106].mxu1  ;;  %v10020_v18 = vsel %vm9755_vm3, %v25180_v38, -inf  ;;  %v20061_v55 = vpop.f32.mrb[91].mxu0  ;;  %v25199_v8 = vadd.f32 %v8858_v30, %v6707_v24  ;;  %v6710_v24 = vld [vmem:[%s27560_s5 + $0x2e0] sm:$0xff] }
 0x563   : > { %v20019_v9 = vpop.f32.mrb[107].mxu1  ;;  %22333 = vpow2.f32 %v10300_v53  ;;  %v10144_v53 = vsub.f32 %v24510_v39, %v9770_v56 }
 0x564   : > { %28031 = vst [vmem:[#allocation111_spill] sm:$0xff] %v25199_v8  ;;  %10021 = vmax.xlane.f32.xlu1 %v10020_v18  ;;  %v25204_v9 = vadd.f32 %v25109_v7, %v6684_v63  ;;  %v10023_v17 = vsel %vm9755_vm3, %v25199_v8, -inf }
 0x565   : > { %v9818_v37 = vpop.xlane.xlu1 %9817  ;;  %9946 = vmax.xlane.f32.xlu0 %v9945_v41 }
 0x566   : > { %v9761_v45 = vpop.xlane.xlu0 %9760  ;;  %28032 = vst [vmem:[#allocation112_spill] sm:$0xff] %v25204_v9  ;;  %v10160_v39 = vsub.f32 %v24532_v31, %v9818_v37  ;;  %v6688_v31 = vld [vmem:[%s27560_s5 + $0x230] sm:$0xff] }
 0x567   : > { %v10141_v55 = vsub.f32 %v24537_v26, %v9761_v45  ;;  %v8949_v38 = vpop.f32.mrb[92].mxu0  ;;  %v25212_v30 = vpop.f32.mrb[108].mxu1  ;;  %v25267_v50 = vadd.f32 %v25146_v6, %v6688_v31 }
 0x568   : > { %10525 = vadd.xlane.f32.xlu1 %v10524_v46  ;;  %v20072_v18 = vpop.f32.mrb[93].mxu0  ;;  %v20030_v63 = vpop.f32.mrb[109].mxu1  ;;  %v25220_v45 = vadd.f32 %v8949_v38, %v6710_v24 }
 0x569   : > { %v10270_v13 = vmul.f32 1.442695, %v10141_v55  ;;  %v25216_v7 = vpop.xlane.xlu1 %9772  ;;  %10024 = vmax.xlane.f32.xlu0 %v10023_v17  ;;  %v8952_v26 = vpop.f32.mrb[94].mxu0  ;;  %v9954_v18 = vsel %vm9755_vm3, %v25204_v9, -inf  ;;  %v10143_v55 = vsub.f32 %v24496_v59, %v25167_v22  ;;  %v10276_v9 = vmul.f32 1.442695, %v10144_v53 }
 0x56a   : > { %v25218_v41 = vpop.f32.mrb[110].mxu1  ;;  %28033 = vst [vmem:[#allocation113_spill] sm:$0xff] %v25220_v45  ;;  %v20073_v21 = vpop.f32.mrb[95].mxu0  ;;  %v10032_v38 = vsel %vm9755_vm3, %v25220_v45, -inf  ;;  %28038 = vst [vmem:[#allocation118_spill] sm:$0xff] %v25267_v50 }
 0x56b   : > { %22335 = vpow2.f32 %v10270_v13  ;;  %v9809_v46 = vpop.xlane.xlu0 %9808  ;;  %v20031_v28 = vpop.f32.mrb[111].mxu1  ;;  %v10274_v13 = vmul.f32 1.442695, %v10143_v55 }
 0x56c   : > { %9955 = vmax.xlane.f32.xlu1 %v9954_v18  ;;  %v25233_v21 = vpop.eup %22331  ;;  %v10157_v18 = vsub.f32 %v24570_v52, %v9809_v46 }
 0x56d   : > { %v25226_v8 = vpop.xlane.xlu1 %9775  ;;  %28034 = vst [vmem:[#allocation114_spill] sm:$0xff] %v25233_v21  ;;  %v10530_v52 = vsel %vm9755_vm3, %v25233_v21, 0.0  ;;  %v25252_v46 = vpop.eup %22333  ;;  %22337 = vpow2.f32 %v10274_v13 }
 0x56e   : > { %28035 = vst [vmem:[#allocation115_spill] sm:$0xff] %v25252_v46  ;;  %v10302_v53 = vmul.f32 1.442695, %v10157_v18  ;;  %22339 = vpow2.f32 %v10276_v9  ;;  %v6714_v9 = vld [vmem:[%s27560_s5 + $0x300] sm:$0xff] }
 0x56f   : > { %v25229_v17 = vpop.xlane.xlu0 %9820  ;;  %v9043_v63 = vpop.f32.mrb[96].mxu0 }
 0x570   : > { %10033 = vmax.xlane.f32.xlu1 %v10032_v38  ;;  %v25235_v24 = vpop.f32.mrb[112].mxu1  ;;  %v20084_v28 = vpop.f32.mrb[97].mxu0  ;;  %v6685_v38 = vld [vmem:[%s27560_s5 + $0x218] sm:$0xff]  ;;  %22341 = vpow2.f32 %v10302_v53  ;;  %v25293_v48 = vadd.f32 %v9043_v63, %v6714_v9  ;;  %v9966_v53 = vsel %vm9755_vm3, %v25267_v50, -inf }
 0x571   : > { %v25238_v59 = vpop.xlane.xlu1 %9829  ;;  %v20042_v22 = vpop.f32.mrb[113].mxu1 }
 0x572   : > { %v25241_v56 = vpop.f32.mrb[114].mxu1  ;;  %v25243_v60 = vpop.f32.mrb[98].mxu0  ;;  %v10308_v22 = vmul.f32 1.442695, %v10160_v39  ;;  %28040 = vst [vmem:[#allocation120_spill] sm:$0xff] %v25293_v48 }
 0x573   : > { %v20085_v45 = vpop.f32.mrb[99].mxu0  ;;  %v25248_v54 = vpop.xlane.xlu0 %9778 }
 0x574   : > { %v20043_v37 = vpop.f32.mrb[115].mxu1  ;;  %10531 = vadd.xlane.f32.xlu1 %v10530_v52  ;;  %v25262_v45 = vadd.f32 %v25117_v4, %v6685_v38  ;;  %v6711_v52 = vld [vmem:[%s27560_s5 + $0x2e8] sm:$0xff]  ;;  %v10572_v4 = vsel %vm9755_vm3, %v25252_v46, 0.0  ;;  %22343 = vpow2.f32 %v10308_v22 }
 0x575   : > { %v25257_v55 = vpop.eup %22335  ;;  %v25259_v28 = vpop.xlane.xlu1 %9781  ;;  %v25285_v31 = vadd.f32 %v8952_v26, %v6711_v52  ;;  %v10145_v26 = vsub.f32 %v24558_v20, %v25216_v7  ;;  %v10146_v52 = vsub.f32 %v24583_v35, %v25226_v8  ;;  %v10161_v8 = vsub.f32 %v24587_v2, %v25229_v17  ;;  %v6689_v2 = vld [vmem:[%s27560_s5 + $0x238] sm:$0xff] }
 0x576   : > { %28036 = vst [vmem:[#allocation116_spill] sm:$0xff] %v25257_v55  ;;  %28037 = vst [vmem:[#allocation117_spill] sm:$0xff] %v25262_v45  ;;  %v10527_v21 = vsel %vm9755_vm3, %v25257_v55, 0.0  ;;  %v9957_v46 = vsel %vm9755_vm3, %v25262_v45, -inf }
 0x577   : > { %v25272_v37 = vpop.xlane.xlu0 %9832  ;;  %v25274_v13 = vpop.f32.mrb[100].mxu0  ;;  %10528 = vadd.xlane.f32.xlu0 %v10527_v21  ;;  %28039 = vst [vmem:[#allocation119_spill] sm:$0xff] %v25285_v31  ;;  %v10035_v63 = vsel %vm9755_vm3, %v25285_v31, -inf  ;;  %v10278_v35 = vmul.f32 1.442695, %v10145_v26 }
 0x578   : > { %10573 = vadd.xlane.f32.xlu1 %v10572_v4  ;;  %v25281_v18 = vpop.f32.mrb[116].mxu1  ;;  %v20096_v6 = vpop.f32.mrb[101].mxu0  ;;  %v10280_v45 = vmul.f32 1.442695, %v10146_v52 }
 0x579   : > { %v25283_v39 = vpop.xlane.xlu1 %9841  ;;  %v20054_v38 = vpop.f32.mrb[117].mxu1  ;;  %22345 = vpow2.f32 %v10278_v35 }
 0x57a   : > { %v25287_v55 = vpop.f32.mrb[118].mxu1  ;;  %v25289_v21 = vpop.f32.mrb[102].mxu0  ;;  %22347 = vpow2.f32 %v10280_v45  ;;  %v6718_v45 = vld [vmem:[%s27560_s5 + $0x320] sm:$0xff] }
 0x57b   : > { %v20097_v4 = vpop.f32.mrb[103].mxu0  ;;  %v25295_v43 = vpop.xlane.xlu0 %9784  ;;  %9958 = vmax.xlane.f32.xlu0 %v9957_v46 }
 0x57c   : > { %v20055_v6 = vpop.f32.mrb[119].mxu1  ;;  %9967 = vmax.xlane.f32.xlu1 %v9966_v53  ;;  %v25307_v9 = vpop.eup %22337  ;;  %v10044_v4 = vsel %vm9755_vm3, %v25293_v48, -inf }
 0x57d   : > { %v25301_v22 = vpop.xlane.xlu1 %9787  ;;  %28041 = vst [vmem:[#allocation121_spill] sm:$0xff] %v25307_v9  ;;  %v25315_v53 = vpop.eup %22339 }
 0x57e   : > { %28042 = vst [vmem:[#allocation122_spill] sm:$0xff] %v25315_v53  ;;  %v25331_v25 = vpop.eup %22341 }
 0x57f   : > { %v25309_v38 = vpop.xlane.xlu0 %9844  ;;  %v25311_v46 = vpop.f32.mrb[104].mxu0  ;;  %10036 = vmax.xlane.f32.xlu0 %v10035_v63  ;;  %v10164_v63 = vsub.f32 %v24603_v14, %v25238_v59  ;;  %28043 = vst [vmem:[#allocation123_spill] sm:$0xff] %v25331_v25  ;;  %v10536_v14 = vsel %vm9755_vm3, %v25315_v53, 0.0  ;;  %v10575_v53 = vsel %vm9755_vm3, %v25331_v25, 0.0 }
 0x580   : > { %10045 = vmax.xlane.f32.xlu1 %v10044_v4  ;;  %v25317_v20 = vpop.f32.mrb[120].mxu1  ;;  %v20108_v7 = vpop.f32.mrb[105].mxu0  ;;  %v10533_v4 = vsel %vm9755_vm3, %v25307_v9, 0.0 }
 0x581   : > { %v25321_v6 = vpop.xlane.xlu1 %9853  ;;  %v20066_v31 = vpop.f32.mrb[121].mxu1  ;;  %v10310_v7 = vmul.f32 1.442695, %v10161_v8 }
 0x582   : > { %v25325_v50 = vpop.f32.mrb[122].mxu1  ;;  %v25327_v48 = vpop.f32.mrb[106].mxu0  ;;  %v6692_v31 = vld [vmem:[%s27560_s5 + $0x250] sm:$0xff] }
 0x583   : > { %v20109_v17 = vpop.f32.mrb[107].mxu0  ;;  %v25336_v26 = vpop.xlane.xlu0 %9790  ;;  %10534 = vadd.xlane.f32.xlu0 %v10533_v4  ;;  %v10316_v4 = vmul.f32 1.442695, %v10164_v63  ;;  %v25353_v32 = vadd.f32 %v25182_v12, %v6692_v31  ;;  %22349 = vpow2.f32 %v10310_v7 }
 0x584   : > { %v25340_v59 = vpop.eup %22343  ;;  %v20067_v52 = vpop.f32.mrb[123].mxu1  ;;  %10537 = vadd.xlane.f32.xlu1 %v10536_v14  ;;  %v25348_v17 = vadd.f32 %v25153_v62, %v6689_v2 }
 0x585   : > { %28044 = vst [vmem:[#allocation124_spill] sm:$0xff] %v25340_v59  ;;  %v25345_v9 = vpop.xlane.xlu1 %9793  ;;  %28046 = vst [vmem:[#allocation126_spill] sm:$0xff] %v25353_v32  ;;  %v6715_v52 = vld [vmem:[%s27560_s5 + $0x308] sm:$0xff]  ;;  %v10584_v62 = vsel %vm9755_vm3, %v25340_v59, 0.0  ;;  %22351 = vpow2.f32 %v10316_v4  ;;  %v9978_v7 = vsel %vm9755_vm3, %v25353_v32, -inf }
 0x586   : > { %28045 = vst [vmem:[#allocation125_spill] sm:$0xff] %v25348_v17  ;;  %v25372_v31 = vadd.f32 %v25243_v60, %v6715_v52  ;;  %v9969_v59 = vsel %vm9755_vm3, %v25348_v17, -inf  ;;  %v10147_v60 = vsub.f32 %v24612_v61, %v25248_v54 }
 0x587   : > { %v25358_v14 = vpop.xlane.xlu0 %9856  ;;  %v25360_v35 = vpop.f32.mrb[108].mxu0  ;;  %10576 = vadd.xlane.f32.xlu0 %v10575_v53 }
 0x588   : > { %10585 = vadd.xlane.f32.xlu1 %v10584_v62  ;;  %v25367_v8 = vpop.f32.mrb[124].mxu1  ;;  %v20120_v12 = vpop.f32.mrb[109].mxu0  ;;  %28047 = vst [vmem:[#allocation127_spill] sm:$0xff] %v25372_v31  ;;  %v25381_v62 = vadd.f32 %v25274_v13, %v6718_v45  ;;  %v10047_v13 = vsel %vm9755_vm3, %v25372_v31, -inf }
 0x589   : > { %v25369_v63 = vpop.xlane.xlu1 %9865  ;;  %v20078_v2 = vpop.f32.mrb[125].mxu1 }
 0x58a   : > { %v25374_v53 = vpop.f32.mrb[126].mxu1  ;;  %v25376_v25 = vpop.f32.mrb[110].mxu0  ;;  %28049 = vst [vmem:[#allocation129_spill] sm:$0xff] %v25381_v62  ;;  %v10148_v2 = vsub.f32 %v24628_v40, %v25259_v28  ;;  %v10282_v40 = vmul.f32 1.442695, %v10147_v60  ;;  %v10165_v28 = vsub.f32 %v24632_v16, %v25272_v37  ;;  %v6693_v16 = vld [vmem:[%s27560_s5 + $0x258] sm:$0xff] }
 0x58b   : > { %28048 = vst [vmem:[#allocation128_spill] sm:$0xff] %v25374_v53  ;;  %v20121_v3 = vpop.f32.mrb[111].mxu0  ;;  %v25383_v12 = vpop.xlane.xlu0 %9796  ;;  %9970 = vmax.xlane.f32.xlu0 %v9969_v59 }
 0x58c   : > { %v20079_v4 = vpop.f32.mrb[127].mxu1  ;;  %9979 = vmax.xlane.f32.xlu1 %v9978_v7  ;;  %v25395_v3 = vpop.eup %22345  ;;  %v10056_v7 = vsel %vm9755_vm3, %v25381_v62, -inf  ;;  %v10284_v32 = vmul.f32 1.442695, %v10148_v2  ;;  %22353 = vpow2.f32 %v10282_v40 }
 0x58d   : > { %v25389_v52 = vpop.xlane.xlu1 %9799  ;;  %28050 = vst [vmem:[#allocation130_spill] sm:$0xff] %v25395_v3  ;;  %v25403_v4 = vpop.eup %22347 }
 0x58e   : > { %28051 = vst [vmem:[#allocation131_spill] sm:$0xff] %v25403_v4  ;;  %22355 = vpow2.f32 %v10284_v32  ;;  %v6722_v32 = vld [vmem:[%s27560_s5 + $0x340] sm:$0xff] }
 0x58f   : > { %v25397_v45 = vpop.xlane.xlu0 %9868  ;;  %v25399_v59 = vpop.f32.mrb[112].mxu0  ;;  %10048 = vmax.xlane.f32.xlu0 %v10047_v13  ;;  %v10168_v13 = vsub.f32 %v24650_v0, %v25283_v39  ;;  %v10542_v0 = vsel %vm9755_vm3, %v25403_v4, 0.0 }
 0x590   : > { %10057 = vmax.xlane.f32.xlu1 %v10056_v7  ;;  %v25405_v61 = vpop.f32.mrb[128].mxu1  ;;  %v20132_v54 = vpop.f32.mrb[113].mxu0  ;;  %v10539_v7 = vsel %vm9755_vm3, %v25395_v3, 0.0 }
 0x591   : > { %28052 = vst [vmem:[#allocation132_spill] sm:$0xff] %v25405_v61  ;;  %v25409_v31 = vpop.xlane.xlu1 %9877  ;;  %v20090_v17 = vpop.f32.mrb[129].mxu1  ;;  %v10318_v54 = vmul.f32 1.442695, %v10165_v28 }
 0x592   : > { %v25413_v53 = vpop.f32.mrb[130].mxu1  ;;  %v25415_v62 = vpop.f32.mrb[114].mxu0  ;;  %v6696_v17 = vld [vmem:[%s27560_s5 + $0x270] sm:$0xff] }
 0x593   : > { %28053 = vst [vmem:[#allocation133_spill] sm:$0xff] %v25413_v53  ;;  %v25419_v61 = vpop.eup %22349  ;;  %v20133_v37 = vpop.f32.mrb[115].mxu0  ;;  %10540 = vadd.xlane.f32.xlu0 %v10539_v7  ;;  %v10324_v7 = vmul.f32 1.442695, %v10168_v13  ;;  %v25441_v53 = vadd.f32 %v25212_v30, %v6696_v17  ;;  %22357 = vpow2.f32 %v10318_v54 }
 0x594   : > { %28054 = vst [vmem:[#allocation134_spill] sm:$0xff] %v25419_v61  ;;  %v25424_v60 = vpop.xlane.xlu0 %9802  ;;  %v25428_v39 = vpop.eup %22351  ;;  %10543 = vadd.xlane.f32.xlu1 %v10542_v0  ;;  %v25436_v37 = vadd.f32 %v25190_v57, %v6693_v16  ;;  %v10587_v4 = vsel %vm9755_vm3, %v25419_v61, 0.0 }
 0x595   : > { %28055 = vst [vmem:[#allocation135_spill] sm:$0xff] %v25428_v39  ;;  %v20091_v2 = vpop.f32.mrb[131].mxu1  ;;  %v25433_v3 = vpop.xlane.xlu1 %9811  ;;  %28057 = vst [vmem:[#allocation137_spill] sm:$0xff] %v25441_v53  ;;  %v10596_v57 = vsel %vm9755_vm3, %v25428_v39, 0.0  ;;  %22359 = vpow2.f32 %v10324_v7  ;;  %v9990_v54 = vsel %vm9755_vm3, %v25441_v53, -inf }
 0x596   : > { %28056 = vst [vmem:[#allocation136_spill] sm:$0xff] %v25436_v37  ;;  %v6719_v2 = vld [vmem:[%s27560_s5 + $0x328] sm:$0xff]  ;;  %v9981_v39 = vsel %vm9755_vm3, %v25436_v37, -inf }
 0x597   : > { %v25448_v40 = vpop.f32.mrb[116].mxu0  ;;  %10588 = vadd.xlane.f32.xlu0 %v10587_v4  ;;  %v25460_v17 = vadd.f32 %v25289_v21, %v6719_v2  ;;  %v10149_v21 = vsub.f32 %v24658_v51, %v25295_v43 }
 0x598   : > { %v25446_v0 = vpop.xlane.xlu0 %9880  ;;  %28058 = vst [vmem:[#allocation138_spill] sm:$0xff] %v25448_v40  ;;  %10597 = vadd.xlane.f32.xlu1 %v10596_v57  ;;  %v25455_v28 = vpop.f32.mrb[132].mxu1  ;;  %v25469_v57 = vadd.f32 %v25311_v46, %v6722_v32 }
 0x599   : > { %v20144_v30 = vpop.f32.mrb[117].mxu0  ;;  %v25457_v13 = vpop.xlane.xlu1 %9889  ;;  %28059 = vst [vmem:[#allocation139_spill] sm:$0xff] %v25460_v17  ;;  %v10059_v46 = vsel %vm9755_vm3, %v25460_v17, -inf }
 0x59a   : > { %v20102_v16 = vpop.f32.mrb[133].mxu1  ;;  %v25464_v61 = vpop.f32.mrb[118].mxu0  ;;  %28061 = vst [vmem:[#allocation141_spill] sm:$0xff] %v25469_v57 }
 0x59b   : > { %v25462_v4 = vpop.f32.mrb[134].mxu1  ;;  %28060 = vst [vmem:[#allocation140_spill] sm:$0xff] %v25464_v61  ;;  %v20145_v40 = vpop.f32.mrb[119].mxu0  ;;  %9982 = vmax.xlane.f32.xlu0 %v9981_v39  ;;  %v10150_v16 = vsub.f32 %v24673_v19, %v25301_v22  ;;  %v10286_v19 = vmul.f32 1.442695, %v10149_v21  ;;  %v10169_v22 = vsub.f32 %v24677_v29, %v25309_v38  ;;  %v6697_v29 = vld [vmem:[%s27560_s5 + $0x278] sm:$0xff] }
 0x59c   : > { %v25471_v30 = vpop.xlane.xlu0 %9814  ;;  %v20103_v7 = vpop.f32.mrb[135].mxu1  ;;  %9991 = vmax.xlane.f32.xlu1 %v9990_v54  ;;  %v10068_v54 = vsel %vm9755_vm3, %v25469_v57, -inf }
 0x59d   : > { %v25477_v2 = vpop.xlane.xlu1 %9823  ;;  %v25483_v40 = vpop.eup %22353  ;;  %v10288_v53 = vmul.f32 1.442695, %v10150_v16  ;;  %22361 = vpow2.f32 %v10286_v19 }
 0x59e   : > { %28062 = vst [vmem:[#allocation142_spill] sm:$0xff] %v25483_v40  ;;  %v25491_v7 = vpop.eup %22355 }
 0x59f   : > { %v25487_v39 = vpop.f32.mrb[120].mxu0  ;;  %10060 = vmax.xlane.f32.xlu0 %v10059_v46  ;;  %28064 = vst [vmem:[#allocation144_spill] sm:$0xff] %v25491_v7  ;;  %v10172_v46 = vsub.f32 %v24691_v36, %v25321_v6  ;;  %v25507_v61 = vpop.eup %22357  ;;  %v10548_v36 = vsel %vm9755_vm3, %v25491_v7, 0.0  ;;  %22363 = vpow2.f32 %v10288_v53  ;;  %v6726_v53 = vld [vmem:[%s27560_s5 + $0x360] sm:$0xff] }
 0x5a0   : > { %v25485_v32 = vpop.xlane.xlu0 %9892  ;;  %28063 = vst [vmem:[#allocation143_spill] sm:$0xff] %v25487_v39  ;;  %10069 = vmax.xlane.f32.xlu1 %v10068_v54  ;;  %v25493_v51 = vpop.f32.mrb[136].mxu1  ;;  %v10545_v54 = vsel %vm9755_vm3, %v25483_v40, 0.0  ;;  %28066 = vst [vmem:[#allocation146_spill] sm:$0xff] %v25507_v61  ;;  %v10599_v7 = vsel %vm9755_vm3, %v25507_v61, 0.0 }
 0x5a1   : > { %v20156_v43 = vpop.f32.mrb[121].mxu0  ;;  %v25497_v17 = vpop.xlane.xlu1 %9901 }
 0x5a2   : > { %v20114_v37 = vpop.f32.mrb[137].mxu1  ;;  %v25503_v57 = vpop.f32.mrb[122].mxu0  ;;  %v10326_v43 = vmul.f32 1.442695, %v10169_v22 }
 0x5a3   : > { %v25501_v39 = vpop.f32.mrb[138].mxu1  ;;  %28065 = vst [vmem:[#allocation145_spill] sm:$0xff] %v25503_v57  ;;  %v20157_v38 = vpop.f32.mrb[123].mxu0  ;;  %10546 = vadd.xlane.f32.xlu0 %v10545_v54  ;;  %v6700_v37 = vld [vmem:[%s27560_s5 + $0x290] sm:$0xff]  ;;  %v10332_v54 = vmul.f32 1.442695, %v10172_v46 }
 0x5a4   : > { %v25512_v21 = vpop.xlane.xlu0 %9826  ;;  %v25516_v6 = vpop.eup %22359  ;;  %10549 = vadd.xlane.f32.xlu1 %v10548_v36  ;;  %v25524_v38 = vadd.f32 %v25218_v41, %v6697_v29  ;;  %v25529_v40 = vadd.f32 %v25235_v24, %v6700_v37  ;;  %22365 = vpow2.f32 %v10326_v43 }
 0x5a5   : > { %28067 = vst [vmem:[#allocation147_spill] sm:$0xff] %v25516_v6  ;;  %v20115_v16 = vpop.f32.mrb[139].mxu1  ;;  %v25521_v57 = vpop.xlane.xlu1 %9835  ;;  %v10608_v41 = vsel %vm9755_vm3, %v25516_v6, 0.0  ;;  %22367 = vpow2.f32 %v10332_v54 }
 0x5a6   : > { %28068 = vst [vmem:[#allocation148_spill] sm:$0xff] %v25524_v38  ;;  %28069 = vst [vmem:[#allocation149_spill] sm:$0xff] %v25529_v40  ;;  %v6723_v16 = vld [vmem:[%s27560_s5 + $0x348] sm:$0xff]  ;;  %v9993_v6 = vsel %vm9755_vm3, %v25524_v38, -inf  ;;  %v10002_v43 = vsel %vm9755_vm3, %v25529_v40, -inf }
 0x5a7   : > { %v25536_v19 = vpop.f32.mrb[124].mxu0  ;;  %10600 = vadd.xlane.f32.xlu0 %v10599_v7  ;;  %v25548_v37 = vadd.f32 %v25327_v48, %v6723_v16  ;;  %v10151_v48 = vsub.f32 %v24699_v47, %v25336_v26 }
 0x5a8   : > { %v25534_v36 = vpop.xlane.xlu0 %9904  ;;  %28070 = vst [vmem:[#allocation150_spill] sm:$0xff] %v25536_v19  ;;  %10609 = vadd.xlane.f32.xlu1 %v10608_v41  ;;  %v25543_v22 = vpop.f32.mrb[140].mxu1  ;;  %v25557_v41 = vadd.f32 %v25360_v35, %v6726_v53 }
 0x5a9   : > { %v20168_v24 = vpop.f32.mrb[125].mxu0  ;;  %v25545_v46 = vpop.xlane.xlu1 %9913  ;;  %28071 = vst [vmem:[#allocation151_spill] sm:$0xff] %v25548_v37  ;;  %v10071_v35 = vsel %vm9755_vm3, %v25548_v37, -inf  ;;  %v10290_v26 = vmul.f32 1.442695, %v10151_v48  ;;  %v6701_v48 = vld [vmem:[%s27560_s5 + $0x298] sm:$0xff] }
 0x5aa   : > { %v20126_v29 = vpop.f32.mrb[141].mxu1  ;;  %v25552_v19 = vpop.f32.mrb[126].mxu0  ;;  %28073 = vst [vmem:[#allocation153_spill] sm:$0xff] %v25557_v41  ;;  %v25608_v40 = vadd.f32 %v25241_v56, %v6701_v48  ;;  %v6730_v56 = vld [vmem:[%s27560_s5 + $0x380] sm:$0xff]  ;;  %v10154_v48 = vsub.f32 %v24753_v1, %v25389_v52 }
 0x5ab   : > { %v25550_v7 = vpop.f32.mrb[142].mxu1  ;;  %28072 = vst [vmem:[#allocation152_spill] sm:$0xff] %v25552_v19  ;;  %v20169_v61 = vpop.f32.mrb[127].mxu0  ;;  %9994 = vmax.xlane.f32.xlu0 %v9993_v6  ;;  %v10152_v29 = vsub.f32 %v24712_v42, %v25345_v9  ;;  %v10080_v6 = vsel %vm9755_vm3, %v25557_v41, -inf  ;;  %v10173_v42 = vsub.f32 %v24716_v15, %v25358_v14  ;;  %v10176_v19 = vsub.f32 %v24732_v33, %v25369_v63  ;;  %v6704_v33 = vld [vmem:[%s27560_s5 + $0x2b0] sm:$0xff] }
 0x5ac   : > { %v25559_v24 = vpop.xlane.xlu0 %9838  ;;  %v20127_v54 = vpop.f32.mrb[143].mxu1  ;;  %10003 = vmax.xlane.f32.xlu1 %v10002_v43  ;;  %22369 = vpow2.f32 %v10290_v26  ;;  %28078 = vst [vmem:[#allocation158_spill] sm:$0xff] %v25608_v40  ;;  %v10296_v52 = vmul.f32 1.442695, %v10154_v48 }
 0x5ad   : > { %v25565_v16 = vpop.xlane.xlu1 %9847  ;;  %v25571_v61 = vpop.eup %22361  ;;  %v10292_v37 = vmul.f32 1.442695, %v10152_v29  ;;  %v10334_v63 = vmul.f32 1.442695, %v10173_v42 }
 0x5ae   : > { %28074 = vst [vmem:[#allocation154_spill] sm:$0xff] %v25571_v61  ;;  %v25577_v43 = vpop.eup %22363  ;;  %v10551_v41 = vsel %vm9755_vm3, %v25571_v61, 0.0  ;;  %v6727_v61 = vld [vmem:[%s27560_s5 + $0x368] sm:$0xff] }
 0x5af   : > { %10072 = vmax.xlane.f32.xlu0 %v10071_v35  ;;  %28075 = vst [vmem:[#allocation155_spill] sm:$0xff] %v25577_v43  ;;  %v25591_v38 = vpop.eup %22365  ;;  %v10554_v14 = vsel %vm9755_vm3, %v25577_v43, 0.0  ;;  %22371 = vpow2.f32 %v10292_v37  ;;  %v25613_v43 = vadd.f32 %v25281_v18, %v6704_v33  ;;  %v25630_v42 = vadd.f32 %v25376_v25, %v6727_v61 }
 0x5b0   : > { %v25573_v53 = vpop.xlane.xlu0 %9916  ;;  %10081 = vmax.xlane.f32.xlu1 %v10080_v6  ;;  %v25579_v47 = vpop.f32.mrb[144].mxu1  ;;  %28076 = vst [vmem:[#allocation156_spill] sm:$0xff] %v25591_v38  ;;  %22373 = vpow2.f32 %v10334_v63  ;;  %v10153_v25 = vsub.f32 %v24740_v11, %v25383_v12  ;;  %v10180_v61 = vsub.f32 %v24767_v23, %v25409_v31  ;;  %v10177_v23 = vsub.f32 %v24757_v44, %v25397_v45 }
 0x5b1   : > { %v25583_v9 = vpop.xlane.xlu1 %9925  ;;  %v20138_v54 = vpop.f32.mrb[145].mxu1  ;;  %28079 = vst [vmem:[#allocation159_spill] sm:$0xff] %v25630_v42 }
 0x5b2   : > { %v25587_v35 = vpop.f32.mrb[146].mxu1  ;;  %v25600_v29 = vpop.eup %22367  ;;  %v10294_v12 = vmul.f32 1.442695, %v10153_v25 }
 0x5b3   : > { %v20139_v15 = vpop.f32.mrb[147].mxu1  ;;  %10552 = vadd.xlane.f32.xlu0 %v10551_v41  ;;  %28077 = vst [vmem:[#allocation157_spill] sm:$0xff] %v25600_v29  ;;  %v10611_v41 = vsel %vm9755_vm3, %v25591_v38, 0.0  ;;  %v10620_v26 = vsel %vm9755_vm3, %v25600_v29, 0.0 }
 0x5b4   : > { %v25596_v6 = vpop.xlane.xlu0 %9850  ;;  %10555 = vadd.xlane.f32.xlu1 %v10554_v14  ;;  %v10340_v15 = vmul.f32 1.442695, %v10176_v19 }
 0x5b5   : > { %v25605_v54 = vpop.xlane.xlu1 %9859 }
 0x5b6   : > { %22375 = vpow2.f32 %v10340_v15  ;;  %v10014_v15 = vsel %vm9755_vm3, %v25613_v43, -inf }
 0x5b7   : > { %10612 = vadd.xlane.f32.xlu0 %v10611_v41  ;;  %v10005_v41 = vsel %vm9755_vm3, %v25608_v40, -inf  ;;  %22377 = vpow2.f32 %v10296_v52  ;;  %v6708_v52 = vld [vmem:[%s27560_s5 + $0x2d0] sm:$0xff] }
 0x5b8   : > { %v25618_v14 = vpop.xlane.xlu0 %9928  ;;  %10621 = vadd.xlane.f32.xlu1 %v10620_v26  ;;  %v25625_v19 = vpop.f32.mrb[148].mxu1  ;;  %v25639_v26 = vadd.f32 %v25399_v59, %v6730_v56  ;;  %v10083_v59 = vsel %vm9755_vm3, %v25630_v42, -inf  ;;  %22379 = vpow2.f32 %v10294_v12  ;;  %v6731_v12 = vld [vmem:[%s27560_s5 + $0x388] sm:$0xff] }
 0x5b9   : > { %v25627_v18 = vpop.xlane.xlu1 %9937  ;;  %v20150_v37 = vpop.f32.mrb[149].mxu1 }
 0x5ba   : > { %v25634_v33 = vpop.f32.mrb[150].mxu1  ;;  %28080 = vst [vmem:[#allocation160_spill] sm:$0xff] %v25639_v26  ;;  %v25653_v56 = vpop.eup %22369 }
 0x5bb   : > { %v20151_v63 = vpop.f32.mrb[151].mxu1  ;;  %10006 = vmax.xlane.f32.xlu0 %v10005_v41  ;;  %v10092_v41 = vsel %vm9755_vm3, %v25639_v26, -inf }
 0x5bc   : > { %v25641_v29 = vpop.xlane.xlu0 %9862  ;;  %10015 = vmax.xlane.f32.xlu1 %v10014_v15  ;;  %v25659_v63 = vpop.eup %22371  ;;  %v10348_v15 = vmul.f32 1.442695, %v10180_v61  ;;  %v10342_v61 = vmul.f32 1.442695, %v10177_v23 }
 0x5bd   : > { %v25647_v1 = vpop.xlane.xlu1 %9871  ;;  %28081 = vst [vmem:[#allocation161_spill] sm:$0xff] %v25659_v63  ;;  %v25671_v26 = vpop.eup %22373  ;;  %v10560_v44 = vsel %vm9755_vm3, %v25659_v63, 0.0  ;;  %v25695_v63 = vadd.f32 %v25317_v20, %v6708_v52  ;;  %v10184_v52 = vsub.f32 %v24798_v34, %v25457_v13 }
 0x5be   : > { %28082 = vst [vmem:[#allocation162_spill] sm:$0xff] %v25671_v26  ;;  %22381 = vpow2.f32 %v10348_v15 }
 0x5bf   : > { %10084 = vmax.xlane.f32.xlu0 %v10083_v59  ;;  %v10557_v59 = vsel %vm9755_vm3, %v25653_v56, 0.0  ;;  %22383 = vpow2.f32 %v10342_v61  ;;  %v10356_v13 = vmul.f32 1.442695, %v10184_v52 }
 0x5c0   : > { %v25655_v37 = vpop.xlane.xlu0 %9940  ;;  %10093 = vmax.xlane.f32.xlu1 %v10092_v41  ;;  %v25661_v11 = vpop.f32.mrb[152].mxu1  ;;  %v6705_v41 = vld [vmem:[%s27560_s5 + $0x2b8] sm:$0xff] }
 0x5c1   : > { %v25665_v31 = vpop.xlane.xlu1 %9949  ;;  %v20162_v48 = vpop.f32.mrb[153].mxu1  ;;  %v25688_v40 = vadd.f32 %v25287_v55, %v6705_v41  ;;  %v25711_v41 = vadd.f32 %v25415_v62, %v6731_v12 }
 0x5c2   : > { %v25667_v42 = vpop.f32.mrb[154].mxu1  ;;  %v25680_v45 = vpop.eup %22375 }
 0x5c3   : > { %v20163_v38 = vpop.f32.mrb[155].mxu1  ;;  %10558 = vadd.xlane.f32.xlu0 %v10557_v59  ;;  %28083 = vst [vmem:[#allocation163_spill] sm:$0xff] %v25680_v45  ;;  %28084 = vst [vmem:[#allocation164_spill] sm:$0xff] %v25688_v40  ;;  %v10623_v59 = vsel %vm9755_vm3, %v25671_v26, 0.0  ;;  %v10632_v55 = vsel %vm9755_vm3, %v25680_v45, 0.0  ;;  %v10095_v12 = vsel %vm9755_vm3, %v25711_v41, -inf }
 0x5c4   : > { %v25676_v25 = vpop.xlane.xlu0 %9874  ;;  %10561 = vadd.xlane.f32.xlu1 %v10560_v44  ;;  %v10158_v38 = vsub.f32 %v24784_v10, %v25433_v3  ;;  %v10155_v10 = vsub.f32 %v24774_v5, %v25424_v60  ;;  %28085 = vst [vmem:[#allocation165_spill] sm:$0xff] %v25711_v41  ;;  %v10026_v5 = vsel %vm9755_vm3, %v25695_v63, -inf  ;;  %v25723_v60 = vpop.eup %22377  ;;  %v6709_v41 = vld [vmem:[%s27560_s5 + $0x2d8] sm:$0xff] }
 0x5c5   : > { %v25685_v48 = vpop.xlane.xlu1 %9883  ;;  %28087 = vst [vmem:[#allocation167_spill] sm:$0xff] %v25723_v60 }
 0x5c6   : > { %v10304_v44 = vmul.f32 1.442695, %v10158_v38  ;;  %v10298_v62 = vmul.f32 1.442695, %v10155_v10  ;;  %v10181_v38 = vsub.f32 %v24788_v49, %v25446_v0  ;;  %v6712_v49 = vld [vmem:[%s27560_s5 + $0x2f0] sm:$0xff] }
 0x5c7   : > { %10624 = vadd.xlane.f32.xlu0 %v10623_v59  ;;  %v25754_v26 = vadd.f32 %v25367_v8, %v6712_v49  ;;  %v28093_v8 = vld [vmem:[#allocation33_spill] sm:$0xff] }
 0x5c8   : > { %v25700_v23 = vpop.xlane.xlu0 %9952  ;;  %10633 = vadd.xlane.f32.xlu1 %v10632_v55  ;;  %v25704_v15 = vpop.f32.mrb[156].mxu1  ;;  %v10017_v55 = vsel %vm9755_vm3, %v25688_v40, -inf  ;;  %22385 = vpow2.f32 %v10304_v44  ;;  %v10350_v0 = vmul.f32 1.442695, %v10181_v38  ;;  %v10162_v44 = vsub.f32 %v24815_v58, %v25477_v2 }
 0x5c9   : > { %v25708_v3 = vpop.xlane.xlu1 %9961  ;;  %v20174_v20 = vpop.f32.mrb[157].mxu1  ;;  %22387 = vpow2.f32 %v10298_v62  ;;  %28091 = vst [vmem:[#allocation171_spill] sm:$0xff] %v25754_v26  ;;  %v10159_v58 = vsub.f32 %v24805_v27, %v25471_v30  ;;  %v10188_v49 = vsub.f32 %v28093_v8, %v25497_v17 }
 0x5ca   : > { %v25715_v59 = vpop.f32.mrb[158].mxu1  ;;  %v25731_v20 = vpop.eup %22379  ;;  %22389 = vpow2.f32 %v10356_v13  ;;  %v25765_v13 = vadd.f32 %v25325_v50, %v6709_v41  ;;  %v28095_v50 = vld [vmem:[#allocation31_spill] sm:$0xff] }
 0x5cb   : > { %28086 = vst [vmem:[#allocation166_spill] sm:$0xff] %v25715_v59  ;;  %v20175_v61 = vpop.f32.mrb[159].mxu1  ;;  %10018 = vmax.xlane.f32.xlu0 %v10017_v55  ;;  %28088 = vst [vmem:[#allocation168_spill] sm:$0xff] %v25731_v20  ;;  %v10563_v52 = vsel %vm9755_vm3, %v25731_v20, 0.0  ;;  %22391 = vpow2.f32 %v10350_v0  ;;  %v10038_v0 = vsel %vm9755_vm3, %v25754_v26, -inf  ;;  %v10185_v30 = vsub.f32 %v28095_v50, %v25485_v32  ;;  %v6716_v32 = vld [vmem:[%s27560_s5 + $0x310] sm:$0xff] }
 0x5cc   : > { %v25719_v45 = vpop.xlane.xlu0 %9886  ;;  %10027 = vmax.xlane.f32.xlu1 %v10026_v5  ;;  %v10566_v61 = vsel %vm9755_vm3, %v25723_v60, 0.0  ;;  %v25737_v5 = vpop.eup %22381  ;;  %28092 = vst [vmem:[#allocation172_spill] sm:$0xff] %v25765_v13  ;;  %v10306_v27 = vmul.f32 1.442695, %v10159_v58  ;;  %v10364_v17 = vmul.f32 1.442695, %v10188_v49 }
 0x5cd   : > { %v25727_v34 = vpop.xlane.xlu1 %9895  ;;  %28089 = vst [vmem:[#allocation169_spill] sm:$0xff] %v25737_v5  ;;  %v10644_v38 = vsel %vm9755_vm3, %v25737_v5, 0.0  ;;  %v10358_v58 = vmul.f32 1.442695, %v10185_v30  ;;  %v28098_v49 = vld [vmem:[#allocation55_spill] sm:$0xff] }
 0x5ce   : > { %v10166_v50 = vsub.f32 %v28098_v49, %v25521_v57  ;;  %v28102_v57 = vld [vmem:[#allocation63_spill] sm:$0xff]  ;;  %v28103_v49 = vld [vmem:[#allocation128_spill] sm:$0xff] }
 0x5cf   : > { %10096 = vmax.xlane.f32.xlu0 %v10095_v12  ;;  %v25748_v12 = vpop.eup %22383  ;;  %v10163_v30 = vsub.f32 %v28102_v57, %v25512_v21 }
 0x5d0   : > { %v25733_v55 = vpop.xlane.xlu0 %9964  ;;  %10567 = vadd.xlane.f32.xlu1 %v10566_v61  ;;  %28090 = vst [vmem:[#allocation170_spill] sm:$0xff] %v25748_v12  ;;  %v10312_v61 = vmul.f32 1.442695, %v10162_v44  ;;  %v10029_v44 = vsel %vm9755_vm3, %v25765_v13, -inf  ;;  %v28100_v13 = vld [vmem:[#allocation132_spill] sm:$0xff] }
 0x5d1   : > { %v25742_v10 = vpop.xlane.xlu1 %9973  ;;  %v25806_v59 = vadd.f32 %v28100_v13, %v6716_v32  ;;  %v10320_v26 = vmul.f32 1.442695, %v10166_v50  ;;  %v28105_v13 = vld [vmem:[#allocation64_spill] sm:$0xff]  ;;  %v10314_v21 = vmul.f32 1.442695, %v10163_v30  ;;  %v6720_v30 = vld [vmem:[%s27560_s5 + $0x330] sm:$0xff] }
 0x5d2   : > { %22393 = vpow2.f32 %v10312_v61  ;;  %v10192_v32 = vsub.f32 %v28105_v13, %v25545_v46 }
 0x5d3   : > { %10564 = vadd.xlane.f32.xlu0 %v10563_v52  ;;  %v10635_v52 = vsel %vm9755_vm3, %v25748_v12, 0.0  ;;  %22395 = vpow2.f32 %v10306_v27  ;;  %28101 = vst [vmem:[#allocation132_spill] sm:$0xff] %v25806_v59 }
 0x5d4   : > { %v25756_v62 = vpop.xlane.xlu0 %9898  ;;  %10645 = vadd.xlane.f32.xlu1 %v10644_v38  ;;  %v25775_v38 = vpop.eup %22385  ;;  %22397 = vpow2.f32 %v10364_v17  ;;  %v10372_v46 = vmul.f32 1.442695, %v10192_v32 }
 0x5d5   : > { %v25762_v2 = vpop.xlane.xlu1 %9907  ;;  %28094 = vst [vmem:[#allocation33_spill] sm:$0xff] %v25775_v38  ;;  %v25783_v8 = vpop.eup %22387  ;;  %v10578_v5 = vsel %vm9755_vm3, %v25775_v38, 0.0  ;;  %v6713_v38 = vld [vmem:[%s27560_s5 + $0x2f8] sm:$0xff]  ;;  %22399 = vpow2.f32 %v10358_v58  ;;  %v10050_v58 = vsel %vm9755_vm3, %v25806_v59, -inf }
 0x5d6   : > { %28096 = vst [vmem:[#allocation31_spill] sm:$0xff] %v25783_v8  ;;  %22401 = vpow2.f32 %v10320_v26  ;;  %v28115_v59 = vld [vmem:[#allocation68_spill] sm:$0xff] }
 0x5d7   : > { %10636 = vadd.xlane.f32.xlu0 %v10635_v52  ;;  %22403 = vpow2.f32 %v10314_v21  ;;  %v10196_v20 = vsub.f32 %v28115_v59, %v25583_v9 }
 0x5d8   : > { %v25771_v60 = vpop.xlane.xlu0 %9976  ;;  %10039 = vmax.xlane.f32.xlu1 %v10038_v0  ;;  %v25789_v0 = vpop.eup %22389  ;;  %22405 = vpow2.f32 %v10372_v46 }
 0x5d9   : > { %v25779_v41 = vpop.xlane.xlu1 %9985  ;;  %28097 = vst [vmem:[#allocation173_spill] sm:$0xff] %v25789_v0  ;;  %v25800_v12 = vpop.eup %22391  ;;  %v10656_v27 = vsel %vm9755_vm3, %v25789_v0, 0.0  ;;  %v10380_v9 = vmul.f32 1.442695, %v10196_v20 }
 0x5da   : > { %28099 = vst [vmem:[#allocation55_spill] sm:$0xff] %v25800_v12 }
 0x5db   : > { %10030 = vmax.xlane.f32.xlu0 %v10029_v44  ;;  %v10569_v44 = vsel %vm9755_vm3, %v25783_v8, 0.0  ;;  %v25817_v8 = vadd.f32 %v28103_v49, %v6713_v38  ;;  %v28107_v38 = vld [vmem:[#allocation57_spill] sm:$0xff] }
 0x5dc   : > { %v25785_v52 = vpop.xlane.xlu0 %9910  ;;  %10579 = vadd.xlane.f32.xlu1 %v10578_v5  ;;  %v10189_v57 = vsub.f32 %v28107_v38, %v25534_v36 }
 0x5dd   : > { %v25794_v61 = vpop.xlane.xlu1 %9919  ;;  %28104 = vst [vmem:[#allocation63_spill] sm:$0xff] %v25817_v8  ;;  %v10041_v49 = vsel %vm9755_vm3, %v25817_v8, -inf  ;;  %v25858_v8 = vadd.f32 %v25455_v28, %v6720_v30 }
 0x5de   : > { %v10366_v26 = vmul.f32 1.442695, %v10189_v57 }
 0x5df   : > { %10570 = vadd.xlane.f32.xlu0 %v10569_v44  ;;  %v10647_v44 = vsel %vm9755_vm3, %v25800_v12, 0.0 }
 0x5e0   : > { %v25808_v5 = vpop.xlane.xlu0 %9988  ;;  %10657 = vadd.xlane.f32.xlu1 %v10656_v27  ;;  %v25827_v27 = vpop.eup %22393  ;;  %22407 = vpow2.f32 %v10366_v26  ;;  %v10062_v26 = vsel %vm9755_vm3, %v25858_v8, -inf }
 0x5e1   : > { %v25814_v17 = vpop.xlane.xlu1 %9997  ;;  %28106 = vst [vmem:[#allocation128_spill] sm:$0xff] %v25827_v27  ;;  %v25835_v13 = vpop.eup %22395 }
 0x5e2   : > { %28108 = vst [vmem:[#allocation64_spill] sm:$0xff] %v25835_v13  ;;  %v25839_v0 = vpop.eup %22397 }
 0x5e3   : > { %10648 = vadd.xlane.f32.xlu0 %v10647_v44  ;;  %v10590_v44 = vsel %vm9755_vm3, %v25827_v27, 0.0  ;;  %28109 = vst [vmem:[#allocation57_spill] sm:$0xff] %v25839_v0  ;;  %v25852_v12 = vpop.eup %22399  ;;  %v6717_v27 = vld [vmem:[%s27560_s5 + $0x318] sm:$0xff]  ;;  %v10668_v21 = vsel %vm9755_vm3, %v25839_v0, 0.0 }
 0x5e4   : > { %v25823_v40 = vpop.xlane.xlu0 %9922  ;;  %10051 = vmax.xlane.f32.xlu1 %v10050_v58  ;;  %v28110_v58 = vld [vmem:[#allocation47_spill] sm:$0xff]  ;;  %v10659_v30 = vsel %vm9755_vm3, %v25852_v12, 0.0 }
 0x5e5   : > { %v25831_v50 = vpop.xlane.xlu1 %9931  ;;  %v10170_v38 = vsub.f32 %v28110_v58, %v25565_v16  ;;  %28111 = vst [vmem:[#allocation47_spill] sm:$0xff] %v25852_v12  ;;  %v28112_v16 = vld [vmem:[#allocation6_spill] sm:$0xff]  ;;  %v6721_v12 = vld [vmem:[%s27560_s5 + $0x338] sm:$0xff] }
 0x5e6   : > { %v10167_v57 = vsub.f32 %v28112_v16, %v25559_v24 }
 0x5e7   : > { %10042 = vmax.xlane.f32.xlu0 %v10041_v49  ;;  %v10581_v49 = vsel %vm9755_vm3, %v25835_v13, 0.0  ;;  %v10328_v13 = vmul.f32 1.442695, %v10170_v38 }
 0x5e8   : > { %v25844_v36 = vpop.xlane.xlu0 %10000  ;;  %10591 = vadd.xlane.f32.xlu1 %v10590_v44  ;;  %v28113_v44 = vld [vmem:[#allocation133_spill] sm:$0xff]  ;;  %v10322_v24 = vmul.f32 1.442695, %v10167_v57  ;;  %v6724_v57 = vld [vmem:[%s27560_s5 + $0x350] sm:$0xff] }
 0x5e9   : > { %v25846_v32 = vpop.xlane.xlu1 %10009  ;;  %v25867_v58 = vadd.f32 %v28113_v44, %v6717_v27  ;;  %v28117_v27 = vld [vmem:[#allocation49_spill] sm:$0xff]  ;;  %22409 = vpow2.f32 %v10328_v13 }
 0x5ea   : > { %22411 = vpow2.f32 %v10322_v24 }
 0x5eb   : > { %10582 = vadd.xlane.f32.xlu0 %v10581_v49  ;;  %28114 = vst [vmem:[#allocation6_spill] sm:$0xff] %v25867_v58  ;;  %v25877_v49 = vpop.eup %22401  ;;  %v10053_v59 = vsel %vm9755_vm3, %v25867_v58, -inf  ;;  %22413 = vpow2.f32 %v10380_v9 }
 0x5ec   : > { %10669 = vadd.xlane.f32.xlu1 %v10668_v21  ;;  %v25871_v28 = vpop.xlane.xlu0 %9934  ;;  %28116 = vst [vmem:[#allocation133_spill] sm:$0xff] %v25877_v49  ;;  %v10193_v21 = vsub.f32 %v28117_v27, %v25573_v53  ;;  %v25885_v16 = vpop.eup %22403  ;;  %v10602_v44 = vsel %vm9755_vm3, %v25877_v49, 0.0  ;;  %v25906_v49 = vadd.f32 %v25493_v51, %v6724_v57 }
 0x5ed   : > { %v25864_v46 = vpop.xlane.xlu1 %9943  ;;  %28118 = vst [vmem:[#allocation68_spill] sm:$0xff] %v25885_v16 }
 0x5ee   : > { %v10374_v20 = vmul.f32 1.442695, %v10193_v21  ;;  %28122 = vst [vmem:[#allocation174_spill] sm:$0xff] %v25906_v49 }
 0x5ef   : > { %10660 = vadd.xlane.f32.xlu0 %v10659_v30  ;;  %v25889_v30 = vpop.eup %22405 }
 0x5f0   : > { %10063 = vmax.xlane.f32.xlu1 %v10062_v26  ;;  %28119 = vst [vmem:[#allocation49_spill] sm:$0xff] %v25889_v30  ;;  %v25894_v53 = vpop.xlane.xlu0 %10012  ;;  %v28120_v26 = vld [vmem:[#allocation69_spill] sm:$0xff]  ;;  %v25900_v0 = vpop.eup %22407  ;;  %v10680_v24 = vsel %vm9755_vm3, %v25889_v30, 0.0  ;;  %22415 = vpow2.f32 %v10374_v20  ;;  %v10074_v20 = vsel %vm9755_vm3, %v25906_v49, -inf }
 0x5f1   : > { %v25881_v38 = vpop.xlane.xlu1 %10021  ;;  %v10174_v27 = vsub.f32 %v28120_v26, %v25605_v54  ;;  %28121 = vst [vmem:[#allocation69_spill] sm:$0xff] %v25900_v0  ;;  %v28123_v54 = vld [vmem:[#allocation67_spill] sm:$0xff]  ;;  %v10671_v57 = vsel %vm9755_vm3, %v25900_v0, 0.0  ;;  %v6725_v0 = vld [vmem:[%s27560_s5 + $0x358] sm:$0xff] }
 0x5f2   : > { %v10171_v21 = vsub.f32 %v28123_v54, %v25596_v6  ;;  %v28127_v6 = vld [vmem:[#allocation70_spill] sm:$0xff] }
 0x5f3   : > { %10054 = vmax.xlane.f32.xlu0 %v10053_v59  ;;  %v10593_v59 = vsel %vm9755_vm3, %v25885_v16, 0.0  ;;  %v10336_v26 = vmul.f32 1.442695, %v10174_v27  ;;  %v28125_v16 = vld [vmem:[#allocation73_spill] sm:$0xff] }
 0x5f4   : > { %10603 = vadd.xlane.f32.xlu1 %v10602_v44  ;;  %v25915_v44 = vadd.f32 %v25462_v4, %v6721_v12  ;;  %v10200_v58 = vsub.f32 %v28125_v16, %v25627_v18  ;;  %v25919_v51 = vpop.xlane.xlu0 %9946  ;;  %v10330_v4 = vmul.f32 1.442695, %v10171_v21 }
 0x5f5   : > { %v10526_v13 = vpop.xlane.xlu1 %10525  ;;  %22417 = vpow2.f32 %v10336_v26  ;;  %v28130_v26 = vld [vmem:[#allocation74_spill] sm:$0xff] }
 0x5f6   : > { %28124 = vst [vmem:[#allocation67_spill] sm:$0xff] %v25915_v44  ;;  %v10388_v18 = vmul.f32 1.442695, %v10200_v58  ;;  %v10065_v16 = vsel %vm9755_vm3, %v25915_v44, -inf  ;;  %22419 = vpow2.f32 %v10330_v4  ;;  %v28144_v44 = vld [vmem:[#allocation116_spill] sm:$0xff] }
 0x5f7   : > { %10594 = vadd.xlane.f32.xlu0 %v10593_v59  ;;  %v25925_v59 = vpop.eup %22409 }
 0x5f8   : > { %10681 = vadd.xlane.f32.xlu1 %v10680_v24  ;;  %28126 = vst [vmem:[#allocation73_spill] sm:$0xff] %v25925_v59  ;;  %v10197_v24 = vsub.f32 %v28127_v6, %v25618_v14  ;;  %v25933_v27 = vpop.eup %22411  ;;  %v10614_v54 = vsel %vm9755_vm3, %v25925_v59, 0.0  ;;  %v6728_v14 = vld [vmem:[%s27560_s5 + $0x370] sm:$0xff]  ;;  %22421 = vpow2.f32 %v10388_v18  ;;  %v10178_v6 = vsub.f32 %v28130_v26, %v25647_v1  ;;  %v28133_v18 = vld [vmem:[#allocation72_spill] sm:$0xff] }
 0x5f9   : > { %v25912_v9 = vpop.xlane.xlu1 %9955  ;;  %28128 = vst [vmem:[#allocation70_spill] sm:$0xff] %v25933_v27  ;;  %22423 = vrcp.f32 %v10526_v13  ;;  %v25961_v59 = vadd.f32 %v25501_v39, %v6725_v0 }
 0x5fa   : > { %v10382_v21 = vmul.f32 1.442695, %v10197_v24  ;;  %v25954_v24 = vadd.f32 %v25543_v22, %v6728_v14  ;;  %v28135_v22 = vld [vmem:[#allocation78_spill] sm:$0xff] }
 0x5fb   : > { %10672 = vadd.xlane.f32.xlu0 %v10671_v57  ;;  %v25937_v57 = vpop.eup %22413  ;;  %28134 = vst [vmem:[#allocation72_spill] sm:$0xff] %v25961_v59  ;;  %v10204_v14 = vsub.f32 %v28135_v22, %v25665_v31 }
 0x5fc   : > { %10075 = vmax.xlane.f32.xlu1 %v10074_v20  ;;  %28129 = vst [vmem:[#allocation175_spill] sm:$0xff] %v25937_v57  ;;  %v25942_v20 = vpop.xlane.xlu0 %10024  ;;  %v25948_v30 = vpop.eup %22415  ;;  %28132 = vst [vmem:[#allocation176_spill] sm:$0xff] %v25954_v24  ;;  %v10692_v4 = vsel %vm9755_vm3, %v25937_v57, 0.0  ;;  %22425 = vpow2.f32 %v10382_v21 }
 0x5fd   : > { %v25929_v12 = vpop.xlane.xlu1 %10033  ;;  %28131 = vst [vmem:[#allocation74_spill] sm:$0xff] %v25948_v30  ;;  %v10683_v13 = vsel %vm9755_vm3, %v25948_v30, 0.0 }
 0x5ff   : > { %10066 = vmax.xlane.f32.xlu0 %v10065_v16  ;;  %v10605_v16 = vsel %vm9755_vm3, %v25933_v27, 0.0  ;;  %v10344_v27 = vmul.f32 1.442695, %v10178_v6 }
 0x600   : > { %10615 = vadd.xlane.f32.xlu1 %v10614_v54  ;;  %v10175_v54 = vsub.f32 %v28133_v18, %v25641_v29  ;;  %v25971_v29 = vpop.eup %22417  ;;  %v10396_v18 = vmul.f32 1.442695, %v10204_v14 }
 0x601   : > { %v10532_v58 = vpop.xlane.xlu1 %10531  ;;  %28137 = vst [vmem:[#allocation78_spill] sm:$0xff] %v25971_v29  ;;  %v25981_v22 = vpop.eup %22419 }
 0x602   : > { %v10338_v6 = vmul.f32 1.442695, %v10175_v54  ;;  %v25985_v57 = vpop.eup %22421 }
 0x603   : > { %10606 = vadd.xlane.f32.xlu0 %v10605_v16  ;;  %v28136_v16 = vld [vmem:[#allocation75_spill] sm:$0xff]  ;;  %v22424_v14 = vpop.eup %22423 }
 0x604   : > { %10693 = vadd.xlane.f32.xlu1 %v10692_v4  ;;  %v10529_v1 = vpop.xlane.xlu0 %10528  ;;  %v10201_v21 = vsub.f32 %v28136_v16, %v25655_v37  ;;  %v10086_v4 = vsel %vm9755_vm3, %v25954_v24, -inf  ;;  %v10077_v37 = vsel %vm9755_vm3, %v25961_v59, -inf  ;;  %28139 = vst [vmem:[#allocation75_spill] sm:$0xff] %v25981_v22  ;;  %v10626_v16 = vsel %vm9755_vm3, %v25971_v29, 0.0  ;;  %v28143_v59 = vld [vmem:[#allocation110_spill] sm:$0xff] }
 0x605   : > { %22427 = vrcp.f32 %v10529_v1  ;;  %v10574_v26 = vpop.xlane.xlu1 %10573  ;;  %v28138_v1 = vld [vmem:[#allocation79_spill] sm:$0xff]  ;;  %v11036_v24 = vmul.f32 %v22424_v14, %v28143_v59 }
 0x606   : > { %v10182_v39 = vsub.f32 %v28138_v1, %v25685_v48  ;;  %22429 = vpow2.f32 %v10344_v27  ;;  %28140 = vst [vmem:[#allocation79_spill] sm:$0xff] %v25985_v57  ;;  %v6732_v48 = vld [vmem:[%s27560_s5 + $0x390] sm:$0xff]  ;;  %v25994_v1 = vpop.eup %22425 }
 0x607   : > { %10684 = vadd.xlane.f32.xlu0 %v10683_v13  ;;  %v10390_v13 = vmul.f32 1.442695, %v10201_v21  ;;  %22431 = vpow2.f32 %v10338_v6  ;;  %28141 = vst [vmem:[#allocation177_spill] sm:$0xff] %v25994_v1  ;;  %v6729_v21 = vld [vmem:[%s27560_s5 + $0x378] sm:$0xff]  ;;  %v26004_v29 = vadd.f32 %v25579_v47, %v6732_v48  ;;  %v10704_v6 = vsel %vm9755_vm3, %v25985_v57, 0.0 }
 0x608   : > { %10087 = vmax.xlane.f32.xlu1 %v10086_v4  ;;  %v25975_v0 = vpop.xlane.xlu0 %9958  ;;  %v10352_v54 = vmul.f32 1.442695, %v10182_v39  ;;  %22433 = vpow2.f32 %v10396_v18  ;;  %v10617_v39 = vsel %vm9755_vm3, %v25981_v22, 0.0 }
 0x609   : > { %v25977_v31 = vpop.xlane.xlu1 %9967  ;;  %22435 = vpow2.f32 %v10390_v13  ;;  %v10695_v13 = vsel %vm9755_vm3, %v25994_v1, 0.0 }
 0x60a   : > { %22437 = vpow2.f32 %v10352_v54  ;;  %v28146_v54 = vld [vmem:[#allocation85_spill] sm:$0xff] }
 0x60b   : > { %10078 = vmax.xlane.f32.xlu0 %v10077_v37  ;;  %v28142_v37 = vld [vmem:[#allocation83_spill] sm:$0xff]  ;;  %22439 = vrcp.f32 %v10532_v58  ;;  %v10186_v59 = vsub.f32 %v28146_v54, %v25727_v34 }
 0x60c   : > { %10627 = vadd.xlane.f32.xlu1 %v10626_v16  ;;  %v25990_v27 = vpop.xlane.xlu0 %10036  ;;  %v10208_v30 = vsub.f32 %v28142_v37, %v25708_v3  ;;  %v26011_v3 = vadd.f32 %v25550_v7, %v6729_v21  ;;  %v28145_v37 = vld [vmem:[#allocation77_spill] sm:$0xff]  ;;  %22441 = vrcp.f32 %v10574_v26  ;;  %v10098_v7 = vsel %vm9755_vm3, %v26004_v29, -inf }
 0x60d   : > { %v25992_v4 = vpop.xlane.xlu1 %10045  ;;  %v10179_v22 = vsub.f32 %v28145_v37, %v25676_v25  ;;  %v28148_v21 = vld [vmem:[#allocation81_spill] sm:$0xff]  ;;  %v28154_v37 = vld [vmem:[#allocation90_spill] sm:$0xff] }
 0x60e   : > { %v10404_v48 = vmul.f32 1.442695, %v10208_v30  ;;  %v10205_v30 = vsub.f32 %v28148_v21, %v25700_v23  ;;  %v10089_v26 = vsel %vm9755_vm3, %v26011_v3, -inf }
 0x60f   : > { %v22428_v16 = vpop.eup %22427  ;;  %10618 = vadd.xlane.f32.xlu0 %v10617_v39  ;;  %v10346_v58 = vmul.f32 1.442695, %v10179_v22  ;;  %v28149_v39 = vld [vmem:[#allocation27_spill] sm:$0xff]  ;;  %v28152_v22 = vld [vmem:[#allocation82_spill] sm:$0xff] }
 0x610   : > { %v11037_v18 = vmul.f32 %v22428_v16, %v28144_v44  ;;  %10705 = vadd.xlane.f32.xlu1 %v10704_v6  ;;  %v10535_v49 = vpop.xlane.xlu0 %10534  ;;  %v26023_v14 = vpop.eup %22429  ;;  %v10183_v23 = vsub.f32 %v28152_v22, %v25719_v45  ;;  %v6733_v45 = vld [vmem:[%s27560_s5 + $0x398] sm:$0xff] }
 0x611   : > { %v26015_v47 = vpop.xlane.xlu1 %10537  ;;  %22443 = vrcp.f32 %v10535_v49  ;;  %28147 = vst [vmem:[#allocation83_spill] sm:$0xff] %v26023_v14  ;;  %v28150_v49 = vmov 0.0   ;;  %v26035_v16 = vpop.eup %22431  ;;  %v10638_v6 = vsel %vm9755_vm3, %v26023_v14, 0.0 }
 0x612   : > { %v11164_v44 = vpack.c.bf16 %v11037_v18, %v11036_v24  ;;  %v10360_v24 = vmul.f32 1.442695, %v10186_v59  ;;  %28151 = vst [vmem:[#allocation110_spill] sm:$0xff] %v26035_v16  ;;  %v26041_v18 = vpop.eup %22433  ;;  %v10398_v59 = vmul.f32 1.442695, %v10205_v30 }
 0x613   : > { %10696 = vadd.xlane.f32.xlu0 %v10695_v13  ;;  %28153 = vst [vmem:[#allocation116_spill] sm:$0xff] %v26041_v18  ;;  %v10190_v13 = vsub.f32 %v28154_v37, %v25762_v2  ;;  %v26047_v54 = vpop.eup %22435  ;;  %v10354_v21 = vmul.f32 1.442695, %v10183_v23  ;;  %v28159_v23 = vld [vmem:[#allocation88_spill] sm:$0xff] }
 0x614   : > { %10099 = vmax.xlane.f32.xlu1 %v10098_v7  ;;  %20179 = vmatmul.mubr.msk.bf16.vlgmr.msra.gmra.mrb[128].mxu0 %vm9755_vm3, %v11164_v44  ;;  %v10577_v25 = vpop.xlane.xlu0 %10576  ;;  %28155 = vst [vmem:[#allocation77_spill] sm:$0xff] %v26047_v54  ;;  %v26051_v7 = vpop.eup %22437  ;;  %v10212_v1 = vsub.f32 %v28159_v23, %v25742_v10  ;;  %v28164_v10 = vld [vmem:[#allocation123_spill] sm:$0xff] }
 0x615   : > { %20189 = vmatpush3.xpose.msk.msra.mxu0 %vm9755_vm3, %v28149_v39  ;;  %22445 = vrcp.f32 %v10577_v25  ;;  %v10586_v34 = vpop.xlane.xlu1 %10585  ;;  %20190 = vmatprep.mubr.msk.bf16.mxu0 %vm22908_vm1, %v28150_v49  ;;  %28156 = vst [vmem:[#allocation85_spill] sm:$0xff] %v26051_v7  ;;  %v10629_v25 = vsel %vm9755_vm3, %v26035_v16, 0.0  ;;  %v22440_v2 = vpop.eup %22439  ;;  %v28157_v39 = vld [vmem:[#allocation86_spill] sm:$0xff]  ;;  %v10368_v22 = vmul.f32 1.442695, %v10190_v13  ;;  %v10707_v13 = vsel %vm9755_vm3, %v26047_v54, 0.0 }
 0x616   : > { %22447 = vpow2.f32 %v10404_v48  ;;  %20200 = vmatprep.subr.mxu0 %v28150_v49  ;;  %v22442_v30 = vpop.eup %22441  ;;  %v28180_v54 = vld [vmem:[#allocation130_spill] sm:$0xff] }
 0x617   : > { %10090 = vmax.xlane.f32.xlu0 %v10089_v26  ;;  %22449 = vpow2.f32 %v10346_v58  ;;  %v10209_v26 = vsub.f32 %v28157_v39, %v25733_v55  ;;  %v10716_v58 = vsel %vm9755_vm3, %v26041_v18, 0.0  ;;  %v28160_v55 = vld [vmem:[#allocation114_spill] sm:$0xff]  ;;  %v28161_v39 = vld [vmem:[#allocation121_spill] sm:$0xff] }
 0x618   : > { %10639 = vadd.xlane.f32.xlu1 %v10638_v6  ;;  %v26045_v48 = vpop.xlane.xlu0 %9970  ;;  %22451 = vpow2.f32 %v10360_v24  ;;  %v26065_v24 = vadd.f32 %v25587_v35, %v6733_v45  ;;  %v10650_v35 = vsel %vm9755_vm3, %v26051_v7, 0.0  ;;  %v28163_v45 = vld [vmem:[#allocation115_spill] sm:$0xff] }
 0x619   : > { %v26049_v44 = vpop.xlane.xlu1 %9979  ;;  %22453 = vpow2.f32 %v10398_v59  ;;  %v10406_v18 = vmul.f32 1.442695, %v10209_v26  ;;  %v26080_v16 = vmul.f32 %v22442_v30, %v28163_v45  ;;  %v28166_v30 = vld [vmem:[#allocation95_spill] sm:$0xff] }
 0x61a   : > { %28158 = vst [vmem:[#allocation81_spill] sm:$0xff] %v26065_v24  ;;  %22455 = vpow2.f32 %v10354_v21 }
 0x61b   : > { %10630 = vadd.xlane.f32.xlu0 %v10629_v25  ;;  %v22444_v37 = vpop.eup %22443  ;;  %v11038_v25 = vmul.f32 %v22440_v2, %v28160_v55  ;;  %22457 = vpow2.f32 %v10368_v22  ;;  %v28165_v55 = vld [vmem:[#allocation87_spill] sm:$0xff]  ;;  %v10412_v22 = vmul.f32 1.442695, %v10212_v1 }
 0x61c   : > { %10717 = vadd.xlane.f32.xlu1 %v10716_v58  ;;  %v26062_v6 = vpop.xlane.xlu0 %10048  ;;  %v11039_v14 = vmul.f32 %v22444_v37, %v28161_v39  ;;  %v10187_v21 = vsub.f32 %v28165_v55, %v25756_v62  ;;  %22459 = vrcp.f32 %v26015_v47  ;;  %v10101_v39 = vsel %vm9755_vm3, %v26065_v24, -inf  ;;  %v28168_v62 = vld [vmem:[#allocation34_spill] sm:$0xff] }
 0x61d   : > { %v26067_v57 = vpop.xlane.xlu1 %10057  ;;  %22461 = vrcp.f32 %v10586_v34 }
 0x61e   : > { %v11165_v37 = vpack.c.bf16 %v11039_v14, %v11038_v25 }
 0x61f   : > { %v22446_v58 = vpop.eup %22445  ;;  %10708 = vadd.xlane.f32.xlu0 %v10707_v13  ;;  %v10194_v13 = vsub.f32 %v28166_v30, %v25794_v61  ;;  %v6734_v61 = vld [vmem:[%s27560_s5 + $0x3a0] sm:$0xff]  ;;  %v28174_v30 = vld [vmem:[#allocation100_spill] sm:$0xff] }
 0x620   : > { %v26077_v59 = vpop.eup %22447  ;;  %v26083_v2 = vmul.f32 %v22446_v58, %v28164_v10  ;;  %10651 = vadd.xlane.f32.xlu1 %v10650_v35  ;;  %v10541_v23 = vpop.xlane.xlu0 %10540  ;;  %20185 = vmatmul.mubr.msk.bf16.vlgmr.msra.gmra.mrb[160].mxu1 %vm9755_vm3, %v11165_v37  ;;  %v10362_v58 = vmul.f32 1.442695, %v10187_v21 }
 0x621   : > { %28162 = vst [vmem:[#allocation27_spill] sm:$0xff] %v26077_v59  ;;  %v26088_v26 = vpop.xlane.xlu1 %10543  ;;  %v26097_v25 = vpop.eup %22449  ;;  %20195 = vmatpush3.xpose.msk.msra.mxu1 %vm9755_vm3, %v28168_v62  ;;  %22463 = vrcp.f32 %v10541_v23  ;;  %v10728_v47 = vsel %vm9755_vm3, %v26077_v59, 0.0  ;;  %20196 = vmatprep.mubr.msk.bf16.mxu1 %vm22908_vm1, %v28150_v49  ;;  %v10376_v45 = vmul.f32 1.442695, %v10194_v13  ;;  %v28171_v23 = vld [vmem:[#allocation138_spill] sm:$0xff]  ;;  %v10198_v62 = vsub.f32 %v28174_v30, %v25831_v50 }
 0x622   : > { %28167 = vst [vmem:[#allocation82_spill] sm:$0xff] %v26097_v25  ;;  %v26103_v1 = vpop.eup %22451  ;;  %22465 = vpow2.f32 %v10406_v18  ;;  %20206 = vmatprep.subr.mxu1 %v28150_v49  ;;  %v10641_v10 = vsel %vm9755_vm3, %v26097_v25, 0.0  ;;  %v26116_v55 = vadd.f32 %v28171_v23, %v6734_v61  ;;  %v28173_v18 = vld [vmem:[#allocation93_spill] sm:$0xff] }
 0x623   : > { %10102 = vmax.xlane.f32.xlu0 %v10101_v39  ;;  %28169 = vst [vmem:[#allocation90_spill] sm:$0xff] %v26103_v1  ;;  %v26113_v37 = vpop.eup %22453  ;;  %v10191_v39 = vsub.f32 %v28173_v18, %v25785_v52  ;;  %v10662_v21 = vsel %vm9755_vm3, %v26103_v1, 0.0  ;;  %v10384_v30 = vmul.f32 1.442695, %v10198_v62 }
 0x624   : > { %10729 = vadd.xlane.f32.xlu1 %v10728_v47  ;;  %v10589_v34 = vpop.xlane.xlu0 %10588  ;;  %28170 = vst [vmem:[#allocation86_spill] sm:$0xff] %v26113_v37  ;;  %28172 = vst [vmem:[#allocation88_spill] sm:$0xff] %v26116_v55  ;;  %v26126_v13 = vpop.eup %22455  ;;  %v10719_v52 = vsel %vm9755_vm3, %v26113_v37, 0.0  ;;  %v10104_v50 = vsel %vm9755_vm3, %v26116_v55, -inf  ;;  %v28179_v37 = vld [vmem:[#allocation122_spill] sm:$0xff] }
 0x625   : > { %22467 = vrcp.f32 %v10589_v34  ;;  %v10598_v35 = vpop.xlane.xlu1 %10597  ;;  %28175 = vst [vmem:[#allocation114_spill] sm:$0xff] %v26126_v13  ;;  %v26130_v61 = vpop.eup %22457  ;;  %v10370_v18 = vmul.f32 1.442695, %v10191_v39  ;;  %v28183_v55 = vld [vmem:[#allocation134_spill] sm:$0xff] }
 0x626   : > { %22469 = vpow2.f32 %v10412_v22  ;;  %28176 = vst [vmem:[#allocation121_spill] sm:$0xff] %v26130_v61  ;;  %v22460_v34 = vpop.eup %22459  ;;  %v10674_v62 = vsel %vm9755_vm3, %v26130_v61, 0.0 }
 0x627   : > { %10642 = vadd.xlane.f32.xlu0 %v10641_v10  ;;  %22471 = vpow2.f32 %v10362_v58  ;;  %v28177_v10 = vld [vmem:[#allocation91_spill] sm:$0xff]  ;;  %v11040_v1 = vmul.f32 %v22460_v34, %v28179_v37  ;;  %v28184_v34 = vld [vmem:[#allocation98_spill] sm:$0xff] }
 0x628   : > { %10663 = vadd.xlane.f32.xlu1 %v10662_v21  ;;  %v26124_v22 = vpop.xlane.xlu0 %9982  ;;  %22473 = vpow2.f32 %v10376_v45  ;;  %v10213_v23 = vsub.f32 %v28177_v10, %v25771_v60  ;;  %v22462_v21 = vpop.eup %22461  ;;  %v10653_v60 = vsel %vm9755_vm3, %v26126_v13, 0.0 }
 0x629   : > { %v26128_v47 = vpop.xlane.xlu1 %9991  ;;  %22475 = vpow2.f32 %v10370_v18 }
 0x62a   : > { %v10414_v10 = vmul.f32 1.442695, %v10213_v23  ;;  %22477 = vpow2.f32 %v10384_v30  ;;  %v10195_v23 = vsub.f32 %v28184_v34, %v25823_v40  ;;  %v6735_v40 = vld [vmem:[%s27560_s5 + $0x3a8] sm:$0xff] }
 0x62b   : > { %10720 = vadd.xlane.f32.xlu0 %v10719_v52  ;;  %v22464_v14 = vpop.eup %22463  ;;  %22479 = vrcp.f32 %v26088_v26  ;;  %v28187_v26 = vld [vmem:[#allocation7_spill] sm:$0xff] }
 0x62c   : > { %10105 = vmax.xlane.f32.xlu1 %v10104_v50  ;;  %v26138_v58 = vpop.xlane.xlu0 %10060  ;;  %v26142_v45 = vpop.eup %22465  ;;  %v11041_v7 = vmul.f32 %v22464_v14, %v28180_v54  ;;  %v28182_v50 = vld [vmem:[#allocation124_spill] sm:$0xff]  ;;  %22481 = vrcp.f32 %v10598_v35 }
 0x62d   : > { %v26140_v59 = vpop.xlane.xlu1 %10069  ;;  %28178 = vst [vmem:[#allocation115_spill] sm:$0xff] %v26142_v45  ;;  %v26153_v25 = vmul.f32 %v22462_v21, %v28182_v50  ;;  %v6736_v21 = vld [vmem:[%s27560_s5 + $0x3b0] sm:$0xff]  ;;  %v10378_v50 = vmul.f32 1.442695, %v10195_v23 }
 0x62e   : > { %v11166_v54 = vpack.c.bf16 %v11041_v7, %v11040_v1 }
 0x62f   : > { %v22468_v39 = vpop.eup %22467  ;;  %10654 = vadd.xlane.f32.xlu0 %v10653_v60  ;;  %v28185_v60 = vld [vmem:[#allocation105_spill] sm:$0xff] }
 0x630   : > { %v26150_v52 = vpop.eup %22469  ;;  %v26156_v37 = vmul.f32 %v22468_v39, %v28183_v55  ;;  %10675 = vadd.xlane.f32.xlu1 %v10674_v62  ;;  %v10547_v14 = vpop.xlane.xlu0 %10546  ;;  %v10202_v61 = vsub.f32 %v28185_v60, %v25864_v46  ;;  %20191 = vmatmul.mubr.msk.bf16.vlgmr.msra.gmra.mrb[132].mxu0 %vm9755_vm3, %v11166_v54  ;;  %v10731_v55 = vsel %vm9755_vm3, %v26142_v45, 0.0  ;;  %v28189_v39 = vld [vmem:[#allocation94_spill] sm:$0xff] }
 0x631   : > { %28181 = vst [vmem:[#allocation123_spill] sm:$0xff] %v26150_v52  ;;  %v26161_v18 = vpop.xlane.xlu1 %10549  ;;  %v26170_v1 = vpop.eup %22471  ;;  %20201 = vmatpush3.xpose.msk.msra.mxu0 %vm9755_vm3, %v28187_v26  ;;  %22483 = vrcp.f32 %v10547_v14  ;;  %v10740_v46 = vsel %vm9755_vm3, %v26150_v52, 0.0  ;;  %20202 = vmatprep.mubr.msk.bf16.mxu0 %vm22908_vm1, %v28150_v49  ;;  %v10216_v62 = vsub.f32 %v28189_v39, %v25779_v41  ;;  %v28190_v14 = vld [vmem:[#allocation140_spill] sm:$0xff]  ;;  %v28193_v41 = vld [vmem:[#allocation103_spill] sm:$0xff] }
 0x632   : > { %28186 = vst [vmem:[#allocation87_spill] sm:$0xff] %v26170_v1  ;;  %v26179_v35 = vpop.eup %22473  ;;  %22485 = vpow2.f32 %v10414_v10  ;;  %20212 = vmatprep.subr.mxu0 %v28150_v49  ;;  %v26192_v34 = vadd.f32 %v28190_v14, %v6735_v40  ;;  %v10392_v60 = vmul.f32 1.442695, %v10202_v61  ;;  %v10665_v10 = vsel %vm9755_vm3, %v26170_v1, 0.0 }
 0x633   : > { %10732 = vadd.xlane.f32.xlu0 %v10731_v55  ;;  %28188 = vst [vmem:[#allocation95_spill] sm:$0xff] %v26179_v35  ;;  %v26197_v55 = vadd.f32 %v25625_v19, %v6736_v21  ;;  %v10686_v26 = vsel %vm9755_vm3, %v26179_v35, 0.0  ;;  %v10199_v23 = vsub.f32 %v28193_v41, %v25871_v28  ;;  %v10420_v40 = vmul.f32 1.442695, %v10216_v62  ;;  %v28196_v19 = vld [vmem:[#allocation112_spill] sm:$0xff]  ;;  %v6738_v62 = vld [vmem:[%s27560_s5 + $0x3c0] sm:$0xff] }
 0x634   : > { %10741 = vadd.xlane.f32.xlu1 %v10740_v46  ;;  %v10601_v30 = vpop.xlane.xlu0 %10600  ;;  %28191 = vst [vmem:[#allocation34_spill] sm:$0xff] %v26192_v34  ;;  %v10206_v21 = vsub.f32 %v28196_v19, %v25912_v9  ;;  %v10107_v14 = vsel %vm9755_vm3, %v26192_v34, -inf  ;;  %v28199_v35 = vld [vmem:[#allocation142_spill] sm:$0xff]  ;;  %v28200_v34 = vld [vmem:[#allocation143_spill] sm:$0xff] }
 0x635   : > { %22487 = vrcp.f32 %v10601_v30  ;;  %v26188_v54 = vpop.xlane.xlu1 %10609  ;;  %28192 = vst [vmem:[#allocation138_spill] sm:$0xff] %v26197_v55  ;;  %v26205_v30 = vpop.eup %22475  ;;  %v10110_v28 = vsel %vm9755_vm3, %v26197_v55, -inf }
 0x636   : > { %28194 = vst [vmem:[#allocation93_spill] sm:$0xff] %v26205_v30  ;;  %22489 = vpow2.f32 %v10378_v50  ;;  %v26209_v39 = vpop.eup %22477  ;;  %v10386_v50 = vmul.f32 1.442695, %v10199_v23  ;;  %v10400_v7 = vmul.f32 1.442695, %v10206_v21  ;;  %v10677_v1 = vsel %vm9755_vm3, %v26205_v30, 0.0 }
 0x637   : > { %10666 = vadd.xlane.f32.xlu0 %v10665_v10  ;;  %28195 = vst [vmem:[#allocation100_spill] sm:$0xff] %v26209_v39  ;;  %22491 = vpow2.f32 %v10392_v60  ;;  %v22480_v10 = vpop.eup %22479  ;;  %v26231_v23 = vadd.f32 %v28200_v34, %v6738_v62  ;;  %v28203_v21 = vld [vmem:[#allocation146_spill] sm:$0xff] }
 0x638   : > { %10687 = vadd.xlane.f32.xlu1 %v10686_v26  ;;  %v26203_v46 = vpop.xlane.xlu0 %9994  ;;  %v22482_v26 = vpop.eup %22481  ;;  %22493 = vpow2.f32 %v10420_v40  ;;  %v10698_v40 = vsel %vm9755_vm3, %v26209_v39, 0.0  ;;  %v28216_v39 = vld [vmem:[#allocation99_spill] sm:$0xff] }
 0x639   : > { %v26207_v61 = vpop.xlane.xlu1 %10003  ;;  %28201 = vst [vmem:[#allocation122_spill] sm:$0xff] %v26231_v23  ;;  %22495 = vpow2.f32 %v10386_v50  ;;  %v28209_v50 = vld [vmem:[#allocation96_spill] sm:$0xff] }
 0x63a   : > { %22497 = vrcp.f32 %v26161_v18 }
 0x63b   : > { %10108 = vmax.xlane.f32.xlu0 %v10107_v14  ;;  %v22484_v60 = vpop.eup %22483  ;;  %v28198_v14 = vld [vmem:[#allocation131_spill] sm:$0xff]  ;;  %22499 = vpow2.f32 %v10400_v7 }
 0x63c   : > { %10111 = vmax.xlane.f32.xlu1 %v10110_v28  ;;  %v26220_v41 = vpop.xlane.xlu0 %10072  ;;  %v26224_v19 = vpop.eup %22485  ;;  %v11042_v52 = vmul.f32 %v22480_v10, %v28198_v14  ;;  %v11043_v45 = vmul.f32 %v22484_v60, %v28199_v35  ;;  %v28202_v28 = vld [vmem:[#allocation135_spill] sm:$0xff]  ;;  %v28204_v60 = vld [vmem:[#allocation108_spill] sm:$0xff] }
 0x63d   : > { %v26222_v9 = vpop.xlane.xlu1 %10081  ;;  %28197 = vst [vmem:[#allocation91_spill] sm:$0xff] %v26224_v19  ;;  %v26236_v13 = vmul.f32 %v22482_v26, %v28202_v28  ;;  %v10203_v14 = vsub.f32 %v28204_v60, %v25919_v51  ;;  %v10743_v26 = vsel %vm9755_vm3, %v26224_v19, 0.0  ;;  %v6737_v51 = vld [vmem:[%s27560_s5 + $0x3b8] sm:$0xff]  ;;  %v10220_v19 = vsub.f32 %v28216_v39, %v25814_v17 }
 0x63e   : > { %v11167_v35 = vpack.c.bf16 %v11043_v45, %v11042_v52  ;;  %v28207_v52 = vld [vmem:[#allocation9_spill] sm:$0xff] }
 0x63f   : > { %v22488_v55 = vpop.eup %22487  ;;  %10678 = vadd.xlane.f32.xlu0 %v10677_v1  ;;  %v28205_v1 = vld [vmem:[#allocation118_spill] sm:$0xff]  ;;  %v10394_v28 = vmul.f32 1.442695, %v10203_v14 }
 0x640   : > { %v26239_v24 = vmul.f32 %v22488_v55, %v28203_v21  ;;  %10699 = vadd.xlane.f32.xlu1 %v10698_v40  ;;  %v10553_v10 = vpop.xlane.xlu0 %10552  ;;  %v10210_v62 = vsub.f32 %v28205_v1, %v25977_v31  ;;  %20197 = vmatmul.mubr.msk.bf16.vlgmr.msra.gmra.mrb[164].mxu1 %vm9755_vm3, %v11167_v35  ;;  %v26251_v45 = vpop.eup %22489  ;;  %v10116_v31 = vsel %vm9755_vm3, %v26231_v23, -inf  ;;  %v10217_v40 = vsub.f32 %v28209_v50, %v25808_v5  ;;  %v28212_v5 = vld [vmem:[#allocation117_spill] sm:$0xff]  ;;  %v28213_v50 = vld [vmem:[#allocation126_spill] sm:$0xff] }
 0x641   : > { %v10556_v34 = vpop.xlane.xlu1 %10555  ;;  %28206 = vst [vmem:[#allocation130_spill] sm:$0xff] %v26251_v45  ;;  %20207 = vmatpush3.xpose.msk.msra.mxu1 %vm9755_vm3, %v28207_v52  ;;  %22501 = vrcp.f32 %v10553_v10  ;;  %v26260_v18 = vpop.eup %22491  ;;  %20208 = vmatprep.mubr.msk.bf16.mxu1 %vm22908_vm1, %v28150_v49  ;;  %v26272_v35 = vadd.f32 %v25634_v33, %v6737_v51  ;;  %v10689_v60 = vsel %vm9755_vm3, %v26251_v45, 0.0  ;;  %v10207_v14 = vsub.f32 %v28212_v5, %v25975_v0  ;;  %v6739_v51 = vld [vmem:[%s27560_s5 + $0x3c8] sm:$0xff]  ;;  %v6740_v5 = vld [vmem:[%s27560_s5 + $0x3d0] sm:$0xff]  ;;  %v28217_v45 = vld [vmem:[#allocation144_spill] sm:$0xff] }
 0x642   : > { %28208 = vst [vmem:[#allocation124_spill] sm:$0xff] %v26260_v18  ;;  %20218 = vmatprep.subr.mxu1 %v28150_v49  ;;  %v10408_v10 = vmul.f32 1.442695, %v10210_v62  ;;  %v26276_v1 = vpop.eup %22493  ;;  %22503 = vpow2.f32 %v10394_v28 }
 0x643   : > { %10744 = vadd.xlane.f32.xlu0 %v10743_v26  ;;  %28210 = vst [vmem:[#allocation134_spill] sm:$0xff] %v26272_v35  ;;  %28211 = vst [vmem:[#allocation98_spill] sm:$0xff] %v26276_v1  ;;  %v10710_v26 = vsel %vm9755_vm3, %v26260_v18, 0.0  ;;  %v26286_v62 = vpop.eup %22495  ;;  %v10113_v0 = vsel %vm9755_vm3, %v26272_v35, -inf  ;;  %v10402_v55 = vmul.f32 1.442695, %v10207_v14 }
 0x644   : > { %10117 = vmax.xlane.f32.xlu1 %v10116_v31  ;;  %v26262_v7 = vpop.xlane.xlu0 %10612  ;;  %v10422_v31 = vmul.f32 1.442695, %v10217_v40  ;;  %22505 = vpow2.f32 %v10408_v10  ;;  %v10752_v40 = vsel %vm9755_vm3, %v26276_v1, 0.0  ;;  %v28218_v35 = vld [vmem:[#allocation154_spill] sm:$0xff]  ;;  %v10701_v14 = vsel %vm9755_vm3, %v26286_v62, 0.0 }
 0x645   : > { %v26268_v21 = vpop.xlane.xlu1 %10621 }
 0x646   : > { %22507 = vpow2.f32 %v10422_v31  ;;  %v28219_v31 = vld [vmem:[#allocation125_spill] sm:$0xff] }
 0x647   : > { %10690 = vadd.xlane.f32.xlu0 %v10689_v60  ;;  %v10214_v60 = vsub.f32 %v28213_v50, %v26049_v44  ;;  %v28215_v44 = vld [vmem:[#allocation145_spill] sm:$0xff]  ;;  %22509 = vpow2.f32 %v10402_v55  ;;  %v28222_v55 = vld [vmem:[#allocation24_spill] sm:$0xff] }
 0x648   : > { %10711 = vadd.xlane.f32.xlu1 %v10710_v26  ;;  %v26282_v52 = vpop.xlane.xlu0 %10006  ;;  %v22498_v26 = vpop.eup %22497  ;;  %v26305_v50 = vadd.f32 %v28215_v44, %v6739_v51  ;;  %22511 = vrcp.f32 %v10556_v34 }
 0x649   : > { %v26284_v33 = vpop.xlane.xlu1 %10015  ;;  %v26297_v28 = vpop.eup %22499  ;;  %v11044_v30 = vmul.f32 %v22498_v26, %v28217_v45 }
 0x64a   : > { %28214 = vst [vmem:[#allocation105_spill] sm:$0xff] %v26297_v28  ;;  %v10722_v51 = vsel %vm9755_vm3, %v26297_v28, 0.0 }
 0x64b   : > { %10114 = vmax.xlane.f32.xlu0 %v10113_v0  ;;  %v22502_v18 = vpop.eup %22501  ;;  %v10416_v0 = vmul.f32 1.442695, %v10214_v60  ;;  %v10211_v60 = vsub.f32 %v28219_v31, %v26045_v48 }
 0x64c   : > { %10753 = vadd.xlane.f32.xlu1 %v10752_v40  ;;  %v26302_v10 = vpop.xlane.xlu0 %10084  ;;  %v11045_v23 = vmul.f32 %v22502_v18, %v28218_v35  ;;  %v26316_v40 = vadd.f32 %v25661_v11, %v6740_v5  ;;  %v10428_v18 = vmul.f32 1.442695, %v10220_v19  ;;  %v28220_v35 = vld [vmem:[#allocation137_spill] sm:$0xff]  ;;  %v10119_v11 = vsel %vm9755_vm3, %v26305_v50, -inf  ;;  %v26327_v5 = vpop.eup %22503 }
 0x64d   : > { %v26309_v1 = vpop.xlane.xlu1 %10093  ;;  %22513 = vpow2.f32 %v10416_v0  ;;  %v10218_v26 = vsub.f32 %v28220_v35, %v26128_v47  ;;  %28221 = vst [vmem:[#allocation7_spill] sm:$0xff] %v26327_v5  ;;  %v6742_v47 = vld [vmem:[%s27560_s5 + $0x3e0] sm:$0xff]  ;;  %v10713_v0 = vsel %vm9755_vm3, %v26327_v5, 0.0 }
 0x64e   : > { %v11168_v17 = vpack.c.bf16 %v11045_v23, %v11044_v30  ;;  %v10122_v48 = vsel %vm9755_vm3, %v26316_v40, -inf  ;;  %v26333_v30 = vpop.eup %22505  ;;  %v10410_v23 = vmul.f32 1.442695, %v10211_v60 }
 0x64f   : > { %10702 = vadd.xlane.f32.xlu0 %v10701_v14  ;;  %28223 = vst [vmem:[#allocation94_spill] sm:$0xff] %v26333_v30  ;;  %v10424_v44 = vmul.f32 1.442695, %v10218_v26  ;;  %v10734_v60 = vsel %vm9755_vm3, %v26333_v30, 0.0 }
 0x650   : > { %10723 = vadd.xlane.f32.xlu1 %v10722_v51  ;;  %v10559_v39 = vpop.xlane.xlu0 %10558  ;;  %20203 = vmatmul.mubr.msk.bf16.vlgmr.msra.gmra.mrb[136].mxu0 %vm9755_vm3, %v11168_v17  ;;  %v26347_v14 = vpop.eup %22507  ;;  %v28225_v51 = vld [vmem:[#allocation150_spill] sm:$0xff] }
 0x651   : > { %v10562_v45 = vpop.xlane.xlu1 %10561  ;;  %20213 = vmatpush3.xpose.msk.msra.mxu0 %vm9755_vm3, %v28222_v55  ;;  %22515 = vrcp.f32 %v10559_v39  ;;  %20214 = vmatprep.mubr.msk.bf16.mxu0 %vm22908_vm1, %v28150_v49  ;;  %28224 = vst [vmem:[#allocation140_spill] sm:$0xff] %v26347_v14  ;;  %v26350_v17 = vadd.f32 %v28225_v51, %v6742_v47  ;;  %v28227_v39 = vld [vmem:[#allocation136_spill] sm:$0xff]  ;;  %v26362_v55 = vpop.eup %22509 }
 0x652   : > { %20224 = vmatprep.subr.mxu0 %v28150_v49  ;;  %22517 = vpow2.f32 %v10428_v18  ;;  %v10215_v31 = vsub.f32 %v28227_v39, %v26124_v22  ;;  %v28228_v18 = vld [vmem:[#allocation149_spill] sm:$0xff]  ;;  %v10755_v22 = vsel %vm9755_vm3, %v26347_v14, 0.0  ;;  %v22512_v47 = vpop.eup %22511  ;;  %v28232_v14 = vld [vmem:[#allocation155_spill] sm:$0xff] }
 0x653   : > { %10120 = vmax.xlane.f32.xlu0 %v10119_v11  ;;  %28226 = vst [vmem:[#allocation103_spill] sm:$0xff] %v26350_v17  ;;  %22519 = vpow2.f32 %v10410_v23  ;;  %v10222_v26 = vsub.f32 %v28228_v18, %v26207_v61  ;;  %v10128_v23 = vsel %vm9755_vm3, %v26350_v17, -inf  ;;  %v11046_v5 = vmul.f32 %v22512_v47, %v28232_v14 }
 0x654   : > { %10123 = vmax.xlane.f32.xlu1 %v10122_v48  ;;  %v26338_v19 = vpop.xlane.xlu0 %10624  ;;  %v6741_v48 = vld [vmem:[%s27560_s5 + $0x3d8] sm:$0xff]  ;;  %22521 = vpow2.f32 %v10424_v44  ;;  %v28230_v44 = vld [vmem:[#allocation101_spill] sm:$0xff] }
 0x655   : > { %v26342_v34 = vpop.xlane.xlu1 %10633  ;;  %v10221_v18 = vsub.f32 %v28230_v44, %v25844_v36  ;;  %v10432_v30 = vmul.f32 1.442695, %v10222_v26 }
 0x657   : > { %10714 = vadd.xlane.f32.xlu0 %v10713_v0  ;;  %v10418_v0 = vmul.f32 1.442695, %v10215_v31  ;;  %v26371_v51 = vpop.eup %22513  ;;  %v28231_v31 = vld [vmem:[#allocation104_spill] sm:$0xff]  ;;  %v10430_v44 = vmul.f32 1.442695, %v10221_v18  ;;  %v28238_v18 = vld [vmem:[#allocation109_spill] sm:$0xff] }
 0x658   : > { %10735 = vadd.xlane.f32.xlu1 %v10734_v60  ;;  %v26356_v35 = vpop.xlane.xlu0 %10018  ;;  %28229 = vst [vmem:[#allocation112_spill] sm:$0xff] %v26371_v51  ;;  %v26376_v60 = vadd.f32 %v25667_v42, %v6741_v48  ;;  %v10746_v42 = vsel %vm9755_vm3, %v26371_v51, 0.0 }
 0x659   : > { %v26360_v11 = vpop.xlane.xlu1 %10027  ;;  %22523 = vpow2.f32 %v10418_v0  ;;  %v10226_v0 = vsub.f32 %v25613_v43, %v26284_v33  ;;  %v6744_v33 = vld [vmem:[%s27560_s5 + $0x3f0] sm:$0xff] }
 0x65a   : > { %22525 = vrcp.f32 %v10562_v45  ;;  %v10125_v45 = vsel %vm9755_vm3, %v26376_v60, -inf }
 0x65b   : > { %10756 = vadd.xlane.f32.xlu0 %v10755_v22  ;;  %v22516_v39 = vpop.eup %22515  ;;  %v10224_v22 = vsub.f32 %v28231_v31, %v25846_v32  ;;  %v28234_v32 = vld [vmem:[#allocation148_spill] sm:$0xff]  ;;  %22527 = vpow2.f32 %v10432_v30  ;;  %v10228_v31 = vsub.f32 %v28238_v18, %v25881_v38 }
 0x65c   : > { %10129 = vmax.xlane.f32.xlu1 %v10128_v23  ;;  %v26373_v61 = vpop.xlane.xlu0 %10096  ;;  %v11047_v17 = vmul.f32 %v22516_v39, %v25653_v56  ;;  %v10725_v23 = vsel %vm9755_vm3, %v26362_v55, 0.0  ;;  %v26388_v48 = vpop.eup %22517  ;;  %v10219_v14 = vsub.f32 %v28234_v32, %v26203_v46  ;;  %v28236_v46 = vld [vmem:[#allocation8_spill] sm:$0xff] }
 0x65d   : > { %v10568_v28 = vpop.xlane.xlu1 %10567  ;;  %28233 = vst [vmem:[#allocation131_spill] sm:$0xff] %v26388_v48  ;;  %v10436_v47 = vmul.f32 1.442695, %v10224_v22  ;;  %v26399_v39 = vpop.eup %22519  ;;  %v10764_v30 = vsel %vm9755_vm3, %v26388_v48, 0.0 }
 0x65e   : > { %v11169_v36 = vpack.c.bf16 %v11047_v17, %v11046_v5  ;;  %28235 = vst [vmem:[#allocation142_spill] sm:$0xff] %v26399_v39  ;;  %v6743_v5 = vld [vmem:[%s27560_s5 + $0x3e8] sm:$0xff]  ;;  %v26408_v43 = vpop.eup %22521  ;;  %v10426_v22 = vmul.f32 1.442695, %v10219_v14  ;;  %v10737_v32 = vsel %vm9755_vm3, %v26399_v39, 0.0 }
 0x65f   : > { %10726 = vadd.xlane.f32.xlu0 %v10725_v23  ;;  %28237 = vst [vmem:[#allocation143_spill] sm:$0xff] %v26408_v43 }
 0x660   : > { %10747 = vadd.xlane.f32.xlu1 %v10746_v42  ;;  %v10565_v26 = vpop.xlane.xlu0 %10564  ;;  %20209 = vmatmul.mubr.msk.bf16.vlgmr.msra.gmra.mrb[168].mxu1 %vm9755_vm3, %v11169_v36  ;;  %v28239_v42 = vld [vmem:[#allocation152_spill] sm:$0xff] }
 0x661   : > { %v26392_v56 = vpop.xlane.xlu1 %10645  ;;  %22529 = vrcp.f32 %v10565_v26  ;;  %20219 = vmatpush3.xpose.msk.msra.mxu1 %vm9755_vm3, %v28236_v46  ;;  %20220 = vmatprep.mubr.msk.bf16.mxu1 %vm22908_vm1, %v28150_v49  ;;  %v26423_v36 = vadd.f32 %v28239_v42, %v6743_v5  ;;  %v10440_v26 = vmul.f32 1.442695, %v10226_v0  ;;  %v10444_v46 = vmul.f32 1.442695, %v10228_v31  ;;  %v28242_v42 = vld [vmem:[#allocation106_spill] sm:$0xff] }
 0x662   : > { %22531 = vpow2.f32 %v10430_v44  ;;  %20230 = vmatprep.subr.mxu1 %v28150_v49  ;;  %v10758_v44 = vsel %vm9755_vm3, %v26408_v43, 0.0 }
 0x663   : > { %10126 = vmax.xlane.f32.xlu0 %v10125_v45  ;;  %22533 = vpow2.f32 %v10436_v47  ;;  %v26428_v45 = vadd.f32 %v25704_v15, %v6744_v33  ;;  %v26434_v14 = vpop.eup %22523  ;;  %v28240_v47 = vld [vmem:[#allocation158_spill] sm:$0xff]  ;;  %v10230_v15 = vsub.f32 %v25695_v63, %v26360_v11  ;;  %v10131_v33 = vsel %vm9755_vm3, %v26423_v36, -inf  ;;  %v28244_v11 = vld [vmem:[#allocation168_spill] sm:$0xff] }
 0x664   : > { %10765 = vadd.xlane.f32.xlu1 %v10764_v30  ;;  %v26413_v17 = vpop.xlane.xlu0 %10636  ;;  %22535 = vpow2.f32 %v10426_v22  ;;  %v10223_v0 = vsub.f32 %v28240_v47, %v26282_v52  ;;  %v22526_v30 = vpop.eup %22525  ;;  %v10225_v52 = vsub.f32 %v28242_v42, %v25894_v53  ;;  %v10749_v39 = vsel %vm9755_vm3, %v26434_v14, 0.0 }
 0x665   : > { %v26419_v23 = vpop.xlane.xlu1 %10039  ;;  %22537 = vpow2.f32 %v10440_v26  ;;  %v26444_v18 = vpop.eup %22527  ;;  %v10134_v31 = vsel %vm9755_vm3, %v26428_v45, -inf  ;;  %v10448_v51 = vmul.f32 1.442695, %v10230_v15  ;;  %v28248_v15 = vld [vmem:[#allocation171_spill] sm:$0xff] }
 0x666   : > { %28241 = vst [vmem:[#allocation135_spill] sm:$0xff] %v26444_v18  ;;  %22539 = vrcp.f32 %v10568_v28  ;;  %v10434_v26 = vmul.f32 1.442695, %v10223_v0  ;;  %v28246_v28 = vld [vmem:[#allocation164_spill] sm:$0xff]  ;;  %v10770_v0 = vsel %vm9755_vm3, %v26444_v18, 0.0  ;;  %v10234_v42 = vsub.f32 %v28248_v15, %v26419_v23  ;;  %v28253_v15 = vld [vmem:[#allocation166_spill] sm:$0xff] }
 0x667   : > { %10738 = vadd.xlane.f32.xlu0 %v10737_v32  ;;  %22541 = vpow2.f32 %v10444_v46  ;;  %v10227_v46 = vsub.f32 %v28246_v28, %v26356_v35  ;;  %v28249_v35 = vld [vmem:[#allocation53_spill] sm:$0xff]  ;;  %v6745_v23 = vld [vmem:[%s27560_s5 + $0x3f8] sm:$0xff] }
 0x668   : > { %10759 = vadd.xlane.f32.xlu1 %v10758_v44  ;;  %v26432_v38 = vpop.xlane.xlu0 %10030  ;;  %v28243_v44 = vld [vmem:[#allocation161_spill] sm:$0xff] }
 0x669   : > { %v26438_v5 = vpop.xlane.xlu1 %10579  ;;  %v11048_v63 = vmul.f32 %v22526_v30, %v28243_v44 }
 0x66b   : > { %10132 = vmax.xlane.f32.xlu0 %v10131_v33  ;;  %v22530_v22 = vpop.eup %22529  ;;  %v28245_v33 = vld [vmem:[#allocation113_spill] sm:$0xff] }
 0x66c   : > { %10135 = vmax.xlane.f32.xlu1 %v10134_v31  ;;  %v10571_v32 = vpop.xlane.xlu0 %10570  ;;  %v11049_v47 = vmul.f32 %v22530_v22, %v28244_v11  ;;  %v10232_v48 = vsub.f32 %v28245_v33, %v25929_v12  ;;  %v26458_v53 = vpop.eup %22531  ;;  %v10438_v12 = vmul.f32 1.442695, %v10225_v52  ;;  %v10442_v52 = vmul.f32 1.442695, %v10227_v46 }
 0x66d   : > { %v26452_v43 = vpop.xlane.xlu1 %10657  ;;  %22543 = vrcp.f32 %v10571_v32  ;;  %v26464_v31 = vpop.eup %22533 }
 0x66e   : > { %v11170_v30 = vpack.c.bf16 %v11049_v47, %v11048_v63  ;;  %28247 = vst [vmem:[#allocation146_spill] sm:$0xff] %v26464_v31  ;;  %22545 = vpow2.f32 %v10434_v26  ;;  %v10452_v44 = vmul.f32 1.442695, %v10232_v48  ;;  %v26477_v63 = vpop.eup %22535  ;;  %v28251_v26 = vld [vmem:[#allocation111_spill] sm:$0xff]  ;;  %v28252_v47 = vld [vmem:[#allocation120_spill] sm:$0xff] }
 0x66f   : > { %10750 = vadd.xlane.f32.xlu0 %v10749_v39  ;;  %22547 = vpow2.f32 %v10448_v51  ;;  %v10767_v39 = vsel %vm9755_vm3, %v26458_v53, 0.0  ;;  %28250 = vst [vmem:[#allocation108_spill] sm:$0xff] %v26477_v63  ;;  %v10776_v51 = vsel %vm9755_vm3, %v26464_v31, 0.0  ;;  %v26485_v48 = vpop.eup %22537  ;;  %v10229_v11 = vsub.f32 %v28251_v26, %v25942_v20  ;;  %v28254_v20 = vld [vmem:[#allocation119_spill] sm:$0xff] }
 0x670   : > { %10771 = vadd.xlane.f32.xlu1 %v10770_v0  ;;  %v26466_v22 = vpop.xlane.xlu0 %10648  ;;  %20215 = vmatmul.mubr.msk.bf16.vlgmr.msra.gmra.mrb[140].mxu0 %vm9755_vm3, %v11170_v30  ;;  %v10236_v33 = vsub.f32 %v28252_v47, %v25992_v4  ;;  %22549 = vpow2.f32 %v10438_v12  ;;  %v10456_v0 = vmul.f32 1.442695, %v10234_v42  ;;  %v22540_v30 = vpop.eup %22539  ;;  %v10233_v4 = vsub.f32 %v28254_v20, %v25990_v27 }
 0x671   : > { %v10052_v32 = vpop.xlane.xlu1 %10051  ;;  %20225 = vmatpush3.xpose.msk.msra.mxu0 %vm9755_vm3, %v28249_v35  ;;  %20226 = vmatprep.mubr.msk.bf16.mxu0 %vm22908_vm1, %v28150_v49  ;;  %v26496_v35 = vadd.f32 %v28253_v15, %v6745_v23  ;;  %22551 = vpow2.f32 %v10452_v44  ;;  %v26500_v31 = vpop.eup %22541  ;;  %v10782_v12 = vsel %vm9755_vm3, %v26485_v48, 0.0  ;;  %v28255_v23 = vld [vmem:[#allocation167_spill] sm:$0xff]  ;;  %v28256_v15 = vld [vmem:[#allocation172_spill] sm:$0xff] }
 0x672   : > { %20236 = vmatprep.subr.mxu0 %v28150_v49  ;;  %22553 = vpow2.f32 %v10442_v52  ;;  %v10460_v26 = vmul.f32 1.442695, %v10236_v33  ;;  %v11050_v47 = vmul.f32 %v22540_v30, %v28255_v23  ;;  %v10231_v18 = vsub.f32 %v28256_v15, %v26432_v38 }
 0x673   : > { %10768 = vadd.xlane.f32.xlu0 %v10767_v39  ;;  %v10761_v39 = vsel %vm9755_vm3, %v26477_v63, 0.0  ;;  %22555 = vrcp.f32 %v26438_v5  ;;  %v28257_v63 = vld [vmem:[#allocation31_spill] sm:$0xff]  ;;  %v28258_v52 = vpack.c.bf16 %v26083_v2, %v26080_v16  ;;  %v28260_v5 = vld [vmem:[#allocation44_spill] sm:$0xff]  ;;  %v28261_v16 = vld [vmem:[#allocation129_spill] sm:$0xff]  ;;  %v10788_v30 = vsel %vm9755_vm3, %v26500_v31, 0.0 }
 0x674   : > { %10777 = vadd.xlane.f32.xlu1 %v10776_v51  ;;  %v26491_v28 = vpop.xlane.xlu0 %10042  ;;  %v10446_v51 = vmul.f32 1.442695, %v10229_v11  ;;  %22557 = vpow2.f32 %v10456_v0  ;;  %v28259_v11 = vld [vmem:[#allocation132_spill] sm:$0xff]  ;;  %v10137_v0 = vsel %vm9755_vm3, %v26496_v35, -inf  ;;  %v10240_v2 = vsub.f32 %v28261_v16, %v26067_v57 }
 0x675   : > { %v26493_v46 = vpop.xlane.xlu1 %10591  ;;  %v10238_v33 = vsub.f32 %v28259_v11, %v10052_v32  ;;  %v28264_v11 = vpack.c.bf16 %v26156_v37, %v26153_v25  ;;  %v28266_v25 = vld [vmem:[#allocation127_spill] sm:$0xff] }
 0x676   : > { %v10237_v37 = vsub.f32 %v28266_v25, %v26062_v6 }
 0x677   : > { %10762 = vadd.xlane.f32.xlu0 %v10761_v39  ;;  %v22544_v42 = vpop.eup %22543  ;;  %v10464_v57 = vmul.f32 1.442695, %v10238_v33 }
 0x678   : > { %10783 = vadd.xlane.f32.xlu1 %v10782_v12  ;;  %v10583_v44 = vpop.xlane.xlu0 %10582  ;;  %v11051_v27 = vmul.f32 %v22544_v42, %v28257_v63  ;;  %20227 = vmatmul.mubr.msk.bf16.vlgmr.msra.gmra.mrb[144].mxu0 %vm9755_vm3, %v28258_v52  ;;  %v26524_v38 = vpop.eup %22545  ;;  %v10454_v63 = vmul.f32 1.442695, %v10233_v4  ;;  %v10450_v42 = vmul.f32 1.442695, %v10231_v18 }
 0x679   : > { %v26515_v39 = vpop.xlane.xlu1 %10669  ;;  %20237 = vmatpush3.xpose.msk.msra.mxu0 %vm9755_vm3, %v28260_v5  ;;  %22559 = vrcp.f32 %v10583_v44  ;;  %20238 = vmatprep.mubr.msk.bf16.mxu0 %vm22908_vm1, %v28150_v49  ;;  %v26531_v20 = vpop.eup %22547  ;;  %v28262_v44 = vld [vmem:[#allocation43_spill] sm:$0xff]  ;;  %v10773_v23 = vsel %vm9755_vm3, %v26524_v38, 0.0 }
 0x67a   : > { %v11171_v32 = vpack.c.bf16 %v11051_v27, %v11050_v47  ;;  %20248 = vmatprep.subr.mxu0 %v28150_v49  ;;  %22561 = vpow2.f32 %v10446_v51  ;;  %v26543_v51 = vpop.eup %22549  ;;  %v10794_v18 = vsel %vm9755_vm3, %v26531_v20, 0.0  ;;  %v28263_v27 = vld [vmem:[#allocation63_spill] sm:$0xff] }
 0x67b   : > { %10138 = vmax.xlane.f32.xlu0 %v10137_v0  ;;  %22563 = vpow2.f32 %v10460_v26  ;;  %v10468_v26 = vmul.f32 1.442695, %v10240_v2  ;;  %v10235_v52 = vsub.f32 %v28263_v27, %v26491_v28  ;;  %v28265_v0 = vld [vmem:[#allocation46_spill] sm:$0xff]  ;;  %v28267_v2 = vld [vmem:[#allocation141_spill] sm:$0xff] }
 0x67c   : > { %10789 = vadd.xlane.f32.xlu1 %v10788_v30  ;;  %v26533_v12 = vpop.xlane.xlu0 %10660  ;;  %20221 = vmatmul.mubr.msk.bf16.vlgmr.msra.gmra.mrb[172].mxu1 %vm9755_vm3, %v11171_v32  ;;  %22565 = vrcp.f32 %v26262_v7  ;;  %v26548_v7 = vpop.eup %22551  ;;  %v10244_v30 = vsub.f32 %v28267_v2, %v26140_v59  ;;  %v28274_v2 = vld [vmem:[#allocation174_spill] sm:$0xff] }
 0x67d   : > { %v10064_v4 = vpop.xlane.xlu1 %10063  ;;  %20231 = vmatpush3.xpose.msk.msra.mxu1 %vm9755_vm3, %v28262_v44  ;;  %20232 = vmatprep.mubr.msk.bf16.mxu1 %vm22908_vm1, %v28150_v49  ;;  %22567 = vpow2.f32 %v10454_v63  ;;  %v26553_v15 = vpop.eup %22553  ;;  %v10779_v63 = vsel %vm9755_vm3, %v26543_v51, 0.0  ;;  %v10800_v16 = vsel %vm9755_vm3, %v26548_v7, 0.0  ;;  %v10458_v6 = vmul.f32 1.442695, %v10235_v52 }
 0x67e   : > { %20242 = vmatprep.subr.mxu1 %v28150_v49  ;;  %22569 = vrcp.f32 %v26188_v54  ;;  %v22556_v5 = vpop.eup %22555  ;;  %v10242_v54 = vsub.f32 %v25858_v8, %v10064_v4  ;;  %v10785_v59 = vsel %vm9755_vm3, %v26553_v15, 0.0 }
 0x67f   : > { %10774 = vadd.xlane.f32.xlu0 %v10773_v23  ;;  %22571 = vpow2.f32 %v10450_v42  ;;  %v26570_v28 = vpop.eup %22557  ;;  %v28268_v42 = vld [vmem:[#allocation33_spill] sm:$0xff] }
 0x680   : > { %10795 = vadd.xlane.f32.xlu1 %v10794_v18  ;;  %v26551_v47 = vpop.xlane.xlu0 %10054  ;;  %20239 = vmatmul.mubr.msk.bf16.vlgmr.msra.gmra.mrb[148].mxu0 %vm9755_vm3, %v28264_v11  ;;  %22573 = vpow2.f32 %v10464_v57  ;;  %v11054_v4 = vmul.f32 %v22556_v5, %v28268_v42  ;;  %v28269_v57 = vld [vmem:[#allocation64_spill] sm:$0xff]  ;;  %v10472_v18 = vmul.f32 1.442695, %v10242_v54  ;;  %v10476_v5 = vmul.f32 1.442695, %v10244_v30 }
 0x681   : > { %v26561_v33 = vpop.xlane.xlu1 %10603  ;;  %20249 = vmatpush3.xpose.msk.msra.mxu0 %vm9755_vm3, %v28265_v0  ;;  %20250 = vmatprep.mubr.msk.bf16.mxu0 %vm22908_vm1, %v28150_v49  ;;  %22575 = vpow2.f32 %v10468_v26  ;;  %v28270_v0 = vld [vmem:[#allocation6_spill] sm:$0xff] }
 0x682   : > { %20260 = vmatprep.subr.mxu0 %v28150_v49  ;;  %22577 = vrcp.f32 %v26493_v46  ;;  %v10462_v46 = vmul.f32 1.442695, %v10237_v37  ;;  %v28271_v37 = vpack.c.bf16 %v26239_v24, %v26236_v13  ;;  %v28275_v24 = vld [vmem:[#allocation156_spill] sm:$0xff] }
 0x683   : > { %10780 = vadd.xlane.f32.xlu0 %v10779_v63  ;;  %v22560_v8 = vpop.eup %22559  ;;  %22579 = vrcp.f32 %v26338_v19  ;;  %v10806_v19 = vsel %vm9755_vm3, %v26570_v28, 0.0  ;;  %v10239_v63 = vsub.f32 %v28270_v0, %v26551_v47  ;;  %v28273_v47 = vld [vmem:[#allocation52_spill] sm:$0xff] }
 0x684   : > { %10801 = vadd.xlane.f32.xlu1 %v10800_v16  ;;  %v10595_v32 = vpop.xlane.xlu0 %10594  ;;  %v11055_v44 = vmul.f32 %v22560_v8, %v28269_v57  ;;  %v26585_v26 = vpop.eup %22561  ;;  %v28276_v57 = vld [vmem:[#allocation139_spill] sm:$0xff] }
 0x685   : > { %v26583_v23 = vpop.xlane.xlu1 %10681  ;;  %22581 = vrcp.f32 %v10595_v32  ;;  %v26589_v27 = vpop.eup %22563  ;;  %v10791_v32 = vsel %vm9755_vm3, %v26585_v26, 0.0 }
 0x686   : > { %v11173_v11 = vpack.c.bf16 %v11055_v44, %v11054_v4  ;;  %v22566_v52 = vpop.eup %22565  ;;  %22583 = vrcp.f32 %v26268_v21  ;;  %v28272_v21 = vld [vmem:[#allocation15_spill] sm:$0xff]  ;;  %v10812_v4 = vsel %vm9755_vm3, %v26589_v27, 0.0  ;;  %v10241_v44 = vsub.f32 %v28276_v57, %v26138_v58 }
 0x687   : > { %10786 = vadd.xlane.f32.xlu0 %v10785_v59  ;;  %v26598_v25 = vpop.eup %22567  ;;  %22585 = vpow2.f32 %v10458_v6  ;;  %v11065_v13 = vmul.f32 %v22566_v52, %v28275_v24  ;;  %v28278_v52 = vld [vmem:[#allocation147_spill] sm:$0xff] }
 0x688   : > { %10807 = vadd.xlane.f32.xlu1 %v10806_v19  ;;  %v26596_v54 = vpop.xlane.xlu0 %10672  ;;  %20233 = vmatmul.mubr.msk.bf16.vlgmr.msra.gmra.mrb[176].mxu1 %vm9755_vm3, %v11173_v11  ;;  %v22570_v8 = vpop.eup %22569  ;;  %22587 = vpow2.f32 %v10472_v18  ;;  %v28277_v18 = vld [vmem:[#allocation153_spill] sm:$0xff]  ;;  %v10466_v19 = vmul.f32 1.442695, %v10239_v63  ;;  %v28279_v63 = vld [vmem:[#allocation151_spill] sm:$0xff] }
 0x689   : > { %20251 = vmatmul.mubr.msk.bf16.vlgmr.msra.gmra.mrb[152].mxu0 %vm9755_vm3, %v28271_v37  ;;  %v10076_v16 = vpop.xlane.xlu1 %10075  ;;  %20243 = vmatpush3.xpose.msk.msra.mxu1 %vm9755_vm3, %v28272_v21  ;;  %v26612_v42 = vpop.eup %22571  ;;  %22589 = vpow2.f32 %v10462_v46  ;;  %v10248_v59 = vsub.f32 %v28277_v18, %v26222_v9  ;;  %v11064_v0 = vmul.f32 %v22570_v8, %v28278_v52  ;;  %v10245_v8 = vsub.f32 %v28279_v63, %v26220_v41  ;;  %v28282_v18 = vld [vmem:[#allocation67_spill] sm:$0xff] }
 0x68a   : > { %20261 = vmatpush3.xpose.msk.msra.mxu0 %vm9755_vm3, %v28273_v47  ;;  %v10246_v30 = vsub.f32 %v28274_v2, %v10076_v16  ;;  %20262 = vmatprep.mubr.msk.bf16.mxu0 %vm22908_vm1, %v28150_v49  ;;  %v26619_v6 = vpop.eup %22573  ;;  %22591 = vpow2.f32 %v10476_v5  ;;  %v10797_v9 = vsel %vm9755_vm3, %v26612_v42, 0.0  ;;  %v10470_v2 = vmul.f32 1.442695, %v10241_v44 }
 0x68b   : > { %10792 = vadd.xlane.f32.xlu0 %v10791_v32  ;;  %20272 = vmatprep.subr.mxu0 %v28150_v49  ;;  %v26626_v11 = vpop.eup %22575  ;;  %22593 = vrcp.f32 %v26342_v34  ;;  %v10818_v34 = vsel %vm9755_vm3, %v26619_v6, 0.0  ;;  %v11178_v21 = vpack.c.bf16 %v11065_v13, %v11064_v0  ;;  %v28280_v32 = vld [vmem:[#allocation128_spill] sm:$0xff]  ;;  %v10803_v44 = vsel %vm9755_vm3, %v26598_v25, 0.0 }
 0x68c   : > { %10813 = vadd.xlane.f32.xlu1 %v10812_v4  ;;  %v10067_v46 = vpop.xlane.xlu0 %10066  ;;  %v10480_v37 = vmul.f32 1.442695, %v10246_v30  ;;  %20244 = vmatprep.mubr.msk.bf16.mxu1 %vm22908_vm1, %v28150_v49  ;;  %v22578_v58 = vpop.eup %22577  ;;  %22595 = vrcp.f32 %v26413_v17  ;;  %v10484_v30 = vmul.f32 1.442695, %v10248_v59  ;;  %v28281_v4 = vld [vmem:[#allocation68_spill] sm:$0xff]  ;;  %v10824_v13 = vsel %vm9755_vm3, %v26626_v11, 0.0 }
 0x68d   : > { %v26630_v16 = vpop.xlane.xlu1 %10615  ;;  %20254 = vmatprep.subr.mxu1 %v28150_v49  ;;  %v22580_v5 = vpop.eup %22579  ;;  %22597 = vrcp.f32 %v26561_v33  ;;  %v11058_v24 = vmul.f32 %v22578_v58, %v28280_v32  ;;  %v10243_v41 = vsub.f32 %v28282_v18, %v10067_v46  ;;  %v28284_v46 = vld [vmem:[#allocation160_spill] sm:$0xff] }
 0x68e   : > { %22599 = vpow2.f32 %v10466_v19  ;;  %v10478_v19 = vmul.f32 1.442695, %v10245_v8  ;;  %v10252_v0 = vsub.f32 %v28284_v46, %v26309_v1  ;;  %v28289_v46 = vld [vmem:[#allocation72_spill] sm:$0xff] }
 0x68f   : > { %10798 = vadd.xlane.f32.xlu0 %v10797_v9  ;;  %v22582_v47 = vpop.eup %22581  ;;  %22601 = vpow2.f32 %v10480_v37  ;;  %v28283_v9 = vld [vmem:[#allocation22_spill] sm:$0xff]  ;;  %v10474_v32 = vmul.f32 1.442695, %v10243_v41 }
 0x690   : > { %10819 = vadd.xlane.f32.xlu1 %v10818_v34  ;;  %v10607_v17 = vpop.xlane.xlu0 %10606  ;;  %v11059_v57 = vmul.f32 %v22582_v47, %v28281_v4  ;;  %v22584_v52 = vpop.eup %22583  ;;  %v28285_v37 = vld [vmem:[#allocation162_spill] sm:$0xff]  ;;  %v10492_v18 = vmul.f32 1.442695, %v10252_v0 }
 0x691   : > { %20263 = vmatmul.mubr.msk.bf16.vlgmr.msra.gmra.mrb[156].mxu0 %vm9755_vm3, %v11178_v21  ;;  %v26647_v33 = vpop.xlane.xlu1 %10693  ;;  %22603 = vrcp.f32 %v10607_v17  ;;  %v26657_v59 = vpop.eup %22585  ;;  %v11069_v58 = vmul.f32 %v22580_v5, %v28285_v37  ;;  %v28286_v17 = vld [vmem:[#allocation157_spill] sm:$0xff] }
 0x692   : > { %20273 = vmatpush3.xpose.msk.msra.mxu0 %vm9755_vm3, %v28283_v9  ;;  %20274 = vmatprep.mubr.msk.bf16.mxu0 %vm22908_vm1, %v28150_v49  ;;  %v11175_v63 = vpack.c.bf16 %v11059_v57, %v11058_v24  ;;  %v26663_v34 = vpop.eup %22587  ;;  %22605 = vpow2.f32 %v10470_v2  ;;  %v11068_v8 = vmul.f32 %v22584_v52, %v28286_v17  ;;  %v28287_v24 = vld [vmem:[#allocation13_spill] sm:$0xff]  ;;  %v28288_v2 = vld [vmem:[#allocation176_spill] sm:$0xff]  ;;  %v10809_v57 = vsel %vm9755_vm3, %v26657_v59, 0.0  ;;  %v28291_v17 = vld [vmem:[#allocation170_spill] sm:$0xff] }
 0x693   : > { %10804 = vadd.xlane.f32.xlu0 %v10803_v44  ;;  %20284 = vmatprep.subr.mxu0 %v28150_v49  ;;  %v26667_v47 = vpop.eup %22589  ;;  %22607 = vpow2.f32 %v10484_v30  ;;  %v10830_v41 = vsel %vm9755_vm3, %v26663_v34, 0.0 }
 0x694   : > { %10825 = vadd.xlane.f32.xlu1 %v10824_v13  ;;  %v26665_v21 = vpop.xlane.xlu0 %10684  ;;  %20245 = vmatmul.mubr.msk.bf16.vlgmr.msra.gmra.mrb[180].mxu1 %vm9755_vm3, %v11175_v63  ;;  %v26671_v5 = vpop.eup %22591  ;;  %22609 = vrcp.f32 %v26466_v22  ;;  %v11180_v52 = vpack.c.bf16 %v11069_v58, %v11068_v8  ;;  %v28290_v58 = vld [vmem:[#allocation17_spill] sm:$0xff] }
 0x695   : > { %v10088_v1 = vpop.xlane.xlu1 %10087  ;;  %20255 = vmatpush3.xpose.msk.msra.mxu1 %vm9755_vm3, %v28287_v24  ;;  %20256 = vmatprep.mubr.msk.bf16.mxu1 %vm22908_vm1, %v28150_v49  ;;  %v22594_v30 = vpop.eup %22593  ;;  %22611 = vpow2.f32 %v10478_v19  ;;  %v28292_v24 = vld [vmem:[#allocation159_spill] sm:$0xff] }
 0x696   : > { %v10250_v4 = vsub.f32 %v28288_v2, %v10088_v1  ;;  %20266 = vmatprep.subr.mxu1 %v28150_v49  ;;  %v22596_v22 = vpop.eup %22595  ;;  %22613 = vrcp.f32 %v26392_v56  ;;  %v10815_v56 = vsel %vm9755_vm3, %v26667_v47, 0.0  ;;  %v10249_v2 = vsub.f32 %v28292_v24, %v26302_v10 }
 0x697   : > { %10810 = vadd.xlane.f32.xlu0 %v10809_v57  ;;  %v22598_v44 = vpop.eup %22597  ;;  %22615 = vpow2.f32 %v10474_v32  ;;  %v11073_v8 = vmul.f32 %v22596_v22, %v28291_v17  ;;  %v10836_v32 = vsel %vm9755_vm3, %v26671_v5, 0.0  ;;  %v28295_v22 = vld [vmem:[#allocation70_spill] sm:$0xff] }
 0x698   : > { %v10488_v9 = vmul.f32 1.442695, %v10250_v4  ;;  %10831 = vadd.xlane.f32.xlu1 %v10830_v41  ;;  %v10079_v13 = vpop.xlane.xlu0 %10078  ;;  %v26689_v37 = vpop.eup %22599  ;;  %v28293_v4 = vld [vmem:[#allocation163_spill] sm:$0xff]  ;;  %v10486_v17 = vmul.f32 1.442695, %v10249_v2 }
 0x699   : > { %20275 = vmatmul.mubr.msk.bf16.vlgmr.msra.gmra.mrb[160].mxu0 %vm9755_vm3, %v11180_v52  ;;  %v10247_v19 = vsub.f32 %v28289_v46, %v10079_v13  ;;  %v26687_v0 = vpop.xlane.xlu1 %10627  ;;  %v26697_v63 = vpop.eup %22601  ;;  %v11072_v57 = vmul.f32 %v22594_v30, %v28293_v4  ;;  %v10821_v10 = vsel %vm9755_vm3, %v26689_v37, 0.0  ;;  %v28296_v4 = vld [vmem:[#allocation50_spill] sm:$0xff] }
 0x69a   : > { %22617 = vpow2.f32 %v10488_v9  ;;  %20285 = vmatpush3.xpose.msk.msra.mxu0 %vm9755_vm3, %v28290_v58  ;;  %20286 = vmatprep.mubr.msk.bf16.mxu0 %vm22908_vm1, %v28150_v49 }
 0x69b   : > { %22619 = vpow2.f32 %v10492_v18  ;;  %10816 = vadd.xlane.f32.xlu0 %v10815_v56  ;;  %20296 = vmatprep.subr.mxu0 %v28150_v49  ;;  %v22604_v1 = vpop.eup %22603  ;;  %v28294_v18 = vld [vmem:[#allocation133_spill] sm:$0xff]  ;;  %v10482_v13 = vmul.f32 1.442695, %v10247_v19  ;;  %v11182_v56 = vpack.c.bf16 %v11073_v8, %v11072_v57  ;;  %v28297_v8 = vld [vmem:[#allocation23_spill] sm:$0xff] }
 0x69c   : > { %22621 = vrcp.f32 %v26630_v16  ;;  %10837 = vadd.xlane.f32.xlu1 %v10836_v32  ;;  %v10619_v41 = vpop.xlane.xlu0 %10618  ;;  %v11062_v52 = vmul.f32 %v22598_v44, %v28294_v18  ;;  %v11063_v9 = vmul.f32 %v22604_v1, %v28295_v22  ;;  %v26712_v58 = vpop.eup %22605  ;;  %v10842_v16 = vsel %vm9755_vm3, %v26697_v63, 0.0 }
 0x69d   : > { %22623 = vrcp.f32 %v26533_v12  ;;  %v26710_v46 = vpop.xlane.xlu1 %10705  ;;  %v26716_v30 = vpop.eup %22607  ;;  %v10827_v2 = vsel %vm9755_vm3, %v26712_v58, 0.0 }
 0x69e   : > { %22625 = vrcp.f32 %v10619_v41  ;;  %v11177_v12 = vpack.c.bf16 %v11063_v9, %v11062_v52  ;;  %v22610_v44 = vpop.eup %22609  ;;  %v28298_v41 = vld [vmem:[#allocation55_spill] sm:$0xff]  ;;  %v10848_v52 = vsel %vm9755_vm3, %v26716_v30, 0.0 }
 0x69f   : > { %10822 = vadd.xlane.f32.xlu0 %v10821_v10  ;;  %22627 = vrcp.f32 %v26452_v43  ;;  %v26723_v32 = vpop.eup %22611  ;;  %v11077_v18 = vmul.f32 %v22610_v44, %v28298_v41  ;;  %v28300_v10 = vld [vmem:[#allocation165_spill] sm:$0xff] }
 0x6a0   : > { %10843 = vadd.xlane.f32.xlu1 %v10842_v16  ;;  %v26721_v19 = vpop.xlane.xlu0 %10696  ;;  %22629 = vpow2.f32 %v10482_v13  ;;  %20257 = vmatmul.mubr.msk.bf16.vlgmr.msra.gmra.mrb[184].mxu1 %vm9755_vm3, %v11177_v12  ;;  %v22614_v24 = vpop.eup %22613  ;;  %v10253_v16 = vsub.f32 %v28300_v10, %v26373_v61  ;;  %v28301_v12 = vld [vmem:[#allocation169_spill] sm:$0xff] }
 0x6a1   : > { %20287 = vmatmul.mubr.msk.bf16.vlgmr.msra.gmra.mrb[164].mxu0 %vm9755_vm3, %v11182_v56  ;;  %v10100_v1 = vpop.xlane.xlu1 %10099  ;;  %20267 = vmatpush3.xpose.msk.msra.mxu1 %vm9755_vm3, %v28296_v4  ;;  %v26734_v57 = vpop.eup %22615  ;;  %22631 = vpow2.f32 %v10486_v17  ;;  %v11076_v56 = vmul.f32 %v22614_v24, %v28301_v12  ;;  %v28302_v41 = vld [vmem:[#allocation73_spill] sm:$0xff]  ;;  %v28304_v12 = vld [vmem:[#allocation56_spill] sm:$0xff] }
 0x6a2   : > { %20297 = vmatpush3.xpose.msk.msra.mxu0 %vm9755_vm3, %v28297_v8  ;;  %v10254_v43 = vsub.f32 %v26004_v29, %v10100_v1  ;;  %20298 = vmatprep.mubr.msk.bf16.mxu0 %vm22908_vm1, %v28150_v49  ;;  %22633 = vrcp.f32 %v26596_v54  ;;  %v10833_v4 = vsel %vm9755_vm3, %v26734_v57, 0.0 }
 0x6a3   : > { %10828 = vadd.xlane.f32.xlu0 %v10827_v2  ;;  %20308 = vmatprep.subr.mxu0 %v28150_v49  ;;  %v10494_v2 = vmul.f32 1.442695, %v10253_v16  ;;  %v28305_v16 = vld [vmem:[#allocation47_spill] sm:$0xff] }
 0x6a4   : > { %v26741_v22 = vpop.eup %22617  ;;  %v10496_v9 = vmul.f32 1.442695, %v10254_v43  ;;  %10849 = vadd.xlane.f32.xlu1 %v10848_v52  ;;  %v10091_v29 = vpop.xlane.xlu0 %10090  ;;  %20268 = vmatprep.mubr.msk.bf16.mxu1 %vm22908_vm1, %v28150_v49 }
 0x6a5   : > { %v26744_v13 = vpop.eup %22619  ;;  %v10251_v44 = vsub.f32 %v26011_v3, %v10091_v29  ;;  %v26751_v1 = vpop.xlane.xlu1 %10639  ;;  %20278 = vmatprep.subr.mxu1 %v28150_v49  ;;  %v10854_v54 = vsel %vm9755_vm3, %v26741_v22, 0.0  ;;  %v11184_v3 = vpack.c.bf16 %v11077_v18, %v11076_v56 }
 0x6a6   : > { %28299 = vst [vmem:[#allocation118_spill] sm:$0xff] %v26744_v13  ;;  %v22622_v17 = vpop.eup %22621  ;;  %22635 = vpow2.f32 %v10496_v9  ;;  %v28303_v9 = vld [vmem:[#allocation75_spill] sm:$0xff] }
 0x6a7   : > { %v22624_v8 = vpop.eup %22623  ;;  %22637 = vrcp.f32 %v26515_v39  ;;  %v10490_v61 = vmul.f32 1.442695, %v10251_v44  ;;  %10834 = vadd.xlane.f32.xlu0 %v10833_v4  ;;  %v11066_v52 = vmul.f32 %v22622_v17, %v28302_v41  ;;  %v10860_v44 = vsel %vm9755_vm3, %v26744_v13, 0.0 }
 0x6a8   : > { %v22626_v24 = vpop.eup %22625  ;;  %22639 = vrcp.f32 %v26687_v0  ;;  %10855 = vadd.xlane.f32.xlu1 %v10854_v54  ;;  %v10631_v43 = vpop.xlane.xlu0 %10630  ;;  %v10839_v0 = vsel %vm9755_vm3, %v26723_v32, 0.0  ;;  %v11081_v56 = vmul.f32 %v22624_v8, %v28305_v16  ;;  %v28307_v8 = vld [vmem:[#allocation16_spill] sm:$0xff] }
 0x6a9   : > { %v11067_v29 = vmul.f32 %v22626_v24, %v28303_v9  ;;  %22641 = vpow2.f32 %v10490_v61  ;;  %20299 = vmatmul.mubr.msk.bf16.vlgmr.msra.gmra.mrb[168].mxu0 %vm9755_vm3, %v11184_v3  ;;  %v26765_v39 = vpop.xlane.xlu1 %10717  ;;  %v22628_v10 = vpop.eup %22627  ;;  %v28306_v61 = vld [vmem:[#allocation173_spill] sm:$0xff] }
 0x6aa   : > { %20309 = vmatpush3.xpose.msk.msra.mxu0 %vm9755_vm3, %v28304_v12  ;;  %22643 = vrcp.f32 %v10631_v43  ;;  %20310 = vmatprep.mubr.msk.bf16.mxu0 %vm22908_vm1, %v28150_v49  ;;  %v26773_v18 = vpop.eup %22629  ;;  %v11080_v54 = vmul.f32 %v22628_v10, %v28306_v61  ;;  %v28309_v10 = vld [vmem:[#allocation81_spill] sm:$0xff] }
 0x6ab   : > { %10840 = vadd.xlane.f32.xlu0 %v10839_v0  ;;  %v11179_v17 = vpack.c.bf16 %v11067_v29, %v11066_v52  ;;  %20320 = vmatprep.subr.mxu0 %v28150_v49  ;;  %22645 = vpow2.f32 %v10494_v2  ;;  %v26781_v24 = vpop.eup %22631  ;;  %v10845_v43 = vsel %vm9755_vm3, %v26773_v18, 0.0 }
 0x6ac   : > { %10861 = vadd.xlane.f32.xlu1 %v10860_v44  ;;  %v10709_v4 = vpop.xlane.xlu0 %10708  ;;  %22647 = vrcp.f32 %v26665_v21  ;;  %v22634_v41 = vpop.eup %22633  ;;  %v11186_v2 = vpack.c.bf16 %v11081_v56, %v11080_v54  ;;  %v28310_v44 = vld [vmem:[#allocation20_spill] sm:$0xff]  ;;  %v10851_v56 = vsel %vm9755_vm3, %v26781_v24, 0.0 }
 0x6ad   : > { %20269 = vmatmul.mubr.msk.bf16.vlgmr.msra.gmra.mrb[188].mxu1 %vm9755_vm3, %v11179_v17  ;;  %v10652_v3 = vpop.xlane.xlu1 %10651  ;;  %22649 = vrcp.f32 %v26583_v23  ;;  %v28311_v17 = vld [vmem:[#allocation69_spill] sm:$0xff] }
 0x6ae   : > { %20279 = vmatpush3.xpose.msk.msra.mxu1 %vm9755_vm3, %v28307_v8  ;;  %20280 = vmatprep.mubr.msk.bf16.mxu1 %vm22908_vm1, %v28150_v49  ;;  %v11085_v61 = vmul.f32 %v22634_v41, %v28311_v17  ;;  %22651 = vrcp.f32 %v26751_v1 }
 0x6af   : > { %10846 = vadd.xlane.f32.xlu0 %v10845_v43  ;;  %20290 = vmatprep.subr.mxu1 %v28150_v49 }
 0x6b0   : > { %v26791_v52 = vpop.eup %22635  ;;  %v10103_v9 = vpop.xlane.xlu0 %10102 }
 0x6b1   : > { %28308 = vst [vmem:[#allocation9_spill] sm:$0xff] %v26791_v52  ;;  %v22638_v21 = vpop.eup %22637  ;;  %20311 = vmatmul.mubr.msk.bf16.vlgmr.msra.gmra.mrb[172].mxu0 %vm9755_vm3, %v11186_v2  ;;  %v26795_v29 = vpop.xlane.xlu1 %10729  ;;  %v10255_v12 = vsub.f32 %v28309_v10, %v10103_v9  ;;  %v10866_v0 = vsel %vm9755_vm3, %v26791_v52, 0.0  ;;  %v28312_v2 = vld [vmem:[#allocation57_spill] sm:$0xff]  ;;  %v28313_v10 = vld [vmem:[#allocation78_spill] sm:$0xff] }
 0x6b2   : > { %v22640_v16 = vpop.eup %22639  ;;  %20321 = vmatpush3.xpose.msk.msra.mxu0 %vm9755_vm3, %v28310_v44  ;;  %10867 = vadd.xlane.f32.xlu1 %v10866_v0  ;;  %v11084_v9 = vmul.f32 %v22638_v21, %v28312_v2  ;;  %v28314_v44 = vld [vmem:[#allocation110_spill] sm:$0xff] }
 0x6b3   : > { %v26804_v23 = vpop.eup %22641  ;;  %v10498_v54 = vmul.f32 1.442695, %v10255_v12  ;;  %10852 = vadd.xlane.f32.xlu0 %v10851_v56  ;;  %20322 = vmatprep.mubr.msk.bf16.mxu0 %vm22908_vm1, %v28150_v49  ;;  %v11070_v0 = vmul.f32 %v22640_v16, %v28313_v10 }
 0x6b4   : > { %v22644_v8 = vpop.eup %22643  ;;  %v10643_v43 = vpop.xlane.xlu0 %10642  ;;  %20332 = vmatprep.subr.mxu0 %v28150_v49  ;;  %v10857_v41 = vsel %vm9755_vm3, %v26804_v23, 0.0  ;;  %v11188_v56 = vpack.c.bf16 %v11085_v61, %v11084_v9  ;;  %v28318_v61 = vld [vmem:[#allocation74_spill] sm:$0xff] }
 0x6b5   : > { %v11071_v52 = vmul.f32 %v22644_v8, %v28314_v44  ;;  %22653 = vpow2.f32 %v10498_v54  ;;  %v10664_v13 = vpop.xlane.xlu1 %10663  ;;  %v26817_v12 = vpop.eup %22645  ;;  %v28316_v8 = vld [vmem:[#allocation28_spill] sm:$0xff] }
 0x6b6   : > { %22655 = vrcp.f32 %v26721_v19  ;;  %v22648_v17 = vpop.eup %22647  ;;  %v28315_v19 = vld [vmem:[#allocation10_spill] sm:$0xff] }
 0x6b7   : > { %22657 = vrcp.f32 %v10643_v43  ;;  %10858 = vadd.xlane.f32.xlu0 %v10857_v41  ;;  %v11181_v1 = vpack.c.bf16 %v11071_v52, %v11070_v0  ;;  %v22650_v54 = vpop.eup %22649  ;;  %v28317_v43 = vld [vmem:[#allocation88_spill] sm:$0xff]  ;;  %v10863_v52 = vsel %vm9755_vm3, %v26817_v12, 0.0  ;;  %v28319_v0 = vld [vmem:[#allocation49_spill] sm:$0xff] }
 0x6b8   : > { %22659 = vrcp.f32 %v26647_v33  ;;  %v10721_v21 = vpop.xlane.xlu0 %10720  ;;  %v11089_v33 = vmul.f32 %v22648_v17, %v28318_v61  ;;  %v11088_v44 = vmul.f32 %v22650_v54, %v28319_v0 }
 0x6b9   : > { %20281 = vmatmul.mubr.msk.bf16.vlgmr.msra.gmra.mrb[192].mxu1 %vm9755_vm3, %v11181_v1  ;;  %20323 = vmatmul.mubr.msk.bf16.vlgmr.msra.gmra.mrb[176].mxu0 %vm9755_vm3, %v11188_v56  ;;  %v10106_v16 = vpop.xlane.xlu1 %10105  ;;  %22661 = vrcp.f32 %v10652_v3  ;;  %v22652_v1 = vpop.eup %22651 }
 0x6ba   : > { %20291 = vmatpush3.xpose.msk.msra.mxu1 %vm9755_vm3, %v28315_v19  ;;  %20333 = vmatpush3.xpose.msk.msra.mxu0 %vm9755_vm3, %v28316_v8  ;;  %v10256_v2 = vsub.f32 %v28317_v43, %v10106_v16  ;;  %22663 = vrcp.f32 %v10709_v4  ;;  %v11190_v56 = vpack.c.bf16 %v11089_v33, %v11088_v44  ;;  %v28321_v43 = vld [vmem:[#allocation83_spill] sm:$0xff] }
 0x6bb   : > { %10864 = vadd.xlane.f32.xlu0 %v10863_v52  ;;  %20334 = vmatprep.mubr.msk.bf16.mxu0 %vm22908_vm1, %v28150_v49  ;;  %v28322_v52 = vld [vmem:[#allocation82_spill] sm:$0xff] }
 0x6bc   : > { %v10500_v9 = vmul.f32 1.442695, %v10256_v2  ;;  %v10655_v10 = vpop.xlane.xlu0 %10654  ;;  %20344 = vmatprep.subr.mxu0 %v28150_v49  ;;  %20292 = vmatprep.mubr.msk.bf16.mxu1 %vm22908_vm1, %v28150_v49  ;;  %v11074_v2 = vmul.f32 %v22652_v1, %v28321_v43  ;;  %v28326_v43 = vld [vmem:[#allocation25_spill] sm:$0xff] }
 0x6bd   : > { %v10676_v41 = vpop.xlane.xlu1 %10675  ;;  %22665 = vrcp.f32 %v10655_v10  ;;  %20302 = vmatprep.subr.mxu1 %v28150_v49 }
 0x6be   : > { %22667 = vpow2.f32 %v10500_v9  ;;  %v28323_v9 = vld [vmem:[#allocation18_spill] sm:$0xff] }
 0x6bf   : > { %v26837_v3 = vpop.eup %22653  ;;  %22669 = vrcp.f32 %v26710_v46  ;;  %v28324_v46 = vld [vmem:[#allocation177_spill] sm:$0xff] }
 0x6c0   : > { %28320 = vst [vmem:[#allocation96_spill] sm:$0xff] %v26837_v3  ;;  %v22656_v17 = vpop.eup %22655  ;;  %v10733_v4 = vpop.xlane.xlu0 %10732  ;;  %v10869_v16 = vsel %vm9755_vm3, %v26837_v3, 0.0  ;;  %22671 = vrcp.f32 %v10664_v13 }
 0x6c1   : > { %v22658_v19 = vpop.eup %22657  ;;  %20335 = vmatmul.mubr.msk.bf16.vlgmr.msra.gmra.mrb[180].mxu0 %vm9755_vm3, %v11190_v56  ;;  %v26843_v54 = vpop.xlane.xlu1 %10741  ;;  %10870 = vadd.xlane.f32.xlu0 %v10869_v16  ;;  %v11093_v33 = vmul.f32 %v22656_v17, %v28324_v46  ;;  %v28325_v56 = vld [vmem:[#allocation175_spill] sm:$0xff]  ;;  %v28328_v17 = vld [vmem:[#allocation85_spill] sm:$0xff] }
 0x6c2   : > { %v22660_v8 = vpop.eup %22659  ;;  %v11075_v61 = vmul.f32 %v22658_v19, %v28322_v52  ;;  %20345 = vmatpush3.xpose.msk.msra.mxu0 %vm9755_vm3, %v28323_v9  ;;  %20346 = vmatprep.mubr.msk.bf16.mxu0 %vm22908_vm1, %v28150_v49 }
 0x6c3   : > { %20356 = vmatprep.subr.mxu0 %v28150_v49  ;;  %v22662_v44 = vpop.eup %22661  ;;  %v11092_v16 = vmul.f32 %v22660_v8, %v28325_v56  ;;  %v28331_v56 = vld [vmem:[#allocation59_spill] sm:$0xff] }
 0x6c4   : > { %v11183_v10 = vpack.c.bf16 %v11075_v61, %v11074_v2  ;;  %v10667_v0 = vpop.xlane.xlu0 %10666  ;;  %v22664_v1 = vpop.eup %22663  ;;  %v11078_v8 = vmul.f32 %v22662_v44, %v28328_v17  ;;  %v28329_v2 = vld [vmem:[#allocation114_spill] sm:$0xff] }
 0x6c5   : > { %v10688_v3 = vpop.xlane.xlu1 %10687  ;;  %22673 = vrcp.f32 %v10667_v0  ;;  %v11192_v52 = vpack.c.bf16 %v11093_v33, %v11092_v16 }
 0x6c6   : > { %22675 = vrcp.f32 %v10721_v21  ;;  %20293 = vmatmul.mubr.msk.bf16.vlgmr.msra.gmra.mrb[196].mxu1 %vm9755_vm3, %v11183_v10  ;;  %v28330_v21 = vld [vmem:[#allocation34_spill] sm:$0xff] }
 0x6c7   : > { %v22666_v19 = vpop.eup %22665  ;;  %20303 = vmatpush3.xpose.msk.msra.mxu1 %vm9755_vm3, %v28326_v43  ;;  %20304 = vmatprep.mubr.msk.bf16.mxu1 %vm22908_vm1, %v28150_v49  ;;  %22677 = vrcp.f32 %v26765_v39  ;;  %v28332_v39 = vld [vmem:[#allocation138_spill] sm:$0xff] }
 0x6c8   : > { %v26859_v13 = vpop.eup %22667  ;;  %v11079_v61 = vmul.f32 %v22666_v19, %v28329_v2  ;;  %v10109_v9 = vpop.xlane.xlu0 %10108  ;;  %20314 = vmatprep.subr.mxu1 %v28150_v49  ;;  %v28333_v19 = vld [vmem:[#allocation77_spill] sm:$0xff]  ;;  %22679 = vrcp.f32 %v10676_v41 }
 0x6c9   : > { %28327 = vst [vmem:[#allocation117_spill] sm:$0xff] %v26859_v13  ;;  %20347 = vmatmul.mubr.msk.bf16.vlgmr.msra.gmra.mrb[184].mxu0 %vm9755_vm3, %v11192_v52  ;;  %v10257_v46 = vsub.f32 %v28330_v21, %v10109_v9  ;;  %v10112_v10 = vpop.xlane.xlu1 %10111  ;;  %v10872_v33 = vsel %vm9755_vm3, %v26859_v13, 0.0  ;;  %v22670_v0 = vpop.eup %22669  ;;  %v11097_v43 = vmul.f32 %v22664_v1, %v28333_v19  ;;  %22681 = vrcp.f32 %v10733_v4  ;;  %v28334_v21 = vld [vmem:[#allocation79_spill] sm:$0xff]  ;;  %v28335_v1 = vld [vmem:[#allocation54_spill] sm:$0xff] }
 0x6ca   : > { %20357 = vmatpush3.xpose.msk.msra.mxu0 %vm9755_vm3, %v28331_v56  ;;  %v10258_v16 = vsub.f32 %v28332_v39, %v10112_v10  ;;  %10873 = vadd.xlane.f32.xlu1 %v10872_v33  ;;  %v11185_v44 = vpack.c.bf16 %v11079_v61, %v11078_v8  ;;  %v22672_v9 = vpop.eup %22671  ;;  %v11096_v13 = vmul.f32 %v22670_v0, %v28334_v21  ;;  %v28336_v61 = vld [vmem:[#allocation90_spill] sm:$0xff]  ;;  %v28337_v10 = vld [vmem:[#allocation87_spill] sm:$0xff]  ;;  %v28341_v21 = vld [vmem:[#allocation116_spill] sm:$0xff] }
 0x6cb   : > { %v10502_v17 = vmul.f32 1.442695, %v10257_v46  ;;  %20358 = vmatprep.mubr.msk.bf16.mxu0 %vm22908_vm1, %v28150_v49  ;;  %20368 = vmatprep.subr.mxu0 %v28150_v49  ;;  %v11082_v46 = vmul.f32 %v22672_v9, %v28336_v61 }
 0x6cc   : > { %v10504_v52 = vmul.f32 1.442695, %v10258_v16  ;;  %v10679_v2 = vpop.xlane.xlu0 %10678  ;;  %v11194_v41 = vpack.c.bf16 %v11097_v43, %v11096_v13  ;;  %v28339_v13 = vld [vmem:[#allocation122_spill] sm:$0xff] }
 0x6cd   : > { %22683 = vpow2.f32 %v10502_v17  ;;  %v10700_v56 = vpop.xlane.xlu1 %10699 }
 0x6ce   : > { %22685 = vpow2.f32 %v10504_v52  ;;  %20305 = vmatmul.mubr.msk.bf16.vlgmr.msra.gmra.mrb[200].mxu1 %vm9755_vm3, %v11185_v44  ;;  %v28338_v44 = vld [vmem:[#allocation5_spill] sm:$0xff] }
 0x6cf   : > { %v22674_v8 = vpop.eup %22673  ;;  %20315 = vmatpush3.xpose.msk.msra.mxu1 %vm9755_vm3, %v28335_v1  ;;  %22687 = vrcp.f32 %v10679_v2  ;;  %20316 = vmatprep.mubr.msk.bf16.mxu1 %vm22908_vm1, %v28150_v49 }
 0x6d0   : > { %v22676_v4 = vpop.eup %22675  ;;  %22689 = vrcp.f32 %v26795_v29  ;;  %v11083_v33 = vmul.f32 %v22674_v8, %v28337_v10  ;;  %v10745_v0 = vpop.xlane.xlu0 %10744  ;;  %20326 = vmatprep.subr.mxu1 %v28150_v49  ;;  %v28340_v29 = vld [vmem:[#allocation86_spill] sm:$0xff] }
 0x6d1   : > { %20359 = vmatmul.mubr.msk.bf16.vlgmr.msra.gmra.mrb[188].mxu0 %vm9755_vm3, %v11194_v41  ;;  %v10118_v39 = vpop.xlane.xlu1 %10117  ;;  %v22678_v16 = vpop.eup %22677  ;;  %v11101_v17 = vmul.f32 %v22676_v4, %v28340_v29  ;;  %22691 = vrcp.f32 %v10688_v3 }
 0x6d2   : > { %20369 = vmatpush3.xpose.msk.msra.mxu0 %vm9755_vm3, %v28338_v44  ;;  %v10260_v19 = vsub.f32 %v28339_v13, %v10118_v39  ;;  %v11187_v43 = vpack.c.bf16 %v11083_v33, %v11082_v46  ;;  %20370 = vmatprep.mubr.msk.bf16.mxu0 %vm22908_vm1, %v28150_v49  ;;  %22693 = vrcp.f32 %v10745_v0  ;;  %v22680_v9 = vpop.eup %22679  ;;  %v11100_v8 = vmul.f32 %v22678_v16, %v28341_v21  ;;  %v28342_v46 = vld [vmem:[#allocation21_spill] sm:$0xff]  ;;  %v28344_v16 = vld [vmem:[#allocation134_spill] sm:$0xff] }
 0x6d3   : > { %20380 = vmatprep.subr.mxu0 %v28150_v49  ;;  %v22682_v41 = vpop.eup %22681 }
 0x6d4   : > { %v10508_v52 = vmul.f32 1.442695, %v10260_v19  ;;  %v10691_v2 = vpop.xlane.xlu0 %10690  ;;  %v11196_v3 = vpack.c.bf16 %v11101_v17, %v11100_v8 }
 0x6d5   : > { %22695 = vrcp.f32 %v10691_v2  ;;  %v10712_v1 = vpop.xlane.xlu1 %10711  ;;  %v28348_v2 = vld [vmem:[#allocation115_spill] sm:$0xff] }
 0x6d6   : > { %22697 = vpow2.f32 %v10508_v52  ;;  %20317 = vmatmul.mubr.msk.bf16.vlgmr.msra.gmra.mrb[204].mxu1 %vm9755_vm3, %v11187_v43  ;;  %v28345_v43 = vld [vmem:[#allocation121_spill] sm:$0xff]  ;;  %v28347_v52 = vld [vmem:[#allocation35_spill] sm:$0xff]  ;;  %v11105_v21 = vmul.f32 %v22682_v41, %v28348_v2 }
 0x6d7   : > { %v26896_v61 = vpop.eup %22683  ;;  %20327 = vmatpush3.xpose.msk.msra.mxu1 %vm9755_vm3, %v28342_v46  ;;  %20328 = vmatprep.mubr.msk.bf16.mxu1 %vm22908_vm1, %v28150_v49  ;;  %22699 = vrcp.f32 %v26843_v54  ;;  %v11086_v29 = vmul.f32 %v22680_v9, %v28345_v43  ;;  %v28346_v54 = vld [vmem:[#allocation93_spill] sm:$0xff]  ;;  %v28350_v43 = vld [vmem:[#allocation11_spill] sm:$0xff] }
 0x6d8   : > { %v26902_v4 = vpop.eup %22685  ;;  %v10115_v10 = vpop.xlane.xlu0 %10114  ;;  %v10875_v33 = vsel %vm9755_vm3, %v26896_v61, 0.0  ;;  %20338 = vmatprep.subr.mxu1 %v28150_v49  ;;  %22701 = vrcp.f32 %v10700_v56 }
 0x6d9   : > { %28343 = vst [vmem:[#allocation126_spill] sm:$0xff] %v26902_v4  ;;  %v22688_v0 = vpop.eup %22687  ;;  %20371 = vmatmul.mubr.msk.bf16.vlgmr.msra.gmra.mrb[192].mxu0 %vm9755_vm3, %v11196_v3  ;;  %v10754_v39 = vpop.xlane.xlu1 %10753  ;;  %v10259_v44 = vsub.f32 %v28344_v16, %v10115_v10  ;;  %v10878_v13 = vsel %vm9755_vm3, %v26902_v4, 0.0  ;;  %10876 = vadd.xlane.f32.xlu0 %v10875_v33  ;;  %v28349_v33 = vld [vmem:[#allocation27_spill] sm:$0xff] }
 0x6da   : > { %v22690_v19 = vpop.eup %22689  ;;  %v11087_v17 = vmul.f32 %v22688_v0, %v28346_v54  ;;  %20381 = vmatpush3.xpose.msk.msra.mxu0 %vm9755_vm3, %v28347_v52  ;;  %10879 = vadd.xlane.f32.xlu1 %v10878_v13  ;;  %v28353_v54 = vld [vmem:[#allocation130_spill] sm:$0xff] }
 0x6db   : > { %v10506_v8 = vmul.f32 1.442695, %v10259_v44  ;;  %20382 = vmatprep.mubr.msk.bf16.mxu0 %vm22908_vm1, %v28150_v49  ;;  %20392 = vmatprep.subr.mxu0 %v28150_v49  ;;  %v22692_v10 = vpop.eup %22691  ;;  %v11104_v9 = vmul.f32 %v22690_v19, %v28349_v33  ;;  %v28352_v44 = vld [vmem:[#allocation95_spill] sm:$0xff] }
 0x6dc   : > { %v11189_v46 = vpack.c.bf16 %v11087_v17, %v11086_v29  ;;  %v10703_v3 = vpop.xlane.xlu0 %10702  ;;  %v22694_v16 = vpop.eup %22693  ;;  %v11090_v29 = vmul.f32 %v22692_v10, %v28352_v44  ;;  %v28355_v33 = vld [vmem:[#allocation91_spill] sm:$0xff] }
 0x6dd   : > { %22703 = vpow2.f32 %v10506_v8  ;;  %v10724_v0 = vpop.xlane.xlu1 %10723  ;;  %v11198_v41 = vpack.c.bf16 %v11105_v21, %v11104_v9  ;;  %v11109_v9 = vmul.f32 %v22694_v16, %v28355_v33  ;;  %v28360_v33 = vld [vmem:[#allocation61_spill] sm:$0xff] }
 0x6de   : > { %20329 = vmatmul.mubr.msk.bf16.vlgmr.msra.gmra.mrb[208].mxu1 %vm9755_vm3, %v11189_v46  ;;  %22705 = vrcp.f32 %v10703_v3  ;;  %v28354_v46 = vld [vmem:[#allocation39_spill] sm:$0xff] }
 0x6df   : > { %v22696_v13 = vpop.eup %22695  ;;  %20339 = vmatpush3.xpose.msk.msra.mxu1 %vm9755_vm3, %v28350_v43  ;;  %20340 = vmatprep.mubr.msk.bf16.mxu1 %vm22908_vm1, %v28150_v49  ;;  %22707 = vrcp.f32 %v10712_v1  ;;  %v28358_v1 = vld [vmem:[#allocation19_spill] sm:$0xff] }
 0x6e0   : > { %v26926_v56 = vpop.eup %22697  ;;  %v11091_v19 = vmul.f32 %v22696_v13, %v28353_v54  ;;  %v10121_v17 = vpop.xlane.xlu0 %10120  ;;  %20350 = vmatprep.subr.mxu1 %v28150_v49  ;;  %22709 = vrcp.f32 %v10754_v39 }
 0x6e1   : > { %28351 = vst [vmem:[#allocation145_spill] sm:$0xff] %v26926_v56  ;;  %20383 = vmatmul.mubr.msk.bf16.vlgmr.msra.gmra.mrb[196].mxu0 %vm9755_vm3, %v11198_v41  ;;  %v10261_v52 = vsub.f32 %v26305_v50, %v10121_v17  ;;  %v10124_v2 = vpop.xlane.xlu1 %10123  ;;  %v10884_v21 = vsel %vm9755_vm3, %v26926_v56, 0.0  ;;  %v22700_v8 = vpop.eup %22699  ;;  %v28356_v41 = vld [vmem:[#allocation123_spill] sm:$0xff] }
 0x6e2   : > { %20393 = vmatpush3.xpose.msk.msra.mxu0 %vm9755_vm3, %v28354_v46  ;;  %v10262_v3 = vsub.f32 %v26316_v40, %v10124_v2  ;;  %10885 = vadd.xlane.f32.xlu1 %v10884_v21  ;;  %v11191_v10 = vpack.c.bf16 %v11091_v19, %v11090_v29  ;;  %v11108_v44 = vmul.f32 %v22700_v8, %v28356_v41  ;;  %v22702_v17 = vpop.eup %22701  ;;  %v28359_v46 = vld [vmem:[#allocation100_spill] sm:$0xff] }
 0x6e3   : > { %v10510_v13 = vmul.f32 1.442695, %v10261_v52  ;;  %20394 = vmatprep.mubr.msk.bf16.mxu0 %vm22908_vm1, %v28150_v49  ;;  %20404 = vmatprep.subr.mxu0 %v28150_v49 }
 0x6e4   : > { %v10512_v50 = vmul.f32 1.442695, %v10262_v3  ;;  %v10715_v43 = vpop.xlane.xlu0 %10714  ;;  %v11200_v29 = vpack.c.bf16 %v11109_v9, %v11108_v44  ;;  %v11094_v3 = vmul.f32 %v22702_v17, %v28359_v46  ;;  %v28361_v9 = vld [vmem:[#allocation103_spill] sm:$0xff] }
 0x6e5   : > { %22711 = vpow2.f32 %v10510_v13  ;;  %v10736_v54 = vpop.xlane.xlu1 %10735 }
 0x6e6   : > { %22713 = vpow2.f32 %v10512_v50  ;;  %20341 = vmatmul.mubr.msk.bf16.vlgmr.msra.gmra.mrb[212].mxu1 %vm9755_vm3, %v11191_v10 }
 0x6e7   : > { %v26944_v40 = vpop.eup %22703  ;;  %20351 = vmatpush3.xpose.msk.msra.mxu1 %vm9755_vm3, %v28358_v1  ;;  %22715 = vrcp.f32 %v10715_v43  ;;  %v26948_v16 = vpop.f32.mrb[128].mxu0  ;;  %20352 = vmatprep.mubr.msk.bf16.mxu1 %vm22908_vm1, %v28150_v49 }
 0x6e8   : > { %28357 = vst [vmem:[#allocation99_spill] sm:$0xff] %v26944_v40  ;;  %v20180_v39 = vpop.f32.mrb[129].mxu0  ;;  %v10757_v19 = vpop.xlane.xlu0 %10756  ;;  %v10881_v52 = vsel %vm9755_vm3, %v26944_v40, 0.0  ;;  %20362 = vmatprep.subr.mxu1 %v28150_v49 }
 0x6e9   : > { %v22706_v2 = vpop.eup %22705  ;;  %20395 = vmatmul.mubr.msk.bf16.vlgmr.msra.gmra.mrb[200].mxu0 %vm9755_vm3, %v11200_v29  ;;  %22717 = vrcp.f32 %v10757_v19  ;;  %v10130_v21 = vpop.xlane.xlu1 %10129  ;;  %10882 = vadd.xlane.f32.xlu0 %v10881_v52  ;;  %v28363_v39 = vld [vmem:[#allocation58_spill] sm:$0xff] }
 0x6ea   : > { %v26956_v8 = vpop.f32.mrb[130].mxu0  ;;  %v11095_v10 = vmul.f32 %v22706_v2, %v26286_v62  ;;  %20405 = vmatpush3.xpose.msk.msra.mxu0 %vm9755_vm3, %v28360_v33  ;;  %v10264_v13 = vsub.f32 %v28361_v9, %v10130_v21  ;;  %20406 = vmatprep.mubr.msk.bf16.mxu0 %vm22908_vm1, %v28150_v49  ;;  %22719 = vrcp.f32 %v10724_v0  ;;  %v22708_v1 = vpop.eup %22707  ;;  %v28365_v9 = vld [vmem:[#allocation7_spill] sm:$0xff] }
 0x6eb   : > { %v20181_v50 = vpop.f32.mrb[131].mxu0  ;;  %20416 = vmatprep.subr.mxu0 %v28150_v49  ;;  %v22710_v29 = vpop.eup %22709 }
 0x6ec   : > { %v10516_v43 = vmul.f32 1.442695, %v10264_v13  ;;  %v11193_v41 = vpack.c.bf16 %v11095_v10, %v11094_v3  ;;  %v10727_v44 = vpop.xlane.xlu0 %10726  ;;  %v28364_v10 = vld [vmem:[#allocation124_spill] sm:$0xff] }
 0x6ed   : > { %22721 = vrcp.f32 %v10727_v44  ;;  %v10748_v17 = vpop.xlane.xlu1 %10747  ;;  %v11098_v33 = vmul.f32 %v22708_v1, %v28364_v10  ;;  %v28370_v10 = vld [vmem:[#allocation105_spill] sm:$0xff] }
 0x6ee   : > { %22723 = vpow2.f32 %v10516_v43  ;;  %20353 = vmatmul.mubr.msk.bf16.vlgmr.msra.gmra.mrb[216].mxu1 %vm9755_vm3, %v11193_v41  ;;  %v28366_v41 = vld [vmem:[#allocation98_spill] sm:$0xff] }
 0x6ef   : > { %v26967_v62 = vpop.eup %22711  ;;  %20363 = vmatpush3.xpose.msk.msra.mxu1 %vm9755_vm3, %v28363_v39  ;;  %20364 = vmatprep.mubr.msk.bf16.mxu1 %vm22908_vm1, %v28150_v49  ;;  %v11112_v44 = vmul.f32 %v22710_v29, %v28366_v41  ;;  %22725 = vrcp.f32 %v10736_v54  ;;  %v28367_v39 = vld [vmem:[#allocation140_spill] sm:$0xff] }
 0x6f0   : > { %28362 = vst [vmem:[#allocation144_spill] sm:$0xff] %v26967_v62  ;;  %v26973_v0 = vpop.eup %22713  ;;  %v10127_v19 = vpop.xlane.xlu0 %10126  ;;  %v10887_v52 = vsel %vm9755_vm3, %v26967_v62, 0.0  ;;  %20374 = vmatprep.subr.mxu1 %v28150_v49 }
 0x6f1   : > { %v22716_v2 = vpop.eup %22715  ;;  %v10766_v21 = vpop.xlane.xlu1 %10765  ;;  %v10263_v46 = vsub.f32 %v26376_v60, %v10127_v19  ;;  %v10890_v3 = vsel %vm9755_vm3, %v26973_v0, 0.0  ;;  %10888 = vadd.xlane.f32.xlu0 %v10887_v52 }
 0x6f2   : > { %v11099_v13 = vmul.f32 %v22716_v2, %v28365_v9  ;;  %10891 = vadd.xlane.f32.xlu1 %v10890_v3  ;;  %v28368_v3 = vld [vmem:[#allocation26_spill] sm:$0xff] }
 0x6f3   : > { %v22718_v50 = vpop.eup %22717  ;;  %v10514_v43 = vmul.f32 1.442695, %v10263_v46  ;;  %v26985_v60 = vpop.f32.mrb[160].mxu1 }
 0x6f4   : > { %v11113_v62 = vmul.f32 %v22718_v50, %v28367_v39  ;;  %v11195_v56 = vpack.c.bf16 %v11099_v13, %v11098_v33  ;;  %v10739_v40 = vpop.xlane.xlu0 %10738  ;;  %v22720_v4 = vpop.eup %22719 }
 0x6f5   : > { %22727 = vpow2.f32 %v10514_v43  ;;  %v10760_v19 = vpop.xlane.xlu1 %10759  ;;  %v20186_v52 = vpop.f32.mrb[161].mxu1  ;;  %v11102_v33 = vmul.f32 %v22720_v4, %v28370_v10 }
 0x6f6   : > { %20365 = vmatmul.mubr.msk.bf16.vlgmr.msra.gmra.mrb[220].mxu1 %vm9755_vm3, %v11195_v56  ;;  %v11202_v2 = vpack.c.bf16 %v11113_v62, %v11112_v44  ;;  %22729 = vrcp.f32 %v10739_v40  ;;  %v26992_v54 = vpop.f32.mrb[162].mxu1  ;;  %v28371_v40 = vld [vmem:[#allocation32_spill] sm:$0xff] }
 0x6f7   : > { %v22722_v46 = vpop.eup %22721  ;;  %20375 = vmatpush3.xpose.msk.msra.mxu1 %vm9755_vm3, %v28368_v3  ;;  %20376 = vmatprep.mubr.msk.bf16.mxu1 %vm22908_vm1, %v28150_v49  ;;  %v20187_v62 = vpop.f32.mrb[163].mxu1  ;;  %22731 = vrcp.f32 %v10748_v17  ;;  %v28373_v3 = vld [vmem:[#allocation37_spill] sm:$0xff] }
 0x6f8   : > { %v26996_v29 = vpop.eup %22723  ;;  %v11103_v9 = vmul.f32 %v22722_v46, %v26362_v55  ;;  %20407 = vmatmul.mubr.msk.bf16.vlgmr.msra.gmra.mrb[204].mxu0 %vm9755_vm3, %v11202_v2  ;;  %v10133_v13 = vpop.xlane.xlu0 %10132  ;;  %20386 = vmatprep.subr.mxu1 %v28150_v49  ;;  %22733 = vrcp.f32 %v10766_v21  ;;  %v28375_v62 = vld [vmem:[#allocation142_spill] sm:$0xff] }
 0x6f9   : > { %28369 = vst [vmem:[#allocation154_spill] sm:$0xff] %v26996_v29  ;;  %20417 = vmatpush3.xpose.msk.msra.mxu0 %vm9755_vm3, %v28371_v40  ;;  %v10265_v50 = vsub.f32 %v26423_v36, %v10133_v13  ;;  %v10136_v43 = vpop.xlane.xlu1 %10135  ;;  %v10896_v4 = vsel %vm9755_vm3, %v26996_v29, 0.0  ;;  %20418 = vmatprep.mubr.msk.bf16.mxu0 %vm22908_vm1, %v28150_v49  ;;  %v22726_v2 = vpop.eup %22725 }
 0x6fa   : > { %v10266_v55 = vsub.f32 %v26428_v45, %v10136_v43  ;;  %10897 = vadd.xlane.f32.xlu1 %v10896_v4  ;;  %v11197_v41 = vpack.c.bf16 %v11103_v9, %v11102_v33  ;;  %20428 = vmatprep.subr.mxu0 %v28150_v49  ;;  %v28374_v33 = vld [vmem:[#allocation94_spill] sm:$0xff] }
 0x6fb   : > { %v10518_v44 = vmul.f32 1.442695, %v10265_v50  ;;  %v11106_v9 = vmul.f32 %v22726_v2, %v28374_v33 }
 0x6fc   : > { %v10520_v39 = vmul.f32 1.442695, %v10266_v55  ;;  %v10751_v52 = vpop.xlane.xlu0 %10750 }
 0x6fd   : > { %22735 = vpow2.f32 %v10518_v44  ;;  %v10772_v36 = vpop.xlane.xlu1 %10771 }
 0x6fe   : > { %22737 = vpow2.f32 %v10520_v39  ;;  %20377 = vmatmul.mubr.msk.bf16.vlgmr.msra.gmra.mrb[224].mxu1 %vm9755_vm3, %v11197_v41 }
 0x6ff   : > { %v27014_v46 = vpop.eup %22727  ;;  %20387 = vmatpush3.xpose.msk.msra.mxu1 %vm9755_vm3, %v28373_v3  ;;  %22739 = vrcp.f32 %v10751_v52  ;;  %20388 = vmatprep.mubr.msk.bf16.mxu1 %vm22908_vm1, %v28150_v49  ;;  %v28377_v52 = vld [vmem:[#allocation41_spill] sm:$0xff] }
 0x700   : > { %28372 = vst [vmem:[#allocation125_spill] sm:$0xff] %v27014_v46  ;;  %v10769_v45 = vpop.xlane.xlu0 %10768  ;;  %v10893_v17 = vsel %vm9755_vm3, %v27014_v46, 0.0  ;;  %20398 = vmatprep.subr.mxu1 %v28150_v49  ;;  %v22730_v21 = vpop.eup %22729 }
 0x701   : > { %22741 = vrcp.f32 %v10769_v45  ;;  %v10778_v10 = vpop.xlane.xlu1 %10777  ;;  %10894 = vadd.xlane.f32.xlu0 %v10893_v17  ;;  %v11107_v13 = vmul.f32 %v22730_v21, %v28375_v62  ;;  %v22732_v43 = vpop.eup %22731 }
 0x702   : > { %22743 = vrcp.f32 %v10760_v19  ;;  %v22734_v41 = vpop.eup %22733 }
 0x703   : > { %v11199_v40 = vpack.c.bf16 %v11107_v13, %v11106_v9  ;;  %v27025_v4 = vpop.f32.mrb[132].mxu0  ;;  %v28378_v13 = vld [vmem:[#allocation112_spill] sm:$0xff] }
 0x704   : > { %v10763_v50 = vpop.xlane.xlu0 %10762  ;;  %v20192_v44 = vpop.f32.mrb[133].mxu0 }
 0x705   : > { %22745 = vrcp.f32 %v10763_v50  ;;  %v10784_v55 = vpop.xlane.xlu1 %10783  ;;  %v27032_v2 = vpop.f32.mrb[134].mxu0 }
 0x706   : > { %20389 = vmatmul.mubr.msk.bf16.vlgmr.msra.gmra.mrb[228].mxu1 %vm9755_vm3, %v11199_v40  ;;  %v20193_v3 = vpop.f32.mrb[135].mxu0  ;;  %v11110_v40 = vmul.f32 %v22732_v43, %v28378_v13  ;;  %22747 = vrcp.f32 %v10772_v36 }
 0x707   : > { %v27028_v39 = vpop.eup %22735  ;;  %20399 = vmatpush3.xpose.msk.msra.mxu1 %vm9755_vm3, %v28377_v52  ;;  %20400 = vmatprep.mubr.msk.bf16.mxu1 %vm22908_vm1, %v28150_v49  ;;  %v28379_v3 = vld [vmem:[#allocation131_spill] sm:$0xff] }
 0x708   : > { %28376 = vst [vmem:[#allocation137_spill] sm:$0xff] %v27028_v39  ;;  %v27036_v19 = vpop.eup %22737  ;;  %v10139_v45 = vpop.xlane.xlu0 %10138  ;;  %v10899_v17 = vsel %vm9755_vm3, %v27028_v39, 0.0  ;;  %20410 = vmatprep.subr.mxu1 %v28150_v49  ;;  %v11116_v56 = vmul.f32 %v22734_v41, %v28379_v3 }
 0x709   : > { %v22740_v21 = vpop.eup %22739  ;;  %v10790_v33 = vpop.xlane.xlu1 %10789  ;;  %v10267_v9 = vsub.f32 %v26496_v35, %v10139_v45  ;;  %v10902_v62 = vsel %vm9755_vm3, %v27036_v19, 0.0  ;;  %10900 = vadd.xlane.f32.xlu0 %v10899_v17  ;;  %v28380_v17 = vld [vmem:[#allocation60_spill] sm:$0xff] }
 0x70a   : > { %v11111_v50 = vmul.f32 %v22740_v21, %v26434_v14  ;;  %10903 = vadd.xlane.f32.xlu1 %v10902_v62  ;;  %v28381_v14 = vld [vmem:[#allocation143_spill] sm:$0xff] }
 0x70b   : > { %v22742_v44 = vpop.eup %22741  ;;  %v10522_v52 = vmul.f32 1.442695, %v10267_v9 }
 0x70c   : > { %v11117_v1 = vmul.f32 %v22742_v44, %v26458_v53  ;;  %v11201_v39 = vpack.c.bf16 %v11111_v50, %v11110_v40  ;;  %v10775_v29 = vpop.xlane.xlu0 %10774  ;;  %v22744_v46 = vpop.eup %22743  ;;  %v28382_v53 = vld [vmem:[#allocation108_spill] sm:$0xff]  ;;  %v28384_v50 = vld [vmem:[#allocation30_spill] sm:$0xff] }
 0x70d   : > { %22749 = vpow2.f32 %v10522_v52  ;;  %v10796_v35 = vpop.xlane.xlu1 %10795  ;;  %v11114_v36 = vmul.f32 %v22744_v46, %v28381_v14  ;;  %v28385_v14 = vld [vmem:[#allocation135_spill] sm:$0xff] }
 0x70e   : > { %22751 = vrcp.f32 %v10778_v10  ;;  %20401 = vmatmul.mubr.msk.bf16.vlgmr.msra.gmra.mrb[232].mxu1 %vm9755_vm3, %v11201_v39  ;;  %v11204_v45 = vpack.c.bf16 %v11117_v1, %v11116_v56  ;;  %v28383_v10 = vld [vmem:[#allocation29_spill] sm:$0xff] }
 0x70f   : > { %v22746_v43 = vpop.eup %22745  ;;  %20411 = vmatpush3.xpose.msk.msra.mxu1 %vm9755_vm3, %v28380_v17  ;;  %22753 = vrcp.f32 %v10775_v29  ;;  %20412 = vmatprep.mubr.msk.bf16.mxu1 %vm22908_vm1, %v28150_v49 }
 0x710   : > { %v11115_v41 = vmul.f32 %v22746_v43, %v28382_v53  ;;  %20419 = vmatmul.mubr.msk.bf16.vlgmr.msra.gmra.mrb[208].mxu0 %vm9755_vm3, %v11204_v45  ;;  %v10781_v21 = vpop.xlane.xlu0 %10780  ;;  %20422 = vmatprep.subr.mxu1 %v28150_v49  ;;  %v22748_v9 = vpop.eup %22747 }
 0x711   : > { %20429 = vmatpush3.xpose.msk.msra.mxu0 %vm9755_vm3, %v28383_v10  ;;  %v10802_v1 = vpop.xlane.xlu1 %10801  ;;  %22755 = vrcp.f32 %v10781_v21  ;;  %20430 = vmatprep.mubr.msk.bf16.mxu0 %vm22908_vm1, %v28150_v49  ;;  %v28386_v21 = vld [vmem:[#allocation146_spill] sm:$0xff] }
 0x712   : > { %v11203_v29 = vpack.c.bf16 %v11115_v41, %v11114_v36  ;;  %20440 = vmatprep.subr.mxu0 %v28150_v49  ;;  %22757 = vrcp.f32 %v10784_v55  ;;  %v11118_v36 = vmul.f32 %v22748_v9, %v28385_v14 }
 0x713   : > { %v27062_v46 = vpop.f32.mrb[164].mxu1 }
 0x714   : > { %v10787_v56 = vpop.xlane.xlu0 %10786  ;;  %v21886_v62 = vpack.i.bf16 %v27062_v46, %v27025_v4  ;;  %v20198_v13 = vpop.f32.mrb[165].mxu1  ;;  %v28400_v46 = vld [vmem:[#allocation84_spill] sm:$0xff] }
 0x715   : > { %v10808_v39 = vpop.xlane.xlu1 %10807  ;;  %22759 = vrcp.f32 %v10787_v56  ;;  %v27071_v44 = vpop.f32.mrb[166].mxu1 }
 0x716   : > { %20413 = vmatmul.mubr.msk.bf16.vlgmr.msra.gmra.mrb[236].mxu1 %vm9755_vm3, %v11203_v29  ;;  %22761 = vrcp.f32 %v10790_v33  ;;  %v20199_v3 = vpop.f32.mrb[167].mxu1 }
 0x717   : > { %v27067_v40 = vpop.eup %22749  ;;  %20423 = vmatpush3.xpose.msk.msra.mxu1 %vm9755_vm3, %v28384_v50  ;;  %20424 = vmatprep.mubr.msk.bf16.mxu1 %vm22908_vm1, %v28150_v49 }
 0x718   : > { %v22752_v55 = vpop.eup %22751  ;;  %v10793_v45 = vpop.xlane.xlu0 %10792  ;;  %v10905_v43 = vsel %vm9755_vm3, %v27067_v40, 0.0  ;;  %20434 = vmatprep.subr.mxu1 %v28150_v49 }
 0x719   : > { %v22754_v33 = vpop.eup %22753  ;;  %v10814_v17 = vpop.xlane.xlu1 %10813  ;;  %22763 = vrcp.f32 %v10793_v45  ;;  %10906 = vadd.xlane.f32.xlu0 %v10905_v43  ;;  %v11120_v10 = vmul.f32 %v22752_v55, %v28386_v21  ;;  %v28387_v43 = vld [vmem:[#allocation36_spill] sm:$0xff] }
 0x71a   : > { %v11119_v53 = vmul.f32 %v22754_v33, %v26524_v38  ;;  %22765 = vrcp.f32 %v10796_v35  ;;  %v28388_v33 = vld [vmem:[#allocation62_spill] sm:$0xff] }
 0x71b   : > { %v22756_v41 = vpop.eup %22755 }
 0x71c   : > { %v11121_v29 = vmul.f32 %v22756_v41, %v26543_v51  ;;  %v11205_v56 = vpack.c.bf16 %v11119_v53, %v11118_v36  ;;  %v10799_v13 = vpop.xlane.xlu0 %10798  ;;  %v22758_v50 = vpop.eup %22757 }
 0x71d   : > { %v10820_v3 = vpop.xlane.xlu1 %10819  ;;  %22767 = vrcp.f32 %v10799_v13  ;;  %v11122_v38 = vmul.f32 %v22758_v50, %v26485_v48 }
 0x71e   : > { %20425 = vmatmul.mubr.msk.bf16.vlgmr.msra.gmra.mrb[240].mxu1 %vm9755_vm3, %v11205_v56  ;;  %v11206_v52 = vpack.c.bf16 %v11121_v29, %v11120_v10  ;;  %22769 = vrcp.f32 %v10802_v1  ;;  %v28389_v56 = vld [vmem:[#allocation65_spill] sm:$0xff] }
 0x71f   : > { %v22760_v45 = vpop.eup %22759  ;;  %20435 = vmatpush3.xpose.msk.msra.mxu1 %vm9755_vm3, %v28387_v43  ;;  %20436 = vmatprep.mubr.msk.bf16.mxu1 %vm22908_vm1, %v28150_v49 }
 0x720   : > { %v11123_v51 = vmul.f32 %v22760_v45, %v26553_v15  ;;  %20431 = vmatmul.mubr.msk.bf16.vlgmr.msra.gmra.mrb[212].mxu0 %vm9755_vm3, %v11206_v52  ;;  %v10805_v35 = vpop.xlane.xlu0 %10804  ;;  %20446 = vmatprep.subr.mxu1 %v28150_v49  ;;  %v22762_v9 = vpop.eup %22761 }
 0x721   : > { %v10826_v55 = vpop.xlane.xlu1 %10825  ;;  %20441 = vmatpush3.xpose.msk.msra.mxu0 %vm9755_vm3, %v28388_v33  ;;  %22771 = vrcp.f32 %v10805_v35  ;;  %20442 = vmatprep.mubr.msk.bf16.mxu0 %vm22908_vm1, %v28150_v49  ;;  %v11124_v15 = vmul.f32 %v22762_v9, %v26500_v31 }
 0x722   : > { %v11207_v1 = vpack.c.bf16 %v11123_v51, %v11122_v38  ;;  %20452 = vmatprep.subr.mxu0 %v28150_v49  ;;  %22773 = vrcp.f32 %v10808_v39 }
 0x723   : > { %v22764_v48 = vpop.eup %22763  ;;  %v27100_v53 = vpop.f32.mrb[136].mxu0 }
 0x724   : > { %v11125_v52 = vmul.f32 %v22764_v48, %v26585_v26  ;;  %v10811_v14 = vpop.xlane.xlu0 %10810  ;;  %v22766_v36 = vpop.eup %22765  ;;  %v28391_v48 = vld [vmem:[#allocation71_spill] sm:$0xff] }
 0x725   : > { %v10832_v41 = vpop.xlane.xlu1 %10831  ;;  %22775 = vrcp.f32 %v10811_v14  ;;  %v20204_v21 = vpop.f32.mrb[137].mxu0  ;;  %v11126_v31 = vmul.f32 %v22766_v36, %v26531_v20  ;;  %v28392_v14 = vld [vmem:[#allocation51_spill] sm:$0xff] }
 0x726   : > { %20437 = vmatmul.mubr.msk.bf16.vlgmr.msra.gmra.mrb[244].mxu1 %vm9755_vm3, %v11207_v1  ;;  %v11208_v10 = vpack.c.bf16 %v11125_v52, %v11124_v15  ;;  %22777 = vrcp.f32 %v10814_v17  ;;  %v27105_v39 = vpop.f32.mrb[138].mxu0  ;;  %v28390_v17 = vld [vmem:[#allocation66_spill] sm:$0xff] }
 0x727   : > { %v22768_v29 = vpop.eup %22767  ;;  %20447 = vmatpush3.xpose.msk.msra.mxu1 %vm9755_vm3, %v28389_v56  ;;  %20448 = vmatprep.mubr.msk.bf16.mxu1 %vm22908_vm1, %v28150_v49  ;;  %v20205_v13 = vpop.f32.mrb[139].mxu0 }
 0x728   : > { %v11127_v26 = vmul.f32 %v22768_v29, %v26612_v42  ;;  %20443 = vmatmul.mubr.msk.bf16.vlgmr.msra.gmra.mrb[216].mxu0 %vm9755_vm3, %v11208_v10  ;;  %v10817_v50 = vpop.xlane.xlu0 %10816  ;;  %20458 = vmatprep.subr.mxu1 %v28150_v49  ;;  %v22770_v45 = vpop.eup %22769 }
 0x729   : > { %20453 = vmatpush3.xpose.msk.msra.mxu0 %vm9755_vm3, %v28390_v17  ;;  %22779 = vrcp.f32 %v10817_v50  ;;  %20454 = vmatprep.mubr.msk.bf16.mxu0 %vm22908_vm1, %v28150_v49  ;;  %v10838_v42 = vpop.xlane.xlu1 %10837  ;;  %v11128_v38 = vmul.f32 %v22770_v45, %v26548_v7 }
 0x72a   : > { %v11209_v43 = vpack.c.bf16 %v11127_v26, %v11126_v31  ;;  %20464 = vmatprep.subr.mxu0 %v28150_v49  ;;  %22781 = vrcp.f32 %v10820_v3 }
 0x72b   : > { %v22772_v20 = vpop.eup %22771 }
 0x72c   : > { %v11129_v51 = vmul.f32 %v22772_v20, %v26598_v25  ;;  %v10823_v35 = vpop.xlane.xlu0 %10822  ;;  %v22774_v9 = vpop.eup %22773 }
 0x72d   : > { %22783 = vrcp.f32 %v10823_v35  ;;  %v11130_v3 = vmul.f32 %v22774_v9, %v26570_v28  ;;  %v10844_v52 = vpop.xlane.xlu1 %10843 }
 0x72e   : > { %20449 = vmatmul.mubr.msk.bf16.vlgmr.msra.gmra.mrb[248].mxu1 %vm9755_vm3, %v11209_v43  ;;  %v11210_v33 = vpack.c.bf16 %v11129_v51, %v11128_v38  ;;  %22785 = vrcp.f32 %v10826_v55  ;;  %v28394_v38 = vld [vmem:[#allocation38_spill] sm:$0xff] }
 0x72f   : > { %v22776_v1 = vpop.eup %22775  ;;  %20459 = vmatpush3.xpose.msk.msra.mxu1 %vm9755_vm3, %v28391_v48  ;;  %20460 = vmatprep.mubr.msk.bf16.mxu1 %vm22908_vm1, %v28150_v49  ;;  %v28395_v48 = vpack.i.bf16 %v26985_v60, %v26948_v16  ;;  %v28397_v60 = vld [vmem:[#allocation76_spill] sm:$0xff] }
 0x730   : > { %v11131_v7 = vmul.f32 %v22776_v1, %v26657_v59  ;;  %20455 = vmatmul.mubr.msk.bf16.vlgmr.msra.gmra.mrb[220].mxu0 %vm9755_vm3, %v11210_v33  ;;  %v10829_v25 = vpop.xlane.xlu0 %10828  ;;  %20470 = vmatprep.subr.mxu1 %v28150_v49  ;;  %v22778_v15 = vpop.eup %22777 }
 0x731   : > { %20465 = vmatpush3.xpose.msk.msra.mxu0 %vm9755_vm3, %v28392_v14  ;;  %22787 = vrcp.f32 %v10829_v25  ;;  %20466 = vmatprep.mubr.msk.bf16.mxu0 %vm22908_vm1, %v28150_v49  ;;  %v11132_v59 = vmul.f32 %v22778_v15, %v26589_v27  ;;  %v10850_v50 = vpop.xlane.xlu1 %10849  ;;  %v28396_v25 = vld [vmem:[#allocation45_spill] sm:$0xff] }
 0x732   : > { %v11211_v55 = vpack.c.bf16 %v11131_v7, %v11130_v3  ;;  %20476 = vmatprep.subr.mxu0 %v28150_v49  ;;  %22789 = vrcp.f32 %v10832_v41  ;;  %v28393_v41 = vld [vmem:[#allocation40_spill] sm:$0xff] }
 0x733   : > { %v22780_v28 = vpop.eup %22779  ;;  %v27136_v29 = vpop.f32.mrb[168].mxu1 }
 0x734   : > { %v11133_v36 = vmul.f32 %v22780_v28, %v26667_v47  ;;  %v10835_v21 = vpop.xlane.xlu0 %10834  ;;  %v22782_v10 = vpop.eup %22781  ;;  %v21895_v56 = vpack.i.bf16 %v27136_v29, %v27100_v53 }
 0x735   : > { %22791 = vrcp.f32 %v10835_v21  ;;  %v20210_v31 = vpop.f32.mrb[169].mxu1  ;;  %v11134_v47 = vmul.f32 %v22782_v10, %v26619_v6  ;;  %v10856_v1 = vpop.xlane.xlu1 %10855 }
 0x736   : > { %20461 = vmatmul.mubr.msk.bf16.vlgmr.msra.gmra.mrb[252].mxu1 %vm9755_vm3, %v11211_v55  ;;  %v11212_v26 = vpack.c.bf16 %v11133_v36, %v11132_v59  ;;  %22793 = vrcp.f32 %v10838_v42  ;;  %v27143_v27 = vpop.f32.mrb[170].mxu1 }
 0x737   : > { %v22784_v13 = vpop.eup %22783  ;;  %20471 = vmatpush3.xpose.msk.msra.mxu1 %vm9755_vm3, %v28393_v41  ;;  %20472 = vmatprep.mubr.msk.bf16.mxu1 %vm22908_vm1, %v28150_v49  ;;  %v21897_v17 = vpack.i.bf16 %v27143_v27, %v27105_v39  ;;  %v20211_v43 = vpop.f32.mrb[171].mxu1  ;;  %v28405_v39 = vld [vmem:[#allocation14_spill] sm:$0xff] }
 0x738   : > { %v11135_v45 = vmul.f32 %v22784_v13, %v26689_v37  ;;  %20467 = vmatmul.mubr.msk.bf16.vlgmr.msra.gmra.mrb[224].mxu0 %vm9755_vm3, %v11212_v26  ;;  %v10841_v20 = vpop.xlane.xlu0 %10840  ;;  %20482 = vmatprep.subr.mxu1 %v28150_v49  ;;  %v22786_v42 = vpop.eup %22785  ;;  %v28399_v26 = vld [vmem:[#allocation80_spill] sm:$0xff] }
 0x739   : > { %20477 = vmatpush3.xpose.msk.msra.mxu0 %vm9755_vm3, %v28394_v38  ;;  %22795 = vrcp.f32 %v10841_v20  ;;  %20478 = vmatprep.mubr.msk.bf16.mxu0 %vm22908_vm1, %v28150_v49  ;;  %v11136_v51 = vmul.f32 %v22786_v42, %v26626_v11 }
 0x73a   : > { %v11213_v6 = vpack.c.bf16 %v11135_v45, %v11134_v47  ;;  %20488 = vmatprep.subr.mxu0 %v28150_v49  ;;  %22797 = vrcp.f32 %v10844_v52  ;;  %v28398_v52 = vpack.i.bf16 %v26992_v54, %v26956_v8 }
 0x73b   : > { %v22788_v37 = vpop.eup %22787 }
 0x73c   : > { %v11137_v35 = vmul.f32 %v22788_v37, %v26712_v58  ;;  %v10847_v9 = vpop.xlane.xlu0 %10846  ;;  %v22790_v33 = vpop.eup %22789  ;;  %v28402_v37 = vld [vmem:[#allocation89_spill] sm:$0xff] }
 0x73d   : > { %22799 = vrcp.f32 %v10847_v9  ;;  %21878 = vxpose.xlu1.b32.start [1/2] (short) (narrow) %v28395_v48, 8  ;;  %v11138_v11 = vmul.f32 %v22790_v33, %v26663_v34  ;;  %v28403_v9 = vld [vmem:[#allocation42_spill] sm:$0xff] }
 0x73e   : > { %20473 = vmatmul.mubr.msk.bf16.vlgmr.msra.gmra.mrb[0].mxu1 %vm9755_vm3, %v11213_v6  ;;  %v11214_v3 = vpack.c.bf16 %v11137_v35, %v11136_v51  ;;  %22801 = vrcp.f32 %v10850_v50 }
 0x73f   : > { %v22792_v7 = vpop.eup %22791  ;;  %20483 = vmatpush3.xpose.msk.msra.mxu1 %vm9755_vm3, %v28396_v25  ;;  %20484 = vmatprep.mubr.msk.bf16.mxu1 %vm22908_vm1, %v28150_v49 }
 0x740   : > { %v11139_v58 = vmul.f32 %v22792_v7, %v26734_v57  ;;  %20479 = vmatmul.mubr.msk.bf16.vlgmr.msra.gmra.mrb[228].mxu0 %vm9755_vm3, %v11214_v3  ;;  %v10853_v15 = vpop.xlane.xlu0 %10852  ;;  %20494 = vmatprep.subr.mxu1 %v28150_v49  ;;  %v22794_v16 = vpop.eup %22793  ;;  %v28404_v3 = vld [vmem:[#allocation118_spill] sm:$0xff] }
 0x741   : > { %20489 = vmatpush3.xpose.msk.msra.mxu0 %vm9755_vm3, %v28397_v60  ;;  %22803 = vrcp.f32 %v10853_v15  ;;  %21880 = vxpose.xlu1.b32.end [2/2] (short) (narrow) %v28398_v52, 8  ;;  %v10862_v57 = vpop.xlane.xlu1 %10861  ;;  %v11140_v55 = vmul.f32 %v22794_v16, %v26671_v5  ;;  %v28406_v52 = vld [vmem:[#allocation48_spill] sm:$0xff] }
 0x742   : > { %v11215_v14 = vpack.c.bf16 %v11139_v58, %v11138_v11  ;;  %20490 = vmatprep.mubr.msk.bf16.mxu0 %vm22908_vm1, %v28150_v49  ;;  %20500 = vmatprep.subr.mxu0 %v28150_v49  ;;  %22805 = vrcp.f32 %v10856_v1 }
 0x743   : > { %v22796_v34 = vpop.eup %22795  ;;  %v11774_v59 = vpop.f32.mrb[140].mxu0 }
 0x744   : > { %v11141_v28 = vmul.f32 %v22796_v34, %v26723_v32  ;;  %v10859_v36 = vpop.xlane.xlu0 %10858  ;;  %v22798_v21 = vpop.eup %22797  ;;  %v28408_v34 = vld [vmem:[#allocation96_spill] sm:$0xff] }
 0x745   : > { %v20216_v10 = vpop.f32.mrb[141].mxu0  ;;  %22807 = vrcp.f32 %v10859_v36  ;;  %v11142_v32 = vmul.f32 %v22798_v21, %v26697_v63  ;;  %v10868_v41 = vpop.xlane.xlu1 %10867  ;;  %v28401_v63 = vpack.i.bf16 %v27071_v44, %v27032_v2 }
 0x746   : > { %20485 = vmatmul.mubr.msk.bf16.vlgmr.msra.gmra.mrb[4].mxu1 %vm9755_vm3, %v11215_v14  ;;  %v27183_v8 = vpop.f32.mrb[142].mxu0  ;;  %21887 = vxpose.xlu0.b32.start [1/2] (short) (narrow) %v21886_v62, 8  ;;  %v11216_v54 = vpack.c.bf16 %v11141_v28, %v11140_v55  ;;  %22809 = vrcp.f32 %v10862_v57 }
 0x747   : > { %v22800_v31 = vpop.eup %22799  ;;  %20495 = vmatpush3.xpose.msk.msra.mxu1 %vm9755_vm3, %v28399_v26  ;;  %v20217_v5 = vpop.f32.mrb[143].mxu0  ;;  %20496 = vmatprep.mubr.msk.bf16.mxu1 %vm22908_vm1, %v28150_v49 }
 0x748   : > { %v11143_v13 = vmul.f32 %v22800_v31, %v26773_v18  ;;  %20491 = vmatmul.mubr.msk.bf16.vlgmr.msra.gmra.mrb[232].mxu0 %vm9755_vm3, %v11216_v54  ;;  %v10865_v50 = vpop.xlane.xlu0 %10864  ;;  %20506 = vmatprep.subr.mxu1 %v28150_v49  ;;  %v22802_v4 = vpop.eup %22801  ;;  %v28409_v5 = vld [vmem:[#allocation12_spill] sm:$0xff] }
 0x749   : > { %20501 = vmatpush3.xpose.msk.msra.mxu0 %vm9755_vm3, %v28400_v46  ;;  %22811 = vrcp.f32 %v10865_v50  ;;  %20502 = vmatprep.mubr.msk.bf16.mxu0 %vm22908_vm1, %v28150_v49  ;;  %v11144_v47 = vmul.f32 %v22802_v4, %v26716_v30 }
 0x74a   : > { %v11217_v62 = vpack.c.bf16 %v11143_v13, %v11142_v32  ;;  %21889 = vxpose.xlu0.b32.end [2/2] (short) (narrow) %v28401_v63, 8  ;;  %20512 = vmatprep.subr.mxu0 %v28150_v49  ;;  %22813 = vrcp.f32 %v10868_v41 }
 0x74b   : > { %v22804_v18 = vpop.eup %22803  ;;  %v27206_v43 = vpop.f32.mrb[144].mxu0 }
 0x74c   : > { %v11145_v45 = vmul.f32 %v22804_v18, %v26781_v24  ;;  %v22806_v20 = vpop.eup %22805  ;;  %v20228_v42 = vpop.f32.mrb[145].mxu0 }
 0x74d   : > { %v27209_v38 = vpop.f32.mrb[146].mxu0  ;;  %v11146_v24 = vmul.f32 %v22806_v20, %v26741_v22 }
 0x74e   : > { %20497 = vmatmul.mubr.msk.bf16.vlgmr.msra.gmra.mrb[8].mxu1 %vm9755_vm3, %v11217_v62  ;;  %v10871_v6 = vpop.xlane.xlu0 %10870  ;;  %21896 = vxpose.xlu0.b32.start [1/2] (short) (narrow) %v21895_v56, 8  ;;  %v11218_v2 = vpack.c.bf16 %v11145_v45, %v11144_v47  ;;  %v20229_v30 = vpop.f32.mrb[147].mxu0 }
 0x74f   : > { %v22808_v44 = vpop.eup %22807  ;;  %20507 = vmatpush3.xpose.msk.msra.mxu1 %vm9755_vm3, %v28402_v37  ;;  %22815 = vrcp.f32 %v10871_v6  ;;  %20508 = vmatprep.mubr.msk.bf16.mxu1 %vm22908_vm1, %v28150_v49  ;;  %v11853_v35 = vpop.f32.mrb[172].mxu1  ;;  %v28410_v30 = vld [vmem:[#allocation117_spill] sm:$0xff] }
 0x750   : > { %v11147_v51 = vmul.f32 %v22808_v44, %v26804_v23  ;;  %20503 = vmatmul.mubr.msk.bf16.vlgmr.msra.gmra.mrb[236].mxu0 %vm9755_vm3, %v11218_v2  ;;  %20518 = vmatprep.subr.mxu1 %v28150_v49  ;;  %v22810_v53 = vpop.eup %22809  ;;  %v21904_v29 = vpack.i.bf16 %v11853_v35, %v11774_v59  ;;  %v20222_v56 = vpop.f32.mrb[173].mxu1 }
 0x751   : > { %20513 = vmatpush3.xpose.msk.msra.mxu0 %vm9755_vm3, %v28403_v9  ;;  %20514 = vmatprep.mubr.msk.bf16.mxu0 %vm22908_vm1, %v28150_v49  ;;  %v11856_v1 = vpop.f32.mrb[174].mxu1  ;;  %v11148_v7 = vmul.f32 %v22810_v53, %v28404_v3 }
 0x752   : > { %v11219_v33 = vpack.c.bf16 %v11147_v51, %v11146_v24  ;;  %21898 = vxpose.xlu0.b32.end [2/2] (short) (narrow) %v21897_v17, 8  ;;  %20524 = vmatprep.subr.mxu0 %v28150_v49  ;;  %v21906_v23 = vpack.i.bf16 %v11856_v1, %v27183_v8  ;;  %v20223_v48 = vpop.f32.mrb[175].mxu1 }
 0x753   : > { %v22812_v22 = vpop.eup %22811  ;;  %21905 = vxpose.xlu1.b32.start [1/2] (short) (narrow) %v21904_v29, 8  ;;  %v12090_v11 = vpop.f32.mrb[148].mxu0 }
 0x754   : > { %v11149_v25 = vmul.f32 %v22812_v22, %v26817_v12  ;;  %v20240_v58 = vpop.f32.mrb[149].mxu0  ;;  %v22814_v60 = vpop.eup %22813  ;;  %v28407_v12 = vld [vmem:[#allocation9_spill] sm:$0xff] }
 0x755   : > { %v12093_v15 = vpop.f32.mrb[150].mxu0  ;;  %v11150_v14 = vmul.f32 %v22814_v60, %v28407_v12 }
 0x756   : > { %20509 = vmatmul.mubr.msk.bf16.vlgmr.msra.gmra.mrb[12].mxu1 %vm9755_vm3, %v11219_v33  ;;  %v11220_v16 = vpack.c.bf16 %v11149_v25, %v11148_v7  ;;  %v20241_v27 = vpop.f32.mrb[151].mxu0  ;;  %v28411_v7 = vld [vmem:[#allocation92_spill] sm:$0xff] }
 0x757   : > { %20519 = vmatpush3.xpose.msk.msra.mxu1 %vm9755_vm3, %v28405_v39  ;;  %21907 = vxpose.xlu1.b32.end [2/2] (short) (narrow) %v21906_v23, 8  ;;  %v10874_v13 = vpop.xlane.xlu1 %10873 }
 0x758   : > { %20515 = vmatmul.mubr.msk.bf16.vlgmr.msra.gmra.mrb[240].mxu0 %vm9755_vm3, %v11220_v16  ;;  %20520 = vmatprep.mubr.msk.bf16.mxu1 %vm22908_vm1, %v28150_v49  ;;  %22817 = vrcp.f32 %v10874_v13 }
 0x759   : > { %v22816_v17 = vpop.eup %22815  ;;  %20525 = vmatpush3.xpose.msk.msra.mxu0 %vm9755_vm3, %v28406_v52  ;;  %20530 = vmatprep.subr.mxu1 %v28150_v49 }
 0x75a   : > { %v11151_v57 = vmul.f32 %v22816_v17, %v28408_v34  ;;  %20526 = vmatprep.mubr.msk.bf16.mxu0 %vm22908_vm1, %v28150_v49  ;;  %20536 = vmatprep.subr.mxu0 %v28150_v49 }
 0x75b   : > { %v12011_v28 = vpop.f32.mrb[176].mxu1 }
 0x75c   : > { %v11221_v55 = vpack.c.bf16 %v11151_v57, %v11150_v14  ;;  %v12248_v59 = vpop.f32.mrb[152].mxu0  ;;  %v21913_v36 = vpack.i.bf16 %v12011_v28, %v27206_v43  ;;  %v20234_v21 = vpop.f32.mrb[177].mxu1  ;;  %v28412_v28 = vld [vmem:[#allocation126_spill] sm:$0xff] }
 0x75d   : > { %v20252_v10 = vpop.f32.mrb[153].mxu0  ;;  %v12014_v8 = vpop.f32.mrb[178].mxu1 }
 0x75e   : > { %v12251_v54 = vpop.f32.mrb[154].mxu0  ;;  %20521 = vmatmul.mubr.msk.bf16.vlgmr.msra.gmra.mrb[16].mxu1 %vm9755_vm3, %v11221_v55  ;;  %v21915_v31 = vpack.i.bf16 %v12014_v8, %v27209_v38  ;;  %21914 = vxpose.xlu0.b32.start [1/2] (short) (narrow) %v21913_v36, 8  ;;  %v20235_v32 = vpop.f32.mrb[179].mxu1  ;;  %v28413_v36 = vld [vmem:[#allocation99_spill] sm:$0xff] }
 0x75f   : > { %v20253_v26 = vpop.f32.mrb[155].mxu0  ;;  %20531 = vmatpush3.xpose.msk.msra.mxu1 %vm9755_vm3, %v28409_v5  ;;  %20532 = vmatprep.mubr.msk.bf16.mxu1 %vm22908_vm1, %v28150_v49 }
 0x760   : > { %20542 = vmatprep.subr.mxu1 %v28150_v49 }
 0x762   : > { %21916 = vxpose.xlu0.b32.end [2/2] (short) (narrow) %v21915_v31, 8  ;;  %v22818_v2 = vpop.eup %22817 }
 0x763   : > { %v11152_v24 = vmul.f32 %v22818_v2, %v28410_v30  ;;  %v28417_v30 = vld [vmem:[#allocation102_spill] sm:$0xff] }
 0x764   : > { %v12406_v50 = vpop.f32.mrb[156].mxu0 }
 0x765   : > { %v21931_v4 = vpack.i.bf16 %v12406_v50, %v12090_v11  ;;  %v20264_v46 = vpop.f32.mrb[157].mxu0 }
 0x766   : > { %v12409_v62 = vpop.f32.mrb[158].mxu0  ;;  %v10877_v41 = vpop.xlane.xlu0 %10876  ;;  %v28414_v46 = vld [vmem:[#allocation97_spill] sm:$0xff] }
 0x767   : > { %v21933_v63 = vpack.i.bf16 %v12409_v62, %v12093_v15  ;;  %v20265_v18 = vpop.f32.mrb[159].mxu0  ;;  %22819 = vrcp.f32 %v10877_v41  ;;  %21932 = vxpose.xlu0.b32.start [1/2] (short) (narrow) %v21931_v4, 8  ;;  %v12169_v47 = vpop.f32.mrb[180].mxu1  ;;  %v28415_v41 = vld [vmem:[#allocation145_spill] sm:$0xff] }
 0x768   : > { %v20246_v45 = vpop.f32.mrb[181].mxu1  ;;  %v10880_v35 = vpop.xlane.xlu1 %10879  ;;  %v28416_v18 = vld [vmem:[#allocation144_spill] sm:$0xff] }
 0x769   : > { %v27255_v43 = vpop.f32.mrb[182].mxu1  ;;  %22821 = vrcp.f32 %v10880_v35 }
 0x76a   : > { %v20247_v20 = vpop.f32.mrb[183].mxu1 }
 0x76b   : > { %21934 = vxpose.xlu0.b32.end [2/2] (short) (narrow) %v21933_v63, 8 }
 0x76c   : > { %v12564_v42 = vpop.f32.mrb[160].mxu0 }
 0x76d   : > { %v20276_v38 = vpop.f32.mrb[161].mxu0 }
 0x76e   : > { %v12567_v6 = vpop.f32.mrb[162].mxu0 }
 0x76f   : > { %v20277_v44 = vpop.f32.mrb[163].mxu0  ;;  %v10886_v11 = vpop.xlane.xlu1 %10885 }
 0x771   : > { %v22820_v37 = vpop.eup %22819 }
 0x772   : > { %v11153_v51 = vmul.f32 %v22820_v37, %v26896_v61 }
 0x773   : > { %v12327_v53 = vpop.f32.mrb[184].mxu1  ;;  %v22822_v52 = vpop.eup %22821 }
 0x774   : > { %v12722_v29 = vpop.f32.mrb[164].mxu0  ;;  %v11222_v56 = vpack.c.bf16 %v11153_v51, %v11152_v24  ;;  %v21922_v9 = vpack.i.bf16 %v12327_v53, %v12248_v59  ;;  %v20258_v33 = vpop.f32.mrb[185].mxu1  ;;  %v11154_v59 = vmul.f32 %v22822_v52, %v28412_v28  ;;  %v28421_v28 = vld [vmem:[#allocation137_spill] sm:$0xff] }
 0x775   : > { %v20288_v1 = vpop.f32.mrb[165].mxu0  ;;  %v12330_v22 = vpop.f32.mrb[186].mxu1 }
 0x776   : > { %v12725_v23 = vpop.f32.mrb[166].mxu0  ;;  %20527 = vmatmul.mubr.msk.bf16.vlgmr.msra.gmra.mrb[244].mxu0 %vm9755_vm3, %v11222_v56  ;;  %v21924_v48 = vpack.i.bf16 %v12330_v22, %v12251_v54  ;;  %v10883_v25 = vpop.xlane.xlu0 %10882  ;;  %21923 = vxpose.xlu1.b32.start [1/2] (short) (narrow) %v21922_v9, 8 }
 0x777   : > { %v20289_v3 = vpop.f32.mrb[167].mxu0  ;;  %20537 = vmatpush3.xpose.msk.msra.mxu0 %vm9755_vm3, %v28411_v7  ;;  %22823 = vrcp.f32 %v10883_v25  ;;  %v20259_v61 = vpop.f32.mrb[187].mxu1  ;;  %20538 = vmatprep.mubr.msk.bf16.mxu0 %vm22908_vm1, %v28150_v49  ;;  %v28418_v7 = vld [vmem:[#allocation125_spill] sm:$0xff] }
 0x778   : > { %20548 = vmatprep.subr.mxu0 %v28150_v49  ;;  %22825 = vrcp.f32 %v10886_v11 }
 0x77a   : > { %21925 = vxpose.xlu1.b32.end [2/2] (short) (narrow) %v21924_v48, 8 }
 0x77c   : > { %v12880_v58 = vpop.f32.mrb[168].mxu0 }
 0x77d   : > { %v21949_v15 = vpack.i.bf16 %v12880_v58, %v12564_v42  ;;  %v20300_v16 = vpop.f32.mrb[169].mxu0 }
 0x77e   : > { %v12883_v60 = vpop.f32.mrb[170].mxu0  ;;  %v10889_v39 = vpop.xlane.xlu0 %10888 }
 0x77f   : > { %v21951_v27 = vpack.i.bf16 %v12883_v60, %v12567_v6  ;;  %v20301_v17 = vpop.f32.mrb[171].mxu0  ;;  %22827 = vrcp.f32 %v10889_v39  ;;  %21950 = vxpose.xlu0.b32.start [1/2] (short) (narrow) %v21949_v15, 8  ;;  %v10892_v45 = vpop.xlane.xlu1 %10891 }
 0x780   : > { %v12485_v12 = vpop.f32.mrb[188].mxu1  ;;  %22829 = vrcp.f32 %v10892_v45 }
 0x781   : > { %v21940_v14 = vpack.i.bf16 %v12485_v12, %v12169_v47  ;;  %v20270_v34 = vpop.f32.mrb[189].mxu1  ;;  %v22824_v57 = vpop.eup %22823  ;;  %v28419_v12 = vld [vmem:[#allocation107_spill] sm:$0xff] }
 0x782   : > { %v12488_v55 = vpop.f32.mrb[190].mxu1  ;;  %v11155_v21 = vmul.f32 %v22824_v57, %v28413_v36  ;;  %v22826_v13 = vpop.eup %22825  ;;  %v28420_v34 = vld [vmem:[#allocation154_spill] sm:$0xff] }
 0x783   : > { %v21942_v10 = vpack.i.bf16 %v12488_v55, %v27255_v43  ;;  %21952 = vxpose.xlu0.b32.end [2/2] (short) (narrow) %v21951_v27, 8  ;;  %21941 = vxpose.xlu1.b32.start [1/2] (short) (narrow) %v21940_v14, 8  ;;  %v20271_v8 = vpop.f32.mrb[191].mxu1  ;;  %v11156_v63 = vmul.f32 %v22826_v13, %v28415_v41 }
 0x784   : > { %v13038_v54 = vpop.f32.mrb[172].mxu0  ;;  %v11223_v31 = vpack.c.bf16 %v11155_v21, %v11154_v59 }
 0x785   : > { %v21967_v26 = vpack.i.bf16 %v13038_v54, %v12722_v29  ;;  %v20312_v5 = vpop.f32.mrb[173].mxu0 }
 0x786   : > { %v13041_v32 = vpop.f32.mrb[174].mxu0  ;;  %20533 = vmatmul.mubr.msk.bf16.vlgmr.msra.gmra.mrb[20].mxu1 %vm9755_vm3, %v11223_v31 }
 0x787   : > { %v21969_v50 = vpack.i.bf16 %v13041_v32, %v12725_v23  ;;  %v20313_v4 = vpop.f32.mrb[175].mxu0  ;;  %21968 = vxpose.xlu0.b32.start [1/2] (short) (narrow) %v21967_v26, 8  ;;  %20543 = vmatpush3.xpose.msk.msra.mxu1 %vm9755_vm3, %v28414_v46  ;;  %v10898_v35 = vpop.xlane.xlu1 %10897 }
 0x788   : > { %21943 = vxpose.xlu1.b32.end [2/2] (short) (narrow) %v21942_v10, 8  ;;  %20544 = vmatprep.mubr.msk.bf16.mxu1 %vm22908_vm1, %v28150_v49 }
 0x789   : > { %v22828_v62 = vpop.eup %22827  ;;  %20554 = vmatprep.subr.mxu1 %v28150_v49 }
 0x78a   : > { %v11157_v47 = vmul.f32 %v22828_v62, %v28416_v18  ;;  %v22830_v1 = vpop.eup %22829 }
 0x78b   : > { %21970 = vxpose.xlu0.b32.end [2/2] (short) (narrow) %v21969_v50, 8  ;;  %v11158_v3 = vmul.f32 %v22830_v1, %v26973_v0 }
 0x78c   : > { %v12643_v43 = vpop.f32.mrb[192].mxu1  ;;  %v13196_v20 = vpop.f32.mrb[176].mxu0  ;;  %v11224_v42 = vpack.c.bf16 %v11157_v47, %v11156_v63 }
 0x78d   : > { %v20282_v38 = vpop.f32.mrb[193].mxu1  ;;  %v20324_v6 = vpop.f32.mrb[177].mxu0 }
 0x78e   : > { %v12646_v2 = vpop.f32.mrb[194].mxu1  ;;  %v13199_v44 = vpop.f32.mrb[178].mxu0  ;;  %20539 = vmatmul.mubr.msk.bf16.vlgmr.msra.gmra.mrb[248].mxu0 %vm9755_vm3, %v11224_v42 }
 0x78f   : > { %v20325_v37 = vpop.f32.mrb[179].mxu0  ;;  %20549 = vmatpush3.xpose.msk.msra.mxu0 %vm9755_vm3, %v28417_v30  ;;  %v10895_v24 = vpop.xlane.xlu0 %10894  ;;  %20550 = vmatprep.mubr.msk.bf16.mxu0 %vm22908_vm1, %v28150_v49 }
 0x790   : > { %22831 = vrcp.f32 %v10895_v24  ;;  %v20283_v51 = vpop.f32.mrb[195].mxu1 }
 0x791   : > { %22833 = vrcp.f32 %v10898_v35 }
 0x794   : > { %v13354_v53 = vpop.f32.mrb[180].mxu0 }
 0x795   : > { %v20336_v29 = vpop.f32.mrb[181].mxu0 }
 0x796   : > { %v13357_v56 = vpop.f32.mrb[182].mxu0  ;;  %v10901_v9 = vpop.xlane.xlu0 %10900 }
 0x797   : > { %v20337_v33 = vpop.f32.mrb[183].mxu0  ;;  %22835 = vrcp.f32 %v10901_v9  ;;  %v10904_v55 = vpop.xlane.xlu1 %10903 }
 0x798   : > { %22837 = vrcp.f32 %v10904_v55 }
 0x799   : > { %v12801_v22 = vpop.f32.mrb[196].mxu1 }
 0x79a   : > { %v22832_v23 = vpop.eup %22831  ;;  %v20294_v48 = vpop.f32.mrb[197].mxu1 }
 0x79b   : > { %v11159_v25 = vmul.f32 %v22832_v23, %v28418_v7  ;;  %v12804_v61 = vpop.f32.mrb[198].mxu1  ;;  %v22834_v27 = vpop.eup %22833 }
 0x79c   : > { %v20295_v11 = vpop.f32.mrb[199].mxu1  ;;  %v13512_v58 = vpop.f32.mrb[184].mxu0  ;;  %v11160_v57 = vmul.f32 %v22834_v27, %v28420_v34 }
 0x79d   : > { %v11225_v15 = vpack.c.bf16 %v11159_v25, %v11158_v3  ;;  %v22003_v16 = vpack.i.bf16 %v13512_v58, %v13196_v20  ;;  %v20348_v60 = vpop.f32.mrb[185].mxu0 }
 0x79e   : > { %v13515_v39 = vpop.f32.mrb[186].mxu0 }
 0x79f   : > { %v22005_v17 = vpack.i.bf16 %v13515_v39, %v13199_v44  ;;  %v20349_v52 = vpop.f32.mrb[187].mxu0  ;;  %20545 = vmatmul.mubr.msk.bf16.vlgmr.msra.gmra.mrb[24].mxu1 %vm9755_vm3, %v11225_v15  ;;  %22004 = vxpose.xlu0.b32.start [1/2] (short) (narrow) %v22003_v16, 8 }
 0x7a0   : > { %20555 = vmatpush3.xpose.msk.msra.mxu1 %vm9755_vm3, %v28419_v12  ;;  %20556 = vmatprep.mubr.msk.bf16.mxu1 %vm22908_vm1, %v28150_v49 }
 0x7a1   : > { %v22836_v0 = vpop.eup %22835  ;;  %v12959_v14 = vpop.f32.mrb[200].mxu1 }
 0x7a2   : > { %v11161_v59 = vmul.f32 %v22836_v0, %v28421_v28  ;;  %v21958_v36 = vpack.i.bf16 %v12959_v14, %v12643_v43  ;;  %v20306_v21 = vpop.f32.mrb[201].mxu1  ;;  %v22838_v42 = vpop.eup %22837 }
 0x7a3   : > { %v12962_v10 = vpop.f32.mrb[202].mxu1  ;;  %22006 = vxpose.xlu0.b32.end [2/2] (short) (narrow) %v22005_v17, 8  ;;  %v11162_v44 = vmul.f32 %v22838_v42, %v27036_v19 }
 0x7a4   : > { %v21960_v8 = vpack.i.bf16 %v12962_v10, %v12646_v2  ;;  %21959 = vxpose.xlu1.b32.start [1/2] (short) (narrow) %v21958_v36, 8  ;;  %v20307_v54 = vpop.f32.mrb[203].mxu1  ;;  %v13670_v31 = vpop.f32.mrb[188].mxu0  ;;  %v11226_v26 = vpack.c.bf16 %v11161_v59, %v11160_v57 }
 0x7a5   : > { %v22021_v5 = vpack.i.bf16 %v13670_v31, %v13354_v53  ;;  %v20360_v32 = vpop.f32.mrb[189].mxu0 }
 0x7a6   : > { %v13673_v49 = vpop.f32.mrb[190].mxu0  ;;  %20551 = vmatmul.mubr.msk.bf16.vlgmr.msra.gmra.mrb[252].mxu0 %vm9755_vm3, %v11226_v26  ;;  %v10907_v13 = vpop.xlane.xlu0 %10906 }
 0x7a7   : > { %v22023_v50 = vpack.i.bf16 %v13673_v49, %v13357_v56  ;;  %v20361_v4 = vpop.f32.mrb[191].mxu0  ;;  %22839 = vrcp.f32 %v10907_v13  ;;  %22022 = vxpose.xlu0.b32.start [1/2] (short) (narrow) %v22021_v5, 8 }
 0x7a8   : > { %21961 = vxpose.xlu1.b32.end [2/2] (short) (narrow) %v21960_v8, 8 }
 0x7a9   : > { %v13117_v46 = vpop.f32.mrb[204].mxu1 }
 0x7aa   : > { %v21976_v62 = vpack.i.bf16 %v13117_v46, %v12801_v22  ;;  %v20318_v41 = vpop.f32.mrb[205].mxu1 }
 0x7ab   : > { %v13120_v63 = vpop.f32.mrb[206].mxu1  ;;  %22024 = vxpose.xlu0.b32.end [2/2] (short) (narrow) %v22023_v50, 8 }
 0x7ac   : > { %v21978_v18 = vpack.i.bf16 %v13120_v63, %v12804_v61  ;;  %21977 = vxpose.xlu1.b32.start [1/2] (short) (narrow) %v21976_v62, 8  ;;  %v20319_v47 = vpop.f32.mrb[207].mxu1  ;;  %v13828_v45 = vpop.f32.mrb[192].mxu0 }
 0x7ad   : > { %v20372_v43 = vpop.f32.mrb[193].mxu0 }
 0x7ae   : > { %v13831_v20 = vpop.f32.mrb[194].mxu0 }
 0x7af   : > { %v20373_v38 = vpop.f32.mrb[195].mxu0 }
 0x7b0   : > { %21979 = vxpose.xlu1.b32.end [2/2] (short) (narrow) %v21978_v18, 8 }
 0x7b1   : > { %v22840_v6 = vpop.eup %22839  ;;  %v27291_v2 = vpop.f32.mrb[208].mxu1 }
 0x7b2   : > { %v11163_v37 = vmul.f32 %v22840_v6, %v27067_v40  ;;  %v20330_v30 = vpop.f32.mrb[209].mxu1 }
 0x7b3   : > { %v27295_v24 = vpop.f32.mrb[210].mxu1 }
 0x7b4   : > { %v11227_v51 = vpack.c.bf16 %v11163_v37, %v11162_v44  ;;  %v20331_v35 = vpop.f32.mrb[211].mxu1  ;;  %v13986_v53 = vpop.f32.mrb[196].mxu0 }
 0x7b5   : > { %v20384_v29 = vpop.f32.mrb[197].mxu0 }
 0x7b6   : > { %v13989_v56 = vpop.f32.mrb[198].mxu0  ;;  %20557 = vmatmul.mubr.msk.bf16.vlgmr.msra.gmra.mrb[28].mxu1 %vm9755_vm3, %v11227_v51 }
 0x7b7   : > { %v20385_v9 = vpop.f32.mrb[199].mxu0 }
 0x7b9   : > { %v27298_v33 = vpop.f32.mrb[212].mxu1 }
 0x7ba   : > { %v20342_v1 = vpop.f32.mrb[213].mxu1 }
 0x7bb   : > { %v27300_v22 = vpop.f32.mrb[214].mxu1 }
 0x7bc   : > { %v20343_v23 = vpop.f32.mrb[215].mxu1  ;;  %v14144_v19 = vpop.f32.mrb[200].mxu0 }
 0x7bd   : > { %v22057_v48 = vpack.i.bf16 %v14144_v19, %v13828_v45  ;;  %v20396_v40 = vpop.f32.mrb[201].mxu0  ;;  %v21881_v3 = vpop.trf.xlu1 }
 0x7be   : > { %v14147_v7 = vpop.f32.mrb[202].mxu0  ;;  %v21882_v36 = vunpack.i.l.bf16 %v21881_v3  ;;  %v21885_v8 = vunpack.i.h.bf16 %v21881_v3 }
 0x7bf   : > { %v22059_v25 = vpack.i.bf16 %v14147_v7, %v13831_v20  ;;  %v20397_v61 = vpop.f32.mrb[203].mxu0  ;;  %22058 = vxpose.xlu0.b32.start [1/2] (short) (narrow) %v22057_v48, 8 }
 0x7c1   : > { %v13591_v11 = vpop.f32.mrb[216].mxu1 }
 0x7c2   : > { %v22012_v58 = vpack.i.bf16 %v13591_v11, %v27291_v2  ;;  %v20354_v15 = vpop.f32.mrb[217].mxu1 }
 0x7c3   : > { %v13594_v16 = vpop.f32.mrb[218].mxu1  ;;  %22060 = vxpose.xlu0.b32.end [2/2] (short) (narrow) %v22059_v25, 8 }
 0x7c4   : > { %v22014_v60 = vpack.i.bf16 %v13594_v16, %v27295_v24  ;;  %v20355_v39 = vpop.f32.mrb[219].mxu1 }
 0x7c6   : > { %v21890_v27 = vpop.trf.xlu0 }
 0x7c7   : > { %v21891_v13 = vunpack.i.l.bf16 %v21890_v27  ;;  %v21894_v63 = vunpack.i.h.bf16 %v21890_v27 }
 0x7c9   : > { %v13749_v17 = vpop.f32.mrb[220].mxu1 }
 0x7ca   : > { %v22030_v52 = vpack.i.bf16 %v13749_v17, %v27298_v33  ;;  %v20366_v12 = vpop.f32.mrb[221].mxu1 }
 0x7cb   : > { %v13752_v0 = vpop.f32.mrb[222].mxu1  ;;  %v14302_v14 = vpop.f32.mrb[204].mxu0 }
 0x7cc   : > { %v22032_v34 = vpack.i.bf16 %v13752_v0, %v27300_v22  ;;  %v20367_v57 = vpop.f32.mrb[223].mxu1  ;;  %v22075_v55 = vpack.i.bf16 %v14302_v14, %v13986_v53  ;;  %v20408_v28 = vpop.f32.mrb[205].mxu0 }
 0x7cd   : > { %v14305_v59 = vpop.f32.mrb[206].mxu0 }
 0x7ce   : > { %v22077_v21 = vpack.i.bf16 %v14305_v59, %v13989_v56  ;;  %v20409_v10 = vpop.f32.mrb[207].mxu0  ;;  %v21899_v54 = vpop.trf.xlu0  ;;  %22076 = vxpose.xlu0.b32.start [1/2] (short) (narrow) %v22075_v55, 8 }
 0x7cf   : > { %v21903_v31 = vunpack.i.h.bf16 %v21899_v54  ;;  %v21900_v26 = vunpack.i.l.bf16 %v21899_v54 }
 0x7d1   : > { %v27306_v5 = vpop.f32.mrb[224].mxu1  ;;  %v21985_v32 = vpack.i.bf16 %v21900_v26, %v21882_v36  ;;  %v21987_v46 = vpack.i.bf16 %v21903_v31, %v21885_v8 }
 0x7d2   : > { %v20378_v49 = vpop.f32.mrb[225].mxu1  ;;  %22078 = vxpose.xlu0.b32.end [2/2] (short) (narrow) %v22077_v21, 8 }
 0x7d3   : > { %v27308_v50 = vpop.f32.mrb[226].mxu1  ;;  %21986 = vxpose.xlu1.b32.start [1/4] (short) (narrow) %v21985_v32, 16  ;;  %v21908_v4 = vpop.trf.xlu1 }
 0x7d4   : > { %v20379_v62 = vpop.f32.mrb[227].mxu1  ;;  %v21909_v41 = vunpack.i.l.bf16 %v21908_v4  ;;  %v21912_v18 = vunpack.i.h.bf16 %v21908_v4 }
 0x7d6   : > { %v21989_v47 = vpack.i.bf16 %v21909_v41, %v21891_v13  ;;  %v21991_v42 = vpack.i.bf16 %v21912_v18, %v21894_v63 }
 0x7d7   : > { %21988 = vxpose.xlu1.b32.cont [2/4] (short) (narrow) %v21987_v46, 16 }
 0x7d9   : > { %v27310_v45 = vpop.f32.mrb[228].mxu1 }
 0x7da   : > { %v20390_v43 = vpop.f32.mrb[229].mxu1 }
 0x7db   : > { %v27312_v20 = vpop.f32.mrb[230].mxu1  ;;  %21990 = vxpose.xlu1.b32.cont [3/4] (short) (narrow) %v21989_v47, 16 }
 0x7dc   : > { %v20391_v38 = vpop.f32.mrb[231].mxu1 }
 0x7de   : > { %v21917_v6 = vpop.trf.xlu0 }
 0x7df   : > { %21992 = vxpose.xlu1.b32.end [4/4] (short) (narrow) %v21991_v42, 16  ;;  %v21918_v16 = vunpack.i.l.bf16 %v21917_v6 }
 0x7e1   : > { %v27314_v2 = vpop.f32.mrb[232].mxu1 }
 0x7e2   : > { %v22066_v44 = vpack.i.bf16 %v27314_v2, %v27306_v5  ;;  %v20402_v37 = vpop.f32.mrb[233].mxu1 }
 0x7e3   : > { %v27318_v30 = vpop.f32.mrb[234].mxu1  ;;  %v14460_v24 = vpop.f32.mrb[208].mxu0  ;;  %22013 = vxpose.xlu1.b32.start [1/2] (short) (narrow) %v22012_v58, 8 }
 0x7e4   : > { %v22068_v51 = vpack.i.bf16 %v27318_v30, %v27308_v50  ;;  %v20403_v35 = vpop.f32.mrb[235].mxu1  ;;  %v20420_v53 = vpop.f32.mrb[209].mxu0 }
 0x7e5   : > { %v14463_v29 = vpop.f32.mrb[210].mxu0 }
 0x7e6   : > { %v20421_v56 = vpop.f32.mrb[211].mxu0 }
 0x7e7   : > { %22015 = vxpose.xlu1.b32.end [2/2] (short) (narrow) %v22014_v60, 8  ;;  %v21935_v9 = vpop.trf.xlu0  ;;  %v21921_v60 = vunpack.i.h.bf16 %v21917_v6 }
 0x7e9   : > { %v27322_v33 = vpop.f32.mrb[236].mxu1 }
 0x7ea   : > { %v22084_v1 = vpack.i.bf16 %v27322_v33, %v27310_v45  ;;  %v20414_v22 = vpop.f32.mrb[237].mxu1 }
 0x7eb   : > { %v27326_v23 = vpop.f32.mrb[238].mxu1  ;;  %22031 = vxpose.xlu1.b32.start [1/2] (short) (narrow) %v22030_v52, 8  ;;  %v22327_v22 = vld [vmem:[%s27558_s3] sm:$0xff]  }
 0x7ec   : > { %v22086_v19 = vpack.i.bf16 %v27326_v23, %v27312_v20  ;;  %v20415_v48 = vpop.f32.mrb[239].mxu1  ;;  %20560 = vmatprep.subr.bf16.mxu0 %v22327_v22 }
 0x7ed   : > { %v22328_v48 = vld [vmem:[%s27558_s3 + $0x8] sm:$0xff]   ;;  %20561 = vmatpush3.bf16.msra.mxu0 %v22327_v22 }
 0x7ee   : > { %20562 = vmatprep.subr.bf16.mxu0 %v22328_v48 }
 0x7ef   : > { %22033 = vxpose.xlu1.b32.end [2/2] (short) (narrow) %v22032_v34, 8 }
 0x7f1   : > { %v14539_v40 = vpop.f32.mrb[240].mxu1  ;;  %20563 = vmatpush3.bf16.msra.mxu0 %v22328_v48 }
 0x7f2   : > { %v20426_v3 = vpop.f32.mrb[241].mxu1 }
 0x7f3   : > { %v14542_v7 = vpop.f32.mrb[242].mxu1  ;;  %v14618_v25 = vpop.f32.mrb[212].mxu0 }
 0x7f4   : > { %v20427_v61 = vpop.f32.mrb[243].mxu1  ;;  %v20432_v11 = vpop.f32.mrb[213].mxu0 }
 0x7f5   : > { %v14621_v58 = vpop.f32.mrb[214].mxu0 }
 0x7f6   : > { %v20433_v15 = vpop.f32.mrb[215].mxu0  ;;  %v21926_v39 = vpop.trf.xlu1 }
 0x7f7   : > { %v21930_v27 = vunpack.i.h.bf16 %v21926_v39  ;;  %v21927_v17 = vunpack.i.l.bf16 %v21926_v39 }
 0x7f9   : > { %v27330_v12 = vpop.f32.mrb[244].mxu1  ;;  %v22039_v0 = vpack.i.bf16 %v21927_v17, %v21918_v16  ;;  %v22041_v59 = vpack.i.bf16 %v21930_v27, %v21921_v60 }
 0x7fa   : > { %v20438_v52 = vpop.f32.mrb[245].mxu1 }
 0x7fb   : > { %v27332_v14 = vpop.f32.mrb[246].mxu1  ;;  %v14776_v34 = vpop.f32.mrb[216].mxu0  ;;  %22040 = vxpose.xlu1.b32.start [1/4] (short) (narrow) %v22039_v0, 16 }
 0x7fc   : > { %v20439_v57 = vpop.f32.mrb[247].mxu1  ;;  %v22111_v55 = vpack.i.bf16 %v14776_v34, %v14460_v24  ;;  %v20444_v28 = vpop.f32.mrb[217].mxu0 }
 0x7fd   : > { %v14779_v36 = vpop.f32.mrb[218].mxu0 }
 0x7fe   : > { %v22113_v21 = vpack.i.bf16 %v14779_v36, %v14463_v29  ;;  %v20445_v10 = vpop.f32.mrb[219].mxu0  ;;  %22112 = vxpose.xlu0.b32.start [1/2] (short) (narrow) %v22111_v55, 8 }
 0x7ff   : > { %v21953_v8 = vpop.trf.xlu0  ;;  %22042 = vxpose.xlu1.b32.cont [2/4] (short) (narrow) %v22041_v59, 16 }
 0x801   : > { %v14855_v54 = vpop.f32.mrb[248].mxu1 }
 0x802   : > { %v22120_v31 = vpack.i.bf16 %v14855_v54, %v14539_v40  ;;  %v20450_v26 = vpop.f32.mrb[249].mxu1  ;;  %22114 = vxpose.xlu0.b32.end [2/2] (short) (narrow) %v22113_v21, 8 }
 0x803   : > { %v14858_v32 = vpop.f32.mrb[250].mxu1  ;;  %v14934_v49 = vpop.f32.mrb[220].mxu0  ;;  %22044 = vxpose.xlu1.b32.cont [3/4] (short) (narrow) %v21935_v9, 16 }
 0x804   : > { %v22122_v13 = vpack.i.bf16 %v14858_v32, %v14542_v7  ;;  %v21944_v4 = vpop.trf.xlu1  ;;  %v20451_v46 = vpop.f32.mrb[251].mxu1  ;;  %v22129_v62 = vpack.i.bf16 %v14934_v49, %v14618_v25 }
 0x805   : > { %v20456_v41 = vpop.f32.mrb[221].mxu0 }
 0x806   : > { %v14937_v63 = vpop.f32.mrb[222].mxu0  ;;  %22121 = vxpose.xlu0.b32.start [1/2] (short) (narrow) %v22120_v31, 8 }
 0x807   : > { %v22131_v18 = vpack.i.bf16 %v14937_v63, %v14621_v58  ;;  %v20457_v47 = vpop.f32.mrb[223].mxu0  ;;  %v27334_v43 = vpop.trf.xlu0  ;;  %22046 = vxpose.xlu1.b32.end [4/4] (short) (narrow) %v21944_v4, 16 }
 0x809   : > { %v27336_v42 = vpop.f32.mrb[252].mxu1 }
 0x80a   : > { %v22138_v38 = vpack.i.bf16 %v27336_v42, %v27330_v12  ;;  %v20462_v6 = vpop.f32.mrb[253].mxu1  ;;  %22123 = vxpose.xlu0.b32.end [2/2] (short) (narrow) %v22122_v13, 8 }
 0x80b   : > { %v27340_v37 = vpop.f32.mrb[254].mxu1  ;;  %v15092_v24 = vpop.f32.mrb[224].mxu0  ;;  %22067 = vxpose.xlu1.b32.start [1/2] (short) (narrow) %v22066_v44, 8 }
 0x80c   : > { %v22140_v35 = vpack.i.bf16 %v27340_v37, %v27332_v14  ;;  %v20463_v53 = vpop.f32.mrb[255].mxu1  ;;  %v20468_v29 = vpop.f32.mrb[225].mxu0 }
 0x80d   : > { %v15095_v56 = vpop.f32.mrb[226].mxu0 }
 0x80e   : > { %v20469_v9 = vpop.f32.mrb[227].mxu0  ;;  %22130 = vxpose.xlu0.b32.start [1/2] (short) (narrow) %v22129_v62, 8 }
 0x80f   : > { %22069 = vxpose.xlu1.b32.end [2/2] (short) (narrow) %v22068_v51, 8 }
 0x811   : > { %v15171_v40 = vpop.f32.mrb[0].mxu1 }
 0x812   : > { %v20474_v3 = vpop.f32.mrb[1].mxu1  ;;  %22132 = vxpose.xlu0.b32.end [2/2] (short) (narrow) %v22131_v18, 8 }
 0x813   : > { %v15174_v5 = vpop.f32.mrb[2].mxu1  ;;  %v15250_v2 = vpop.f32.mrb[228].mxu0  ;;  %22085 = vxpose.xlu1.b32.start [1/2] (short) (narrow) %v22084_v1, 8 }
 0x814   : > { %v20475_v44 = vpop.f32.mrb[3].mxu1  ;;  %v20480_v7 = vpop.f32.mrb[229].mxu0 }
 0x815   : > { %v15253_v25 = vpop.f32.mrb[230].mxu0 }
 0x816   : > { %v20481_v61 = vpop.f32.mrb[231].mxu0 }
 0x817   : > { %22087 = vxpose.xlu1.b32.end [2/2] (short) (narrow) %v22086_v19, 8 }
 0x819   : > { %v15329_v50 = vpop.f32.mrb[4].mxu1 }
 0x81a   : > { %v20486_v30 = vpop.f32.mrb[5].mxu1 }
 0x81b   : > { %v15332_v51 = vpop.f32.mrb[6].mxu1  ;;  %v15408_v11 = vpop.f32.mrb[232].mxu0  ;;  %22094 = vxpose.xlu1.b32.start [1/4] (short) (narrow) %v21953_v8, 16 }
 0x81c   : > { %v20487_v58 = vpop.f32.mrb[7].mxu1  ;;  %v22147_v15 = vpack.i.bf16 %v15408_v11, %v15092_v24  ;;  %v20492_v16 = vpop.f32.mrb[233].mxu0 }
 0x81d   : > { %v15411_v60 = vpop.f32.mrb[234].mxu0 }
 0x81e   : > { %v22149_v39 = vpack.i.bf16 %v15411_v60, %v15095_v56  ;;  %v20493_v27 = vpop.f32.mrb[235].mxu0  ;;  %22148 = vxpose.xlu0.b32.start [1/2] (short) (narrow) %v22147_v15, 8 }
 0x81f   : > { %v27362_v45 = vpop.trf.xlu0 }
 0x821   : > { %v15487_v33 = vpop.f32.mrb[8].mxu1 }
 0x822   : > { %v22156_v1 = vpack.i.bf16 %v15487_v33, %v15171_v40  ;;  %v20498_v17 = vpop.f32.mrb[9].mxu1  ;;  %22150 = vxpose.xlu0.b32.end [2/2] (short) (narrow) %v22149_v39, 8 }
 0x823   : > { %v15490_v20 = vpop.f32.mrb[10].mxu1  ;;  %v15566_v23 = vpop.f32.mrb[236].mxu0 }
 0x824   : > { %v22158_v19 = vpack.i.bf16 %v15490_v20, %v15174_v5  ;;  %v21962_v52 = vpop.trf.xlu1  ;;  %v20499_v0 = vpop.f32.mrb[11].mxu1  ;;  %v22165_v34 = vpack.i.bf16 %v15566_v23, %v15250_v2 }
 0x825   : > { %v20504_v57 = vpop.f32.mrb[237].mxu0  ;;  %22096 = vxpose.xlu1.b32.cont [2/4] (short) (narrow) %v21962_v52, 16 }
 0x826   : > { %v15569_v55 = vpop.f32.mrb[238].mxu0  ;;  %22157 = vxpose.xlu0.b32.start [1/2] (short) (narrow) %v22156_v1, 8 }
 0x827   : > { %v22167_v28 = vpack.i.bf16 %v15569_v55, %v15253_v25  ;;  %v20505_v59 = vpop.f32.mrb[239].mxu0  ;;  %v27364_v36 = vpop.trf.xlu0 }
 0x829   : > { %v15645_v21 = vpop.f32.mrb[12].mxu1  ;;  %22098 = vxpose.xlu1.b32.cont [3/4] (short) (narrow) %v27334_v43, 16 }
 0x82a   : > { %v22174_v10 = vpack.i.bf16 %v15645_v21, %v15329_v50  ;;  %v20510_v8 = vpop.f32.mrb[13].mxu1  ;;  %22159 = vxpose.xlu0.b32.end [2/2] (short) (narrow) %v22158_v19, 8 }
 0x82b   : > { %v15648_v54 = vpop.f32.mrb[14].mxu1  ;;  %v15724_v31 = vpop.f32.mrb[240].mxu0 }
 0x82c   : > { %v22176_v26 = vpack.i.bf16 %v15648_v54, %v15332_v51  ;;  %v21980_v32 = vpop.trf.xlu1  ;;  %v20511_v49 = vpop.f32.mrb[15].mxu1 }
 0x82d   : > { %v20516_v13 = vpop.f32.mrb[241].mxu0  ;;  %22100 = vxpose.xlu1.b32.end [4/4] (short) (narrow) %v21980_v32, 16 }
 0x82e   : > { %v15727_v4 = vpop.f32.mrb[242].mxu0  ;;  %22166 = vxpose.xlu0.b32.start [1/2] (short) (narrow) %v22165_v34, 8 }
 0x82f   : > { %v20517_v46 = vpop.f32.mrb[243].mxu0 }
 0x831   : > { %v15803_v62 = vpop.f32.mrb[16].mxu1  ;;  %22139 = vxpose.xlu1.b32.start [1/2] (short) (narrow) %v22138_v38, 8 }
 0x832   : > { %22168 = vxpose.xlu0.b32.end [2/2] (short) (narrow) %v22167_v28, 8  ;;  %v20522_v41 = vpop.f32.mrb[17].mxu1 }
 0x833   : > { %v15806_v63 = vpop.f32.mrb[18].mxu1 }
 0x834   : > { %v20523_v18 = vpop.f32.mrb[19].mxu1 }
 0x835   : > { %22141 = vxpose.xlu1.b32.end [2/2] (short) (narrow) %v22140_v35, 8 }
 0x839   : > { %22175 = vxpose.xlu1.b32.start [1/2] (short) (narrow) %v22174_v10, 8 }
 0x83d   : > { %22177 = vxpose.xlu1.b32.end [2/2] (short) (narrow) %v22176_v26, 8 }
 0x83f   : > { %v27373_v47 = vpop.trf.xlu0 }
 0x849   : > { %v15882_v43 = vpop.f32.mrb[244].mxu0 }
 0x84a   : > { %v20528_v6 = vpop.f32.mrb[245].mxu0 }
 0x84b   : > { %v15885_v24 = vpop.f32.mrb[246].mxu0 }
 0x84c   : > { %v20529_v53 = vpop.f32.mrb[247].mxu0 }
 0x84e   : > { %v27375_v29 = vpop.trf.xlu0 }
 0x853   : > { %v21993_v56 = vpop.trf.xlu1 }
 0x854   : > { %v21997_v9 = vunpack.i.h.bf16 %v21993_v56  ;;  %v21994_v22 = vunpack.i.l.bf16 %v21993_v56 }
 0x857   : > { %v21998_v48 = vpop.trf.xlu1 }
 0x858   : > { %v22002_v12 = vunpack.i.h.bf16 %v21998_v48  ;;  %v21999_v42 = vunpack.i.l.bf16 %v21998_v48 }
 0x859   : > { %v15961_v38 = vpop.f32.mrb[20].mxu1 }
 0x85a   : > { %v18845_v40 = vpack.c.bf16 %v22002_v12, %v21997_v9  ;;  %v18844_v14 = vpack.c.bf16 %v21999_v42, %v21994_v22  ;;  %v20534_v37 = vpop.f32.mrb[21].mxu1 }
 0x85b   : > { %v15964_v35 = vpop.f32.mrb[22].mxu1 }
 0x85c   : > { %20564 = vmatprep.mubr.msk.bf16.mxu0 %vm392_vm0, %v18844_v14  ;;  %v20535_v3 = vpop.f32.mrb[23].mxu1 }
 0x85d   : > { %20565 = vmatmul.mubr.msk.bf16.vlgmr.msra.gmra.mrb[0].mxu0 %vm392_vm0, %v18845_v40 }
 0x861   : > { %v16040_v5 = vpop.f32.mrb[248].mxu0 }
 0x862   : > { %v22183_v2 = vpack.i.bf16 %v16040_v5, %v15724_v31  ;;  %v20540_v44 = vpop.f32.mrb[249].mxu0 }
 0x863   : > { %v16043_v7 = vpop.f32.mrb[250].mxu0  ;;  %v22016_v25 = vpop.trf.xlu1 }
 0x864   : > { %v22185_v61 = vpack.i.bf16 %v16043_v7, %v15727_v4  ;;  %v20541_v50 = vpop.f32.mrb[251].mxu0  ;;  %22184 = vxpose.xlu0.b32.start [1/2] (short) (narrow) %v22183_v2, 8 }
 0x868   : > { %22186 = vxpose.xlu0.b32.end [2/2] (short) (narrow) %v22185_v61, 8 }
 0x86b   : > { %v22034_v30 = vpop.trf.xlu1 }
 0x872   : > { %v16119_v51 = vpop.f32.mrb[24].mxu1 }
 0x873   : > { %v22192_v11 = vpack.i.bf16 %v16119_v51, %v15803_v62  ;;  %v20546_v58 = vpop.f32.mrb[25].mxu1 }
 0x874   : > { %v16122_v15 = vpop.f32.mrb[26].mxu1 }
 0x875   : > { %v22194_v16 = vpack.i.bf16 %v16122_v15, %v15806_v63  ;;  %22193 = vxpose.xlu0.b32.start [1/2] (short) (narrow) %v22192_v11, 8  ;;  %v20547_v60 = vpop.f32.mrb[27].mxu1  ;;  %v27397_v11 = vld [vmem:[%s27559_s4] ss:$0 sm:$0xff] }
 0x879   : > { %22195 = vxpose.xlu0.b32.end [2/2] (short) (narrow) %v22194_v16, 8  ;;  %v16198_v39 = vpop.f32.mrb[252].mxu0 }
 0x87a   : > { %v22201_v27 = vpack.i.bf16 %v16198_v39, %v15882_v43  ;;  %v20552_v33 = vpop.f32.mrb[253].mxu0 }
 0x87b   : > { %v16201_v1 = vpop.f32.mrb[254].mxu0  ;;  %v22047_v23 = vpop.trf.xlu1 }
 0x87c   : > { %v22203_v17 = vpack.i.bf16 %v16201_v1, %v15885_v24  ;;  %v20553_v20 = vpop.f32.mrb[255].mxu0  ;;  %v22051_v52 = vunpack.i.h.bf16 %v22047_v23  ;;  %v22048_v0 = vunpack.i.l.bf16 %v22047_v23 }
 0x87d   : > { %22202 = vxpose.xlu0.b32.start [1/2] (short) (narrow) %v22201_v27, 8 }
 0x87e   : > { %v22115_v19 = vpop.trf.xlu0 }
 0x87f   : > { %v22052_v34 = vpop.trf.xlu1 }
 0x880   : > { %v22056_v57 = vunpack.i.h.bf16 %v22052_v34  ;;  %v22053_v55 = vunpack.i.l.bf16 %v22052_v34 }
 0x881   : > { %22204 = vxpose.xlu0.b32.end [2/2] (short) (narrow) %v22203_v17, 8 }
 0x882   : > { %v18847_v28 = vpack.c.bf16 %v22056_v57, %v22051_v52  ;;  %v18846_v59 = vpack.c.bf16 %v22053_v55, %v22048_v0 }
 0x884   : > { %20568 = vmatprep.mubr.msk.bf16.mxu0 %vm392_vm0, %v18846_v59 }
 0x885   : > { %22211 = vxpose.xlu0.b32.start [1/4] (short) (narrow) %v27362_v45, 16  ;;  %20569 = vmatmul.mubr.msk.bf16.gmra.mrb[4].mxu0 %vm392_vm0, %v18847_v28 }
 0x886   : > { %v22124_v21 = vpop.trf.xlu0 }
 0x889   : > { %v16277_v10 = vpop.f32.mrb[28].mxu1  ;;  %22213 = vxpose.xlu0.b32.cont [2/4] (short) (narrow) %v22016_v25, 16 }
 0x88a   : > { %v22228_v8 = vpack.i.bf16 %v16277_v10, %v15961_v38  ;;  %v20558_v54 = vpop.f32.mrb[29].mxu1 }
 0x88b   : > { %v16280_v31 = vpop.f32.mrb[30].mxu1  ;;  %v22070_v49 = vpop.trf.xlu1 }
 0x88c   : > { %v22230_v26 = vpack.i.bf16 %v16280_v31, %v15964_v35  ;;  %22229 = vxpose.xlu1.b32.start [1/2] (short) (narrow) %v22228_v8, 8  ;;  %v20559_v32 = vpop.f32.mrb[31].mxu1 }
 0x88d   : > { %22215 = vxpose.xlu0.b32.cont [3/4] (short) (narrow) %v27364_v36, 16 }
 0x88e   : > { %v22133_v13 = vpop.trf.xlu0 }
 0x890   : > { %22231 = vxpose.xlu1.b32.end [2/2] (short) (narrow) %v22230_v26, 8 }
 0x891   : > { %22217 = vxpose.xlu0.b32.end [4/4] (short) (narrow) %v22034_v30, 16 }
 0x893   : > { %v22088_v45 = vpop.trf.xlu1 }
 0x894   : > { %22238 = vxpose.xlu1.b32.start [1/4] (short) (narrow) %v27373_v47, 16 }
 0x895   : > { %22256 = vxpose.xlu0.b32.start [1/4] (short) (narrow) %v22115_v19, 16 }
 0x898   : > { %22240 = vxpose.xlu1.b32.cont [2/4] (short) (narrow) %v22070_v49, 16 }
 0x899   : > { %22258 = vxpose.xlu0.b32.cont [2/4] (short) (narrow) %v22124_v21, 16 }
 0x89c   : > { %22242 = vxpose.xlu1.b32.cont [3/4] (short) (narrow) %v27375_v29, 16 }
 0x89d   : > { %22260 = vxpose.xlu0.b32.cont [3/4] (short) (narrow) %v22133_v13, 16 }
 0x89e   : > { %v22151_v4 = vpop.trf.xlu0 }
 0x8a0   : > { %22244 = vxpose.xlu1.b32.end [4/4] (short) (narrow) %v22088_v45, 16 }
 0x8a1   : > { %v22101_v46 = vpop.trf.xlu1 }
 0x8a2   : > { %v22105_v41 = vunpack.i.h.bf16 %v22101_v46  ;;  %v22102_v63 = vunpack.i.l.bf16 %v22101_v46 }
 0x8a4   : > { %22274 = vxpose.xlu1.b32.start [1/4] (short) (narrow) %v22151_v4, 16 }
 0x8a5   : > { %v22106_v36 = vpop.trf.xlu1 }
 0x8a6   : > { %v22160_v62 = vpop.trf.xlu0  ;;  %v22110_v18 = vunpack.i.h.bf16 %v22106_v36  ;;  %v22107_v43 = vunpack.i.l.bf16 %v22106_v36 }
 0x8a8   : > { %22276 = vxpose.xlu1.b32.cont [2/4] (short) (narrow) %v22160_v62, 16  ;;  %v18849_v6 = vpack.c.bf16 %v22110_v18, %v22105_v41  ;;  %v18848_v47 = vpack.c.bf16 %v22107_v43, %v22102_v63 }
 0x8aa   : > { %20572 = vmatprep.mubr.msk.bf16.mxu0 %vm392_vm0, %v18848_v47 }
 0x8ab   : > { %20573 = vmatmul.mubr.msk.bf16.gmra.mrb[8].mxu0 %vm392_vm0, %v18849_v6 }
 0x8ae   : > { %v22169_v24 = vpop.trf.xlu0 }
 0x8af   : > { %22278 = vxpose.xlu1.b32.cont [3/4] (short) (narrow) %v22169_v24, 16 }
 0x8b1   : > { %v22142_v53 = vpop.trf.xlu1 }
 0x8b2   : > { %22262 = vxpose.xlu0.b32.end [4/4] (short) (narrow) %v22142_v53, 16 }
 0x8b9   : > { %v22178_v29 = vpop.trf.xlu1 }
 0x8ba   : > { %22280 = vxpose.xlu1.b32.end [4/4] (short) (narrow) %v22178_v29, 16 }
 0x8e4   : > { %v22187_v56 = vpop.trf.xlu0 }
 0x8e5   : > { %22292 = vxpose.xlu0.b32.start [1/4] (short) (narrow) %v22187_v56, 16 }
 0x8f5   : > { %v22196_v9 = vpop.trf.xlu0 }
 0x8f6   : > { %22294 = vxpose.xlu0.b32.cont [2/4] (short) (narrow) %v22196_v9, 16 }
 0x8fd   : > { %v22205_v22 = vpop.trf.xlu0 }
 0x8fe   : > { %22296 = vxpose.xlu0.b32.cont [3/4] (short) (narrow) %v22205_v22, 16 }
 0x905   : > { %v22218_v48 = vpop.trf.xlu0 }
 0x906   : > { %v22222_v12 = vunpack.i.h.bf16 %v22218_v48  ;;  %v22219_v42 = vunpack.i.l.bf16 %v22218_v48 }
 0x909   : > { %v22223_v38 = vpop.trf.xlu0 }
 0x90a   : > { %v22227_v40 = vunpack.i.h.bf16 %v22223_v38  ;;  %v22224_v14 = vunpack.i.l.bf16 %v22223_v38 }
 0x90c   : > { %v22232_v37 = vpop.trf.xlu1  ;;  %v18851_v35 = vpack.c.bf16 %v22227_v40, %v22222_v12  ;;  %v18850_v3 = vpack.c.bf16 %v22224_v14, %v22219_v42 }
 0x90d   : > { %22298 = vxpose.xlu0.b32.end [4/4] (short) (narrow) %v22232_v37, 16 }
 0x90e   : > { %20576 = vmatprep.mubr.msk.bf16.mxu0 %vm392_vm0, %v18850_v3 }
 0x90f   : > { %20577 = vmatmul.mubr.msk.bf16.gmra.mrb[12].mxu0 %vm392_vm0, %v18851_v35 }
 0x914   : > { %v22245_v5 = vpop.trf.xlu1 }
 0x915   : > { %v22249_v2 = vunpack.i.h.bf16 %v22245_v5  ;;  %v22246_v44 = vunpack.i.l.bf16 %v22245_v5 }
 0x918   : > { %v22250_v7 = vpop.trf.xlu1 }
 0x919   : > { %v22254_v25 = vunpack.i.h.bf16 %v22250_v7  ;;  %v22251_v61 = vunpack.i.l.bf16 %v22250_v7 }
 0x91b   : > { %v18853_v50 = vpack.c.bf16 %v22254_v25, %v22249_v2  ;;  %v18852_v30 = vpack.c.bf16 %v22251_v61, %v22246_v44 }
 0x91d   : > { %20580 = vmatprep.mubr.msk.bf16.mxu0 %vm392_vm0, %v18852_v30 }
 0x91e   : > { %20581 = vmatmul.mubr.msk.bf16.gmra.mrb[16].mxu0 %vm392_vm0, %v18853_v50 }
 0x926   : > { %v22263_v51 = vpop.trf.xlu0 }
 0x927   : > { %v22267_v15 = vunpack.i.h.bf16 %v22263_v51  ;;  %v22264_v16 = vunpack.i.l.bf16 %v22263_v51 }
 0x92a   : > { %v22268_v27 = vpop.trf.xlu0 }
 0x92b   : > { %v22272_v17 = vunpack.i.h.bf16 %v22268_v27  ;;  %v22269_v20 = vunpack.i.l.bf16 %v22268_v27 }
 0x92d   : > { %v18855_v0 = vpack.c.bf16 %v22272_v17, %v22267_v15  ;;  %v18854_v34 = vpack.c.bf16 %v22269_v20, %v22264_v16 }
 0x92e   : > { %v22281_v57 = vpop.trf.xlu1 }
 0x92f   : > { %20584 = vmatprep.mubr.msk.bf16.mxu0 %vm392_vm0, %v18854_v34  ;;  %v22285_v55 = vunpack.i.h.bf16 %v22281_v57  ;;  %v22282_v28 = vunpack.i.l.bf16 %v22281_v57 }
 0x930   : > { %v20566_v58 = vpop.f32.mrb[0].mxu0  ;;  %20585 = vmatmul.mubr.msk.bf16.gmra.mrb[20].mxu0 %vm392_vm0, %v18855_v0 }
 0x931   : > { %v18974_v60 = vadd.f32 %v20566_v58, %v27397_v11  ;;  %v18965_v39 = vpop.f32.mrb[1].mxu0 }
 0x932   : > { %v18966_v33 = vadd.f32 %v27397_v11, %v18965_v39  ;;  %v20567_v1 = vpop.f32.mrb[2].mxu0  ;;  %v22286_v59 = vpop.trf.xlu1 }
 0x933   : > { %19094 = vst.msk [vmem:[%s27401_s16 + $0x10] sm:$0xff] %vm392_vm0, %v18974_v60  ;;  %v18968_v23 = vpop.f32.mrb[3].mxu0  ;;  %v18977_v19 = vadd.f32 %v20567_v1, %v27397_v11  ;;  %v22290_v21 = vunpack.i.h.bf16 %v22286_v59  ;;  %v22287_v10 = vunpack.i.l.bf16 %v22286_v59 }
 0x934   : > { %19092 = vst.msk [vmem:[%s27401_s16] sm:$0xff] %vm392_vm0, %v18966_v33  ;;  %v18969_v52 = vadd.f32 %v27397_v11, %v18968_v23 }
 0x935   : > { %19095 = vst.msk [vmem:[%s27401_s16 + $0x18] sm:$0xff] %vm392_vm0, %v18977_v19  ;;  %v18856_v8 = vpack.c.bf16 %v22287_v10, %v22282_v28  ;;  %v18857_v54 = vpack.c.bf16 %v22290_v21, %v22285_v55 }
 0x936   : > { %19093 = vst.msk [vmem:[%s27401_s16 + $0x8] sm:$0xff] %vm392_vm0, %v18969_v52 }
 0x937   : > { %20588 = vmatprep.mubr.msk.bf16.mxu0 %vm392_vm0, %v18856_v8 }
 0x938   : > { %20589 = vmatmul.mubr.msk.bf16.gmra.mrb[24].mxu0 %vm392_vm0, %v18857_v54 }
 0x958   : > { %v20570_v31 = vpop.f32.mrb[4].mxu0 }
 0x959   : > { %v18990_v26 = vadd.f32 %v20570_v31, %v27397_v11  ;;  %v18981_v32 = vpop.f32.mrb[5].mxu0 }
 0x95a   : > { %v18982_v49 = vadd.f32 %v27397_v11, %v18981_v32  ;;  %v20571_v13 = vpop.f32.mrb[6].mxu0 }
 0x95b   : > { %19098 = vst.msk [vmem:[%s27401_s16 + $0x30] sm:$0xff] %vm392_vm0, %v18990_v26  ;;  %v18993_v45 = vadd.f32 %v20571_v13, %v27397_v11  ;;  %v18984_v4 = vpop.f32.mrb[7].mxu0 }
 0x95c   : > { %19096 = vst.msk [vmem:[%s27401_s16 + $0x20] sm:$0xff] %vm392_vm0, %v18982_v49  ;;  %v18985_v46 = vadd.f32 %v27397_v11, %v18984_v4 }
 0x95d   : > { %19099 = vst.msk [vmem:[%s27401_s16 + $0x38] sm:$0xff] %vm392_vm0, %v18993_v45 }
 0x95e   : > { %19097 = vst.msk [vmem:[%s27401_s16 + $0x28] sm:$0xff] %vm392_vm0, %v18985_v46 }
 0x97e   : > { %v20574_v62 = vpop.f32.mrb[8].mxu0 }
 0x97f   : > { %v19006_v41 = vadd.f32 %v20574_v62, %v27397_v11  ;;  %v18997_v63 = vpop.f32.mrb[9].mxu0 }
 0x980   : > { %v18998_v36 = vadd.f32 %v27397_v11, %v18997_v63  ;;  %v20575_v18 = vpop.f32.mrb[10].mxu0 }
 0x981   : > { %v22299_v43 = vpop.trf.xlu0  ;;  %19102 = vst.msk [vmem:[%s27401_s16 + $0x50] sm:$0xff] %vm392_vm0, %v19006_v41  ;;  %v19009_v6 = vadd.f32 %v20575_v18, %v27397_v11  ;;  %v19000_v47 = vpop.f32.mrb[11].mxu0 }
 0x982   : > { %19100 = vst.msk [vmem:[%s27401_s16 + $0x40] sm:$0xff] %vm392_vm0, %v18998_v36  ;;  %v19001_v24 = vadd.f32 %v27397_v11, %v19000_v47  ;;  %v22303_v53 = vunpack.i.h.bf16 %v22299_v43  ;;  %v22300_v29 = vunpack.i.l.bf16 %v22299_v43 }
 0x983   : > { %19103 = vst.msk [vmem:[%s27401_s16 + $0x58] sm:$0xff] %vm392_vm0, %v19009_v6 }
 0x984   : > { %19101 = vst.msk [vmem:[%s27401_s16 + $0x48] sm:$0xff] %vm392_vm0, %v19001_v24 }
 0x985   : > { %v22304_v56 = vpop.trf.xlu0 }
 0x986   : > { %v22308_v9 = vunpack.i.h.bf16 %v22304_v56  ;;  %v22305_v22 = vunpack.i.l.bf16 %v22304_v56 }
 0x988   : > { %v18858_v48 = vpack.c.bf16 %v22305_v22, %v22300_v29  ;;  %v18859_v12 = vpack.c.bf16 %v22308_v9, %v22303_v53 }
 0x98a   : > { %20592 = vmatprep.mubr.msk.bf16.mxu0 %vm392_vm0, %v18858_v48 }
 0x98b   : > { %20593 = vmatmul.mubr.msk.bf16.gmra.mrb[28].mxu0 %vm392_vm0, %v18859_v12 }
 0x9e2   : > { %v20578_v42 = vpop.f32.mrb[12].mxu0 }
 0x9e3   : > { %v19022_v38 = vadd.f32 %v20578_v42, %v27397_v11  ;;  %v19013_v40 = vpop.f32.mrb[13].mxu0 }
 0x9e4   : > { %v19014_v14 = vadd.f32 %v27397_v11, %v19013_v40  ;;  %v20579_v37 = vpop.f32.mrb[14].mxu0 }
 0x9e5   : > { %19106 = vst.msk [vmem:[%s27401_s16 + $0x70] sm:$0xff] %vm392_vm0, %v19022_v38  ;;  %v19025_v35 = vadd.f32 %v20579_v37, %v27397_v11  ;;  %v19016_v3 = vpop.f32.mrb[15].mxu0 }
 0x9e6   : > { %19104 = vst.msk [vmem:[%s27401_s16 + $0x60] sm:$0xff] %vm392_vm0, %v19014_v14  ;;  %v19017_v5 = vadd.f32 %v27397_v11, %v19016_v3 }
 0x9e7   : > { %19107 = vst.msk [vmem:[%s27401_s16 + $0x78] sm:$0xff] %vm392_vm0, %v19025_v35 }
 0x9e8   : > { %19105 = vst.msk [vmem:[%s27401_s16 + $0x68] sm:$0xff] %vm392_vm0, %v19017_v5 }
 0x9f1   : > { %v20582_v2 = vpop.f32.mrb[16].mxu0 }
 0x9f2   : > { %v19038_v44 = vadd.f32 %v20582_v2, %v27397_v11  ;;  %v19029_v7 = vpop.f32.mrb[17].mxu0 }
 0x9f3   : > { %v19030_v25 = vadd.f32 %v27397_v11, %v19029_v7  ;;  %v20583_v61 = vpop.f32.mrb[18].mxu0 }
 0x9f4   : > { %19110 = vst.msk [vmem:[%s27401_s16 + $0x90] sm:$0xff] %vm392_vm0, %v19038_v44  ;;  %v19041_v50 = vadd.f32 %v20583_v61, %v27397_v11  ;;  %v19032_v30 = vpop.f32.mrb[19].mxu0 }
 0x9f5   : > { %19108 = vst.msk [vmem:[%s27401_s16 + $0x80] sm:$0xff] %vm392_vm0, %v19030_v25  ;;  %v19033_v51 = vadd.f32 %v27397_v11, %v19032_v30 }
 0x9f6   : > { %19111 = vst.msk [vmem:[%s27401_s16 + $0x98] sm:$0xff] %vm392_vm0, %v19041_v50 }
 0x9f7   : > { %19109 = vst.msk [vmem:[%s27401_s16 + $0x88] sm:$0xff] %vm392_vm0, %v19033_v51 }
 0xa03   : > { %v20586_v58 = vpop.f32.mrb[20].mxu0 }
 0xa04   : > { %v19054_v15 = vadd.f32 %v20586_v58, %v27397_v11  ;;  %v19045_v16 = vpop.f32.mrb[21].mxu0 }
 0xa05   : > { %v19046_v60 = vadd.f32 %v27397_v11, %v19045_v16  ;;  %v20587_v39 = vpop.f32.mrb[22].mxu0 }
 0xa06   : > { %19114 = vst.msk [vmem:[%s27401_s16 + $0xb0] sm:$0xff] %vm392_vm0, %v19054_v15  ;;  %v19057_v27 = vadd.f32 %v20587_v39, %v27397_v11  ;;  %v19048_v33 = vpop.f32.mrb[23].mxu0 }
 0xa07   : > { %19112 = vst.msk [vmem:[%s27401_s16 + $0xa0] sm:$0xff] %vm392_vm0, %v19046_v60  ;;  %v19049_v1 = vadd.f32 %v27397_v11, %v19048_v33 }
 0xa08   : > { %19115 = vst.msk [vmem:[%s27401_s16 + $0xb8] sm:$0xff] %vm392_vm0, %v19057_v27 }
 0xa09   : > { %19113 = vst.msk [vmem:[%s27401_s16 + $0xa8] sm:$0xff] %vm392_vm0, %v19049_v1 }
 0xa0b   : > { %v20590_v17 = vpop.f32.mrb[24].mxu0 }
 0xa0c   : > { %v19070_v20 = vadd.f32 %v20590_v17, %v27397_v11  ;;  %v19061_v23 = vpop.f32.mrb[25].mxu0 }
 0xa0d   : > { %v19062_v19 = vadd.f32 %v27397_v11, %v19061_v23  ;;  %v20591_v52 = vpop.f32.mrb[26].mxu0 }
 0xa0e   : > { %19118 = vst.msk [vmem:[%s27401_s16 + $0xd0] sm:$0xff] %vm392_vm0, %v19070_v20  ;;  %v19073_v0 = vadd.f32 %v20591_v52, %v27397_v11  ;;  %v19064_v34 = vpop.f32.mrb[27].mxu0 }
 0xa0f   : > { %19116 = vst.msk [vmem:[%s27401_s16 + $0xc0] sm:$0xff] %vm392_vm0, %v19062_v19  ;;  %v19065_v57 = vadd.f32 %v27397_v11, %v19064_v34 }
 0xa10   : > { %19119 = vst.msk [vmem:[%s27401_s16 + $0xd8] sm:$0xff] %vm392_vm0, %v19073_v0 }
 0xa11   : > { %19117 = vst.msk [vmem:[%s27401_s16 + $0xc8] sm:$0xff] %vm392_vm0, %v19065_v57 }
 0xa5e   : > { %v20594_v55 = vpop.f32.mrb[28].mxu0 }
 0xa5f   : > { %v19086_v28 = vadd.f32 %v20594_v55, %v27397_v11  ;;  %v19077_v59 = vpop.f32.mrb[29].mxu0 }
 0xa60   : > { %v19078_v21 = vadd.f32 %v27397_v11, %v19077_v59  ;;  %v20595_v10 = vpop.f32.mrb[30].mxu0 }
 0xa61   : > { %19122 = vst.msk [vmem:[%s27401_s16 + $0xf0] sm:$0xff] %vm392_vm0, %v19086_v28  ;;  %v19089_v8 = vadd.f32 %v20595_v10, %v27397_v11  ;;  %v19080_v54 = vpop.f32.mrb[31].mxu0 }
 0xa62   : > { %19120 = vst.msk [vmem:[%s27401_s16 + $0xe0] sm:$0xff] %vm392_vm0, %v19078_v21  ;;  %v19081_v31 = vadd.f32 %v27397_v11, %v19080_v54 }
 0xa63   : > { %19123 = vst.msk [vmem:[%s27401_s16 + $0xf8] sm:$0xff] %vm392_vm0, %v19089_v8 }
 0xa64   : > { %19121 = vst.msk [vmem:[%s27401_s16 + $0xe8] sm:$0xff] %vm392_vm0, %v19081_v31 }
 0xa65   : > { %22854 = shalt.err (!%p22851_p3)
}
 0xa66   : > { %s22855_s11 = scalar_lea.hbm %s27501_s26, 4096  ;;  %s22859_s14 = scalar_lea.hbm %s27561_s6, 8192 }
 0xa67   : > { %p22856_p4 = scmp.ne.s32.totalorder %s27501_s26, %s22855_s11  ;;  %p22860_p9 = scmp.lt.u32.totalorder %s27501_s26, %s27561_s6 }
 0xa68   : > { %p22861_p10 = scmp.lt.u32.totalorder %s22859_s14, %s22855_s11  ;;  %p22863_p12 = scmp.lt.u32.totalorder %s22855_s11, %s27501_s26 }
 0xa69   : > { %p22857_p7 = pnand %p22856_p4, %p22985_p5 }
 0xa6a   : > { %p22862_p11 = por %p22861_p10, %p22860_p9 }
 0xa6b   : > { %p22858_p8 = pneg %p22857_p7 }
 0xa6c   : > { %p22864_p13 = por %p22863_p12, %p22862_p11 }
 0xa6e   : > { %p22865_p0 = pnand %p22864_p13, %p22858_p8 }
 0xa70   : > { %22868 = shalt.err (!%p22865_p0)
}
 0xa71   : > { %s22910_s17 = smov 128   ;;  %s22911_s19 = smov 8  }
 0xa72   : > { %20600 = dma.vmem_to_hbm [thread:$0]  (%p22985_p5), %s27503_s18, 4096, %s27501_s26, %s27514_s25, %s22910_s17, %s22910_s17, %s22911_s19  }
 0xa73 PF: > { %p20606_p1 = scmp.ge.s32.totalorder %s22903_s24, 2  ;;  %s19154_s20 = sand.u32 1, %s22891_s21  }
 0xa74   : > { %s19155_s28 = scalar_lea.sflag [#allocation3], %s19154_s20 }
 0xa75   : > { %p20603_p2 = pnand %p20606_p1, %p22989_p6 }
 0xa77   : > { %22886 = dma.done.wait (!%p20603_p2), %s19155_s28, 4096  }
 0xa78   : > { %22888 = vsyncadd (!%p20603_p2), %s19155_s28, 4294963200  ;;  %p16_p3 = scmp.ge.s32.totalorder %s22972_s27, 4   ;;  %s28422_s21 = smov %s22895_s22 }
 0xa79   : > { %s28423_s22 = smov %s22899_s23  ;;  %s28424_s23 = smov %s22983_s30 }
 0xa7a   : > { %s28425_s24 = smov %s22972_s27  ;;  %18 = sbr.rel (!%p16_p3) target bundleno = 3 (0x3), region = 79 }
 0xa81   :  { %19160 = vsyncpa [#allocation3], 1 }
 0xa82   :  { %19162 = vsyncpa [#allocation3 + $0x1], 1 }

</bundles_post_ra>
